<compile_context>
chip_gen: v6e
topology: v6e:2x2x1
jax: 0.10.0
libtpu: 0.0.40
codegen_flags: <defaults>
</compile_context>

<pallas_src>
import functools

import jax
import jax.numpy as jnp
from jax.experimental import pallas as pl
from jax.experimental.pallas import tpu as pltpu

NUM_CLASSES = 7                      # garment classes
_ROW_CHUNK = 512                     # rows of output computed per in-kernel step
_VMEM_LIMIT = 64 * 1024 * 1024       # <= physical VMEM on v5e/v6e/v7x


# --------------------------------------------------------------------------
# helpers
# --------------------------------------------------------------------------
def _round_up(x, m):
    return (x + m - 1) // m * m


def _choose_tm(M):
    """M tile: multiple of 8, <=512, >=2 grid steps whenever M allows it."""
    m8 = _round_up(M, 8)
    if m8 <= 8:
        return m8, m8
    if m8 <= 1024:
        tm = _round_up((m8 + 1) // 2, 8)     # exactly two tiles
        return tm, 2 * tm
    return 512, _round_up(m8, 512)


def _pad_rows(x, M, Mp, axis):
    if Mp == M:
        return x
    pad = [(0, 0)] * x.ndim
    pad[axis] = (0, Mp - M)
    return jnp.pad(x, pad)


# --------------------------------------------------------------------------
# Kernel 1: single-shot matmul + fused per-channel affine (folded BN) + ReLU.
# Used by the stride-2 encoder convs (im2col) and the dec_low 1x1 projection.
# All operands arrive in bf16; accumulation is f32; output is bf16.
# --------------------------------------------------------------------------
def _matmul_affine_kernel(a_ref, b_ref, s_ref, c_ref, o_ref, *, relu):
    acc = jnp.dot(a_ref[...], b_ref[...], preferred_element_type=jnp.float32)
    y = acc * s_ref[...] + c_ref[...]
    if relu:
        y = jnp.maximum(y, 0.0)
    o_ref[...] = y.astype(o_ref.dtype)


def pallas_matmul_affine(a, b, scale, bias, relu, out_dtype=jnp.bfloat16):
    """out = maybe_relu((a @ b) * scale + bias); a/b bf16, scale/bias f32."""
    M, K = a.shape
    _, Nc = b.shape
    tm, Mp = _choose_tm(M)
    a_p = _pad_rows(a, M, Mp, 0)

    out = pl.pallas_call(
        functools.partial(_matmul_affine_kernel, relu=relu),
        out_shape=jax.ShapeDtypeStruct((Mp, Nc), out_dtype),
        grid_spec=pltpu.PrefetchScalarGridSpec(
            num_scalar_prefetch=0,
            grid=(Mp // tm,),
            in_specs=[
                pl.BlockSpec((tm, K), lambda i: (i, 0)),    # patches (bf16)
                pl.BlockSpec((K, Nc), lambda i: (0, 0)),    # weights (bf16)
                pl.BlockSpec((1, Nc), lambda i: (0, 0)),    # scale
                pl.BlockSpec((1, Nc), lambda i: (0, 0)),    # bias
            ],
            out_specs=pl.BlockSpec((tm, Nc), lambda i: (i, 0)),
        ),
        compiler_params=pltpu.CompilerParams(
            dimension_semantics=("parallel",),
            vmem_limit_bytes=_VMEM_LIMIT),
        cost_estimate=pl.CostEstimate(
            flops=int(2 * Mp * Nc * K),
            transcendentals=0,
            bytes_accessed=int(2 * Mp * K + 2 * K * Nc + 8 * Nc
                               + jnp.dtype(out_dtype).itemsize * Mp * Nc)),
    )(a_p, b, scale.reshape(1, Nc), bias.reshape(1, Nc))
    return out[:M] if Mp != M else out


# --------------------------------------------------------------------------
# im2col glue (bf16) for the strided encoder convolutions only.
# --------------------------------------------------------------------------
def _im2col(x, kh, kw, stride, dilation):
    N, H, W, C = x.shape
    ph = dilation * (kh - 1) // 2
    pw = dilation * (kw - 1) // 2
    xp = jnp.pad(x, ((0, 0), (ph, ph), (pw, pw), (0, 0)))
    Ho = (H + 2 * ph - dilation * (kh - 1) - 1) // stride + 1
    Wo = (W + 2 * pw - dilation * (kw - 1) - 1) // stride + 1
    cols = []
    for i in range(kh):
        for j in range(kw):
            hs, ws = i * dilation, j * dilation
            sl = xp[:, hs:hs + stride * (Ho - 1) + 1:stride,
                       ws:ws + stride * (Wo - 1) + 1:stride, :]
            cols.append(sl.reshape(N * Ho * Wo, C))
    return jnp.concatenate(cols, axis=-1), (N, Ho, Wo)


def conv_bn_relu(x, params, stride=1, dilation=1, relu=True):
    """x: NHWC bf16; params: (w[kh,kw,Cin,Cout], scale[Cout], bias[Cout])."""
    w, scale, bias = params
    kh, kw, cin, cout = w.shape
    if kh == 1 and kw == 1 and stride == 1 and dilation == 1:
        N, H, W, C = x.shape
        a = x.reshape(N * H * W, C)
        wm = w.reshape(cin, cout).astype(jnp.bfloat16)
        y = pallas_matmul_affine(a, wm, scale, bias, relu)
        return y.reshape(N, H, W, cout)
    patches, (N, Ho, Wo) = _im2col(x, kh, kw, stride, dilation)
    wm = w.reshape(kh * kw * cin, cout).astype(jnp.bfloat16)
    y = pallas_matmul_affine(patches, wm, scale, bias, relu)
    return y.reshape(N, Ho, Wo, cout)


# --------------------------------------------------------------------------
# Kernel 2: fused ASPP (1x1 + three dilated 3x3 branches + pooled branch +
# concat + 1x1 projection) with the padded /16 feature map resident in VMEM.
# Grid is over batch; conv taps are contiguous row slices of the resident
# (Hp*Wp, C) tile.  The concat+projection is a sum of per-branch slab dots so
# the 160-channel concat never exists; the pooled branch is a precomputed
# per-image epilogue add.
# --------------------------------------------------------------------------
def _aspp_kernel(x_ref, pooled_ref, w0_ref, s0_ref, c0_ref,
                 wd_ref, sd_ref, cd_ref, wj_ref, sj_ref, cj_ref, o_ref,
                 *, Wp, Mo, pad, dils, chunk):
    pooled = pooled_ref[...]                                   # (1, co)
    for cs in range(0, Mo, chunk):
        cz = min(chunk, Mo - cs)

        # branch 0: 1x1 conv on the (unshifted) center tap
        off0 = cs + pad * Wp + pad
        b = jnp.dot(x_ref[off0:off0 + cz, :], w0_ref[...],
                    preferred_element_type=jnp.float32)
        b = jnp.maximum(b * s0_ref[...] + c0_ref[...], 0.0)
        acc = jnp.dot(b.astype(jnp.bfloat16), wj_ref[0],
                      preferred_element_type=jnp.float32)

        # branches 1..3: dilated 3x3 convs from the resident tile
        for t, d in enumerate(dils):
            bacc = None
            for i in range(3):
                for j in range(3):
                    off = cs + (pad + (i - 1) * d) * Wp + pad + (j - 1) * d
                    c_ = jnp.dot(x_ref[off:off + cz, :],
                                 wd_ref[t * 9 + 3 * i + j],
                                 preferred_element_type=jnp.float32)
                    bacc = c_ if bacc is None else bacc + c_
            b = jnp.maximum(bacc * sd_ref[t] + cd_ref[t], 0.0)
            acc = acc + jnp.dot(b.astype(jnp.bfloat16), wj_ref[1 + t],
                                preferred_element_type=jnp.float32)

        # pooled-branch contribution + projection affine + ReLU
        y = jnp.maximum((acc + pooled) * sj_ref[...] + cj_ref[...], 0.0)
        o_ref[cs:cs + cz, :] = y.astype(o_ref.dtype)


def aspp_fused(high, params):
    N, H, W, C = high.shape
    w0, s0, c0 = params['aspp0']
    wp_, sp_, cp_ = params['aspp_pool']
    wj, sj, cj = params['aspp_proj']
    cb = w0.shape[-1]
    co = wj.shape[-1]
    dils = (1, 2, 3)
    pad = max(dils)

    Wp = W + 2 * pad
    Hp = H + 2 * pad + 1                 # +1 bottom row absorbs flat-tap overrun
    Mo = H * Wp

    xpad = jnp.pad(high, ((0, 0), (pad, pad + 1), (pad, pad), (0, 0)))
    xflat = xpad.reshape(N, Hp * Wp, C)                          # bf16

    # image-pooling branch: tiny per-image math done in the wrapper once
    gp = jnp.mean(high.astype(jnp.float32), axis=(1, 2))         # (N, C)
    wj5 = wj.reshape(5, cb, co)
    bpool = jnp.maximum(gp @ wp_.reshape(C, cb) * sp_ + cp_, 0.0)
    pooled = (bpool @ wj5[4]).reshape(N, 1, co)                   # (N,1,co) f32

    w0m = w0.reshape(C, cb).astype(jnp.bfloat16)
    wds, sds, cds = [], [], []
    for name in ('aspp1', 'aspp2', 'aspp3'):
        w, s, c = params[name]
        wds.append(w.reshape(9, C, cb))
        sds.append(s)
        cds.append(c)
    wdm = jnp.concatenate(wds, 0).astype(jnp.bfloat16)            # (27, C, cb)
    sdm = jnp.stack(sds, 0).reshape(3, 1, cb)
    cdm = jnp.stack(cds, 0).reshape(3, 1, cb)
    wj03 = wj5[:4].astype(jnp.bfloat16)                           # (4, cb, co)

    flops = 2 * N * Mo * (28 * C * cb + 4 * cb * co)
    bytes_acc = (2 * N * Hp * Wp * C + 2 * N * Mo * co + 4 * N * co
                 + 2 * (28 * C * cb + 4 * cb * co))

    out = pl.pallas_call(
        functools.partial(_aspp_kernel, Wp=Wp, Mo=Mo, pad=pad, dils=dils,
                          chunk=_ROW_CHUNK),
        out_shape=jax.ShapeDtypeStruct((N, Mo, co), jnp.bfloat16),
        grid_spec=pltpu.PrefetchScalarGridSpec(
            num_scalar_prefetch=0,
            grid=(N,),
            in_specs=[
                pl.BlockSpec((None, Hp * Wp, C), lambda n: (n, 0, 0)),  # map
                pl.BlockSpec((None, 1, co), lambda n: (n, 0, 0)),       # pooled
                pl.BlockSpec((C, cb), lambda n: (0, 0)),
                pl.BlockSpec((1, cb), lambda n: (0, 0)),
                pl.BlockSpec((1, cb), lambda n: (0, 0)),
                pl.BlockSpec((27, C, cb), lambda n: (0, 0, 0)),
                pl.BlockSpec((3, 1, cb), lambda n: (0, 0, 0)),
                pl.BlockSpec((3, 1, cb), lambda n: (0, 0, 0)),
                pl.BlockSpec((4, cb, co), lambda n: (0, 0, 0)),
                pl.BlockSpec((1, co), lambda n: (0, 0)),
                pl.BlockSpec((1, co), lambda n: (0, 0)),
            ],
            out_specs=pl.BlockSpec((None, Mo, co), lambda n: (n, 0, 0)),
        ),
        compiler_params=pltpu.CompilerParams(
            dimension_semantics=("parallel",),
            vmem_limit_bytes=_VMEM_LIMIT),
        cost_estimate=pl.CostEstimate(flops=int(flops), transcendentals=0,
                                      bytes_accessed=int(bytes_acc)),
    )(xflat, pooled,
      w0m, s0.reshape(1, cb), c0.reshape(1, cb),
      wdm, sdm, cdm,
      wj03, sj.reshape(1, co), cj.reshape(1, co))

    return out.reshape(N, H, Wp, co)[:, :, :W, :]


# --------------------------------------------------------------------------
# Kernel 3: 3x3 same-padding conv with the padded map resident in VMEM
# (grid over batch, 9 tap dots per row chunk).  Used for the decoder refine
# conv (on the concatenated [a_up, low_p] map) and for the segmentation head.
# --------------------------------------------------------------------------
def _conv3x3_kernel(x_ref, w_ref, s_ref, c_ref, o_ref, *, Wp, Mo, relu, chunk):
    for cs in range(0, Mo, chunk):
        cz = min(chunk, Mo - cs)
        acc = None
        for i in range(3):
            for j in range(3):
                off = cs + i * Wp + j
                c_ = jnp.dot(x_ref[off:off + cz, :], w_ref[3 * i + j],
                             preferred_element_type=jnp.float32)
                acc = c_ if acc is None else acc + c_
        y = acc * s_ref[...] + c_ref[...]
        if relu:
            y = jnp.maximum(y, 0.0)
        o_ref[cs:cs + cz, :] = y.astype(o_ref.dtype)


def conv3x3_same(x, params, relu=True, out_dtype=jnp.bfloat16):
    w, scale, bias = params
    kh, kw, cin, cout = w.shape
    assert kh == 3 and kw == 3
    N, H, W, C = x.shape
    assert C == cin

    Wp = W + 2
    Hp = H + 3                            # pad (1, 2) along H: +1 absorbs overrun
    Mo = H * Wp
    xpad = jnp.pad(x, ((0, 0), (1, 2), (1, 1), (0, 0)))
    xflat = xpad.reshape(N, Hp * Wp, C)
    w9 = w.reshape(9, cin, cout).astype(jnp.bfloat16)

    flops = 2 * N * Mo * 9 * cin * cout
    bytes_acc = (2 * N * Hp * Wp * cin + 2 * 9 * cin * cout + 8 * cout
                 + jnp.dtype(out_dtype).itemsize * N * Mo * cout)

    out = pl.pallas_call(
        functools.partial(_conv3x3_kernel, Wp=Wp, Mo=Mo, relu=relu,
                          chunk=_ROW_CHUNK),
        out_shape=jax.ShapeDtypeStruct((N, Mo, cout), out_dtype),
        grid_spec=pltpu.PrefetchScalarGridSpec(
            num_scalar_prefetch=0,
            grid=(N,),
            in_specs=[
                pl.BlockSpec((None, Hp * Wp, C), lambda n: (n, 0, 0)),
                pl.BlockSpec((9, cin, cout), lambda n: (0, 0, 0)),
                pl.BlockSpec((1, cout), lambda n: (0, 0)),
                pl.BlockSpec((1, cout), lambda n: (0, 0)),
            ],
            out_specs=pl.BlockSpec((None, Mo, cout), lambda n: (n, 0, 0)),
        ),
        compiler_params=pltpu.CompilerParams(
            dimension_semantics=("parallel",),
            vmem_limit_bytes=_VMEM_LIMIT),
        cost_estimate=pl.CostEstimate(flops=int(flops), transcendentals=0,
                                      bytes_accessed=int(bytes_acc)),
    )(xflat, w9, scale.reshape(1, cout), bias.reshape(1, cout))

    return out.reshape(N, H, Wp, cout)[:, :, :W, :]


# --------------------------------------------------------------------------
# Deterministic synthetic parameters (BN folded into per-channel scale/bias).
# --------------------------------------------------------------------------
def _make_conv(key, kh, kw, cin, cout, bn=True):
    k1, k2, k3 = jax.random.split(key, 3)
    fan_in = kh * kw * cin
    w = jax.random.normal(k1, (kh, kw, cin, cout), jnp.float32) / jnp.sqrt(float(fan_in))
    if bn:
        scale = 1.0 + 0.1 * jax.random.normal(k2, (cout,), jnp.float32)
    else:
        scale = jnp.ones((cout,), jnp.float32)          # plain conv + bias (head)
    bias = 0.1 * jax.random.normal(k3, (cout,), jnp.float32)
    return (w, scale, bias)


def init_params(key, num_classes=NUM_CLASSES):
    keys = jax.random.split(key, 16)
    p = {}
    p['stem'] = _make_conv(keys[0], 3, 3, 3, 16)       # /2
    p['l1'] = _make_conv(keys[1], 3, 3, 16, 24)        # /4  (low-level feat)
    p['l2'] = _make_conv(keys[2], 3, 3, 24, 48)        # /8
    p['l3'] = _make_conv(keys[3], 3, 3, 48, 64)        # /16 (high-level feat)
    # ASPP (rates scaled down for the small synthetic spatial size)
    p['aspp0'] = _make_conv(keys[4], 1, 1, 64, 32)
    p['aspp1'] = _make_conv(keys[5], 3, 3, 64, 32)     # dilation 1
    p['aspp2'] = _make_conv(keys[6], 3, 3, 64, 32)     # dilation 2
    p['aspp3'] = _make_conv(keys[7], 3, 3, 64, 32)     # dilation 3
    p['aspp_pool'] = _make_conv(keys[8], 1, 1, 64, 32)
    p['aspp_proj'] = _make_conv(keys[9], 1, 1, 5 * 32, 64)
    # decoder
    p['dec_low'] = _make_conv(keys[10], 1, 1, 24, 12)
    p['dec_conv'] = _make_conv(keys[11], 3, 3, 64 + 12, 64)
    # segmentation head: plain conv + bias, activation=None
    p['head'] = _make_conv(keys[12], 3, 3, 64, num_classes, bn=False)
    return p


# --------------------------------------------------------------------------
# Forward pass (DeepLabV3Plus structure), NCHW f32 in/out, bf16 internals.
# --------------------------------------------------------------------------
def garment_seg_forward(x_nchw, params):
    x = jnp.transpose(x_nchw, (0, 2, 3, 1)).astype(jnp.bfloat16)  # NHWC bf16

    # encoder (im2col + fused matmul kernels, bf16 streams)
    x0 = conv_bn_relu(x, params['stem'], stride=2)          # /2,  16ch
    low = conv_bn_relu(x0, params['l1'], stride=2)          # /4,  24ch
    x2 = conv_bn_relu(low, params['l2'], stride=2)          # /8,  48ch
    high = conv_bn_relu(x2, params['l3'], stride=2)         # /16, 64ch

    # ASPP: all five branches + concat + projection in ONE pallas_call
    a = aspp_fused(high, params)                             # /16, 64ch (bf16)

    # decoder: upsample x4 (bf16), 1x1 low-level projection once, concat,
    # then one fused resident-map 3x3 refine conv.
    N, _, _, C = a.shape
    Hl, Wl = low.shape[1], low.shape[2]
    a_up = jax.image.resize(a, (N, Hl, Wl, C), method='bilinear')
    low_p = conv_bn_relu(low, params['dec_low'])             # /4, 12ch
    cat = jnp.concatenate([a_up, low_p], axis=-1)            # /4, 76ch (bf16)
    d = conv3x3_same(cat, params['dec_conv'], relu=True)     # /4, 64ch

    # segmentation head: 3x3 conv to num_classes (no activation) + 4x upsample
    logits = conv3x3_same(d, params['head'], relu=False, out_dtype=jnp.float32)
    N, Hd, Wd, K = logits.shape
    logits = jax.image.resize(logits, (N, Hd * 4, Wd * 4, K), method='bilinear')

    return jnp.transpose(logits, (0, 3, 1, 2))  # back to NCHW, f32


if __name__ == "__main__":
    key = jax.random.PRNGKey(0)
    kx, kp = jax.random.split(key)

    # small input consistent with the module: NCHW, 3 input channels
    x = jax.random.normal(kx, (2, 3, 32, 32), jnp.float32)
    params = init_params(kp, NUM_CLASSES)

    out = jax.jit(garment_seg_forward)(x, params)
    out = jax.block_until_ready(out)

    assert out.shape == (2, NUM_CLASSES, 32, 32), out.shape
    assert bool(jnp.all(jnp.isfinite(out)))
    print("KERNEL_OK")
</pallas_src>

<mosaic_0001>
module attributes {stable_mosaic.version = 11 : i64} {
  func.func @_matmul_affine_kernel(%arg0: i32, %arg1: memref<256x27xbf16, #tpu.memory_space<vmem>>, %arg2: memref<27x16xbf16, #tpu.memory_space<vmem>>, %arg3: memref<1x16xf32, #tpu.memory_space<vmem>>, %arg4: memref<1x16xf32, #tpu.memory_space<vmem>>, %arg5: memref<256x16xbf16, #tpu.memory_space<vmem>>) attributes {dimension_semantics = [#tpu.dimension_semantics<parallel>], iteration_bounds = array<i64: 2>, scalar_prefetch = 0 : i64, scratch_operands = 0 : i64, tpu.core_type = #tpu.core_type<tc>, window_params = [{transform_indices = @transform_0, window_bounds = array<i64: 256, 27>}, {pipeline_mode = #tpu.pipeline_mode<synchronous>, transform_indices = @transform_1, window_bounds = array<i64: 27, 16>}, {pipeline_mode = #tpu.pipeline_mode<synchronous>, transform_indices = @transform_2, window_bounds = array<i64: 1, 16>}, {pipeline_mode = #tpu.pipeline_mode<synchronous>, transform_indices = @transform_3, window_bounds = array<i64: 1, 16>}, {transform_indices = @transform_4, window_bounds = array<i64: 256, 16>}]} {
    %c0 = arith.constant 0 : index
    %c0_0 = arith.constant 0 : index
    %0 = vector.load %arg1[%c0, %c0_0] : memref<256x27xbf16, #tpu.memory_space<vmem>>, vector<256x27xbf16>
    %c0_1 = arith.constant 0 : index
    %c0_2 = arith.constant 0 : index
    %1 = vector.load %arg2[%c0_1, %c0_2] : memref<27x16xbf16, #tpu.memory_space<vmem>>, vector<27x16xbf16>
    %cst = arith.constant dense<0.000000e+00> : vector<256x16xf32>
    %2 = tpu.matmul %0, %1, %cst {dimension_numbers = #tpu.dot_dimension_numbers<[1], [0], [0], [1], [0, 0, 1, 1], [], []>} : vector<256x27xbf16>, vector<27x16xbf16>, vector<256x16xf32> -> vector<256x16xf32>
    %c0_3 = arith.constant 0 : index
    %c0_4 = arith.constant 0 : index
    %3 = vector.load %arg3[%c0_3, %c0_4] : memref<1x16xf32, #tpu.memory_space<vmem>>, vector<1x16xf32>
    %4 = vector.broadcast %3 : vector<1x16xf32> to vector<256x16xf32>
    %5 = arith.mulf %2, %4 : vector<256x16xf32>
    %c0_5 = arith.constant 0 : index
    %c0_6 = arith.constant 0 : index
    %6 = vector.load %arg4[%c0_5, %c0_6] : memref<1x16xf32, #tpu.memory_space<vmem>>, vector<1x16xf32>
    %7 = vector.broadcast %6 : vector<1x16xf32> to vector<256x16xf32>
    %8 = arith.addf %5, %7 : vector<256x16xf32>
    %cst_7 = arith.constant 0.000000e+00 : f32
    %9 = vector.broadcast %cst_7 : f32 to vector<256x16xf32>
    %10 = arith.maximumf %8, %9 : vector<256x16xf32>
    %11 = arith.truncf %10 : vector<256x16xf32> to vector<256x16xbf16>
    %c0_8 = arith.constant 0 : index
    %c0_9 = arith.constant 0 : index
    %12 = vector.load %arg5[%c0_8, %c0_9] : memref<256x16xbf16, #tpu.memory_space<vmem>>, vector<256x16xbf16>
    tpu.vector_store %arg5[%c0_8, %c0_9], %11 {strides = array<i32>} : memref<256x16xbf16, #tpu.memory_space<vmem>>, vector<256x16xbf16>,
    return
  }
  func.func @transform_0(%arg0: i32) -> (i32, i32) {
    %c0_i32 = arith.constant 0 : i32
    %c0_i32_0 = arith.constant 0 : i32
    return %arg0, %c0_i32 : i32, i32
  }
  func.func @transform_1(%arg0: i32) -> (i32, i32) {
    %c0_i32 = arith.constant 0 : i32
    %c0_i32_0 = arith.constant 0 : i32
    %c0_i32_1 = arith.constant 0 : i32
    return %c0_i32, %c0_i32_0 : i32, i32
  }
  func.func @transform_2(%arg0: i32) -> (i32, i32) {
    %c0_i32 = arith.constant 0 : i32
    %c0_i32_0 = arith.constant 0 : i32
    %c0_i32_1 = arith.constant 0 : i32
    return %c0_i32, %c0_i32_0 : i32, i32
  }
  func.func @transform_3(%arg0: i32) -> (i32, i32) {
    %c0_i32 = arith.constant 0 : i32
    %c0_i32_0 = arith.constant 0 : i32
    %c0_i32_1 = arith.constant 0 : i32
    return %c0_i32, %c0_i32_0 : i32, i32
  }
  func.func @transform_4(%arg0: i32) -> (i32, i32) {
    %c0_i32 = arith.constant 0 : i32
    %c0_i32_0 = arith.constant 0 : i32
    return %arg0, %c0_i32 : i32, i32
  }
}

module attributes {stable_mosaic.version = 11 : i64} {
  func.func @_matmul_affine_kernel(%arg0: i32, %arg1: memref<64x144xbf16, #tpu.memory_space<vmem>>, %arg2: memref<144x24xbf16, #tpu.memory_space<vmem>>, %arg3: memref<1x24xf32, #tpu.memory_space<vmem>>, %arg4: memref<1x24xf32, #tpu.memory_space<vmem>>, %arg5: memref<64x24xbf16, #tpu.memory_space<vmem>>) attributes {dimension_semantics = [#tpu.dimension_semantics<parallel>], iteration_bounds = array<i64: 2>, scalar_prefetch = 0 : i64, scratch_operands = 0 : i64, tpu.core_type = #tpu.core_type<tc>, window_params = [{transform_indices = @transform_0, window_bounds = array<i64: 64, 144>}, {pipeline_mode = #tpu.pipeline_mode<synchronous>, transform_indices = @transform_1, window_bounds = array<i64: 144, 24>}, {pipeline_mode = #tpu.pipeline_mode<synchronous>, transform_indices = @transform_2, window_bounds = array<i64: 1, 24>}, {pipeline_mode = #tpu.pipeline_mode<synchronous>, transform_indices = @transform_3, window_bounds = array<i64: 1, 24>}, {transform_indices = @transform_4, window_bounds = array<i64: 64, 24>}]} {
    %c0 = arith.constant 0 : index
    %c0_0 = arith.constant 0 : index
    %0 = vector.load %arg1[%c0, %c0_0] : memref<64x144xbf16, #tpu.memory_space<vmem>>, vector<64x144xbf16>
    %c0_1 = arith.constant 0 : index
    %c0_2 = arith.constant 0 : index
    %1 = vector.load %arg2[%c0_1, %c0_2] : memref<144x24xbf16, #tpu.memory_space<vmem>>, vector<144x24xbf16>
    %cst = arith.constant dense<0.000000e+00> : vector<64x24xf32>
    %2 = tpu.matmul %0, %1, %cst {dimension_numbers = #tpu.dot_dimension_numbers<[1], [0], [0], [1], [0, 0, 1, 1], [], []>} : vector<64x144xbf16>, vector<144x24xbf16>, vector<64x24xf32> -> vector<64x24xf32>
    %c0_3 = arith.constant 0 : index
    %c0_4 = arith.constant 0 : index
    %3 = vector.load %arg3[%c0_3, %c0_4] : memref<1x24xf32, #tpu.memory_space<vmem>>, vector<1x24xf32>
    %4 = vector.broadcast %3 : vector<1x24xf32> to vector<64x24xf32>
    %5 = arith.mulf %2, %4 : vector<64x24xf32>
    %c0_5 = arith.constant 0 : index
    %c0_6 = arith.constant 0 : index
    %6 = vector.load %arg4[%c0_5, %c0_6] : memref<1x24xf32, #tpu.memory_space<vmem>>, vector<1x24xf32>
    %7 = vector.broadcast %6 : vector<1x24xf32> to vector<64x24xf32>
    %8 = arith.addf %5, %7 : vector<64x24xf32>
    %cst_7 = arith.constant 0.000000e+00 : f32
    %9 = vector.broadcast %cst_7 : f32 to vector<64x24xf32>
    %10 = arith.maximumf %8, %9 : vector<64x24xf32>
    %11 = arith.truncf %10 : vector<64x24xf32> to vector<64x24xbf16>
    %c0_8 = arith.constant 0 : index
    %c0_9 = arith.constant 0 : index
    %12 = vector.load %arg5[%c0_8, %c0_9] : memref<64x24xbf16, #tpu.memory_space<vmem>>, vector<64x24xbf16>
    tpu.vector_store %arg5[%c0_8, %c0_9], %11 {strides = array<i32>} : memref<64x24xbf16, #tpu.memory_space<vmem>>, vector<64x24xbf16>,
    return
  }
  func.func @transform_0(%arg0: i32) -> (i32, i32) {
    %c0_i32 = arith.constant 0 : i32
    %c0_i32_0 = arith.constant 0 : i32
    return %arg0, %c0_i32 : i32, i32
  }
  func.func @transform_1(%arg0: i32) -> (i32, i32) {
    %c0_i32 = arith.constant 0 : i32
    %c0_i32_0 = arith.constant 0 : i32
    %c0_i32_1 = arith.constant 0 : i32
    return %c0_i32, %c0_i32_0 : i32, i32
  }
  func.func @transform_2(%arg0: i32) -> (i32, i32) {
    %c0_i32 = arith.constant 0 : i32
    %c0_i32_0 = arith.constant 0 : i32
    %c0_i32_1 = arith.constant 0 : i32
    return %c0_i32, %c0_i32_0 : i32, i32
  }
  func.func @transform_3(%arg0: i32) -> (i32, i32) {
    %c0_i32 = arith.constant 0 : i32
    %c0_i32_0 = arith.constant 0 : i32
    %c0_i32_1 = arith.constant 0 : i32
    return %c0_i32, %c0_i32_0 : i32, i32
  }
  func.func @transform_4(%arg0: i32) -> (i32, i32) {
    %c0_i32 = arith.constant 0 : i32
    %c0_i32_0 = arith.constant 0 : i32
    return %arg0, %c0_i32 : i32, i32
  }
}

module attributes {stable_mosaic.version = 11 : i64} {
  func.func @_matmul_affine_kernel(%arg0: i32, %arg1: memref<16x216xbf16, #tpu.memory_space<vmem>>, %arg2: memref<216x48xbf16, #tpu.memory_space<vmem>>, %arg3: memref<1x48xf32, #tpu.memory_space<vmem>>, %arg4: memref<1x48xf32, #tpu.memory_space<vmem>>, %arg5: memref<16x48xbf16, #tpu.memory_space<vmem>>) attributes {dimension_semantics = [#tpu.dimension_semantics<parallel>], iteration_bounds = array<i64: 2>, scalar_prefetch = 0 : i64, scratch_operands = 0 : i64, tpu.core_type = #tpu.core_type<tc>, window_params = [{transform_indices = @transform_0, window_bounds = array<i64: 16, 216>}, {pipeline_mode = #tpu.pipeline_mode<synchronous>, transform_indices = @transform_1, window_bounds = array<i64: 216, 48>}, {pipeline_mode = #tpu.pipeline_mode<synchronous>, transform_indices = @transform_2, window_bounds = array<i64: 1, 48>}, {pipeline_mode = #tpu.pipeline_mode<synchronous>, transform_indices = @transform_3, window_bounds = array<i64: 1, 48>}, {transform_indices = @transform_4, window_bounds = array<i64: 16, 48>}]} {
    %c0 = arith.constant 0 : index
    %c0_0 = arith.constant 0 : index
    %0 = vector.load %arg1[%c0, %c0_0] : memref<16x216xbf16, #tpu.memory_space<vmem>>, vector<16x216xbf16>
    %c0_1 = arith.constant 0 : index
    %c0_2 = arith.constant 0 : index
    %1 = vector.load %arg2[%c0_1, %c0_2] : memref<216x48xbf16, #tpu.memory_space<vmem>>, vector<216x48xbf16>
    %cst = arith.constant dense<0.000000e+00> : vector<16x48xf32>
    %2 = tpu.matmul %0, %1, %cst {dimension_numbers = #tpu.dot_dimension_numbers<[1], [0], [0], [1], [0, 0, 1, 1], [], []>} : vector<16x216xbf16>, vector<216x48xbf16>, vector<16x48xf32> -> vector<16x48xf32>
    %c0_3 = arith.constant 0 : index
    %c0_4 = arith.constant 0 : index
    %3 = vector.load %arg3[%c0_3, %c0_4] : memref<1x48xf32, #tpu.memory_space<vmem>>, vector<1x48xf32>
    %4 = vector.broadcast %3 : vector<1x48xf32> to vector<16x48xf32>
    %5 = arith.mulf %2, %4 : vector<16x48xf32>
    %c0_5 = arith.constant 0 : index
    %c0_6 = arith.constant 0 : index
    %6 = vector.load %arg4[%c0_5, %c0_6] : memref<1x48xf32, #tpu.memory_space<vmem>>, vector<1x48xf32>
    %7 = vector.broadcast %6 : vector<1x48xf32> to vector<16x48xf32>
    %8 = arith.addf %5, %7 : vector<16x48xf32>
    %cst_7 = arith.constant 0.000000e+00 : f32
    %9 = vector.broadcast %cst_7 : f32 to vector<16x48xf32>
    %10 = arith.maximumf %8, %9 : vector<16x48xf32>
    %11 = arith.truncf %10 : vector<16x48xf32> to vector<16x48xbf16>
    %c0_8 = arith.constant 0 : index
    %c0_9 = arith.constant 0 : index
    %12 = vector.load %arg5[%c0_8, %c0_9] : memref<16x48xbf16, #tpu.memory_space<vmem>>, vector<16x48xbf16>
    tpu.vector_store %arg5[%c0_8, %c0_9], %11 {strides = array<i32>} : memref<16x48xbf16, #tpu.memory_space<vmem>>, vector<16x48xbf16>,
    return
  }
  func.func @transform_0(%arg0: i32) -> (i32, i32) {
    %c0_i32 = arith.constant 0 : i32
    %c0_i32_0 = arith.constant 0 : i32
    return %arg0, %c0_i32 : i32, i32
  }
  func.func @transform_1(%arg0: i32) -> (i32, i32) {
    %c0_i32 = arith.constant 0 : i32
    %c0_i32_0 = arith.constant 0 : i32
    %c0_i32_1 = arith.constant 0 : i32
    return %c0_i32, %c0_i32_0 : i32, i32
  }
  func.func @transform_2(%arg0: i32) -> (i32, i32) {
    %c0_i32 = arith.constant 0 : i32
    %c0_i32_0 = arith.constant 0 : i32
    %c0_i32_1 = arith.constant 0 : i32
    return %c0_i32, %c0_i32_0 : i32, i32
  }
  func.func @transform_3(%arg0: i32) -> (i32, i32) {
    %c0_i32 = arith.constant 0 : i32
    %c0_i32_0 = arith.constant 0 : i32
    %c0_i32_1 = arith.constant 0 : i32
    return %c0_i32, %c0_i32_0 : i32, i32
  }
  func.func @transform_4(%arg0: i32) -> (i32, i32) {
    %c0_i32 = arith.constant 0 : i32
    %c0_i32_0 = arith.constant 0 : i32
    return %arg0, %c0_i32 : i32, i32
  }
}

module attributes {stable_mosaic.version = 11 : i64} {
  func.func @_matmul_affine_kernel(%arg0: i32, %arg1: memref<8x432xbf16, #tpu.memory_space<vmem>>, %arg2: memref<432x64xbf16, #tpu.memory_space<vmem>>, %arg3: memref<1x64xf32, #tpu.memory_space<vmem>>, %arg4: memref<1x64xf32, #tpu.memory_space<vmem>>, %arg5: memref<8x64xbf16, #tpu.memory_space<vmem>>) attributes {dimension_semantics = [#tpu.dimension_semantics<parallel>], iteration_bounds = array<i64: 1>, scalar_prefetch = 0 : i64, scratch_operands = 0 : i64, tpu.core_type = #tpu.core_type<tc>, window_params = [{transform_indices = @transform_0, window_bounds = array<i64: 8, 432>}, {pipeline_mode = #tpu.pipeline_mode<synchronous>, transform_indices = @transform_1, window_bounds = array<i64: 432, 64>}, {pipeline_mode = #tpu.pipeline_mode<synchronous>, transform_indices = @transform_2, window_bounds = array<i64: 1, 64>}, {pipeline_mode = #tpu.pipeline_mode<synchronous>, transform_indices = @transform_3, window_bounds = array<i64: 1, 64>}, {transform_indices = @transform_4, window_bounds = array<i64: 8, 64>}]} {
    %c0 = arith.constant 0 : index
    %c0_0 = arith.constant 0 : index
    %0 = vector.load %arg1[%c0, %c0_0] : memref<8x432xbf16, #tpu.memory_space<vmem>>, vector<8x432xbf16>
    %c0_1 = arith.constant 0 : index
    %c0_2 = arith.constant 0 : index
    %1 = vector.load %arg2[%c0_1, %c0_2] : memref<432x64xbf16, #tpu.memory_space<vmem>>, vector<432x64xbf16>
    %cst = arith.constant dense<0.000000e+00> : vector<8x64xf32>
    %2 = tpu.matmul %0, %1, %cst {dimension_numbers = #tpu.dot_dimension_numbers<[1], [0], [0], [1], [0, 0, 1, 1], [], []>} : vector<8x432xbf16>, vector<432x64xbf16>, vector<8x64xf32> -> vector<8x64xf32>
    %c0_3 = arith.constant 0 : index
    %c0_4 = arith.constant 0 : index
    %3 = vector.load %arg3[%c0_3, %c0_4] : memref<1x64xf32, #tpu.memory_space<vmem>>, vector<1x64xf32>
    %4 = vector.broadcast %3 : vector<1x64xf32> to vector<8x64xf32>
    %5 = arith.mulf %2, %4 : vector<8x64xf32>
    %c0_5 = arith.constant 0 : index
    %c0_6 = arith.constant 0 : index
    %6 = vector.load %arg4[%c0_5, %c0_6] : memref<1x64xf32, #tpu.memory_space<vmem>>, vector<1x64xf32>
    %7 = vector.broadcast %6 : vector<1x64xf32> to vector<8x64xf32>
    %8 = arith.addf %5, %7 : vector<8x64xf32>
    %cst_7 = arith.constant 0.000000e+00 : f32
    %9 = vector.broadcast %cst_7 : f32 to vector<8x64xf32>
    %10 = arith.maximumf %8, %9 : vector<8x64xf32>
    %11 = arith.truncf %10 : vector<8x64xf32> to vector<8x64xbf16>
    %c0_8 = arith.constant 0 : index
    %c0_9 = arith.constant 0 : index
    %12 = vector.load %arg5[%c0_8, %c0_9] : memref<8x64xbf16, #tpu.memory_space<vmem>>, vector<8x64xbf16>
    tpu.vector_store %arg5[%c0_8, %c0_9], %11 {strides = array<i32>} : memref<8x64xbf16, #tpu.memory_space<vmem>>, vector<8x64xbf16>,
    return
  }
  func.func @transform_0(%arg0: i32) -> (i32, i32) {
    %c0_i32 = arith.constant 0 : i32
    %c0_i32_0 = arith.constant 0 : i32
    return %arg0, %c0_i32 : i32, i32
  }
  func.func @transform_1(%arg0: i32) -> (i32, i32) {
    %c0_i32 = arith.constant 0 : i32
    %c0_i32_0 = arith.constant 0 : i32
    %c0_i32_1 = arith.constant 0 : i32
    return %c0_i32, %c0_i32_0 : i32, i32
  }
  func.func @transform_2(%arg0: i32) -> (i32, i32) {
    %c0_i32 = arith.constant 0 : i32
    %c0_i32_0 = arith.constant 0 : i32
    %c0_i32_1 = arith.constant 0 : i32
    return %c0_i32, %c0_i32_0 : i32, i32
  }
  func.func @transform_3(%arg0: i32) -> (i32, i32) {
    %c0_i32 = arith.constant 0 : i32
    %c0_i32_0 = arith.constant 0 : i32
    %c0_i32_1 = arith.constant 0 : i32
    return %c0_i32, %c0_i32_0 : i32, i32
  }
  func.func @transform_4(%arg0: i32) -> (i32, i32) {
    %c0_i32 = arith.constant 0 : i32
    %c0_i32_0 = arith.constant 0 : i32
    return %arg0, %c0_i32 : i32, i32
  }
}

module attributes {stable_mosaic.version = 11 : i64} {
  func.func @_aspp_kernel(%arg0: i32, %arg1: memref<1x72x64xbf16, #tpu.memory_space<vmem>>, %arg2: memref<1x1x64xf32, #tpu.memory_space<vmem>>, %arg3: memref<64x32xbf16, #tpu.memory_space<vmem>>, %arg4: memref<1x32xf32, #tpu.memory_space<vmem>>, %arg5: memref<1x32xf32, #tpu.memory_space<vmem>>, %arg6: memref<27x64x32xbf16, #tpu.memory_space<vmem>>, %arg7: memref<3x1x32xf32, #tpu.memory_space<vmem>>, %arg8: memref<3x1x32xf32, #tpu.memory_space<vmem>>, %arg9: memref<4x32x64xbf16, #tpu.memory_space<vmem>>, %arg10: memref<1x64xf32, #tpu.memory_space<vmem>>, %arg11: memref<1x64xf32, #tpu.memory_space<vmem>>, %arg12: memref<1x16x64xbf16, #tpu.memory_space<vmem>>) attributes {dimension_semantics = [#tpu.dimension_semantics<parallel>], iteration_bounds = array<i64: 2>, scalar_prefetch = 0 : i64, scratch_operands = 0 : i64, tpu.core_type = #tpu.core_type<tc>, window_params = [{transform_indices = @transform_0, window_bounds = array<i64: 1, 72, 64>}, {transform_indices = @transform_1, window_bounds = array<i64: 1, 1, 64>}, {pipeline_mode = #tpu.pipeline_mode<synchronous>, transform_indices = @transform_2, window_bounds = array<i64: 64, 32>}, {pipeline_mode = #tpu.pipeline_mode<synchronous>, transform_indices = @transform_3, window_bounds = array<i64: 1, 32>}, {pipeline_mode = #tpu.pipeline_mode<synchronous>, transform_indices = @transform_4, window_bounds = array<i64: 1, 32>}, {pipeline_mode = #tpu.pipeline_mode<synchronous>, transform_indices = @transform_5, window_bounds = array<i64: 27, 64, 32>}, {pipeline_mode = #tpu.pipeline_mode<synchronous>, transform_indices = @transform_6, window_bounds = array<i64: 3, 1, 32>}, {pipeline_mode = #tpu.pipeline_mode<synchronous>, transform_indices = @transform_7, window_bounds = array<i64: 3, 1, 32>}, {pipeline_mode = #tpu.pipeline_mode<synchronous>, transform_indices = @transform_8, window_bounds = array<i64: 4, 32, 64>}, {pipeline_mode = #tpu.pipeline_mode<synchronous>, transform_indices = @transform_9, window_bounds = array<i64: 1, 64>}, {pipeline_mode = #tpu.pipeline_mode<synchronous>, transform_indices = @transform_10, window_bounds = array<i64: 1, 64>}, {transform_indices = @transform_11, window_bounds = array<i64: 1, 16, 64>}]} {
    %c0 = arith.constant 0 : index
    %c0_0 = arith.constant 0 : index
    %c0_1 = arith.constant 0 : index
    %0 = vector.load %arg2[%c0, %c0_0, %c0_1] : memref<1x1x64xf32, #tpu.memory_space<vmem>>, vector<1x1x64xf32>
    %1 = vector.shape_cast %0 : vector<1x1x64xf32> to vector<1x64xf32>
    %c0_2 = arith.constant 0 : index
    %c27 = arith.constant 27 : index
    %c0_3 = arith.constant 0 : index
    %2 = vector.load %arg1[%c0_2, %c27, %c0_3] : memref<1x72x64xbf16, #tpu.memory_space<vmem>>, vector<1x16x64xbf16>
    %3 = vector.shape_cast %2 : vector<1x16x64xbf16> to vector<16x64xbf16>
    %c0_4 = arith.constant 0 : index
    %c0_5 = arith.constant 0 : index
    %4 = vector.load %arg3[%c0_4, %c0_5] : memref<64x32xbf16, #tpu.memory_space<vmem>>, vector<64x32xbf16>
    %cst = arith.constant dense<0.000000e+00> : vector<16x32xf32>
    %5 = tpu.matmul %3, %4, %cst {dimension_numbers = #tpu.dot_dimension_numbers<[1], [0], [0], [1], [0, 0, 1, 1], [], []>} : vector<16x64xbf16>, vector<64x32xbf16>, vector<16x32xf32> -> vector<16x32xf32>
    %c0_6 = arith.constant 0 : index
    %c0_7 = arith.constant 0 : index
    %6 = vector.load %arg4[%c0_6, %c0_7] : memref<1x32xf32, #tpu.memory_space<vmem>>, vector<1x32xf32>
    %7 = vector.broadcast %6 : vector<1x32xf32> to vector<16x32xf32>
    %8 = arith.mulf %5, %7 : vector<16x32xf32>
    %c0_8 = arith.constant 0 : index
    %c0_9 = arith.constant 0 : index
    %9 = vector.load %arg5[%c0_8, %c0_9] : memref<1x32xf32, #tpu.memory_space<vmem>>, vector<1x32xf32>
    %10 = vector.broadcast %9 : vector<1x32xf32> to vector<16x32xf32>
    %11 = arith.addf %8, %10 : vector<16x32xf32>
    %cst_10 = arith.constant 0.000000e+00 : f32
    %12 = vector.broadcast %cst_10 : f32 to vector<16x32xf32>
    %13 = arith.maximumf %11, %12 : vector<16x32xf32>
    %14 = arith.truncf %13 : vector<16x32xf32> to vector<16x32xbf16>
    %c0_11 = arith.constant 0 : index
    %c0_12 = arith.constant 0 : index
    %c0_13 = arith.constant 0 : index
    %15 = vector.load %arg9[%c0_11, %c0_12, %c0_13] : memref<4x32x64xbf16, #tpu.memory_space<vmem>>, vector<1x32x64xbf16>
    %16 = vector.shape_cast %15 : vector<1x32x64xbf16> to vector<32x64xbf16>
    %cst_14 = arith.constant dense<0.000000e+00> : vector<16x64xf32>
    %17 = tpu.matmul %14, %16, %cst_14 {dimension_numbers = #tpu.dot_dimension_numbers<[1], [0], [0], [1], [0, 0, 1, 1], [], []>} : vector<16x32xbf16>, vector<32x64xbf16>, vector<16x64xf32> -> vector<16x64xf32>
    %c0_15 = arith.constant 0 : index
    %c18 = arith.constant 18 : index
    %c0_16 = arith.constant 0 : index
    %18 = vector.load %arg1[%c0_15, %c18, %c0_16] : memref<1x72x64xbf16, #tpu.memory_space<vmem>>, vector<1x16x64xbf16>
    %19 = vector.shape_cast %18 : vector<1x16x64xbf16> to vector<16x64xbf16>
    %c0_17 = arith.constant 0 : index
    %c0_18 = arith.constant 0 : index
    %c0_19 = arith.constant 0 : index
    %20 = vector.load %arg6[%c0_17, %c0_18, %c0_19] : memref<27x64x32xbf16, #tpu.memory_space<vmem>>, vector<1x64x32xbf16>
    %21 = vector.shape_cast %20 : vector<1x64x32xbf16> to vector<64x32xbf16>
    %cst_20 = arith.constant dense<0.000000e+00> : vector<16x32xf32>
    %22 = tpu.matmul %19, %21, %cst_20 {dimension_numbers = #tpu.dot_dimension_numbers<[1], [0], [0], [1], [0, 0, 1, 1], [], []>} : vector<16x64xbf16>, vector<64x32xbf16>, vector<16x32xf32> -> vector<16x32xf32>
    %c0_21 = arith.constant 0 : index
    %c19 = arith.constant 19 : index
    %c0_22 = arith.constant 0 : index
    %23 = vector.load %arg1[%c0_21, %c19, %c0_22] : memref<1x72x64xbf16, #tpu.memory_space<vmem>>, vector<1x16x64xbf16>
    %24 = vector.shape_cast %23 : vector<1x16x64xbf16> to vector<16x64xbf16>
    %c1 = arith.constant 1 : index
    %c0_23 = arith.constant 0 : index
    %c0_24 = arith.constant 0 : index
    %25 = vector.load %arg6[%c1, %c0_23, %c0_24] : memref<27x64x32xbf16, #tpu.memory_space<vmem>>, vector<1x64x32xbf16>
    %26 = vector.shape_cast %25 : vector<1x64x32xbf16> to vector<64x32xbf16>
    %cst_25 = arith.constant dense<0.000000e+00> : vector<16x32xf32>
    %27 = tpu.matmul %24, %26, %cst_25 {dimension_numbers = #tpu.dot_dimension_numbers<[1], [0], [0], [1], [0, 0, 1, 1], [], []>} : vector<16x64xbf16>, vector<64x32xbf16>, vector<16x32xf32> -> vector<16x32xf32>
    %28 = arith.addf %22, %27 : vector<16x32xf32>
    %c0_26 = arith.constant 0 : index
    %c20 = arith.constant 20 : index
    %c0_27 = arith.constant 0 : index
    %29 = vector.load %arg1[%c0_26, %c20, %c0_27] : memref<1x72x64xbf16, #tpu.memory_space<vmem>>, vector<1x16x64xbf16>
    %30 = vector.shape_cast %29 : vector<1x16x64xbf16> to vector<16x64xbf16>
    %c2 = arith.constant 2 : index
    %c0_28 = arith.constant 0 : index
    %c0_29 = arith.constant 0 : index
    %31 = vector.load %arg6[%c2, %c0_28, %c0_29] : memref<27x64x32xbf16, #tpu.memory_space<vmem>>, vector<1x64x32xbf16>
    %32 = vector.shape_cast %31 : vector<1x64x32xbf16> to vector<64x32xbf16>
    %cst_30 = arith.constant dense<0.000000e+00> : vector<16x32xf32>
    %33 = tpu.matmul %30, %32, %cst_30 {dimension_numbers = #tpu.dot_dimension_numbers<[1], [0], [0], [1], [0, 0, 1, 1], [], []>} : vector<16x64xbf16>, vector<64x32xbf16>, vector<16x32xf32> -> vector<16x32xf32>
    %34 = arith.addf %28, %33 : vector<16x32xf32>
    %c0_31 = arith.constant 0 : index
    %c26 = arith.constant 26 : index
    %c0_32 = arith.constant 0 : index
    %35 = vector.load %arg1[%c0_31, %c26, %c0_32] : memref<1x72x64xbf16, #tpu.memory_space<vmem>>, vector<1x16x64xbf16>
    %36 = vector.shape_cast %35 : vector<1x16x64xbf16> to vector<16x64xbf16>
    %c3 = arith.constant 3 : index
    %c0_33 = arith.constant 0 : index
    %c0_34 = arith.constant 0 : index
    %37 = vector.load %arg6[%c3, %c0_33, %c0_34] : memref<27x64x32xbf16, #tpu.memory_space<vmem>>, vector<1x64x32xbf16>
    %38 = vector.shape_cast %37 : vector<1x64x32xbf16> to vector<64x32xbf16>
    %cst_35 = arith.constant dense<0.000000e+00> : vector<16x32xf32>
    %39 = tpu.matmul %36, %38, %cst_35 {dimension_numbers = #tpu.dot_dimension_numbers<[1], [0], [0], [1], [0, 0, 1, 1], [], []>} : vector<16x64xbf16>, vector<64x32xbf16>, vector<16x32xf32> -> vector<16x32xf32>
    %40 = arith.addf %34, %39 : vector<16x32xf32>
    %c0_36 = arith.constant 0 : index
    %c27_37 = arith.constant 27 : index
    %c0_38 = arith.constant 0 : index
    %41 = vector.load %arg1[%c0_36, %c27_37, %c0_38] : memref<1x72x64xbf16, #tpu.memory_space<vmem>>, vector<1x16x64xbf16>
    %42 = vector.shape_cast %41 : vector<1x16x64xbf16> to vector<16x64xbf16>
    %c4 = arith.constant 4 : index
    %c0_39 = arith.constant 0 : index
    %c0_40 = arith.constant 0 : index
    %43 = vector.load %arg6[%c4, %c0_39, %c0_40] : memref<27x64x32xbf16, #tpu.memory_space<vmem>>, vector<1x64x32xbf16>
    %44 = vector.shape_cast %43 : vector<1x64x32xbf16> to vector<64x32xbf16>
    %cst_41 = arith.constant dense<0.000000e+00> : vector<16x32xf32>
    %45 = tpu.matmul %42, %44, %cst_41 {dimension_numbers = #tpu.dot_dimension_numbers<[1], [0], [0], [1], [0, 0, 1, 1], [], []>} : vector<16x64xbf16>, vector<64x32xbf16>, vector<16x32xf32> -> vector<16x32xf32>
    %46 = arith.addf %40, %45 : vector<16x32xf32>
    %c0_42 = arith.constant 0 : index
    %c28 = arith.constant 28 : index
    %c0_43 = arith.constant 0 : index
    %47 = vector.load %arg1[%c0_42, %c28, %c0_43] : memref<1x72x64xbf16, #tpu.memory_space<vmem>>, vector<1x16x64xbf16>
    %48 = vector.shape_cast %47 : vector<1x16x64xbf16> to vector<16x64xbf16>
    %c5 = arith.constant 5 : index
    %c0_44 = arith.constant 0 : index
    %c0_45 = arith.constant 0 : index
    %49 = vector.load %arg6[%c5, %c0_44, %c0_45] : memref<27x64x32xbf16, #tpu.memory_space<vmem>>, vector<1x64x32xbf16>
    %50 = vector.shape_cast %49 : vector<1x64x32xbf16> to vector<64x32xbf16>
    %cst_46 = arith.constant dense<0.000000e+00> : vector<16x32xf32>
    %51 = tpu.matmul %48, %50, %cst_46 {dimension_numbers = #tpu.dot_dimension_numbers<[1], [0], [0], [1], [0, 0, 1, 1], [], []>} : vector<16x64xbf16>, vector<64x32xbf16>, vector<16x32xf32> -> vector<16x32xf32>
    %52 = arith.addf %46, %51 : vector<16x32xf32>
    %c0_47 = arith.constant 0 : index
    %c34 = arith.constant 34 : index
    %c0_48 = arith.constant 0 : index
    %53 = vector.load %arg1[%c0_47, %c34, %c0_48] : memref<1x72x64xbf16, #tpu.memory_space<vmem>>, vector<1x16x64xbf16>
    %54 = vector.shape_cast %53 : vector<1x16x64xbf16> to vector<16x64xbf16>
    %c6 = arith.constant 6 : index
    %c0_49 = arith.constant 0 : index
    %c0_50 = arith.constant 0 : index
    %55 = vector.load %arg6[%c6, %c0_49, %c0_50] : memref<27x64x32xbf16, #tpu.memory_space<vmem>>, vector<1x64x32xbf16>
    %56 = vector.shape_cast %55 : vector<1x64x32xbf16> to vector<64x32xbf16>
    %cst_51 = arith.constant dense<0.000000e+00> : vector<16x32xf32>
    %57 = tpu.matmul %54, %56, %cst_51 {dimension_numbers = #tpu.dot_dimension_numbers<[1], [0], [0], [1], [0, 0, 1, 1], [], []>} : vector<16x64xbf16>, vector<64x32xbf16>, vector<16x32xf32> -> vector<16x32xf32>
    %58 = arith.addf %52, %57 : vector<16x32xf32>
    %c0_52 = arith.constant 0 : index
    %c35 = arith.constant 35 : index
    %c0_53 = arith.constant 0 : index
    %59 = vector.load %arg1[%c0_52, %c35, %c0_53] : memref<1x72x64xbf16, #tpu.memory_space<vmem>>, vector<1x16x64xbf16>
    %60 = vector.shape_cast %59 : vector<1x16x64xbf16> to vector<16x64xbf16>
    %c7 = arith.constant 7 : index
    %c0_54 = arith.constant 0 : index
    %c0_55 = arith.constant 0 : index
    %61 = vector.load %arg6[%c7, %c0_54, %c0_55] : memref<27x64x32xbf16, #tpu.memory_space<vmem>>, vector<1x64x32xbf16>
    %62 = vector.shape_cast %61 : vector<1x64x32xbf16> to vector<64x32xbf16>
    %cst_56 = arith.constant dense<0.000000e+00> : vector<16x32xf32>
    %63 = tpu.matmul %60, %62, %cst_56 {dimension_numbers = #tpu.dot_dimension_numbers<[1], [0], [0], [1], [0, 0, 1, 1], [], []>} : vector<16x64xbf16>, vector<64x32xbf16>, vector<16x32xf32> -> vector<16x32xf32>
    %64 = arith.addf %58, %63 : vector<16x32xf32>
    %c0_57 = arith.constant 0 : index
    %c36 = arith.constant 36 : index
    %c0_58 = arith.constant 0 : index
    %65 = vector.load %arg1[%c0_57, %c36, %c0_58] : memref<1x72x64xbf16, #tpu.memory_space<vmem>>, vector<1x16x64xbf16>
    %66 = vector.shape_cast %65 : vector<1x16x64xbf16> to vector<16x64xbf16>
    %c8 = arith.constant 8 : index
    %c0_59 = arith.constant 0 : index
    %c0_60 = arith.constant 0 : index
    %67 = vector.load %arg6[%c8, %c0_59, %c0_60] : memref<27x64x32xbf16, #tpu.memory_space<vmem>>, vector<1x64x32xbf16>
    %68 = vector.shape_cast %67 : vector<1x64x32xbf16> to vector<64x32xbf16>
    %cst_61 = arith.constant dense<0.000000e+00> : vector<16x32xf32>
    %69 = tpu.matmul %66, %68, %cst_61 {dimension_numbers = #tpu.dot_dimension_numbers<[1], [0], [0], [1], [0, 0, 1, 1], [], []>} : vector<16x64xbf16>, vector<64x32xbf16>, vector<16x32xf32> -> vector<16x32xf32>
    %70 = arith.addf %64, %69 : vector<16x32xf32>
    %c0_62 = arith.constant 0 : index
    %c0_63 = arith.constant 0 : index
    %c0_64 = arith.constant 0 : index
    %71 = vector.load %arg7[%c0_62, %c0_63, %c0_64] : memref<3x1x32xf32, #tpu.memory_space<vmem>>, vector<1x1x32xf32>
    %72 = vector.shape_cast %71 : vector<1x1x32xf32> to vector<1x32xf32>
    %73 = vector.broadcast %72 : vector<1x32xf32> to vector<16x32xf32>
    %74 = arith.mulf %70, %73 : vector<16x32xf32>
    %c0_65 = arith.constant 0 : index
    %c0_66 = arith.constant 0 : index
    %c0_67 = arith.constant 0 : index
    %75 = vector.load %arg8[%c0_65, %c0_66, %c0_67] : memref<3x1x32xf32, #tpu.memory_space<vmem>>, vector<1x1x32xf32>
    %76 = vector.shape_cast %75 : vector<1x1x32xf32> to vector<1x32xf32>
    %77 = vector.broadcast %76 : vector<1x32xf32> to vector<16x32xf32>
    %78 = arith.addf %74, %77 : vector<16x32xf32>
    %cst_68 = arith.constant 0.000000e+00 : f32
    %79 = vector.broadcast %cst_68 : f32 to vector<16x32xf32>
    %80 = arith.maximumf %78, %79 : vector<16x32xf32>
    %81 = arith.truncf %80 : vector<16x32xf32> to vector<16x32xbf16>
    %c1_69 = arith.constant 1 : index
    %c0_70 = arith.constant 0 : index
    %c0_71 = arith.constant 0 : index
    %82 = vector.load %arg9[%c1_69, %c0_70, %c0_71] : memref<4x32x64xbf16, #tpu.memory_space<vmem>>, vector<1x32x64xbf16>
    %83 = vector.shape_cast %82 : vector<1x32x64xbf16> to vector<32x64xbf16>
    %cst_72 = arith.constant dense<0.000000e+00> : vector<16x64xf32>
    %84 = tpu.matmul %81, %83, %cst_72 {dimension_numbers = #tpu.dot_dimension_numbers<[1], [0], [0], [1], [0, 0, 1, 1], [], []>} : vector<16x32xbf16>, vector<32x64xbf16>, vector<16x64xf32> -> vector<16x64xf32>
    %85 = arith.addf %17, %84 : vector<16x64xf32>
    %c0_73 = arith.constant 0 : index
    %c9 = arith.constant 9 : index
    %c0_74 = arith.constant 0 : index
    %86 = vector.load %arg1[%c0_73, %c9, %c0_74] : memref<1x72x64xbf16, #tpu.memory_space<vmem>>, vector<1x16x64xbf16>
    %87 = vector.shape_cast %86 : vector<1x16x64xbf16> to vector<16x64xbf16>
    %c9_75 = arith.constant 9 : index
    %c0_76 = arith.constant 0 : index
    %c0_77 = arith.constant 0 : index
    %88 = vector.load %arg6[%c9_75, %c0_76, %c0_77] : memref<27x64x32xbf16, #tpu.memory_space<vmem>>, vector<1x64x32xbf16>
    %89 = vector.shape_cast %88 : vector<1x64x32xbf16> to vector<64x32xbf16>
    %cst_78 = arith.constant dense<0.000000e+00> : vector<16x32xf32>
    %90 = tpu.matmul %87, %89, %cst_78 {dimension_numbers = #tpu.dot_dimension_numbers<[1], [0], [0], [1], [0, 0, 1, 1], [], []>} : vector<16x64xbf16>, vector<64x32xbf16>, vector<16x32xf32> -> vector<16x32xf32>
    %c0_79 = arith.constant 0 : index
    %c11 = arith.constant 11 : index
    %c0_80 = arith.constant 0 : index
    %91 = vector.load %arg1[%c0_79, %c11, %c0_80] : memref<1x72x64xbf16, #tpu.memory_space<vmem>>, vector<1x16x64xbf16>
    %92 = vector.shape_cast %91 : vector<1x16x64xbf16> to vector<16x64xbf16>
    %c10 = arith.constant 10 : index
    %c0_81 = arith.constant 0 : index
    %c0_82 = arith.constant 0 : index
    %93 = vector.load %arg6[%c10, %c0_81, %c0_82] : memref<27x64x32xbf16, #tpu.memory_space<vmem>>, vector<1x64x32xbf16>
    %94 = vector.shape_cast %93 : vector<1x64x32xbf16> to vector<64x32xbf16>
    %cst_83 = arith.constant dense<0.000000e+00> : vector<16x32xf32>
    %95 = tpu.matmul %92, %94, %cst_83 {dimension_numbers = #tpu.dot_dimension_numbers<[1], [0], [0], [1], [0, 0, 1, 1], [], []>} : vector<16x64xbf16>, vector<64x32xbf16>, vector<16x32xf32> -> vector<16x32xf32>
    %96 = arith.addf %90, %95 : vector<16x32xf32>
    %c0_84 = arith.constant 0 : index
    %c13 = arith.constant 13 : index
    %c0_85 = arith.constant 0 : index
    %97 = vector.load %arg1[%c0_84, %c13, %c0_85] : memref<1x72x64xbf16, #tpu.memory_space<vmem>>, vector<1x16x64xbf16>
    %98 = vector.shape_cast %97 : vector<1x16x64xbf16> to vector<16x64xbf16>
    %c11_86 = arith.constant 11 : index
    %c0_87 = arith.constant 0 : index
    %c0_88 = arith.constant 0 : index
    %99 = vector.load %arg6[%c11_86, %c0_87, %c0_88] : memref<27x64x32xbf16, #tpu.memory_space<vmem>>, vector<1x64x32xbf16>
    %100 = vector.shape_cast %99 : vector<1x64x32xbf16> to vector<64x32xbf16>
    %cst_89 = arith.constant dense<0.000000e+00> : vector<16x32xf32>
    %101 = tpu.matmul %98, %100, %cst_89 {dimension_numbers = #tpu.dot_dimension_numbers<[1], [0], [0], [1], [0, 0, 1, 1], [], []>} : vector<16x64xbf16>, vector<64x32xbf16>, vector<16x32xf32> -> vector<16x32xf32>
    %102 = arith.addf %96, %101 : vector<16x32xf32>
    %c0_90 = arith.constant 0 : index
    %c25 = arith.constant 25 : index
    %c0_91 = arith.constant 0 : index
    %103 = vector.load %arg1[%c0_90, %c25, %c0_91] : memref<1x72x64xbf16, #tpu.memory_space<vmem>>, vector<1x16x64xbf16>
    %104 = vector.shape_cast %103 : vector<1x16x64xbf16> to vector<16x64xbf16>
    %c12 = arith.constant 12 : index
    %c0_92 = arith.constant 0 : index
    %c0_93 = arith.constant 0 : index
    %105 = vector.load %arg6[%c12, %c0_92, %c0_93] : memref<27x64x32xbf16, #tpu.memory_space<vmem>>, vector<1x64x32xbf16>
    %106 = vector.shape_cast %105 : vector<1x64x32xbf16> to vector<64x32xbf16>
    %cst_94 = arith.constant dense<0.000000e+00> : vector<16x32xf32>
    %107 = tpu.matmul %104, %106, %cst_94 {dimension_numbers = #tpu.dot_dimension_numbers<[1], [0], [0], [1], [0, 0, 1, 1], [], []>} : vector<16x64xbf16>, vector<64x32xbf16>, vector<16x32xf32> -> vector<16x32xf32>
    %108 = arith.addf %102, %107 : vector<16x32xf32>
    %c0_95 = arith.constant 0 : index
    %c27_96 = arith.constant 27 : index
    %c0_97 = arith.constant 0 : index
    %109 = vector.load %arg1[%c0_95, %c27_96, %c0_97] : memref<1x72x64xbf16, #tpu.memory_space<vmem>>, vector<1x16x64xbf16>
    %110 = vector.shape_cast %109 : vector<1x16x64xbf16> to vector<16x64xbf16>
    %c13_98 = arith.constant 13 : index
    %c0_99 = arith.constant 0 : index
    %c0_100 = arith.constant 0 : index
    %111 = vector.load %arg6[%c13_98, %c0_99, %c0_100] : memref<27x64x32xbf16, #tpu.memory_space<vmem>>, vector<1x64x32xbf16>
    %112 = vector.shape_cast %111 : vector<1x64x32xbf16> to vector<64x32xbf16>
    %cst_101 = arith.constant dense<0.000000e+00> : vector<16x32xf32>
    %113 = tpu.matmul %110, %112, %cst_101 {dimension_numbers = #tpu.dot_dimension_numbers<[1], [0], [0], [1], [0, 0, 1, 1], [], []>} : vector<16x64xbf16>, vector<64x32xbf16>, vector<16x32xf32> -> vector<16x32xf32>
    %114 = arith.addf %108, %113 : vector<16x32xf32>
    %c0_102 = arith.constant 0 : index
    %c29 = arith.constant 29 : index
    %c0_103 = arith.constant 0 : index
    %115 = vector.load %arg1[%c0_102, %c29, %c0_103] : memref<1x72x64xbf16, #tpu.memory_space<vmem>>, vector<1x16x64xbf16>
    %116 = vector.shape_cast %115 : vector<1x16x64xbf16> to vector<16x64xbf16>
    %c14 = arith.constant 14 : index
    %c0_104 = arith.constant 0 : index
    %c0_105 = arith.constant 0 : index
    %117 = vector.load %arg6[%c14, %c0_104, %c0_105] : memref<27x64x32xbf16, #tpu.memory_space<vmem>>, vector<1x64x32xbf16>
    %118 = vector.shape_cast %117 : vector<1x64x32xbf16> to vector<64x32xbf16>
    %cst_106 = arith.constant dense<0.000000e+00> : vector<16x32xf32>
    %119 = tpu.matmul %116, %118, %cst_106 {dimension_numbers = #tpu.dot_dimension_numbers<[1], [0], [0], [1], [0, 0, 1, 1], [], []>} : vector<16x64xbf16>, vector<64x32xbf16>, vector<16x32xf32> -> vector<16x32xf32>
    %120 = arith.addf %114, %119 : vector<16x32xf32>
    %c0_107 = arith.constant 0 : index
    %c41 = arith.constant 41 : index
    %c0_108 = arith.constant 0 : index
    %121 = vector.load %arg1[%c0_107, %c41, %c0_108] : memref<1x72x64xbf16, #tpu.memory_space<vmem>>, vector<1x16x64xbf16>
    %122 = vector.shape_cast %121 : vector<1x16x64xbf16> to vector<16x64xbf16>
    %c15 = arith.constant 15 : index
    %c0_109 = arith.constant 0 : index
    %c0_110 = arith.constant 0 : index
    %123 = vector.load %arg6[%c15, %c0_109, %c0_110] : memref<27x64x32xbf16, #tpu.memory_space<vmem>>, vector<1x64x32xbf16>
    %124 = vector.shape_cast %123 : vector<1x64x32xbf16> to vector<64x32xbf16>
    %cst_111 = arith.constant dense<0.000000e+00> : vector<16x32xf32>
    %125 = tpu.matmul %122, %124, %cst_111 {dimension_numbers = #tpu.dot_dimension_numbers<[1], [0], [0], [1], [0, 0, 1, 1], [], []>} : vector<16x64xbf16>, vector<64x32xbf16>, vector<16x32xf32> -> vector<16x32xf32>
    %126 = arith.addf %120, %125 : vector<16x32xf32>
    %c0_112 = arith.constant 0 : index
    %c43 = arith.constant 43 : index
    %c0_113 = arith.constant 0 : index
    %127 = vector.load %arg1[%c0_112, %c43, %c0_113] : memref<1x72x64xbf16, #tpu.memory_space<vmem>>, vector<1x16x64xbf16>
    %128 = vector.shape_cast %127 : vector<1x16x64xbf16> to vector<16x64xbf16>
    %c16 = arith.constant 16 : index
    %c0_114 = arith.constant 0 : index
    %c0_115 = arith.constant 0 : index
    %129 = vector.load %arg6[%c16, %c0_114, %c0_115] : memref<27x64x32xbf16, #tpu.memory_space<vmem>>, vector<1x64x32xbf16>
    %130 = vector.shape_cast %129 : vector<1x64x32xbf16> to vector<64x32xbf16>
    %cst_116 = arith.constant dense<0.000000e+00> : vector<16x32xf32>
    %131 = tpu.matmul %128, %130, %cst_116 {dimension_numbers = #tpu.dot_dimension_numbers<[1], [0], [0], [1], [0, 0, 1, 1], [], []>} : vector<16x64xbf16>, vector<64x32xbf16>, vector<16x32xf32> -> vector<16x32xf32>
    %132 = arith.addf %126, %131 : vector<16x32xf32>
    %c0_117 = arith.constant 0 : index
    %c45 = arith.constant 45 : index
    %c0_118 = arith.constant 0 : index
    %133 = vector.load %arg1[%c0_117, %c45, %c0_118] : memref<1x72x64xbf16, #tpu.memory_space<vmem>>, vector<1x16x64xbf16>
    %134 = vector.shape_cast %133 : vector<1x16x64xbf16> to vector<16x64xbf16>
    %c17 = arith.constant 17 : index
    %c0_119 = arith.constant 0 : index
    %c0_120 = arith.constant 0 : index
    %135 = vector.load %arg6[%c17, %c0_119, %c0_120] : memref<27x64x32xbf16, #tpu.memory_space<vmem>>, vector<1x64x32xbf16>
    %136 = vector.shape_cast %135 : vector<1x64x32xbf16> to vector<64x32xbf16>
    %cst_121 = arith.constant dense<0.000000e+00> : vector<16x32xf32>
    %137 = tpu.matmul %134, %136, %cst_121 {dimension_numbers = #tpu.dot_dimension_numbers<[1], [0], [0], [1], [0, 0, 1, 1], [], []>} : vector<16x64xbf16>, vector<64x32xbf16>, vector<16x32xf32> -> vector<16x32xf32>
    %138 = arith.addf %132, %137 : vector<16x32xf32>
    %c1_122 = arith.constant 1 : index
    %c0_123 = arith.constant 0 : index
    %c0_124 = arith.constant 0 : index
    %139 = vector.load %arg7[%c1_122, %c0_123, %c0_124] : memref<3x1x32xf32, #tpu.memory_space<vmem>>, vector<1x1x32xf32>
    %140 = vector.shape_cast %139 : vector<1x1x32xf32> to vector<1x32xf32>
    %141 = vector.broadcast %140 : vector<1x32xf32> to vector<16x32xf32>
    %142 = arith.mulf %138, %141 : vector<16x32xf32>
    %c1_125 = arith.constant 1 : index
    %c0_126 = arith.constant 0 : index
    %c0_127 = arith.constant 0 : index
    %143 = vector.load %arg8[%c1_125, %c0_126, %c0_127] : memref<3x1x32xf32, #tpu.memory_space<vmem>>, vector<1x1x32xf32>
    %144 = vector.shape_cast %143 : vector<1x1x32xf32> to vector<1x32xf32>
    %145 = vector.broadcast %144 : vector<1x32xf32> to vector<16x32xf32>
    %146 = arith.addf %142, %145 : vector<16x32xf32>
    %cst_128 = arith.constant 0.000000e+00 : f32
    %147 = vector.broadcast %cst_128 : f32 to vector<16x32xf32>
    %148 = arith.maximumf %146, %147 : vector<16x32xf32>
    %149 = arith.truncf %148 : vector<16x32xf32> to vector<16x32xbf16>
    %c2_129 = arith.constant 2 : index
    %c0_130 = arith.constant 0 : index
    %c0_131 = arith.constant 0 : index
    %150 = vector.load %arg9[%c2_129, %c0_130, %c0_131] : memref<4x32x64xbf16, #tpu.memory_space<vmem>>, vector<1x32x64xbf16>
    %151 = vector.shape_cast %150 : vector<1x32x64xbf16> to vector<32x64xbf16>
    %cst_132 = arith.constant dense<0.000000e+00> : vector<16x64xf32>
    %152 = tpu.matmul %149, %151, %cst_132 {dimension_numbers = #tpu.dot_dimension_numbers<[1], [0], [0], [1], [0, 0, 1, 1], [], []>} : vector<16x32xbf16>, vector<32x64xbf16>, vector<16x64xf32> -> vector<16x64xf32>
    %153 = arith.addf %85, %152 : vector<16x64xf32>
    %c0_133 = arith.constant 0 : index
    %c0_134 = arith.constant 0 : index
    %c0_135 = arith.constant 0 : index
    %154 = vector.load %arg1[%c0_133, %c0_134, %c0_135] : memref<1x72x64xbf16, #tpu.memory_space<vmem>>, vector<1x16x64xbf16>
    %155 = vector.shape_cast %154 : vector<1x16x64xbf16> to vector<16x64xbf16>
    %c18_136 = arith.constant 18 : index
    %c0_137 = arith.constant 0 : index
    %c0_138 = arith.constant 0 : index
    %156 = vector.load %arg6[%c18_136, %c0_137, %c0_138] : memref<27x64x32xbf16, #tpu.memory_space<vmem>>, vector<1x64x32xbf16>
    %157 = vector.shape_cast %156 : vector<1x64x32xbf16> to vector<64x32xbf16>
    %cst_139 = arith.constant dense<0.000000e+00> : vector<16x32xf32>
    %158 = tpu.matmul %155, %157, %cst_139 {dimension_numbers = #tpu.dot_dimension_numbers<[1], [0], [0], [1], [0, 0, 1, 1], [], []>} : vector<16x64xbf16>, vector<64x32xbf16>, vector<16x32xf32> -> vector<16x32xf32>
    %c0_140 = arith.constant 0 : index
    %c3_141 = arith.constant 3 : index
    %c0_142 = arith.constant 0 : index
    %159 = vector.load %arg1[%c0_140, %c3_141, %c0_142] : memref<1x72x64xbf16, #tpu.memory_space<vmem>>, vector<1x16x64xbf16>
    %160 = vector.shape_cast %159 : vector<1x16x64xbf16> to vector<16x64xbf16>
    %c19_143 = arith.constant 19 : index
    %c0_144 = arith.constant 0 : index
    %c0_145 = arith.constant 0 : index
    %161 = vector.load %arg6[%c19_143, %c0_144, %c0_145] : memref<27x64x32xbf16, #tpu.memory_space<vmem>>, vector<1x64x32xbf16>
    %162 = vector.shape_cast %161 : vector<1x64x32xbf16> to vector<64x32xbf16>
    %cst_146 = arith.constant dense<0.000000e+00> : vector<16x32xf32>
    %163 = tpu.matmul %160, %162, %cst_146 {dimension_numbers = #tpu.dot_dimension_numbers<[1], [0], [0], [1], [0, 0, 1, 1], [], []>} : vector<16x64xbf16>, vector<64x32xbf16>, vector<16x32xf32> -> vector<16x32xf32>
    %164 = arith.addf %158, %163 : vector<16x32xf32>
    %c0_147 = arith.constant 0 : index
    %c6_148 = arith.constant 6 : index
    %c0_149 = arith.constant 0 : index
    %165 = vector.load %arg1[%c0_147, %c6_148, %c0_149] : memref<1x72x64xbf16, #tpu.memory_space<vmem>>, vector<1x16x64xbf16>
    %166 = vector.shape_cast %165 : vector<1x16x64xbf16> to vector<16x64xbf16>
    %c20_150 = arith.constant 20 : index
    %c0_151 = arith.constant 0 : index
    %c0_152 = arith.constant 0 : index
    %167 = vector.load %arg6[%c20_150, %c0_151, %c0_152] : memref<27x64x32xbf16, #tpu.memory_space<vmem>>, vector<1x64x32xbf16>
    %168 = vector.shape_cast %167 : vector<1x64x32xbf16> to vector<64x32xbf16>
    %cst_153 = arith.constant dense<0.000000e+00> : vector<16x32xf32>
    %169 = tpu.matmul %166, %168, %cst_153 {dimension_numbers = #tpu.dot_dimension_numbers<[1], [0], [0], [1], [0, 0, 1, 1], [], []>} : vector<16x64xbf16>, vector<64x32xbf16>, vector<16x32xf32> -> vector<16x32xf32>
    %170 = arith.addf %164, %169 : vector<16x32xf32>
    %c0_154 = arith.constant 0 : index
    %c24 = arith.constant 24 : index
    %c0_155 = arith.constant 0 : index
    %171 = vector.load %arg1[%c0_154, %c24, %c0_155] : memref<1x72x64xbf16, #tpu.memory_space<vmem>>, vector<1x16x64xbf16>
    %172 = vector.shape_cast %171 : vector<1x16x64xbf16> to vector<16x64xbf16>
    %c21 = arith.constant 21 : index
    %c0_156 = arith.constant 0 : index
    %c0_157 = arith.constant 0 : index
    %173 = vector.load %arg6[%c21, %c0_156, %c0_157] : memref<27x64x32xbf16, #tpu.memory_space<vmem>>, vector<1x64x32xbf16>
    %174 = vector.shape_cast %173 : vector<1x64x32xbf16> to vector<64x32xbf16>
    %cst_158 = arith.constant dense<0.000000e+00> : vector<16x32xf32>
    %175 = tpu.matmul %172, %174, %cst_158 {dimension_numbers = #tpu.dot_dimension_numbers<[1], [0], [0], [1], [0, 0, 1, 1], [], []>} : vector<16x64xbf16>, vector<64x32xbf16>, vector<16x32xf32> -> vector<16x32xf32>
    %176 = arith.addf %170, %175 : vector<16x32xf32>
    %c0_159 = arith.constant 0 : index
    %c27_160 = arith.constant 27 : index
    %c0_161 = arith.constant 0 : index
    %177 = vector.load %arg1[%c0_159, %c27_160, %c0_161] : memref<1x72x64xbf16, #tpu.memory_space<vmem>>, vector<1x16x64xbf16>
    %178 = vector.shape_cast %177 : vector<1x16x64xbf16> to vector<16x64xbf16>
    %c22 = arith.constant 22 : index
    %c0_162 = arith.constant 0 : index
    %c0_163 = arith.constant 0 : index
    %179 = vector.load %arg6[%c22, %c0_162, %c0_163] : memref<27x64x32xbf16, #tpu.memory_space<vmem>>, vector<1x64x32xbf16>
    %180 = vector.shape_cast %179 : vector<1x64x32xbf16> to vector<64x32xbf16>
    %cst_164 = arith.constant dense<0.000000e+00> : vector<16x32xf32>
    %181 = tpu.matmul %178, %180, %cst_164 {dimension_numbers = #tpu.dot_dimension_numbers<[1], [0], [0], [1], [0, 0, 1, 1], [], []>} : vector<16x64xbf16>, vector<64x32xbf16>, vector<16x32xf32> -> vector<16x32xf32>
    %182 = arith.addf %176, %181 : vector<16x32xf32>
    %c0_165 = arith.constant 0 : index
    %c30 = arith.constant 30 : index
    %c0_166 = arith.constant 0 : index
    %183 = vector.load %arg1[%c0_165, %c30, %c0_166] : memref<1x72x64xbf16, #tpu.memory_space<vmem>>, vector<1x16x64xbf16>
    %184 = vector.shape_cast %183 : vector<1x16x64xbf16> to vector<16x64xbf16>
    %c23 = arith.constant 23 : index
    %c0_167 = arith.constant 0 : index
    %c0_168 = arith.constant 0 : index
    %185 = vector.load %arg6[%c23, %c0_167, %c0_168] : memref<27x64x32xbf16, #tpu.memory_space<vmem>>, vector<1x64x32xbf16>
    %186 = vector.shape_cast %185 : vector<1x64x32xbf16> to vector<64x32xbf16>
    %cst_169 = arith.constant dense<0.000000e+00> : vector<16x32xf32>
    %187 = tpu.matmul %184, %186, %cst_169 {dimension_numbers = #tpu.dot_dimension_numbers<[1], [0], [0], [1], [0, 0, 1, 1], [], []>} : vector<16x64xbf16>, vector<64x32xbf16>, vector<16x32xf32> -> vector<16x32xf32>
    %188 = arith.addf %182, %187 : vector<16x32xf32>
    %c0_170 = arith.constant 0 : index
    %c48 = arith.constant 48 : index
    %c0_171 = arith.constant 0 : index
    %189 = vector.load %arg1[%c0_170, %c48, %c0_171] : memref<1x72x64xbf16, #tpu.memory_space<vmem>>, vector<1x16x64xbf16>
    %190 = vector.shape_cast %189 : vector<1x16x64xbf16> to vector<16x64xbf16>
    %c24_172 = arith.constant 24 : index
    %c0_173 = arith.constant 0 : index
    %c0_174 = arith.constant 0 : index
    %191 = vector.load %arg6[%c24_172, %c0_173, %c0_174] : memref<27x64x32xbf16, #tpu.memory_space<vmem>>, vector<1x64x32xbf16>
    %192 = vector.shape_cast %191 : vector<1x64x32xbf16> to vector<64x32xbf16>
    %cst_175 = arith.constant dense<0.000000e+00> : vector<16x32xf32>
    %193 = tpu.matmul %190, %192, %cst_175 {dimension_numbers = #tpu.dot_dimension_numbers<[1], [0], [0], [1], [0, 0, 1, 1], [], []>} : vector<16x64xbf16>, vector<64x32xbf16>, vector<16x32xf32> -> vector<16x32xf32>
    %194 = arith.addf %188, %193 : vector<16x32xf32>
    %c0_176 = arith.constant 0 : index
    %c51 = arith.constant 51 : index
    %c0_177 = arith.constant 0 : index
    %195 = vector.load %arg1[%c0_176, %c51, %c0_177] : memref<1x72x64xbf16, #tpu.memory_space<vmem>>, vector<1x16x64xbf16>
    %196 = vector.shape_cast %195 : vector<1x16x64xbf16> to vector<16x64xbf16>
    %c25_178 = arith.constant 25 : index
    %c0_179 = arith.constant 0 : index
    %c0_180 = arith.constant 0 : index
    %197 = vector.load %arg6[%c25_178, %c0_179, %c0_180] : memref<27x64x32xbf16, #tpu.memory_space<vmem>>, vector<1x64x32xbf16>
    %198 = vector.shape_cast %197 : vector<1x64x32xbf16> to vector<64x32xbf16>
    %cst_181 = arith.constant dense<0.000000e+00> : vector<16x32xf32>
    %199 = tpu.matmul %196, %198, %cst_181 {dimension_numbers = #tpu.dot_dimension_numbers<[1], [0], [0], [1], [0, 0, 1, 1], [], []>} : vector<16x64xbf16>, vector<64x32xbf16>, vector<16x32xf32> -> vector<16x32xf32>
    %200 = arith.addf %194, %199 : vector<16x32xf32>
    %c0_182 = arith.constant 0 : index
    %c54 = arith.constant 54 : index
    %c0_183 = arith.constant 0 : index
    %201 = vector.load %arg1[%c0_182, %c54, %c0_183] : memref<1x72x64xbf16, #tpu.memory_space<vmem>>, vector<1x16x64xbf16>
    %202 = vector.shape_cast %201 : vector<1x16x64xbf16> to vector<16x64xbf16>
    %c26_184 = arith.constant 26 : index
    %c0_185 = arith.constant 0 : index
    %c0_186 = arith.constant 0 : index
    %203 = vector.load %arg6[%c26_184, %c0_185, %c0_186] : memref<27x64x32xbf16, #tpu.memory_space<vmem>>, vector<1x64x32xbf16>
    %204 = vector.shape_cast %203 : vector<1x64x32xbf16> to vector<64x32xbf16>
    %cst_187 = arith.constant dense<0.000000e+00> : vector<16x32xf32>
    %205 = tpu.matmul %202, %204, %cst_187 {dimension_numbers = #tpu.dot_dimension_numbers<[1], [0], [0], [1], [0, 0, 1, 1], [], []>} : vector<16x64xbf16>, vector<64x32xbf16>, vector<16x32xf32> -> vector<16x32xf32>
    %206 = arith.addf %200, %205 : vector<16x32xf32>
    %c2_188 = arith.constant 2 : index
    %c0_189 = arith.constant 0 : index
    %c0_190 = arith.constant 0 : index
    %207 = vector.load %arg7[%c2_188, %c0_189, %c0_190] : memref<3x1x32xf32, #tpu.memory_space<vmem>>, vector<1x1x32xf32>
    %208 = vector.shape_cast %207 : vector<1x1x32xf32> to vector<1x32xf32>
    %209 = vector.broadcast %208 : vector<1x32xf32> to vector<16x32xf32>
    %210 = arith.mulf %206, %209 : vector<16x32xf32>
    %c2_191 = arith.constant 2 : index
    %c0_192 = arith.constant 0 : index
    %c0_193 = arith.constant 0 : index
    %211 = vector.load %arg8[%c2_191, %c0_192, %c0_193] : memref<3x1x32xf32, #tpu.memory_space<vmem>>, vector<1x1x32xf32>
    %212 = vector.shape_cast %211 : vector<1x1x32xf32> to vector<1x32xf32>
    %213 = vector.broadcast %212 : vector<1x32xf32> to vector<16x32xf32>
    %214 = arith.addf %210, %213 : vector<16x32xf32>
    %cst_194 = arith.constant 0.000000e+00 : f32
    %215 = vector.broadcast %cst_194 : f32 to vector<16x32xf32>
    %216 = arith.maximumf %214, %215 : vector<16x32xf32>
    %217 = arith.truncf %216 : vector<16x32xf32> to vector<16x32xbf16>
    %c3_195 = arith.constant 3 : index
    %c0_196 = arith.constant 0 : index
    %c0_197 = arith.constant 0 : index
    %218 = vector.load %arg9[%c3_195, %c0_196, %c0_197] : memref<4x32x64xbf16, #tpu.memory_space<vmem>>, vector<1x32x64xbf16>
    %219 = vector.shape_cast %218 : vector<1x32x64xbf16> to vector<32x64xbf16>
    %cst_198 = arith.constant dense<0.000000e+00> : vector<16x64xf32>
    %220 = tpu.matmul %217, %219, %cst_198 {dimension_numbers = #tpu.dot_dimension_numbers<[1], [0], [0], [1], [0, 0, 1, 1], [], []>} : vector<16x32xbf16>, vector<32x64xbf16>, vector<16x64xf32> -> vector<16x64xf32>
    %221 = arith.addf %153, %220 : vector<16x64xf32>
    %222 = vector.broadcast %1 : vector<1x64xf32> to vector<16x64xf32>
    %223 = arith.addf %221, %222 : vector<16x64xf32>
    %c0_199 = arith.constant 0 : index
    %c0_200 = arith.constant 0 : index
    %224 = vector.load %arg10[%c0_199, %c0_200] : memref<1x64xf32, #tpu.memory_space<vmem>>, vector<1x64xf32>
    %225 = vector.broadcast %224 : vector<1x64xf32> to vector<16x64xf32>
    %226 = arith.mulf %223, %225 : vector<16x64xf32>
    %c0_201 = arith.constant 0 : index
    %c0_202 = arith.constant 0 : index
    %227 = vector.load %arg11[%c0_201, %c0_202] : memref<1x64xf32, #tpu.memory_space<vmem>>, vector<1x64xf32>
    %228 = vector.broadcast %227 : vector<1x64xf32> to vector<16x64xf32>
    %229 = arith.addf %226, %228 : vector<16x64xf32>
    %cst_203 = arith.constant 0.000000e+00 : f32
    %230 = vector.broadcast %cst_203 : f32 to vector<16x64xf32>
    %231 = arith.maximumf %229, %230 : vector<16x64xf32>
    %232 = arith.truncf %231 : vector<16x64xf32> to vector<16x64xbf16>
    %c0_204 = arith.constant 0 : index
    %c0_205 = arith.constant 0 : index
    %c0_206 = arith.constant 0 : index
    %233 = vector.load %arg12[%c0_204, %c0_205, %c0_206] : memref<1x16x64xbf16, #tpu.memory_space<vmem>>, vector<1x16x64xbf16>
    %234 = vector.shape_cast %233 : vector<1x16x64xbf16> to vector<16x64xbf16>
    %235 = vector.shape_cast %232 : vector<16x64xbf16> to vector<1x16x64xbf16>
    tpu.vector_store %arg12[%c0_204, %c0_205, %c0_206], %235 {strides = array<i32>} : memref<1x16x64xbf16, #tpu.memory_space<vmem>>, vector<1x16x64xbf16>,
    return
  }
  func.func @transform_0(%arg0: i32) -> (i32, i32, i32) {
    %c0_i32 = arith.constant 0 : i32
    %c0_i32_0 = arith.constant 0 : i32
    %c0_i32_1 = arith.constant 0 : i32
    return %arg0, %c0_i32, %c0_i32_0 : i32, i32, i32
  }
  func.func @transform_1(%arg0: i32) -> (i32, i32, i32) {
    %c0_i32 = arith.constant 0 : i32
    %c0_i32_0 = arith.constant 0 : i32
    %c0_i32_1 = arith.constant 0 : i32
    return %arg0, %c0_i32, %c0_i32_0 : i32, i32, i32
  }
  func.func @transform_2(%arg0: i32) -> (i32, i32) {
    %c0_i32 = arith.constant 0 : i32
    %c0_i32_0 = arith.constant 0 : i32
    %c0_i32_1 = arith.constant 0 : i32
    return %c0_i32, %c0_i32_0 : i32, i32
  }
  func.func @transform_3(%arg0: i32) -> (i32, i32) {
    %c0_i32 = arith.constant 0 : i32
    %c0_i32_0 = arith.constant 0 : i32
    %c0_i32_1 = arith.constant 0 : i32
    return %c0_i32, %c0_i32_0 : i32, i32
  }
  func.func @transform_4(%arg0: i32) -> (i32, i32) {
    %c0_i32 = arith.constant 0 : i32
    %c0_i32_0 = arith.constant 0 : i32
    %c0_i32_1 = arith.constant 0 : i32
    return %c0_i32, %c0_i32_0 : i32, i32
  }
  func.func @transform_5(%arg0: i32) -> (i32, i32, i32) {
    %c0_i32 = arith.constant 0 : i32
    %c0_i32_0 = arith.constant 0 : i32
    %c0_i32_1 = arith.constant 0 : i32
    %c0_i32_2 = arith.constant 0 : i32
    return %c0_i32, %c0_i32_0, %c0_i32_1 : i32, i32, i32
  }
  func.func @transform_6(%arg0: i32) -> (i32, i32, i32) {
    %c0_i32 = arith.constant 0 : i32
    %c0_i32_0 = arith.constant 0 : i32
    %c0_i32_1 = arith.constant 0 : i32
    %c0_i32_2 = arith.constant 0 : i32
    return %c0_i32, %c0_i32_0, %c0_i32_1 : i32, i32, i32
  }
  func.func @transform_7(%arg0: i32) -> (i32, i32, i32) {
    %c0_i32 = arith.constant 0 : i32
    %c0_i32_0 = arith.constant 0 : i32
    %c0_i32_1 = arith.constant 0 : i32
    %c0_i32_2 = arith.constant 0 : i32
    return %c0_i32, %c0_i32_0, %c0_i32_1 : i32, i32, i32
  }
  func.func @transform_8(%arg0: i32) -> (i32, i32, i32) {
    %c0_i32 = arith.constant 0 : i32
    %c0_i32_0 = arith.constant 0 : i32
    %c0_i32_1 = arith.constant 0 : i32
    %c0_i32_2 = arith.constant 0 : i32
    return %c0_i32, %c0_i32_0, %c0_i32_1 : i32, i32, i32
  }
  func.func @transform_9(%arg0: i32) -> (i32, i32) {
    %c0_i32 = arith.constant 0 : i32
    %c0_i32_0 = arith.constant 0 : i32
    %c0_i32_1 = arith.constant 0 : i32
    return %c0_i32, %c0_i32_0 : i32, i32
  }
  func.func @transform_10(%arg0: i32) -> (i32, i32) {
    %c0_i32 = arith.constant 0 : i32
    %c0_i32_0 = arith.constant 0 : i32
    %c0_i32_1 = arith.constant 0 : i32
    return %c0_i32, %c0_i32_0 : i32, i32
  }
  func.func @transform_11(%arg0: i32) -> (i32, i32, i32) {
    %c0_i32 = arith.constant 0 : i32
    %c0_i32_0 = arith.constant 0 : i32
    %c0_i32_1 = arith.constant 0 : i32
    return %arg0, %c0_i32, %c0_i32_0 : i32, i32, i32
  }
}

module attributes {stable_mosaic.version = 11 : i64} {
  func.func @_matmul_affine_kernel(%arg0: i32, %arg1: memref<64x24xbf16, #tpu.memory_space<vmem>>, %arg2: memref<24x12xbf16, #tpu.memory_space<vmem>>, %arg3: memref<1x12xf32, #tpu.memory_space<vmem>>, %arg4: memref<1x12xf32, #tpu.memory_space<vmem>>, %arg5: memref<64x12xbf16, #tpu.memory_space<vmem>>) attributes {dimension_semantics = [#tpu.dimension_semantics<parallel>], iteration_bounds = array<i64: 2>, scalar_prefetch = 0 : i64, scratch_operands = 0 : i64, tpu.core_type = #tpu.core_type<tc>, window_params = [{transform_indices = @transform_0, window_bounds = array<i64: 64, 24>}, {pipeline_mode = #tpu.pipeline_mode<synchronous>, transform_indices = @transform_1, window_bounds = array<i64: 24, 12>}, {pipeline_mode = #tpu.pipeline_mode<synchronous>, transform_indices = @transform_2, window_bounds = array<i64: 1, 12>}, {pipeline_mode = #tpu.pipeline_mode<synchronous>, transform_indices = @transform_3, window_bounds = array<i64: 1, 12>}, {transform_indices = @transform_4, window_bounds = array<i64: 64, 12>}]} {
    %c0 = arith.constant 0 : index
    %c0_0 = arith.constant 0 : index
    %0 = vector.load %arg1[%c0, %c0_0] : memref<64x24xbf16, #tpu.memory_space<vmem>>, vector<64x24xbf16>
    %c0_1 = arith.constant 0 : index
    %c0_2 = arith.constant 0 : index
    %1 = vector.load %arg2[%c0_1, %c0_2] : memref<24x12xbf16, #tpu.memory_space<vmem>>, vector<24x12xbf16>
    %cst = arith.constant dense<0.000000e+00> : vector<64x12xf32>
    %2 = tpu.matmul %0, %1, %cst {dimension_numbers = #tpu.dot_dimension_numbers<[1], [0], [0], [1], [0, 0, 1, 1], [], []>} : vector<64x24xbf16>, vector<24x12xbf16>, vector<64x12xf32> -> vector<64x12xf32>
    %c0_3 = arith.constant 0 : index
    %c0_4 = arith.constant 0 : index
    %3 = vector.load %arg3[%c0_3, %c0_4] : memref<1x12xf32, #tpu.memory_space<vmem>>, vector<1x12xf32>
    %4 = vector.broadcast %3 : vector<1x12xf32> to vector<64x12xf32>
    %5 = arith.mulf %2, %4 : vector<64x12xf32>
    %c0_5 = arith.constant 0 : index
    %c0_6 = arith.constant 0 : index
    %6 = vector.load %arg4[%c0_5, %c0_6] : memref<1x12xf32, #tpu.memory_space<vmem>>, vector<1x12xf32>
    %7 = vector.broadcast %6 : vector<1x12xf32> to vector<64x12xf32>
    %8 = arith.addf %5, %7 : vector<64x12xf32>
    %cst_7 = arith.constant 0.000000e+00 : f32
    %9 = vector.broadcast %cst_7 : f32 to vector<64x12xf32>
    %10 = arith.maximumf %8, %9 : vector<64x12xf32>
    %11 = arith.truncf %10 : vector<64x12xf32> to vector<64x12xbf16>
    %c0_8 = arith.constant 0 : index
    %c0_9 = arith.constant 0 : index
    %12 = vector.load %arg5[%c0_8, %c0_9] : memref<64x12xbf16, #tpu.memory_space<vmem>>, vector<64x12xbf16>
    tpu.vector_store %arg5[%c0_8, %c0_9], %11 {strides = array<i32>} : memref<64x12xbf16, #tpu.memory_space<vmem>>, vector<64x12xbf16>,
    return
  }
  func.func @transform_0(%arg0: i32) -> (i32, i32) {
    %c0_i32 = arith.constant 0 : i32
    %c0_i32_0 = arith.constant 0 : i32
    return %arg0, %c0_i32 : i32, i32
  }
  func.func @transform_1(%arg0: i32) -> (i32, i32) {
    %c0_i32 = arith.constant 0 : i32
    %c0_i32_0 = arith.constant 0 : i32
    %c0_i32_1 = arith.constant 0 : i32
    return %c0_i32, %c0_i32_0 : i32, i32
  }
  func.func @transform_2(%arg0: i32) -> (i32, i32) {
    %c0_i32 = arith.constant 0 : i32
    %c0_i32_0 = arith.constant 0 : i32
    %c0_i32_1 = arith.constant 0 : i32
    return %c0_i32, %c0_i32_0 : i32, i32
  }
  func.func @transform_3(%arg0: i32) -> (i32, i32) {
    %c0_i32 = arith.constant 0 : i32
    %c0_i32_0 = arith.constant 0 : i32
    %c0_i32_1 = arith.constant 0 : i32
    return %c0_i32, %c0_i32_0 : i32, i32
  }
  func.func @transform_4(%arg0: i32) -> (i32, i32) {
    %c0_i32 = arith.constant 0 : i32
    %c0_i32_0 = arith.constant 0 : i32
    return %arg0, %c0_i32 : i32, i32
  }
}

module attributes {stable_mosaic.version = 11 : i64} {
  func.func @_conv3x3_kernel(%arg0: i32, %arg1: memref<1x110x76xbf16, #tpu.memory_space<vmem>>, %arg2: memref<9x76x64xbf16, #tpu.memory_space<vmem>>, %arg3: memref<1x64xf32, #tpu.memory_space<vmem>>, %arg4: memref<1x64xf32, #tpu.memory_space<vmem>>, %arg5: memref<1x80x64xbf16, #tpu.memory_space<vmem>>) attributes {dimension_semantics = [#tpu.dimension_semantics<parallel>], iteration_bounds = array<i64: 2>, scalar_prefetch = 0 : i64, scratch_operands = 0 : i64, tpu.core_type = #tpu.core_type<tc>, window_params = [{transform_indices = @transform_0, window_bounds = array<i64: 1, 110, 76>}, {pipeline_mode = #tpu.pipeline_mode<synchronous>, transform_indices = @transform_1, window_bounds = array<i64: 9, 76, 64>}, {pipeline_mode = #tpu.pipeline_mode<synchronous>, transform_indices = @transform_2, window_bounds = array<i64: 1, 64>}, {pipeline_mode = #tpu.pipeline_mode<synchronous>, transform_indices = @transform_3, window_bounds = array<i64: 1, 64>}, {transform_indices = @transform_4, window_bounds = array<i64: 1, 80, 64>}]} {
    %c0 = arith.constant 0 : index
    %c0_0 = arith.constant 0 : index
    %c0_1 = arith.constant 0 : index
    %0 = vector.load %arg1[%c0, %c0_0, %c0_1] : memref<1x110x76xbf16, #tpu.memory_space<vmem>>, vector<1x80x76xbf16>
    %1 = vector.shape_cast %0 : vector<1x80x76xbf16> to vector<80x76xbf16>
    %c0_2 = arith.constant 0 : index
    %c0_3 = arith.constant 0 : index
    %c0_4 = arith.constant 0 : index
    %2 = vector.load %arg2[%c0_2, %c0_3, %c0_4] : memref<9x76x64xbf16, #tpu.memory_space<vmem>>, vector<1x76x64xbf16>
    %3 = vector.shape_cast %2 : vector<1x76x64xbf16> to vector<76x64xbf16>
    %cst = arith.constant dense<0.000000e+00> : vector<80x64xf32>
    %4 = tpu.matmul %1, %3, %cst {dimension_numbers = #tpu.dot_dimension_numbers<[1], [0], [0], [1], [0, 0, 1, 1], [], []>} : vector<80x76xbf16>, vector<76x64xbf16>, vector<80x64xf32> -> vector<80x64xf32>
    %c0_5 = arith.constant 0 : index
    %c1 = arith.constant 1 : index
    %c0_6 = arith.constant 0 : index
    %5 = vector.load %arg1[%c0_5, %c1, %c0_6] : memref<1x110x76xbf16, #tpu.memory_space<vmem>>, vector<1x80x76xbf16>
    %6 = vector.shape_cast %5 : vector<1x80x76xbf16> to vector<80x76xbf16>
    %c1_7 = arith.constant 1 : index
    %c0_8 = arith.constant 0 : index
    %c0_9 = arith.constant 0 : index
    %7 = vector.load %arg2[%c1_7, %c0_8, %c0_9] : memref<9x76x64xbf16, #tpu.memory_space<vmem>>, vector<1x76x64xbf16>
    %8 = vector.shape_cast %7 : vector<1x76x64xbf16> to vector<76x64xbf16>
    %cst_10 = arith.constant dense<0.000000e+00> : vector<80x64xf32>
    %9 = tpu.matmul %6, %8, %cst_10 {dimension_numbers = #tpu.dot_dimension_numbers<[1], [0], [0], [1], [0, 0, 1, 1], [], []>} : vector<80x76xbf16>, vector<76x64xbf16>, vector<80x64xf32> -> vector<80x64xf32>
    %10 = arith.addf %4, %9 : vector<80x64xf32>
    %c0_11 = arith.constant 0 : index
    %c2 = arith.constant 2 : index
    %c0_12 = arith.constant 0 : index
    %11 = vector.load %arg1[%c0_11, %c2, %c0_12] : memref<1x110x76xbf16, #tpu.memory_space<vmem>>, vector<1x80x76xbf16>
    %12 = vector.shape_cast %11 : vector<1x80x76xbf16> to vector<80x76xbf16>
    %c2_13 = arith.constant 2 : index
    %c0_14 = arith.constant 0 : index
    %c0_15 = arith.constant 0 : index
    %13 = vector.load %arg2[%c2_13, %c0_14, %c0_15] : memref<9x76x64xbf16, #tpu.memory_space<vmem>>, vector<1x76x64xbf16>
    %14 = vector.shape_cast %13 : vector<1x76x64xbf16> to vector<76x64xbf16>
    %cst_16 = arith.constant dense<0.000000e+00> : vector<80x64xf32>
    %15 = tpu.matmul %12, %14, %cst_16 {dimension_numbers = #tpu.dot_dimension_numbers<[1], [0], [0], [1], [0, 0, 1, 1], [], []>} : vector<80x76xbf16>, vector<76x64xbf16>, vector<80x64xf32> -> vector<80x64xf32>
    %16 = arith.addf %10, %15 : vector<80x64xf32>
    %c0_17 = arith.constant 0 : index
    %c10 = arith.constant 10 : index
    %c0_18 = arith.constant 0 : index
    %17 = vector.load %arg1[%c0_17, %c10, %c0_18] : memref<1x110x76xbf16, #tpu.memory_space<vmem>>, vector<1x80x76xbf16>
    %18 = vector.shape_cast %17 : vector<1x80x76xbf16> to vector<80x76xbf16>
    %c3 = arith.constant 3 : index
    %c0_19 = arith.constant 0 : index
    %c0_20 = arith.constant 0 : index
    %19 = vector.load %arg2[%c3, %c0_19, %c0_20] : memref<9x76x64xbf16, #tpu.memory_space<vmem>>, vector<1x76x64xbf16>
    %20 = vector.shape_cast %19 : vector<1x76x64xbf16> to vector<76x64xbf16>
    %cst_21 = arith.constant dense<0.000000e+00> : vector<80x64xf32>
    %21 = tpu.matmul %18, %20, %cst_21 {dimension_numbers = #tpu.dot_dimension_numbers<[1], [0], [0], [1], [0, 0, 1, 1], [], []>} : vector<80x76xbf16>, vector<76x64xbf16>, vector<80x64xf32> -> vector<80x64xf32>
    %22 = arith.addf %16, %21 : vector<80x64xf32>
    %c0_22 = arith.constant 0 : index
    %c11 = arith.constant 11 : index
    %c0_23 = arith.constant 0 : index
    %23 = vector.load %arg1[%c0_22, %c11, %c0_23] : memref<1x110x76xbf16, #tpu.memory_space<vmem>>, vector<1x80x76xbf16>
    %24 = vector.shape_cast %23 : vector<1x80x76xbf16> to vector<80x76xbf16>
    %c4 = arith.constant 4 : index
    %c0_24 = arith.constant 0 : index
    %c0_25 = arith.constant 0 : index
    %25 = vector.load %arg2[%c4, %c0_24, %c0_25] : memref<9x76x64xbf16, #tpu.memory_space<vmem>>, vector<1x76x64xbf16>
    %26 = vector.shape_cast %25 : vector<1x76x64xbf16> to vector<76x64xbf16>
    %cst_26 = arith.constant dense<0.000000e+00> : vector<80x64xf32>
    %27 = tpu.matmul %24, %26, %cst_26 {dimension_numbers = #tpu.dot_dimension_numbers<[1], [0], [0], [1], [0, 0, 1, 1], [], []>} : vector<80x76xbf16>, vector<76x64xbf16>, vector<80x64xf32> -> vector<80x64xf32>
    %28 = arith.addf %22, %27 : vector<80x64xf32>
    %c0_27 = arith.constant 0 : index
    %c12 = arith.constant 12 : index
    %c0_28 = arith.constant 0 : index
    %29 = vector.load %arg1[%c0_27, %c12, %c0_28] : memref<1x110x76xbf16, #tpu.memory_space<vmem>>, vector<1x80x76xbf16>
    %30 = vector.shape_cast %29 : vector<1x80x76xbf16> to vector<80x76xbf16>
    %c5 = arith.constant 5 : index
    %c0_29 = arith.constant 0 : index
    %c0_30 = arith.constant 0 : index
    %31 = vector.load %arg2[%c5, %c0_29, %c0_30] : memref<9x76x64xbf16, #tpu.memory_space<vmem>>, vector<1x76x64xbf16>
    %32 = vector.shape_cast %31 : vector<1x76x64xbf16> to vector<76x64xbf16>
    %cst_31 = arith.constant dense<0.000000e+00> : vector<80x64xf32>
    %33 = tpu.matmul %30, %32, %cst_31 {dimension_numbers = #tpu.dot_dimension_numbers<[1], [0], [0], [1], [0, 0, 1, 1], [], []>} : vector<80x76xbf16>, vector<76x64xbf16>, vector<80x64xf32> -> vector<80x64xf32>
    %34 = arith.addf %28, %33 : vector<80x64xf32>
    %c0_32 = arith.constant 0 : index
    %c20 = arith.constant 20 : index
    %c0_33 = arith.constant 0 : index
    %35 = vector.load %arg1[%c0_32, %c20, %c0_33] : memref<1x110x76xbf16, #tpu.memory_space<vmem>>, vector<1x80x76xbf16>
    %36 = vector.shape_cast %35 : vector<1x80x76xbf16> to vector<80x76xbf16>
    %c6 = arith.constant 6 : index
    %c0_34 = arith.constant 0 : index
    %c0_35 = arith.constant 0 : index
    %37 = vector.load %arg2[%c6, %c0_34, %c0_35] : memref<9x76x64xbf16, #tpu.memory_space<vmem>>, vector<1x76x64xbf16>
    %38 = vector.shape_cast %37 : vector<1x76x64xbf16> to vector<76x64xbf16>
    %cst_36 = arith.constant dense<0.000000e+00> : vector<80x64xf32>
    %39 = tpu.matmul %36, %38, %cst_36 {dimension_numbers = #tpu.dot_dimension_numbers<[1], [0], [0], [1], [0, 0, 1, 1], [], []>} : vector<80x76xbf16>, vector<76x64xbf16>, vector<80x64xf32> -> vector<80x64xf32>
    %40 = arith.addf %34, %39 : vector<80x64xf32>
    %c0_37 = arith.constant 0 : index
    %c21 = arith.constant 21 : index
    %c0_38 = arith.constant 0 : index
    %41 = vector.load %arg1[%c0_37, %c21, %c0_38] : memref<1x110x76xbf16, #tpu.memory_space<vmem>>, vector<1x80x76xbf16>
    %42 = vector.shape_cast %41 : vector<1x80x76xbf16> to vector<80x76xbf16>
    %c7 = arith.constant 7 : index
    %c0_39 = arith.constant 0 : index
    %c0_40 = arith.constant 0 : index
    %43 = vector.load %arg2[%c7, %c0_39, %c0_40] : memref<9x76x64xbf16, #tpu.memory_space<vmem>>, vector<1x76x64xbf16>
    %44 = vector.shape_cast %43 : vector<1x76x64xbf16> to vector<76x64xbf16>
    %cst_41 = arith.constant dense<0.000000e+00> : vector<80x64xf32>
    %45 = tpu.matmul %42, %44, %cst_41 {dimension_numbers = #tpu.dot_dimension_numbers<[1], [0], [0], [1], [0, 0, 1, 1], [], []>} : vector<80x76xbf16>, vector<76x64xbf16>, vector<80x64xf32> -> vector<80x64xf32>
    %46 = arith.addf %40, %45 : vector<80x64xf32>
    %c0_42 = arith.constant 0 : index
    %c22 = arith.constant 22 : index
    %c0_43 = arith.constant 0 : index
    %47 = vector.load %arg1[%c0_42, %c22, %c0_43] : memref<1x110x76xbf16, #tpu.memory_space<vmem>>, vector<1x80x76xbf16>
    %48 = vector.shape_cast %47 : vector<1x80x76xbf16> to vector<80x76xbf16>
    %c8 = arith.constant 8 : index
    %c0_44 = arith.constant 0 : index
    %c0_45 = arith.constant 0 : index
    %49 = vector.load %arg2[%c8, %c0_44, %c0_45] : memref<9x76x64xbf16, #tpu.memory_space<vmem>>, vector<1x76x64xbf16>
    %50 = vector.shape_cast %49 : vector<1x76x64xbf16> to vector<76x64xbf16>
    %cst_46 = arith.constant dense<0.000000e+00> : vector<80x64xf32>
    %51 = tpu.matmul %48, %50, %cst_46 {dimension_numbers = #tpu.dot_dimension_numbers<[1], [0], [0], [1], [0, 0, 1, 1], [], []>} : vector<80x76xbf16>, vector<76x64xbf16>, vector<80x64xf32> -> vector<80x64xf32>
    %52 = arith.addf %46, %51 : vector<80x64xf32>
    %c0_47 = arith.constant 0 : index
    %c0_48 = arith.constant 0 : index
    %53 = vector.load %arg3[%c0_47, %c0_48] : memref<1x64xf32, #tpu.memory_space<vmem>>, vector<1x64xf32>
    %54 = vector.broadcast %53 : vector<1x64xf32> to vector<80x64xf32>
    %55 = arith.mulf %52, %54 : vector<80x64xf32>
    %c0_49 = arith.constant 0 : index
    %c0_50 = arith.constant 0 : index
    %56 = vector.load %arg4[%c0_49, %c0_50] : memref<1x64xf32, #tpu.memory_space<vmem>>, vector<1x64xf32>
    %57 = vector.broadcast %56 : vector<1x64xf32> to vector<80x64xf32>
    %58 = arith.addf %55, %57 : vector<80x64xf32>
    %cst_51 = arith.constant 0.000000e+00 : f32
    %59 = vector.broadcast %cst_51 : f32 to vector<80x64xf32>
    %60 = arith.maximumf %58, %59 : vector<80x64xf32>
    %61 = arith.truncf %60 : vector<80x64xf32> to vector<80x64xbf16>
    %c0_52 = arith.constant 0 : index
    %c0_53 = arith.constant 0 : index
    %c0_54 = arith.constant 0 : index
    %62 = vector.load %arg5[%c0_52, %c0_53, %c0_54] : memref<1x80x64xbf16, #tpu.memory_space<vmem>>, vector<1x80x64xbf16>
    %63 = vector.shape_cast %62 : vector<1x80x64xbf16> to vector<80x64xbf16>
    %64 = vector.shape_cast %61 : vector<80x64xbf16> to vector<1x80x64xbf16>
    tpu.vector_store %arg5[%c0_52, %c0_53, %c0_54], %64 {strides = array<i32>} : memref<1x80x64xbf16, #tpu.memory_space<vmem>>, vector<1x80x64xbf16>,
    return
  }
  func.func @transform_0(%arg0: i32) -> (i32, i32, i32) {
    %c0_i32 = arith.constant 0 : i32
    %c0_i32_0 = arith.constant 0 : i32
    %c0_i32_1 = arith.constant 0 : i32
    return %arg0, %c0_i32, %c0_i32_0 : i32, i32, i32
  }
  func.func @transform_1(%arg0: i32) -> (i32, i32, i32) {
    %c0_i32 = arith.constant 0 : i32
    %c0_i32_0 = arith.constant 0 : i32
    %c0_i32_1 = arith.constant 0 : i32
    %c0_i32_2 = arith.constant 0 : i32
    return %c0_i32, %c0_i32_0, %c0_i32_1 : i32, i32, i32
  }
  func.func @transform_2(%arg0: i32) -> (i32, i32) {
    %c0_i32 = arith.constant 0 : i32
    %c0_i32_0 = arith.constant 0 : i32
    %c0_i32_1 = arith.constant 0 : i32
    return %c0_i32, %c0_i32_0 : i32, i32
  }
  func.func @transform_3(%arg0: i32) -> (i32, i32) {
    %c0_i32 = arith.constant 0 : i32
    %c0_i32_0 = arith.constant 0 : i32
    %c0_i32_1 = arith.constant 0 : i32
    return %c0_i32, %c0_i32_0 : i32, i32
  }
  func.func @transform_4(%arg0: i32) -> (i32, i32, i32) {
    %c0_i32 = arith.constant 0 : i32
    %c0_i32_0 = arith.constant 0 : i32
    %c0_i32_1 = arith.constant 0 : i32
    return %arg0, %c0_i32, %c0_i32_0 : i32, i32, i32
  }
}

module attributes {stable_mosaic.version = 11 : i64} {
  func.func @_conv3x3_kernel(%arg0: i32, %arg1: memref<1x110x64xbf16, #tpu.memory_space<vmem>>, %arg2: memref<9x64x7xbf16, #tpu.memory_space<vmem>>, %arg3: memref<1x7xf32, #tpu.memory_space<vmem>>, %arg4: memref<1x7xf32, #tpu.memory_space<vmem>>, %arg5: memref<1x80x7xf32, #tpu.memory_space<vmem>>) attributes {dimension_semantics = [#tpu.dimension_semantics<parallel>], iteration_bounds = array<i64: 2>, scalar_prefetch = 0 : i64, scratch_operands = 0 : i64, tpu.core_type = #tpu.core_type<tc>, window_params = [{transform_indices = @transform_0, window_bounds = array<i64: 1, 110, 64>}, {pipeline_mode = #tpu.pipeline_mode<synchronous>, transform_indices = @transform_1, window_bounds = array<i64: 9, 64, 7>}, {pipeline_mode = #tpu.pipeline_mode<synchronous>, transform_indices = @transform_2, window_bounds = array<i64: 1, 7>}, {pipeline_mode = #tpu.pipeline_mode<synchronous>, transform_indices = @transform_3, window_bounds = array<i64: 1, 7>}, {transform_indices = @transform_4, window_bounds = array<i64: 1, 80, 7>}]} {
    %c0 = arith.constant 0 : index
    %c0_0 = arith.constant 0 : index
    %c0_1 = arith.constant 0 : index
    %0 = vector.load %arg1[%c0, %c0_0, %c0_1] : memref<1x110x64xbf16, #tpu.memory_space<vmem>>, vector<1x80x64xbf16>
    %1 = vector.shape_cast %0 : vector<1x80x64xbf16> to vector<80x64xbf16>
    %c0_2 = arith.constant 0 : index
    %c0_3 = arith.constant 0 : index
    %c0_4 = arith.constant 0 : index
    %2 = vector.load %arg2[%c0_2, %c0_3, %c0_4] : memref<9x64x7xbf16, #tpu.memory_space<vmem>>, vector<1x64x7xbf16>
    %3 = vector.shape_cast %2 : vector<1x64x7xbf16> to vector<64x7xbf16>
    %cst = arith.constant dense<0.000000e+00> : vector<80x7xf32>
    %4 = tpu.matmul %1, %3, %cst {dimension_numbers = #tpu.dot_dimension_numbers<[1], [0], [0], [1], [0, 0, 1, 1], [], []>} : vector<80x64xbf16>, vector<64x7xbf16>, vector<80x7xf32> -> vector<80x7xf32>
    %c0_5 = arith.constant 0 : index
    %c1 = arith.constant 1 : index
    %c0_6 = arith.constant 0 : index
    %5 = vector.load %arg1[%c0_5, %c1, %c0_6] : memref<1x110x64xbf16, #tpu.memory_space<vmem>>, vector<1x80x64xbf16>
    %6 = vector.shape_cast %5 : vector<1x80x64xbf16> to vector<80x64xbf16>
    %c1_7 = arith.constant 1 : index
    %c0_8 = arith.constant 0 : index
    %c0_9 = arith.constant 0 : index
    %7 = vector.load %arg2[%c1_7, %c0_8, %c0_9] : memref<9x64x7xbf16, #tpu.memory_space<vmem>>, vector<1x64x7xbf16>
    %8 = vector.shape_cast %7 : vector<1x64x7xbf16> to vector<64x7xbf16>
    %cst_10 = arith.constant dense<0.000000e+00> : vector<80x7xf32>
    %9 = tpu.matmul %6, %8, %cst_10 {dimension_numbers = #tpu.dot_dimension_numbers<[1], [0], [0], [1], [0, 0, 1, 1], [], []>} : vector<80x64xbf16>, vector<64x7xbf16>, vector<80x7xf32> -> vector<80x7xf32>
    %10 = arith.addf %4, %9 : vector<80x7xf32>
    %c0_11 = arith.constant 0 : index
    %c2 = arith.constant 2 : index
    %c0_12 = arith.constant 0 : index
    %11 = vector.load %arg1[%c0_11, %c2, %c0_12] : memref<1x110x64xbf16, #tpu.memory_space<vmem>>, vector<1x80x64xbf16>
    %12 = vector.shape_cast %11 : vector<1x80x64xbf16> to vector<80x64xbf16>
    %c2_13 = arith.constant 2 : index
    %c0_14 = arith.constant 0 : index
    %c0_15 = arith.constant 0 : index
    %13 = vector.load %arg2[%c2_13, %c0_14, %c0_15] : memref<9x64x7xbf16, #tpu.memory_space<vmem>>, vector<1x64x7xbf16>
    %14 = vector.shape_cast %13 : vector<1x64x7xbf16> to vector<64x7xbf16>
    %cst_16 = arith.constant dense<0.000000e+00> : vector<80x7xf32>
    %15 = tpu.matmul %12, %14, %cst_16 {dimension_numbers = #tpu.dot_dimension_numbers<[1], [0], [0], [1], [0, 0, 1, 1], [], []>} : vector<80x64xbf16>, vector<64x7xbf16>, vector<80x7xf32> -> vector<80x7xf32>
    %16 = arith.addf %10, %15 : vector<80x7xf32>
    %c0_17 = arith.constant 0 : index
    %c10 = arith.constant 10 : index
    %c0_18 = arith.constant 0 : index
    %17 = vector.load %arg1[%c0_17, %c10, %c0_18] : memref<1x110x64xbf16, #tpu.memory_space<vmem>>, vector<1x80x64xbf16>
    %18 = vector.shape_cast %17 : vector<1x80x64xbf16> to vector<80x64xbf16>
    %c3 = arith.constant 3 : index
    %c0_19 = arith.constant 0 : index
    %c0_20 = arith.constant 0 : index
    %19 = vector.load %arg2[%c3, %c0_19, %c0_20] : memref<9x64x7xbf16, #tpu.memory_space<vmem>>, vector<1x64x7xbf16>
    %20 = vector.shape_cast %19 : vector<1x64x7xbf16> to vector<64x7xbf16>
    %cst_21 = arith.constant dense<0.000000e+00> : vector<80x7xf32>
    %21 = tpu.matmul %18, %20, %cst_21 {dimension_numbers = #tpu.dot_dimension_numbers<[1], [0], [0], [1], [0, 0, 1, 1], [], []>} : vector<80x64xbf16>, vector<64x7xbf16>, vector<80x7xf32> -> vector<80x7xf32>
    %22 = arith.addf %16, %21 : vector<80x7xf32>
    %c0_22 = arith.constant 0 : index
    %c11 = arith.constant 11 : index
    %c0_23 = arith.constant 0 : index
    %23 = vector.load %arg1[%c0_22, %c11, %c0_23] : memref<1x110x64xbf16, #tpu.memory_space<vmem>>, vector<1x80x64xbf16>
    %24 = vector.shape_cast %23 : vector<1x80x64xbf16> to vector<80x64xbf16>
    %c4 = arith.constant 4 : index
    %c0_24 = arith.constant 0 : index
    %c0_25 = arith.constant 0 : index
    %25 = vector.load %arg2[%c4, %c0_24, %c0_25] : memref<9x64x7xbf16, #tpu.memory_space<vmem>>, vector<1x64x7xbf16>
    %26 = vector.shape_cast %25 : vector<1x64x7xbf16> to vector<64x7xbf16>
    %cst_26 = arith.constant dense<0.000000e+00> : vector<80x7xf32>
    %27 = tpu.matmul %24, %26, %cst_26 {dimension_numbers = #tpu.dot_dimension_numbers<[1], [0], [0], [1], [0, 0, 1, 1], [], []>} : vector<80x64xbf16>, vector<64x7xbf16>, vector<80x7xf32> -> vector<80x7xf32>
    %28 = arith.addf %22, %27 : vector<80x7xf32>
    %c0_27 = arith.constant 0 : index
    %c12 = arith.constant 12 : index
    %c0_28 = arith.constant 0 : index
    %29 = vector.load %arg1[%c0_27, %c12, %c0_28] : memref<1x110x64xbf16, #tpu.memory_space<vmem>>, vector<1x80x64xbf16>
    %30 = vector.shape_cast %29 : vector<1x80x64xbf16> to vector<80x64xbf16>
    %c5 = arith.constant 5 : index
    %c0_29 = arith.constant 0 : index
    %c0_30 = arith.constant 0 : index
    %31 = vector.load %arg2[%c5, %c0_29, %c0_30] : memref<9x64x7xbf16, #tpu.memory_space<vmem>>, vector<1x64x7xbf16>
    %32 = vector.shape_cast %31 : vector<1x64x7xbf16> to vector<64x7xbf16>
    %cst_31 = arith.constant dense<0.000000e+00> : vector<80x7xf32>
    %33 = tpu.matmul %30, %32, %cst_31 {dimension_numbers = #tpu.dot_dimension_numbers<[1], [0], [0], [1], [0, 0, 1, 1], [], []>} : vector<80x64xbf16>, vector<64x7xbf16>, vector<80x7xf32> -> vector<80x7xf32>
    %34 = arith.addf %28, %33 : vector<80x7xf32>
    %c0_32 = arith.constant 0 : index
    %c20 = arith.constant 20 : index
    %c0_33 = arith.constant 0 : index
    %35 = vector.load %arg1[%c0_32, %c20, %c0_33] : memref<1x110x64xbf16, #tpu.memory_space<vmem>>, vector<1x80x64xbf16>
    %36 = vector.shape_cast %35 : vector<1x80x64xbf16> to vector<80x64xbf16>
    %c6 = arith.constant 6 : index
    %c0_34 = arith.constant 0 : index
    %c0_35 = arith.constant 0 : index
    %37 = vector.load %arg2[%c6, %c0_34, %c0_35] : memref<9x64x7xbf16, #tpu.memory_space<vmem>>, vector<1x64x7xbf16>
    %38 = vector.shape_cast %37 : vector<1x64x7xbf16> to vector<64x7xbf16>
    %cst_36 = arith.constant dense<0.000000e+00> : vector<80x7xf32>
    %39 = tpu.matmul %36, %38, %cst_36 {dimension_numbers = #tpu.dot_dimension_numbers<[1], [0], [0], [1], [0, 0, 1, 1], [], []>} : vector<80x64xbf16>, vector<64x7xbf16>, vector<80x7xf32> -> vector<80x7xf32>
    %40 = arith.addf %34, %39 : vector<80x7xf32>
    %c0_37 = arith.constant 0 : index
    %c21 = arith.constant 21 : index
    %c0_38 = arith.constant 0 : index
    %41 = vector.load %arg1[%c0_37, %c21, %c0_38] : memref<1x110x64xbf16, #tpu.memory_space<vmem>>, vector<1x80x64xbf16>
    %42 = vector.shape_cast %41 : vector<1x80x64xbf16> to vector<80x64xbf16>
    %c7 = arith.constant 7 : index
    %c0_39 = arith.constant 0 : index
    %c0_40 = arith.constant 0 : index
    %43 = vector.load %arg2[%c7, %c0_39, %c0_40] : memref<9x64x7xbf16, #tpu.memory_space<vmem>>, vector<1x64x7xbf16>
    %44 = vector.shape_cast %43 : vector<1x64x7xbf16> to vector<64x7xbf16>
    %cst_41 = arith.constant dense<0.000000e+00> : vector<80x7xf32>
    %45 = tpu.matmul %42, %44, %cst_41 {dimension_numbers = #tpu.dot_dimension_numbers<[1], [0], [0], [1], [0, 0, 1, 1], [], []>} : vector<80x64xbf16>, vector<64x7xbf16>, vector<80x7xf32> -> vector<80x7xf32>
    %46 = arith.addf %40, %45 : vector<80x7xf32>
    %c0_42 = arith.constant 0 : index
    %c22 = arith.constant 22 : index
    %c0_43 = arith.constant 0 : index
    %47 = vector.load %arg1[%c0_42, %c22, %c0_43] : memref<1x110x64xbf16, #tpu.memory_space<vmem>>, vector<1x80x64xbf16>
    %48 = vector.shape_cast %47 : vector<1x80x64xbf16> to vector<80x64xbf16>
    %c8 = arith.constant 8 : index
    %c0_44 = arith.constant 0 : index
    %c0_45 = arith.constant 0 : index
    %49 = vector.load %arg2[%c8, %c0_44, %c0_45] : memref<9x64x7xbf16, #tpu.memory_space<vmem>>, vector<1x64x7xbf16>
    %50 = vector.shape_cast %49 : vector<1x64x7xbf16> to vector<64x7xbf16>
    %cst_46 = arith.constant dense<0.000000e+00> : vector<80x7xf32>
    %51 = tpu.matmul %48, %50, %cst_46 {dimension_numbers = #tpu.dot_dimension_numbers<[1], [0], [0], [1], [0, 0, 1, 1], [], []>} : vector<80x64xbf16>, vector<64x7xbf16>, vector<80x7xf32> -> vector<80x7xf32>
    %52 = arith.addf %46, %51 : vector<80x7xf32>
    %c0_47 = arith.constant 0 : index
    %c0_48 = arith.constant 0 : index
    %53 = vector.load %arg3[%c0_47, %c0_48] : memref<1x7xf32, #tpu.memory_space<vmem>>, vector<1x7xf32>
    %54 = vector.broadcast %53 : vector<1x7xf32> to vector<80x7xf32>
    %55 = arith.mulf %52, %54 : vector<80x7xf32>
    %c0_49 = arith.constant 0 : index
    %c0_50 = arith.constant 0 : index
    %56 = vector.load %arg4[%c0_49, %c0_50] : memref<1x7xf32, #tpu.memory_space<vmem>>, vector<1x7xf32>
    %57 = vector.broadcast %56 : vector<1x7xf32> to vector<80x7xf32>
    %58 = arith.addf %55, %57 : vector<80x7xf32>
    %c0_51 = arith.constant 0 : index
    %c0_52 = arith.constant 0 : index
    %c0_53 = arith.constant 0 : index
    %59 = vector.load %arg5[%c0_51, %c0_52, %c0_53] : memref<1x80x7xf32, #tpu.memory_space<vmem>>, vector<1x80x7xf32>
    %60 = vector.shape_cast %59 : vector<1x80x7xf32> to vector<80x7xf32>
    %61 = vector.shape_cast %58 : vector<80x7xf32> to vector<1x80x7xf32>
    tpu.vector_store %arg5[%c0_51, %c0_52, %c0_53], %61 {strides = array<i32>} : memref<1x80x7xf32, #tpu.memory_space<vmem>>, vector<1x80x7xf32>,
    return
  }
  func.func @transform_0(%arg0: i32) -> (i32, i32, i32) {
    %c0_i32 = arith.constant 0 : i32
    %c0_i32_0 = arith.constant 0 : i32
    %c0_i32_1 = arith.constant 0 : i32
    return %arg0, %c0_i32, %c0_i32_0 : i32, i32, i32
  }
  func.func @transform_1(%arg0: i32) -> (i32, i32, i32) {
    %c0_i32 = arith.constant 0 : i32
    %c0_i32_0 = arith.constant 0 : i32
    %c0_i32_1 = arith.constant 0 : i32
    %c0_i32_2 = arith.constant 0 : i32
    return %c0_i32, %c0_i32_0, %c0_i32_1 : i32, i32, i32
  }
  func.func @transform_2(%arg0: i32) -> (i32, i32) {
    %c0_i32 = arith.constant 0 : i32
    %c0_i32_0 = arith.constant 0 : i32
    %c0_i32_1 = arith.constant 0 : i32
    return %c0_i32, %c0_i32_0 : i32, i32
  }
  func.func @transform_3(%arg0: i32) -> (i32, i32) {
    %c0_i32 = arith.constant 0 : i32
    %c0_i32_0 = arith.constant 0 : i32
    %c0_i32_1 = arith.constant 0 : i32
    return %c0_i32, %c0_i32_0 : i32, i32
  }
  func.func @transform_4(%arg0: i32) -> (i32, i32, i32) {
    %c0_i32 = arith.constant 0 : i32
    %c0_i32_0 = arith.constant 0 : i32
    %c0_i32_1 = arith.constant 0 : i32
    return %arg0, %c0_i32, %c0_i32_0 : i32, i32, i32
  }
}

</mosaic_0001>

<bundles_post_ra>
// kernel: garment_seg_forward.8
= control target key start
LH: loop header
LB: loop body
LE: loop exit
PB: predicated region body
PF: predicated region fallthrough
CT: control target
= control target key end

     0   :  { %s1103_s15 = smov 0   ;;  %s1307_s0 = inlined_call_operand.vmem [shape: bf16[512,27], index: 0, kind: input, shape index: {}]   ;;  %s1308_s1 = inlined_call_operand.vmem [shape: bf16[27,16], index: 1, kind: input, shape index: {}]   ;;  %s1309_s2 = inlined_call_operand.vmem [shape: f32[1,16], index: 2, kind: input, shape index: {}]   ;;  %s1310_s3 = inlined_call_operand.vmem [shape: f32[1,16], index: 3, kind: input, shape index: {}]   ;;  %s1311_s4 = inlined_call_operand.vmem [shape: bf16[512,16], index: 4, kind: output, shape index: {}]  }
   0x1 LB: > { %s873_s16 = sadd.s32 4294967295, %s1075_s15   ;;  %p877_p0 = scmp.ge.s32.totalorder %s1075_s15, 1  ;;  %s1075_s15 = sphi %s1103_s15, %s14_s15  }
   0x2   : > { %p163_p1 = scmp.lt.s32.totalorder %s1075_s15, 3 }
   0x4   : > { %p164_p2 = pnand %p877_p0, %p163_p1 }
   0x5   : > { %s878_s19 = sshll.u32 (!%p164_p2), %s873_s16, 5 }
   0x6   : > { %167 = sbr.rel (%p164_p2) target bundleno = 259 (0x103), region = 36  ;;  %p190_p3 = scmp.lt.s32.totalorder (!%p164_p2), %s878_s19, 63 }
   0xb   : > { %v1051_v0 = vld [vmem:[%s1308_s1 + $0x8] sm:$0x3f]   ;;  %vm378_vm0 = vcmask 1044480   ;;  %vm379_vm1 = vcmask 1045504   ;;  %v1077_v1 = vmov 65535   ;;  %v1052_v5 = vld [vmem:[%s1308_s1] sm:$0xff]  }
   0xc   : > { %v380_v2 = vsel %vm378_vm0, 4294967295, %v1077_v1  ;;  %s1313_s19 = smov (!%p190_p3, %s878_s19), 63  ;;  %vm329_vm2 = vcmask 220160   ;;  %v1162_v22 = vld [vmem:[%s1309_s2] ss:$0 sm:$0xff]  ;;  %vm784_vm3 = vcmask 125952  }
   0xd   : > { %v381_v3 = vsel %vm379_vm1, %v380_v2, 0  ;;  %s879_s22 = sshll.u32 %s1313_s19, 2  ;;  %v1167_v24 = vld [vmem:[%s1310_s3] ss:$0 sm:$0xff] }
   0xe   : > { %v383_v4 = vand.u32 %v1051_v0, %v381_v3  ;;  %s1125_s25 = scalar_lea.vmem %s1307_s0, %s879_s22  ;;  %s1182_s6 = scalar_lea.vmem %s1311_s4, %s879_s22 }
   0xf   : > { %v1053_v6 = vld [vmem:[%s1125_s25] sm:$0xff]   ;;  %v1055_v8 = vld [vmem:[%s1125_s25 + $0x8] sm:$0xff]   ;;  %v1057_v10 = vld [vmem:[%s1125_s25 + $0x10] sm:$0xff]  }
  0x10   : > { %1002 = vmatprep.subr.bf16.mxu0 %v383_v4  ;;  %1038 = vmatprep.subr.bf16.mxu1 %v383_v4  ;;  %v1054_v7 = vld [vmem:[%s1125_s25 + $0x40] sm:$0xff]   ;;  %v1056_v9 = vld [vmem:[%s1125_s25 + $0x48] sm:$0xff]   ;;  %v1058_v11 = vld [vmem:[%s1125_s25 + $0x50] sm:$0xff]  }
  0x11   : > { %1003 = vmatpush3.bf16.msra.mxu0 %v383_v4  ;;  %1040 = vmatpush3.bf16.msra.mxu1 %v383_v4  ;;  %v1059_v12 = vld [vmem:[%s1125_s25 + $0x18] sm:$0xff]   ;;  %v1061_v14 = vld [vmem:[%s1125_s25 + $0x20] sm:$0xff]   ;;  %v1063_v16 = vld [vmem:[%s1125_s25 + $0x28] sm:$0xff]  }
  0x12   : > { %1004 = vmatprep.subr.bf16.mxu0 %v1052_v5  ;;  %1039 = vmatprep.subr.bf16.mxu1 %v1052_v5  ;;  %v1060_v13 = vld [vmem:[%s1125_s25 + $0x58] sm:$0xff]   ;;  %v1062_v15 = vld [vmem:[%s1125_s25 + $0x60] sm:$0xff]   ;;  %v1064_v17 = vld [vmem:[%s1125_s25 + $0x68] sm:$0xff]  }
  0x13   : > { %1006 = vmatprep.mubr.msk.bf16.mxu0 %vm329_vm2, %v1053_v6  ;;  %1022 = vmatprep.mubr.msk.bf16.mxu1 %vm329_vm2, %v1054_v7  ;;  %v1065_v18 = vld [vmem:[%s1125_s25 + $0x30] sm:$0xff]   ;;  %v1067_v20 = vld [vmem:[%s1125_s25 + $0x38] sm:$0xff]  }
  0x14   : > { %v1066_v19 = vld [vmem:[%s1125_s25 + $0x70] sm:$0xff]   ;;  %v1068_v21 = vld [vmem:[%s1125_s25 + $0x78] sm:$0xff]  }
  0x15   : > { %1005 = vmatpush3.bf16.msra.mxu0 %v1052_v5  ;;  %1041 = vmatpush3.bf16.msra.mxu1 %v1052_v5 }
  0x18   : > { %1007 = vmatmul.mubr.msk.bf16.vlgmr.msra.gmra.mxu0 %vm329_vm2, %v1055_v8  ;;  %1023 = vmatmul.mubr.msk.bf16.vlgmr.msra.gmra.mxu1 %vm329_vm2, %v1056_v9 }
  0x19   : > { %1010 = vmatprep.mubr.msk.bf16.mxu0 %vm329_vm2, %v1057_v10  ;;  %1026 = vmatprep.mubr.msk.bf16.mxu1 %vm329_vm2, %v1058_v11 }
  0x20   : > { %1011 = vmatmul.mubr.msk.bf16.gmra.mxu0 %vm329_vm2, %v1059_v12  ;;  %1027 = vmatmul.mubr.msk.bf16.gmra.mxu1 %vm329_vm2, %v1060_v13 }
  0x21   : > { %1014 = vmatprep.mubr.msk.bf16.mxu0 %vm329_vm2, %v1061_v14  ;;  %1030 = vmatprep.mubr.msk.bf16.mxu1 %vm329_vm2, %v1062_v15 }
  0x28   : > { %1015 = vmatmul.mubr.msk.bf16.gmra.mxu0 %vm329_vm2, %v1063_v16  ;;  %1031 = vmatmul.mubr.msk.bf16.gmra.mxu1 %vm329_vm2, %v1064_v17 }
  0x29   : > { %1018 = vmatprep.mubr.msk.bf16.mxu0 %vm329_vm2, %v1065_v18  ;;  %1034 = vmatprep.mubr.msk.bf16.mxu1 %vm329_vm2, %v1066_v19 }
  0x30   : > { %1019 = vmatmul.mubr.msk.bf16.gmra.mxu0 %vm329_vm2, %v1067_v20  ;;  %1035 = vmatmul.mubr.msk.bf16.gmra.mxu1 %vm329_vm2, %v1068_v21 }
  0xd8   : > { %v1008_v23 = vpop.f32.mrf.mxu0  ;;  %v1024_v25 = vpop.f32.mrf.mxu1 }
  0xd9   : > { %v555_v26 = vmul.f32 %v1008_v23, %v1162_v22  ;;  %v571_v27 = vmul.f32 %v1024_v25, %v1162_v22 }
  0xda   : > { %v419_v28 = vpop.f32.mrf.mxu0  ;;  %v483_v29 = vpop.f32.mrf.mxu1 }
  0xdb   : > { %v594_v30 = vadd.f32 %v1167_v24, %v555_v26  ;;  %v610_v31 = vadd.f32 %v1167_v24, %v571_v27  ;;  %v553_v32 = vmul.f32 %v1162_v22, %v419_v28  ;;  %v569_v33 = vmul.f32 %v1162_v22, %v483_v29 }
  0xdc   : > { %v1009_v34 = vpop.f32.mrf.mxu0  ;;  %v1025_v35 = vpop.f32.mrf.mxu1 }
  0xdd   : > { %v626_v36 = vmax.f32 %v594_v30, 0.0  ;;  %v642_v37 = vmax.f32 %v610_v31, 0.0  ;;  %v592_v38 = vadd.f32 %v1167_v24, %v553_v32  ;;  %v608_v39 = vadd.f32 %v1167_v24, %v569_v33 }
  0xde   : > { %v556_v40 = vmul.f32 %v1009_v34, %v1162_v22  ;;  %v572_v41 = vmul.f32 %v1025_v35, %v1162_v22  ;;  %v422_v42 = vpop.f32.mrf.mxu0  ;;  %v486_v43 = vpop.f32.mrf.mxu1 }
  0xdf   : > { %v954_v44 = vpack.c.bf16 %v626_v36, %v626_v36  ;;  %v970_v45 = vpack.c.bf16 %v642_v37, %v642_v37  ;;  %v624_v46 = vmax.f32 %v592_v38, 0.0  ;;  %v640_v47 = vmax.f32 %v608_v39, 0.0 }
  0xe0   : > { %v595_v48 = vadd.f32 %v1167_v24, %v556_v40  ;;  %v611_v49 = vadd.f32 %v1167_v24, %v572_v41  ;;  %v554_v50 = vmul.f32 %v1162_v22, %v422_v42  ;;  %v570_v51 = vmul.f32 %v1162_v22, %v486_v43  ;;  %v1012_v52 = vpop.f32.mrf.mxu0  ;;  %v1028_v53 = vpop.f32.mrf.mxu1 }
  0xe1   : > { %787 = vst.msk [vmem:[%s1182_s6 + $0x8] sm:$0xf] %vm784_vm3, %v954_v44  ;;  %803 = vst.msk [vmem:[%s1182_s6 + $0x48] sm:$0xf] %vm784_vm3, %v970_v45  ;;  %v952_v54 = vpack.c.bf16 %v624_v46, %v624_v46  ;;  %v968_v55 = vpack.c.bf16 %v640_v47, %v640_v47  ;;  %v559_v56 = vmul.f32 %v1012_v52, %v1162_v22 }
  0xe2   : > { %v575_v57 = vmul.f32 %v1028_v53, %v1162_v22  ;;  %v627_v58 = vmax.f32 %v595_v48, 0.0  ;;  %v643_v59 = vmax.f32 %v611_v49, 0.0  ;;  %v593_v60 = vadd.f32 %v1167_v24, %v554_v50  ;;  %v435_v62 = vpop.f32.mrf.mxu0  ;;  %v499_v63 = vpop.f32.mrf.mxu1 }
  0xe3   : > { %v609_v61 = vadd.f32 %v1167_v24, %v570_v51  ;;  %785 = vst.msk [vmem:[%s1182_s6] sm:$0xf] %vm784_vm3, %v952_v54  ;;  %801 = vst.msk [vmem:[%s1182_s6 + $0x40] sm:$0xf] %vm784_vm3, %v968_v55  ;;  %v598_v0 = vadd.f32 %v1167_v24, %v559_v56  ;;  %v557_v2 = vmul.f32 %v1162_v22, %v435_v62 }
  0xe4   : > { %v614_v1 = vadd.f32 %v1167_v24, %v575_v57  ;;  %v573_v3 = vmul.f32 %v1162_v22, %v499_v63  ;;  %v955_v4 = vpack.c.bf16 %v627_v58, %v627_v58  ;;  %v971_v5 = vpack.c.bf16 %v643_v59, %v643_v59  ;;  %v1013_v8 = vpop.f32.mrf.mxu0  ;;  %v1029_v9 = vpop.f32.mrf.mxu1 }
  0xe5   : > { %v625_v6 = vmax.f32 %v593_v60, 0.0  ;;  %v641_v7 = vmax.f32 %v609_v61, 0.0  ;;  %v630_v10 = vmax.f32 %v598_v0, 0.0  ;;  %v596_v12 = vadd.f32 %v1167_v24, %v557_v2 }
  0xe6   : > { %v646_v11 = vmax.f32 %v614_v1, 0.0  ;;  %v612_v13 = vadd.f32 %v1167_v24, %v573_v3  ;;  %788 = vst.msk [vmem:[%s1182_s6 + $0xc] sm:$0xf] %vm784_vm3, %v955_v4  ;;  %804 = vst.msk [vmem:[%s1182_s6 + $0x4c] sm:$0xf] %vm784_vm3, %v971_v5  ;;  %v560_v16 = vmul.f32 %v1013_v8, %v1162_v22  ;;  %v576_v17 = vmul.f32 %v1029_v9, %v1162_v22  ;;  %v438_v18 = vpop.f32.mrf.mxu0  ;;  %v502_v19 = vpop.f32.mrf.mxu1 }
  0xe7   : > { %v953_v14 = vpack.c.bf16 %v625_v6, %v625_v6  ;;  %v969_v15 = vpack.c.bf16 %v641_v7, %v641_v7  ;;  %v958_v20 = vpack.c.bf16 %v630_v10, %v630_v10  ;;  %v628_v23 = vmax.f32 %v596_v12, 0.0 }
  0xe8   : > { %v974_v21 = vpack.c.bf16 %v646_v11, %v646_v11  ;;  %v644_v25 = vmax.f32 %v612_v13, 0.0  ;;  %v599_v26 = vadd.f32 %v1167_v24, %v560_v16  ;;  %v615_v27 = vadd.f32 %v1167_v24, %v576_v17  ;;  %v1016_v30 = vpop.f32.mrf.mxu0  ;;  %v1032_v31 = vpop.f32.mrf.mxu1 }
  0xe9   : > { %786 = vst.msk [vmem:[%s1182_s6 + $0x4] sm:$0xf] %vm784_vm3, %v953_v14  ;;  %802 = vst.msk [vmem:[%s1182_s6 + $0x44] sm:$0xf] %vm784_vm3, %v969_v15  ;;  %v558_v28 = vmul.f32 %v1162_v22, %v438_v18  ;;  %v574_v29 = vmul.f32 %v1162_v22, %v502_v19  ;;  %v956_v32 = vpack.c.bf16 %v628_v23, %v628_v23 }
  0xea   : > { %791 = vst.msk [vmem:[%s1182_s6 + $0x18] sm:$0xf] %vm784_vm3, %v958_v20  ;;  %807 = vst.msk [vmem:[%s1182_s6 + $0x58] sm:$0xf] %vm784_vm3, %v974_v21  ;;  %v972_v33 = vpack.c.bf16 %v644_v25, %v644_v25  ;;  %v563_v34 = vmul.f32 %v1016_v30, %v1162_v22  ;;  %v579_v35 = vmul.f32 %v1032_v31, %v1162_v22  ;;  %v631_v36 = vmax.f32 %v599_v26, 0.0  ;;  %v451_v40 = vpop.f32.mrf.mxu0  ;;  %v515_v41 = vpop.f32.mrf.mxu1 }
  0xeb   : > { %v647_v37 = vmax.f32 %v615_v27, 0.0  ;;  %v597_v38 = vadd.f32 %v1167_v24, %v558_v28  ;;  %v613_v39 = vadd.f32 %v1167_v24, %v574_v29  ;;  %789 = vst.msk [vmem:[%s1182_s6 + $0x10] sm:$0xf] %vm784_vm3, %v956_v32  ;;  %v561_v44 = vmul.f32 %v1162_v22, %v451_v40 }
  0xec   : > { %805 = vst.msk [vmem:[%s1182_s6 + $0x50] sm:$0xf] %vm784_vm3, %v972_v33  ;;  %v602_v42 = vadd.f32 %v1167_v24, %v563_v34  ;;  %v618_v43 = vadd.f32 %v1167_v24, %v579_v35  ;;  %v577_v45 = vmul.f32 %v1162_v22, %v515_v41  ;;  %v959_v46 = vpack.c.bf16 %v631_v36, %v631_v36  ;;  %v1017_v50 = vpop.f32.mrf.mxu0  ;;  %v1033_v51 = vpop.f32.mrf.mxu1 }
  0xed   : > { %v975_v47 = vpack.c.bf16 %v647_v37, %v647_v37  ;;  %v629_v48 = vmax.f32 %v597_v38, 0.0  ;;  %v645_v49 = vmax.f32 %v613_v39, 0.0  ;;  %v600_v54 = vadd.f32 %v1167_v24, %v561_v44 }
  0xee   : > { %v634_v52 = vmax.f32 %v602_v42, 0.0  ;;  %v650_v53 = vmax.f32 %v618_v43, 0.0  ;;  %v616_v55 = vadd.f32 %v1167_v24, %v577_v45  ;;  %792 = vst.msk [vmem:[%s1182_s6 + $0x1c] sm:$0xf] %vm784_vm3, %v959_v46  ;;  %v564_v58 = vmul.f32 %v1017_v50, %v1162_v22  ;;  %v454_v60 = vpop.f32.mrf.mxu0  ;;  %v518_v61 = vpop.f32.mrf.mxu1 }
  0xef   : > { %808 = vst.msk [vmem:[%s1182_s6 + $0x5c] sm:$0xf] %vm784_vm3, %v975_v47  ;;  %v957_v56 = vpack.c.bf16 %v629_v48, %v629_v48  ;;  %v973_v57 = vpack.c.bf16 %v645_v49, %v645_v49  ;;  %v580_v59 = vmul.f32 %v1033_v51, %v1162_v22  ;;  %v632_v0 = vmax.f32 %v600_v54, 0.0 }
  0xf0   : > { %v962_v62 = vpack.c.bf16 %v634_v52, %v634_v52  ;;  %v978_v63 = vpack.c.bf16 %v650_v53, %v650_v53  ;;  %v648_v1 = vmax.f32 %v616_v55, 0.0  ;;  %v603_v2 = vadd.f32 %v1167_v24, %v564_v58  ;;  %v1020_v6 = vpop.f32.mrf.mxu0  ;;  %v1036_v7 = vpop.f32.mrf.mxu1 }
  0xf1   : > { %790 = vst.msk [vmem:[%s1182_s6 + $0x14] sm:$0xf] %vm784_vm3, %v957_v56  ;;  %806 = vst.msk [vmem:[%s1182_s6 + $0x54] sm:$0xf] %vm784_vm3, %v973_v57  ;;  %v619_v3 = vadd.f32 %v1167_v24, %v580_v59  ;;  %v562_v4 = vmul.f32 %v1162_v22, %v454_v60  ;;  %v578_v5 = vmul.f32 %v1162_v22, %v518_v61 }
  0xf2   : > { %795 = vst.msk [vmem:[%s1182_s6 + $0x28] sm:$0xf] %vm784_vm3, %v962_v62  ;;  %811 = vst.msk [vmem:[%s1182_s6 + $0x68] sm:$0xf] %vm784_vm3, %v978_v63  ;;  %v960_v8 = vpack.c.bf16 %v632_v0, %v632_v0  ;;  %v976_v9 = vpack.c.bf16 %v648_v1, %v648_v1  ;;  %v567_v10 = vmul.f32 %v1020_v6, %v1162_v22  ;;  %v635_v12 = vmax.f32 %v603_v2, 0.0  ;;  %v467_v16 = vpop.f32.mrf.mxu0  ;;  %v531_v17 = vpop.f32.mrf.mxu1 }
  0xf3   : > { %v583_v11 = vmul.f32 %v1036_v7, %v1162_v22  ;;  %v651_v13 = vmax.f32 %v619_v3, 0.0  ;;  %v601_v14 = vadd.f32 %v1167_v24, %v562_v4  ;;  %v617_v15 = vadd.f32 %v1167_v24, %v578_v5 }
  0xf4   : > { %793 = vst.msk [vmem:[%s1182_s6 + $0x20] sm:$0xf] %vm784_vm3, %v960_v8  ;;  %809 = vst.msk [vmem:[%s1182_s6 + $0x60] sm:$0xf] %vm784_vm3, %v976_v9  ;;  %v606_v18 = vadd.f32 %v1167_v24, %v567_v10  ;;  %v565_v20 = vmul.f32 %v1162_v22, %v467_v16  ;;  %v581_v21 = vmul.f32 %v1162_v22, %v531_v17  ;;  %v1021_v28 = vpop.f32.mrf.mxu0  ;;  %v1037_v29 = vpop.f32.mrf.mxu1 }
  0xf5   : > { %v622_v19 = vadd.f32 %v1167_v24, %v583_v11  ;;  %v963_v23 = vpack.c.bf16 %v635_v12, %v635_v12  ;;  %v979_v25 = vpack.c.bf16 %v651_v13, %v651_v13  ;;  %v633_v26 = vmax.f32 %v601_v14, 0.0 }
  0xf6   : > { %v649_v27 = vmax.f32 %v617_v15, 0.0  ;;  %v638_v30 = vmax.f32 %v606_v18, 0.0  ;;  %v604_v32 = vadd.f32 %v1167_v24, %v565_v20  ;;  %v620_v33 = vadd.f32 %v1167_v24, %v581_v21  ;;  %v470_v38 = vpop.f32.mrf.mxu0  ;;  %v534_v39 = vpop.f32.mrf.mxu1 }
  0xf7   : > { %v654_v31 = vmax.f32 %v622_v19, 0.0  ;;  %796 = vst.msk [vmem:[%s1182_s6 + $0x2c] sm:$0xf] %vm784_vm3, %v963_v23  ;;  %812 = vst.msk [vmem:[%s1182_s6 + $0x6c] sm:$0xf] %vm784_vm3, %v979_v25  ;;  %v961_v34 = vpack.c.bf16 %v633_v26, %v633_v26  ;;  %v568_v36 = vmul.f32 %v1021_v28, %v1162_v22  ;;  %v584_v37 = vmul.f32 %v1037_v29, %v1162_v22 }
  0xf8   : > { %v977_v35 = vpack.c.bf16 %v649_v27, %v649_v27  ;;  %v966_v40 = vpack.c.bf16 %v638_v30, %v638_v30  ;;  %v636_v42 = vmax.f32 %v604_v32, 0.0  ;;  %v652_v43 = vmax.f32 %v620_v33, 0.0 }
  0xf9   : > { %v982_v41 = vpack.c.bf16 %v654_v31, %v654_v31  ;;  %794 = vst.msk [vmem:[%s1182_s6 + $0x24] sm:$0xf] %vm784_vm3, %v961_v34  ;;  %v607_v44 = vadd.f32 %v1167_v24, %v568_v36  ;;  %v623_v45 = vadd.f32 %v1167_v24, %v584_v37  ;;  %v566_v46 = vmul.f32 %v1162_v22, %v470_v38 }
  0xfa   : > { %810 = vst.msk [vmem:[%s1182_s6 + $0x64] sm:$0xf] %vm784_vm3, %v977_v35  ;;  %v582_v47 = vmul.f32 %v1162_v22, %v534_v39  ;;  %799 = vst.msk [vmem:[%s1182_s6 + $0x38] sm:$0xf] %vm784_vm3, %v966_v40  ;;  %v964_v48 = vpack.c.bf16 %v636_v42, %v636_v42  ;;  %v980_v49 = vpack.c.bf16 %v652_v43, %v652_v43 }
  0xfb   : > { %815 = vst.msk [vmem:[%s1182_s6 + $0x78] sm:$0xf] %vm784_vm3, %v982_v41  ;;  %v639_v50 = vmax.f32 %v607_v44, 0.0  ;;  %v655_v51 = vmax.f32 %v623_v45, 0.0  ;;  %v605_v52 = vadd.f32 %v1167_v24, %v566_v46 }
  0xfc   : > { %v621_v53 = vadd.f32 %v1167_v24, %v582_v47  ;;  %797 = vst.msk [vmem:[%s1182_s6 + $0x30] sm:$0xf] %vm784_vm3, %v964_v48  ;;  %813 = vst.msk [vmem:[%s1182_s6 + $0x70] sm:$0xf] %vm784_vm3, %v980_v49 }
  0xfd   : > { %v967_v22 = vpack.c.bf16 %v639_v50, %v639_v50  ;;  %v983_v54 = vpack.c.bf16 %v655_v51, %v655_v51  ;;  %v637_v55 = vmax.f32 %v605_v52, 0.0 }
  0xfe   : > { %v653_v56 = vmax.f32 %v621_v53, 0.0 }
  0xff   : > { %800 = vst.msk [vmem:[%s1182_s6 + $0x3c] sm:$0xf] %vm784_vm3, %v967_v22  ;;  %816 = vst.msk [vmem:[%s1182_s6 + $0x7c] sm:$0xf] %vm784_vm3, %v983_v54  ;;  %v965_v57 = vpack.c.bf16 %v637_v55, %v637_v55 }
 0x100   : > { %v981_v58 = vpack.c.bf16 %v653_v56, %v653_v56 }
 0x101   : > { %798 = vst.msk [vmem:[%s1182_s6 + $0x34] sm:$0xf] %vm784_vm3, %v965_v57 }
 0x102   : > { %814 = vst.msk [vmem:[%s1182_s6 + $0x74] sm:$0xf] %vm784_vm3, %v981_v58 }
 0x103 PF: > { %s14_s15 = sadd.s32 1, %s1075_s15  }
 0x104   : > { %p11_p4 = scmp.ge.s32.totalorder %s14_s15, 4  }
 0x106   :  { %13 = sbr.rel (!%p11_p4) target bundleno = 1 (0x1), region = 66 }

// kernel: garment_seg_forward.9
= control target key start
LH: loop header
LB: loop body
LE: loop exit
PB: predicated region body
PF: predicated region fallthrough
CT: control target
= control target key end

     0   :  { %s668_s15 = smov 0   ;;  %s754_s0 = inlined_call_operand.vmem [shape: bf16[128,144], index: 0, kind: input, shape index: {}]   ;;  %s755_s1 = inlined_call_operand.vmem [shape: bf16[144,24], index: 1, kind: input, shape index: {}]   ;;  %s756_s2 = inlined_call_operand.vmem [shape: f32[1,24], index: 2, kind: input, shape index: {}]   ;;  %s757_s3 = inlined_call_operand.vmem [shape: f32[1,24], index: 3, kind: input, shape index: {}]   ;;  %s758_s4 = inlined_call_operand.vmem [shape: bf16[128,24], index: 4, kind: output, shape index: {}]  }
   0x1 LB: > { %s534_s16 = sadd.s32 4294967295, %s640_s15   ;;  %p538_p0 = scmp.ge.s32.totalorder %s640_s15, 1  ;;  %s640_s15 = sphi %s668_s15, %s14_s15  }
   0x2   : > { %p164_p1 = scmp.lt.s32.totalorder %s640_s15, 3 }
   0x4   : > { %p165_p2 = pnand %p538_p0, %p164_p1 }
   0x5   : > { %s539_s19 = sshll.u32 (!%p165_p2), %s534_s16, 3 }
   0x6   : > { %168 = sbr.rel (%p165_p2) target bundleno = 262 (0x106), region = 36  ;;  %p192_p3 = scmp.lt.s32.totalorder (!%p165_p2), %s539_s19, 15 }
   0xb   : > { %v613_v0 = vld [vmem:[%s755_s1 + $0x38] sm:$0xff]   ;;  %v642_v1 = vmov 0   ;;  %v614_v2 = vld [vmem:[%s755_s1 + $0x30] sm:$0xff]   ;;  %s760_s19 = smov (!%p192_p3, %s539_s19), 15  ;;  %v615_v3 = vld [vmem:[%s755_s1 + $0x28] sm:$0xff]   ;;  %vm321_vm0 = vcmask 130048  }
   0xc   : > { %334 = vmatprep.subr.bf16.mxu0 %v642_v1  ;;  %586 = vmatprep.subr.bf16.mxu1 %v642_v1  ;;  %s577_s24 = sshll.u32 %s760_s19, 3  ;;  %v616_v4 = vld [vmem:[%s755_s1 + $0x20] sm:$0xff]   ;;  %v617_v7 = vld [vmem:[%s755_s1 + $0x18] sm:$0xff]   ;;  %v618_v8 = vld [vmem:[%s755_s1 + $0x10] sm:$0xff]   ;;  %s543_s20 = sshll.u32 %s760_s19, 2  ;;  %vm469_vm1 = vcmask 191488  }
   0xd   : > { %335 = vmatpush1.bf16.msra.mxu0 %v613_v0  ;;  %595 = vmatpush1.bf16.msra.mxu1 %v613_v0  ;;  %s691_s27 = scalar_lea.vmem %s754_s0, %s577_s24  ;;  %v619_v9 = vld [vmem:[%s755_s1 + $0x8] sm:$0xff]   ;;  %v620_v10 = vld [vmem:[%s755_s1] sm:$0xff]   ;;  %s733_s23 = scalar_lea.vmem %s758_s4, %s543_s20 }
   0xe   : > { %336 = vmatprep.subr.bf16.mxu0 %v642_v1  ;;  %587 = vmatprep.subr.bf16.mxu1 %v642_v1  ;;  %v624_v5 = vld [vmem:[%s691_s27 + $0x4] ss:$8 sps:$4 sm:$0xff]   ;;  %v622_v12 = vld [vmem:[%s691_s27] ss:$8 sps:$4 sm:$0xff]   ;;  %v628_v14 = vld [vmem:[%s691_s27 + $0x14] ss:$8 sps:$4 sm:$0xff]  }
   0xf   : > { %v627_v6 = vld [vmem:[%s691_s27 + $0x24] ss:$8 sps:$4 sm:$0xff]   ;;  %561 = vmatprep.mubr.msk.bf16.mxu0 %vm321_vm0, %v624_v5  ;;  %v625_v13 = vld [vmem:[%s691_s27 + $0x20] ss:$8 sps:$4 sm:$0xff]   ;;  %v630_v15 = vld [vmem:[%s691_s27 + $0x34] ss:$8 sps:$4 sm:$0xff]  }
  0x10   : > { %563 = vmatprep.mubr.msk.bf16.mxu1 %vm321_vm0, %v627_v6  ;;  %v621_v11 = vld [vmem:[%s755_s1 + $0x40] sm:$0xff]   ;;  %v632_v16 = vld [vmem:[%s691_s27 + $0x10] ss:$8 sps:$4 sm:$0xff]  }
  0x11   : > { %337 = vmatpush1.bf16.msra.mxu0 %v614_v2  ;;  %596 = vmatpush1.bf16.msra.mxu1 %v614_v2  ;;  %v633_v17 = vld [vmem:[%s691_s27 + $0x30] ss:$8 sps:$4 sm:$0xff]   ;;  %v565_v18 = vld [vmem:[%s756_s2] ss:$0 sm:$0xff] }
  0x12   : > { %338 = vmatprep.subr.bf16.mxu0 %v642_v1  ;;  %588 = vmatprep.subr.bf16.mxu1 %v642_v1  ;;  %v566_v20 = vld [vmem:[%s757_s3] ss:$0 sm:$0xff] }
  0x15   : > { %339 = vmatpush1.bf16.msra.mxu0 %v615_v3  ;;  %597 = vmatpush1.bf16.msra.mxu1 %v615_v3 }
  0x16   : > { %340 = vmatprep.subr.bf16.mxu0 %v642_v1  ;;  %589 = vmatprep.subr.bf16.mxu1 %v642_v1 }
  0x19   : > { %341 = vmatpush1.bf16.msra.mxu0 %v616_v4  ;;  %598 = vmatpush1.bf16.msra.mxu1 %v616_v4 }
  0x1a   : > { %342 = vmatprep.subr.bf16.mxu0 %v642_v1  ;;  %590 = vmatprep.subr.bf16.mxu1 %v642_v1 }
  0x1d   : > { %343 = vmatpush1.bf16.msra.mxu0 %v617_v7  ;;  %599 = vmatpush1.bf16.msra.mxu1 %v617_v7 }
  0x1e   : > { %344 = vmatprep.subr.bf16.mxu0 %v642_v1  ;;  %591 = vmatprep.subr.bf16.mxu1 %v642_v1 }
  0x21   : > { %345 = vmatpush1.bf16.msra.mxu0 %v618_v8  ;;  %600 = vmatpush1.bf16.msra.mxu1 %v618_v8 }
  0x22   : > { %346 = vmatprep.subr.bf16.mxu0 %v642_v1  ;;  %592 = vmatprep.subr.bf16.mxu1 %v642_v1 }
  0x25   : > { %347 = vmatpush1.bf16.msra.mxu0 %v619_v9  ;;  %601 = vmatpush1.bf16.msra.mxu1 %v619_v9 }
  0x26   : > { %348 = vmatprep.subr.bf16.mxu0 %v642_v1  ;;  %593 = vmatprep.subr.bf16.mxu1 %v642_v1 }
  0x29   : > { %349 = vmatpush1.bf16.msra.mxu0 %v620_v10  ;;  %602 = vmatpush1.bf16.msra.mxu1 %v620_v10 }
  0x2a   : > { %364 = vmatprep.subr.bf16.mxu0 %v642_v1  ;;  %594 = vmatprep.subr.bf16.mxu1 %v642_v1 }
  0x2d   : > { %365 = vmatpush2.bf16.msra.mxu0 %v621_v11  ;;  %603 = vmatpush2.bf16.msra.mxu1 %v621_v11 }
  0x30   : > { %367 = vmatmul.mubr.bf16.vlgmr.msra.gmra.mxu0 %v622_v12  ;;  %383 = vmatmul.mubr.bf16.vlgmr.msra.gmra.mxu1 %v625_v13 }
  0x31   : > { %562 = vmatprep.mubr.msk.bf16.mxu0 %vm321_vm0, %v628_v14  ;;  %564 = vmatprep.mubr.msk.bf16.mxu1 %vm321_vm0, %v630_v15 }
  0x38   : > { %375 = vmatmul.mubr.bf16.gmra.mxu0 %v632_v16  ;;  %391 = vmatmul.mubr.bf16.gmra.mxu1 %v633_v17 }
  0xf0   : > { %v368_v19 = vpop.f32.mrf.mxu0  ;;  %v384_v21 = vpop.f32.mrf.mxu1 }
  0xf1   : > { %v406_v22 = vmul.f32 %v565_v18, %v368_v19  ;;  %v410_v23 = vmul.f32 %v565_v18, %v384_v21 }
  0xf2   : > { %v370_v24 = vpop.f32.mrf.mxu0  ;;  %v386_v25 = vpop.f32.mrf.mxu1 }
  0xf3   : > { %v421_v26 = vadd.f32 %v566_v20, %v406_v22  ;;  %v425_v27 = vadd.f32 %v566_v20, %v410_v23 }
  0xf4   : > { %v371_v28 = vpop.f32.mrf.mxu0  ;;  %v387_v29 = vpop.f32.mrf.mxu1 }
  0xf5   : > { %v429_v30 = vmax.f32 %v421_v26, 0.0  ;;  %v433_v31 = vmax.f32 %v425_v27, 0.0  ;;  %v407_v32 = vmul.f32 %v565_v18, %v371_v28  ;;  %v411_v33 = vmul.f32 %v565_v18, %v387_v29 }
  0xf6   : > { %v373_v34 = vpop.f32.mrf.mxu0  ;;  %v389_v35 = vpop.f32.mrf.mxu1 }
  0xf7   : > { %v578_v36 = vpack.c.bf16 %v429_v30, %v429_v30  ;;  %v582_v37 = vpack.c.bf16 %v433_v31, %v433_v31  ;;  %v422_v38 = vadd.f32 %v566_v20, %v407_v32  ;;  %v426_v39 = vadd.f32 %v566_v20, %v411_v33 }
  0xf8   : > { %v376_v40 = vpop.f32.mrf.mxu0  ;;  %v392_v41 = vpop.f32.mrf.mxu1 }
  0xf9   : > { %470 = vst.msk [vmem:[%s733_s23] sm:$0xf] %vm469_vm1, %v578_v36  ;;  %474 = vst.msk [vmem:[%s733_s23 + $0x10] sm:$0xf] %vm469_vm1, %v582_v37  ;;  %v430_v42 = vmax.f32 %v422_v38, 0.0  ;;  %v434_v43 = vmax.f32 %v426_v39, 0.0  ;;  %v408_v44 = vmul.f32 %v565_v18, %v376_v40  ;;  %v412_v45 = vmul.f32 %v565_v18, %v392_v41 }
  0xfa   : > { %v378_v46 = vpop.f32.mrf.mxu0  ;;  %v394_v47 = vpop.f32.mrf.mxu1 }
  0xfb   : > { %v579_v48 = vpack.c.bf16 %v430_v42, %v430_v42  ;;  %v583_v49 = vpack.c.bf16 %v434_v43, %v434_v43  ;;  %v423_v50 = vadd.f32 %v566_v20, %v408_v44  ;;  %v427_v51 = vadd.f32 %v566_v20, %v412_v45 }
  0xfc   : > { %v379_v52 = vpop.f32.mrf.mxu0  ;;  %v395_v53 = vpop.f32.mrf.mxu1 }
  0xfd   : > { %471 = vst.msk [vmem:[%s733_s23 + $0x4] sm:$0xf] %vm469_vm1, %v579_v48  ;;  %475 = vst.msk [vmem:[%s733_s23 + $0x14] sm:$0xf] %vm469_vm1, %v583_v49  ;;  %v431_v54 = vmax.f32 %v423_v50, 0.0  ;;  %v435_v55 = vmax.f32 %v427_v51, 0.0  ;;  %v409_v56 = vmul.f32 %v565_v18, %v379_v52  ;;  %v413_v57 = vmul.f32 %v565_v18, %v395_v53 }
  0xfe   : > { %v381_v58 = vpop.f32.mrf.mxu0  ;;  %v397_v59 = vpop.f32.mrf.mxu1 }
  0xff   : > { %v580_v60 = vpack.c.bf16 %v431_v54, %v431_v54  ;;  %v584_v61 = vpack.c.bf16 %v435_v55, %v435_v55  ;;  %v424_v62 = vadd.f32 %v566_v20, %v409_v56  ;;  %v428_v63 = vadd.f32 %v566_v20, %v413_v57 }
 0x101   : > { %472 = vst.msk [vmem:[%s733_s23 + $0x8] sm:$0xf] %vm469_vm1, %v580_v60  ;;  %476 = vst.msk [vmem:[%s733_s23 + $0x18] sm:$0xf] %vm469_vm1, %v584_v61  ;;  %v432_v0 = vmax.f32 %v424_v62, 0.0  ;;  %v436_v1 = vmax.f32 %v428_v63, 0.0 }
 0x103   : > { %v581_v2 = vpack.c.bf16 %v432_v0, %v432_v0  ;;  %v585_v3 = vpack.c.bf16 %v436_v1, %v436_v1 }
 0x105   : > { %473 = vst.msk [vmem:[%s733_s23 + $0xc] sm:$0xf] %vm469_vm1, %v581_v2  ;;  %477 = vst.msk [vmem:[%s733_s23 + $0x1c] sm:$0xf] %vm469_vm1, %v585_v3 }
 0x106 PF: > { %s14_s15 = sadd.s32 1, %s640_s15  }
 0x107   : > { %p11_p4 = scmp.ge.s32.totalorder %s14_s15, 4  }
 0x109   :  { %13 = sbr.rel (!%p11_p4) target bundleno = 1 (0x1), region = 66 }

// kernel: garment_seg_forward.10
= control target key start
LH: loop header
LB: loop body
LE: loop exit
PB: predicated region body
PF: predicated region fallthrough
CT: control target
= control target key end

     0   :  { %s556_s15 = smov 0   ;;  %s629_s0 = inlined_call_operand.vmem [shape: bf16[32,216], index: 0, kind: input, shape index: {}]   ;;  %s630_s1 = inlined_call_operand.vmem [shape: bf16[216,48], index: 1, kind: input, shape index: {}]   ;;  %s631_s2 = inlined_call_operand.vmem [shape: f32[1,48], index: 2, kind: input, shape index: {}]   ;;  %s632_s3 = inlined_call_operand.vmem [shape: f32[1,48], index: 3, kind: input, shape index: {}]   ;;  %s633_s4 = inlined_call_operand.vmem [shape: bf16[32,48], index: 4, kind: output, shape index: {}]  }
   0x1 LB: > { %s460_s16 = sadd.s32 4294967295, %s528_s15   ;;  %p464_p0 = scmp.ge.s32.totalorder %s528_s15, 1  ;;  %s528_s15 = sphi %s556_s15, %s14_s15  }
   0x2   : > { %p164_p1 = scmp.lt.s32.totalorder %s528_s15, 3 }
   0x4   : > { %p165_p2 = pnand %p464_p0, %p164_p1 }
   0x5   : > { %s465_s21 = sshll.u32 (!%p165_p2), %s460_s16, 1 }
   0x6   : > { %168 = sbr.rel (%p165_p2) target bundleno = 274 (0x112), region = 36  ;;  %p192_p3 = scmp.lt.s32.totalorder (!%p165_p2), %s465_s21, 3 }
   0xb   : > { %v505_v0 = vld [vmem:[%s630_s1 + $0x38] sm:$0xff]   ;;  %v530_v1 = vmov 0   ;;  %v506_v2 = vld [vmem:[%s630_s1 + $0x30] sm:$0xff]   ;;  %s635_s21 = smov (!%p192_p3, %s465_s21), 3  ;;  %v507_v3 = vld [vmem:[%s630_s1 + $0x28] sm:$0xff]   ;;  %vm324_vm0 = vcmask 719872  }
   0xc   : > { %332 = vmatprep.subr.bf16.mxu0 %v530_v1  ;;  %s493_s24 = sshll.u32 %s635_s21, 3  ;;  %v508_v4 = vld [vmem:[%s630_s1 + $0x20] sm:$0xff]   ;;  %v509_v5 = vld [vmem:[%s630_s1 + $0x18] sm:$0xff]   ;;  %v510_v7 = vld [vmem:[%s630_s1 + $0x10] sm:$0xff]   ;;  %vm328_vm1 = vcmask 1043456   ;;  %s469_s5 = sshll.u32 %s635_s21, 2 }
   0xd   : > { %333 = vmatpush1.bf16.msra.mxu0 %v505_v0  ;;  %s582_s29 = scalar_lea.vmem %s629_s0, %s493_s24  ;;  %v511_v8 = vld [vmem:[%s630_s1 + $0x8] sm:$0xff]   ;;  %v512_v9 = vld [vmem:[%s630_s1] sm:$0xff]   ;;  %v515_v13 = vld [vmem:[%s630_s1 + $0x58] sm:$0xff]   ;;  %s202_s7 = scalar_lea.vmem %s633_s4, %s469_s5  ;;  %vm401_vm2 = vcmask 388096  }
   0xe   : > { %334 = vmatprep.subr.bf16.mxu0 %v530_v1  ;;  %v521_v6 = vld [vmem:[%s582_s29 + $0x4] ss:$8 sps:$4 sm:$0xff]   ;;  %v513_v10 = vld [vmem:[%s630_s1 + $0x68] ss:$0 sps:$4 sm:$0xff]   ;;  %v516_v14 = vld [vmem:[%s630_s1 + $0x50] sm:$0xff]  }
   0xf   : > { %486 = vmatprep.mubr.msk.bf16.mxu0 %vm324_vm0, %v521_v6  ;;  %v330_v11 = vsel %vm328_vm1, %v513_v10, 0  ;;  %v514_v12 = vld [vmem:[%s630_s1 + $0x60] sm:$0xff]   ;;  %v517_v15 = vld [vmem:[%s630_s1 + $0x48] sm:$0xff]  }
  0x10   : > { %v518_v16 = vld [vmem:[%s630_s1 + $0x40] sm:$0xff]  }
  0x11   : > { %335 = vmatpush1.bf16.msra.mxu0 %v506_v2  ;;  %v519_v17 = vld [vmem:[%s582_s29] ss:$8 sps:$4 sm:$0xff]  }
  0x12   : > { %336 = vmatprep.subr.bf16.mxu0 %v530_v1  ;;  %v487_v18 = vld [vmem:[%s631_s2] ss:$0 sm:$0xff] }
  0x13   : > { %v488_v20 = vld [vmem:[%s632_s3] ss:$0 sm:$0xff] }
  0x15   : > { %337 = vmatpush1.bf16.msra.mxu0 %v507_v3 }
  0x16   : > { %338 = vmatprep.subr.bf16.mxu0 %v530_v1 }
  0x19   : > { %339 = vmatpush1.bf16.msra.mxu0 %v508_v4 }
  0x1a   : > { %340 = vmatprep.subr.bf16.mxu0 %v530_v1 }
  0x1d   : > { %341 = vmatpush1.bf16.msra.mxu0 %v509_v5 }
  0x1e   : > { %342 = vmatprep.subr.bf16.mxu0 %v530_v1 }
  0x21   : > { %343 = vmatpush1.bf16.msra.mxu0 %v510_v7 }
  0x22   : > { %344 = vmatprep.subr.bf16.mxu0 %v530_v1 }
  0x25   : > { %345 = vmatpush1.bf16.msra.mxu0 %v511_v8 }
  0x26   : > { %346 = vmatprep.subr.bf16.mxu0 %v530_v1 }
  0x29   : > { %347 = vmatpush1.bf16.msra.mxu0 %v512_v9 }
  0x2a   : > { %352 = vmatprep.subr.bf16.mxu0 %v530_v1 }
  0x2d   : > { %353 = vmatpush2.bf16.msra.mxu0 %v330_v11 }
  0x2e   : > { %354 = vmatprep.subr.bf16.mxu0 %v530_v1 }
  0x31   : > { %355 = vmatpush2.bf16.msra.mxu0 %v514_v12 }
  0x32   : > { %356 = vmatprep.subr.bf16.mxu0 %v530_v1 }
  0x35   : > { %357 = vmatpush2.bf16.msra.mxu0 %v515_v13 }
  0x36   : > { %358 = vmatprep.subr.bf16.mxu0 %v530_v1 }
  0x39   : > { %359 = vmatpush2.bf16.msra.mxu0 %v516_v14 }
  0x3a   : > { %360 = vmatprep.subr.bf16.mxu0 %v530_v1 }
  0x3d   : > { %361 = vmatpush2.bf16.msra.mxu0 %v517_v15 }
  0x3e   : > { %362 = vmatprep.subr.bf16.mxu0 %v530_v1 }
  0x41   : > { %363 = vmatpush2.bf16.msra.mxu0 %v518_v16 }
  0x44   : > { %365 = vmatmul.mubr.bf16.vlgmr.msra.gmra.mxu0 %v519_v17 }
 0x104   : > { %v366_v19 = vpop.f32.mrf.mxu0 }
 0x105   : > { %v380_v21 = vmul.f32 %v487_v18, %v366_v19 }
 0x106   : > { %v368_v22 = vpop.f32.mrf.mxu0 }
 0x107   : > { %v389_v23 = vadd.f32 %v488_v20, %v380_v21 }
 0x108   : > { %v369_v24 = vpop.f32.mrf.mxu0 }
 0x109   : > { %v391_v25 = vmax.f32 %v389_v23, 0.0  ;;  %v381_v26 = vmul.f32 %v487_v18, %v369_v24 }
 0x10a   : > { %v371_v27 = vpop.f32.mrf.mxu0 }
 0x10b   : > { %v494_v28 = vpack.c.bf16 %v391_v25, %v391_v25  ;;  %v390_v29 = vadd.f32 %v488_v20, %v381_v26 }
 0x10d   : > { %402 = vst.msk [vmem:[%s202_s7] sm:$0xf] %vm401_vm2, %v494_v28  ;;  %v392_v30 = vmax.f32 %v390_v29, 0.0 }
 0x10f   : > { %v495_v31 = vpack.c.bf16 %v392_v30, %v392_v30 }
 0x111   : > { %403 = vst.msk [vmem:[%s202_s7 + $0x4] sm:$0xf] %vm401_vm2, %v495_v31 }
 0x112 PF: > { %s14_s15 = sadd.s32 1, %s528_s15  }
 0x113   : > { %p11_p4 = scmp.ge.s32.totalorder %s14_s15, 4  }
 0x115   :  { %13 = sbr.rel (!%p11_p4) target bundleno = 1 (0x1), region = 66 }

// kernel: garment_seg_forward.11
= control target key start
LH: loop header
LB: loop body
LE: loop exit
PB: predicated region body
PF: predicated region fallthrough
CT: control target
= control target key end

     0   :  { %v445_v0 = vmov 0   ;;  %vm249_vm0 = vcmask 392192   ;;  %vm351_vm1 = vcmask 519168   ;;  %s578_s1 = inlined_call_operand.vmem [shape: bf16[432,64], index: 1, kind: input, shape index: {}]   ;;  %s579_s0 = inlined_call_operand.vmem [shape: bf16[8,432], index: 0, kind: input, shape index: {}]   ;;  %s580_s2 = inlined_call_operand.vmem [shape: f32[1,64], index: 2, kind: input, shape index: {}]   ;;  %s581_s3 = inlined_call_operand.vmem [shape: f32[1,64], index: 3, kind: input, shape index: {}]   ;;  %s582_s4 = inlined_call_operand.vmem [shape: bf16[8,64], index: 4, kind: output, shape index: {}]  }
   0x1   :  { %293 = vmatprep.subr.bf16.mxu1 %v445_v0  ;;  %v414_v1 = vld [vmem:[%s578_s1 + $0xb8] sm:$0xff]   ;;  %v417_v4 = vld [vmem:[%s578_s1 + $0xb0] sm:$0xff]   ;;  %v420_v7 = vld [vmem:[%s578_s1 + $0xa8] sm:$0xff]  }
   0x2   :  { %v415_v2 = vld [vmem:[%s578_s1 + $0x78] sm:$0xff]   ;;  %294 = vmatpush1.bf16.msra.mxu1 %v414_v1  ;;  %v418_v5 = vld [vmem:[%s578_s1 + $0x70] sm:$0xff]   ;;  %v421_v8 = vld [vmem:[%s578_s1 + $0x68] sm:$0xff]  }
   0x3   :  { %v416_v3 = vld [vmem:[%s578_s1 + $0x38] sm:$0xff]   ;;  %391 = vmatprep.subr.bf16.mxu0 %v415_v2  ;;  %295 = vmatprep.subr.bf16.mxu1 %v445_v0  ;;  %v419_v6 = vld [vmem:[%s578_s1 + $0x30] sm:$0xff]   ;;  %v422_v9 = vld [vmem:[%s578_s1 + $0x28] sm:$0xff]  }
   0x4   :  { %392 = vmatpush3.bf16.msra.mxu0 %v416_v3  ;;  %v423_v10 = vld [vmem:[%s578_s1 + $0xa0] sm:$0xff]   ;;  %v427_v13 = vld [vmem:[%s578_s1 + $0x58] sm:$0xff]   ;;  %v430_v16 = vld [vmem:[%s578_s1 + $0x50] sm:$0xff]  }
   0x5   :  { %393 = vmatprep.subr.bf16.mxu0 %v418_v5  ;;  %v424_v11 = vld [vmem:[%s578_s1 + $0x60] sm:$0xff]   ;;  %v426_v14 = vld [vmem:[%s578_s1 + $0x98] sm:$0xff]   ;;  %v429_v17 = vld [vmem:[%s578_s1 + $0x90] sm:$0xff]  }
   0x6   :  { %296 = vmatpush1.bf16.msra.mxu1 %v417_v4  ;;  %v425_v12 = vld [vmem:[%s578_s1 + $0x20] sm:$0xff]   ;;  %v428_v15 = vld [vmem:[%s578_s1 + $0x18] sm:$0xff]   ;;  %v431_v18 = vld [vmem:[%s578_s1 + $0x10] sm:$0xff]  }
   0x7   :  { %297 = vmatprep.subr.bf16.mxu1 %v445_v0  ;;  %v433_v19 = vld [vmem:[%s578_s1 + $0x48] sm:$0xff]   ;;  %v18_v22 = vld [vmem:[%s579_s0] sm:$0xff]  ;;  %v440_v29 = vld [vmem:[%s578_s1 + $0xd0] sm:$0xff]  }
   0x8   :  { %394 = vmatpush3.bf16.msra.mxu0 %v419_v6  ;;  %v432_v20 = vld [vmem:[%s578_s1 + $0x88] sm:$0xff]   ;;  %v436_v23 = vld [vmem:[%s578_s1 + $0x40] sm:$0xff]   ;;  %v358_v24 = vcombine.high %v18_v22, %v18_v22  ;;  %v357_v30 = vcombine.low %v18_v22, %v18_v22 }
   0x9   :  { %395 = vmatprep.subr.bf16.mxu0 %v421_v8  ;;  %v434_v21 = vld [vmem:[%s578_s1 + $0x8] sm:$0xff]   ;;  %v435_v25 = vld [vmem:[%s578_s1 + $0x80] sm:$0xff]  }
   0xa   :  { %298 = vmatpush1.bf16.msra.mxu1 %v420_v7  ;;  %285 = vmatprep.mubr.bf16.mxu0 %v358_v24  ;;  %v19_v26 = vld [vmem:[%s579_s0 + $0x8] sm:$0xff]  ;;  %v437_v27 = vld [vmem:[%s578_s1] sm:$0xff]  }
   0xb   :  { %299 = vmatprep.subr.bf16.mxu1 %v445_v0  ;;  %v360_v28 = vcombine.high %v19_v26, %v19_v26  ;;  %v441_v31 = vld [vmem:[%s578_s1 + $0xc8] sm:$0xff]   ;;  %v442_v32 = vld [vmem:[%s578_s1 + $0xc0] sm:$0xff]   ;;  %v359_v33 = vcombine.low %v19_v26, %v19_v26 }
   0xc   :  { %396 = vmatpush3.bf16.msra.mxu0 %v422_v9  ;;  %v389_v40 = vld [vmem:[%s580_s2] ss:$0 sm:$0xff] }
   0xd   :  { %397 = vmatprep.subr.bf16.mxu0 %v424_v11  ;;  %388 = vmatprep.mubr.msk.bf16.mxu1 %vm249_vm0, %v360_v28  ;;  %v390_v42 = vld [vmem:[%s581_s3] ss:$0 sm:$0xff] }
   0xe   :  { %300 = vmatpush1.bf16.msra.mxu1 %v423_v10 }
   0xf   :  { %301 = vmatprep.subr.bf16.mxu1 %v445_v0 }
  0x10   :  { %398 = vmatpush3.bf16.msra.mxu0 %v425_v12 }
  0x11   :  { %399 = vmatprep.subr.bf16.mxu0 %v427_v13 }
  0x12   :  { %302 = vmatpush1.bf16.msra.mxu1 %v426_v14 }
  0x13   :  { %303 = vmatprep.subr.bf16.mxu1 %v445_v0 }
  0x14   :  { %400 = vmatpush3.bf16.msra.mxu0 %v428_v15 }
  0x15   :  { %401 = vmatprep.subr.bf16.mxu0 %v430_v16 }
  0x16   :  { %304 = vmatpush1.bf16.msra.mxu1 %v429_v17 }
  0x17   :  { %305 = vmatprep.subr.bf16.mxu1 %v445_v0 }
  0x18   :  { %402 = vmatpush3.bf16.msra.mxu0 %v431_v18 }
  0x19   :  { %403 = vmatprep.subr.bf16.mxu0 %v433_v19 }
  0x1a   :  { %306 = vmatpush1.bf16.msra.mxu1 %v432_v20 }
  0x1b   :  { %307 = vmatprep.subr.bf16.mxu1 %v445_v0 }
  0x1c   :  { %404 = vmatpush3.bf16.msra.mxu0 %v434_v21 }
  0x1d   :  { %405 = vmatprep.subr.bf16.mxu0 %v436_v23 }
  0x1e   :  { %308 = vmatpush1.bf16.msra.mxu1 %v435_v25 }
  0x1f   :  { %319 = vmatprep.subr.bf16.mxu1 %v445_v0 }
  0x20   :  { %406 = vmatpush3.bf16.msra.mxu0 %v437_v27 }
  0x22   :  { %320 = vmatpush2.bf16.msra.mxu1 %v440_v29 }
  0x23   :  { %286 = vmatmul.mubr.bf16.vlgmr.msra.gmra.mxu0 %v357_v30  ;;  %321 = vmatprep.subr.bf16.mxu1 %v445_v0 }
  0x26   :  { %322 = vmatpush2.bf16.msra.mxu1 %v441_v31 }
  0x27   :  { %323 = vmatprep.subr.bf16.mxu1 %v445_v0 }
  0x2a   :  { %324 = vmatpush2.bf16.msra.mxu1 %v442_v32 }
  0x2d   :  { %326 = vmatmul.mubr.bf16.vlgmr.msra.gmra.mxu1 %v359_v33 }
  0xe3   :  { %v407_v34 = vpop.f32.mrf.mxu0 }
  0xe5   :  { %v408_v35 = vpop.f32.mrf.mxu0 }
  0xe6   :  { %v409_v38 = vadd.f32 %v408_v35, %v407_v34 }
  0xe7   :  { %v410_v36 = vpop.f32.mrf.mxu0 }
  0xe9   :  { %v411_v37 = vpop.f32.mrf.mxu0 }
  0xed   :  { %v327_v39 = vpop.f32.mrf.mxu1 }
  0xee   :  { %v328_v41 = vadd.f32 %v409_v38, %v327_v39 }
  0xef   :  { %v329_v43 = vpop.f32.mrf.mxu1 }
  0xf0   :  { %v340_v44 = vmul.f32 %v389_v40, %v328_v41 }
  0xf1   :  { %v330_v45 = vpop.f32.mrf.mxu1 }
  0xf2   :  { %v348_v46 = vadd.f32 %v390_v42, %v340_v44 }
  0xf3   :  { %v331_v47 = vpop.f32.mrf.mxu1 }
  0xf4   :  { %v349_v48 = vmax.f32 %v348_v46, 0.0 }
  0xf6   :  { %v350_v49 = vpack.c.bf16 %v349_v48, %v349_v48 }
  0xf8   :  { %352 = vst.msk [vmem:[%s582_s4] sm:$0xf] %vm351_vm1, %v350_v49 }

// kernel: garment_seg_forward.13
= control target key start
LH: loop header
LB: loop body
LE: loop exit
PB: predicated region body
PF: predicated region fallthrough
CT: control target
= control target key end

     0   :  { %s569_s15 = smov 0   ;;  %s623_s0 = inlined_call_operand.vmem [shape: bf16[128,24], index: 0, kind: input, shape index: {}]   ;;  %s624_s1 = inlined_call_operand.vmem [shape: bf16[24,12], index: 1, kind: input, shape index: {}]   ;;  %s625_s2 = inlined_call_operand.vmem [shape: f32[1,12], index: 2, kind: input, shape index: {}]   ;;  %s626_s3 = inlined_call_operand.vmem [shape: f32[1,12], index: 3, kind: input, shape index: {}]   ;;  %s627_s4 = inlined_call_operand.vmem [shape: bf16[128,12], index: 4, kind: output, shape index: {}]  }
   0x1 LB: > { %s459_s16 = sadd.s32 4294967295, %s542_s15   ;;  %p463_p0 = scmp.ge.s32.totalorder %s542_s15, 1  ;;  %s542_s15 = sphi %s569_s15, %s14_s15  }
   0x2   : > { %p163_p1 = scmp.lt.s32.totalorder %s542_s15, 3 }
   0x4   : > { %p164_p2 = pnand %p463_p0, %p163_p1 }
   0x5   : > { %s464_s21 = sshll.u32 (!%p164_p2), %s459_s16, 3 }
   0x6   : > { %167 = sbr.rel (%p164_p2) target bundleno = 229 (0xe5), region = 36  ;;  %p190_p3 = scmp.lt.s32.totalorder (!%p164_p2), %s464_s21, 15 }
   0xb   : > { %v530_v0 = vld [vmem:[%s624_s1 + $0x8] ss:$0 sps:$4 sm:$0xff]   ;;  %vm255_vm0 = vcmask 1043456   ;;  %v531_v1 = vld [vmem:[%s624_s1] sm:$0xff]   ;;  %s629_s21 = smov (!%p190_p3, %s464_s21), 15  ;;  %vm242_vm1 = vcmask 195584  }
   0xc   : > { %520 = vmatprep.subr.msk.bf16.mxu0 %vm255_vm0, %v530_v0  ;;  %521 = vmatprep.subr.msk.bf16.mxu1 %vm255_vm0, %v530_v0  ;;  %v257_v2 = vsel %vm255_vm0, %v530_v0, 0  ;;  %s465_s22 = sshll.u32 %s629_s21, 2  ;;  %v478_v7 = vld [vmem:[%s625_s2] ss:$0 sm:$0xff]  ;;  %vm394_vm2 = vcmask 93184  }
   0xd   : > { %505 = vmatpush3.bf16.msra.mxu0 %v257_v2  ;;  %518 = vmatpush3.bf16.msra.mxu1 %v257_v2  ;;  %s193_s25 = scalar_lea.vmem %s623_s0, %s465_s22  ;;  %v479_v9 = vld [vmem:[%s626_s3] ss:$0 sm:$0xff]  ;;  %s602_s6 = scalar_lea.vmem %s627_s4, %s465_s22 }
   0xe   : > { %506 = vmatprep.subr.bf16.mxu0 %v531_v1  ;;  %517 = vmatprep.subr.bf16.mxu1 %v531_v1  ;;  %v532_v3 = vld [vmem:[%s193_s25] sm:$0xff]   ;;  %v533_v4 = vld [vmem:[%s193_s25 + $0x10] sm:$0xff]   ;;  %v534_v5 = vld [vmem:[%s193_s25 + $0x8] sm:$0xff]  }
   0xf   : > { %508 = vmatprep.mubr.msk.bf16.mxu0 %vm242_vm1, %v532_v3  ;;  %512 = vmatprep.mubr.msk.bf16.mxu1 %vm242_vm1, %v533_v4  ;;  %v535_v6 = vld [vmem:[%s193_s25 + $0x18] sm:$0xff]  }
  0x11   : > { %507 = vmatpush3.bf16.msra.mxu0 %v531_v1  ;;  %519 = vmatpush3.bf16.msra.mxu1 %v531_v1 }
  0x14   : > { %509 = vmatmul.mubr.msk.bf16.vlgmr.msra.gmra.mxu0 %vm242_vm1, %v534_v5  ;;  %513 = vmatmul.mubr.msk.bf16.vlgmr.msra.gmra.mxu1 %vm242_vm1, %v535_v6 }
  0xd4   : > { %v510_v8 = vpop.f32.mrf.mxu0  ;;  %v514_v11 = vpop.f32.mrf.mxu1 }
  0xd5   : > { %v333_v10 = vmul.f32 %v510_v8, %v478_v7  ;;  %v337_v12 = vmul.f32 %v514_v11, %v478_v7 }
  0xd6   : > { %v293_v13 = vpop.f32.mrf.mxu0  ;;  %v309_v16 = vpop.f32.mrf.mxu1 }
  0xd7   : > { %v348_v14 = vadd.f32 %v479_v9, %v333_v10  ;;  %v331_v15 = vmul.f32 %v478_v7, %v293_v13  ;;  %v352_v17 = vadd.f32 %v479_v9, %v337_v12  ;;  %v335_v18 = vmul.f32 %v478_v7, %v309_v16 }
  0xd8   : > { %v511_v19 = vpop.f32.mrf.mxu0  ;;  %v515_v23 = vpop.f32.mrf.mxu1 }
  0xd9   : > { %v356_v20 = vmax.f32 %v348_v14, 0.0  ;;  %v346_v21 = vadd.f32 %v479_v9, %v331_v15  ;;  %v334_v22 = vmul.f32 %v511_v19, %v478_v7  ;;  %v360_v24 = vmax.f32 %v352_v17, 0.0 }
  0xda   : > { %v350_v25 = vadd.f32 %v479_v9, %v335_v18  ;;  %v338_v26 = vmul.f32 %v515_v23, %v478_v7  ;;  %v296_v27 = vpop.f32.mrf.mxu0  ;;  %v312_v32 = vpop.f32.mrf.mxu1 }
  0xdb   : > { %v492_v28 = vpack.c.bf16 %v356_v20, %v356_v20  ;;  %v354_v29 = vmax.f32 %v346_v21, 0.0  ;;  %v349_v30 = vadd.f32 %v479_v9, %v334_v22  ;;  %v332_v31 = vmul.f32 %v478_v7, %v296_v27 }
  0xdc   : > { %v496_v33 = vpack.c.bf16 %v360_v24, %v360_v24  ;;  %v358_v34 = vmax.f32 %v350_v25, 0.0  ;;  %v353_v35 = vadd.f32 %v479_v9, %v338_v26  ;;  %v336_v36 = vmul.f32 %v478_v7, %v312_v32 }
  0xdd   : > { %397 = vst.msk [vmem:[%s602_s6 + $0x8] sm:$0xf] %vm394_vm2, %v492_v28  ;;  %v490_v37 = vpack.c.bf16 %v354_v29, %v354_v29  ;;  %v357_v38 = vmax.f32 %v349_v30, 0.0  ;;  %v347_v39 = vadd.f32 %v479_v9, %v332_v31 }
  0xde   : > { %401 = vst.msk [vmem:[%s602_s6 + $0x18] sm:$0xf] %vm394_vm2, %v496_v33  ;;  %v494_v40 = vpack.c.bf16 %v358_v34, %v358_v34  ;;  %v361_v41 = vmax.f32 %v353_v35, 0.0  ;;  %v351_v42 = vadd.f32 %v479_v9, %v336_v36 }
  0xdf   : > { %395 = vst.msk [vmem:[%s602_s6] sm:$0xf] %vm394_vm2, %v490_v37  ;;  %v493_v43 = vpack.c.bf16 %v357_v38, %v357_v38  ;;  %v355_v44 = vmax.f32 %v347_v39, 0.0 }
  0xe0   : > { %399 = vst.msk [vmem:[%s602_s6 + $0x10] sm:$0xf] %vm394_vm2, %v494_v40  ;;  %v497_v45 = vpack.c.bf16 %v361_v41, %v361_v41  ;;  %v359_v46 = vmax.f32 %v351_v42, 0.0 }
  0xe1   : > { %398 = vst.msk [vmem:[%s602_s6 + $0xc] sm:$0xf] %vm394_vm2, %v493_v43  ;;  %v491_v47 = vpack.c.bf16 %v355_v44, %v355_v44 }
  0xe2   : > { %402 = vst.msk [vmem:[%s602_s6 + $0x1c] sm:$0xf] %vm394_vm2, %v497_v45  ;;  %v495_v48 = vpack.c.bf16 %v359_v46, %v359_v46 }
  0xe3   : > { %396 = vst.msk [vmem:[%s602_s6 + $0x4] sm:$0xf] %vm394_vm2, %v491_v47 }
  0xe4   : > { %400 = vst.msk [vmem:[%s602_s6 + $0x14] sm:$0xf] %vm394_vm2, %v495_v48 }
  0xe5 PF: > { %s14_s15 = sadd.s32 1, %s542_s15  }
  0xe6   : > { %p11_p4 = scmp.ge.s32.totalorder %s14_s15, 4  }
  0xe8   :  { %13 = sbr.rel (!%p11_p4) target bundleno = 1 (0x1), region = 66 }

// kernel: garment_seg_forward.12
= control target key start
LH: loop header
LB: loop body
LE: loop exit
PB: predicated region body
PF: predicated region fallthrough
CT: control target
= control target key end

     0   :  { %s4643_s17 = smov 0   ;;  %s5480_s0 = inlined_call_operand.vmem [shape: bf16[2,72,64], index: 0, kind: input, shape index: {}]   ;;  %s5481_s1 = inlined_call_operand.vmem [shape: f32[2,1,64], index: 1, kind: input, shape index: {}]   ;;  %s5482_s2 = inlined_call_operand.vmem [shape: bf16[64,32], index: 2, kind: input, shape index: {}]   ;;  %s5483_s3 = inlined_call_operand.vmem [shape: f32[1,32], index: 3, kind: input, shape index: {}]   ;;  %s5484_s4 = inlined_call_operand.vmem [shape: f32[1,32], index: 4, kind: input, shape index: {}]   ;;  %s5485_s5 = inlined_call_operand.vmem [shape: bf16[27,64,32], index: 5, kind: input, shape index: {}]   ;;  %s5486_s6 = inlined_call_operand.vmem [shape: f32[3,1,32], index: 6, kind: input, shape index: {}]   ;;  %s5487_s7 = inlined_call_operand.vmem [shape: f32[3,1,32], index: 7, kind: input, shape index: {}]   ;;  %s5488_s8 = inlined_call_operand.vmem [shape: bf16[4,32,64], index: 8, kind: input, shape index: {}]   ;;  %s5489_s9 = inlined_call_operand.vmem [shape: f32[1,64], index: 9, kind: input, shape index: {}]   ;;  %s5490_s10 = inlined_call_operand.vmem [shape: f32[1,64], index: 10, kind: input, shape index: {}]   ;;  %s5491_s11 = inlined_call_operand.vmem [shape: bf16[2,16,64], index: 11, kind: output, shape index: {}]  }
   0x1 LB: > { %s3442_s18 = sadd.s32 4294967295, %s4579_s17   ;;  %p3446_p0 = scmp.ge.s32.totalorder %s4579_s17, 1  ;;  %s4579_s17 = sphi %s4643_s17, %s21_s17  }
   0x2   : > { %p345_p1 = scmp.lt.s32.totalorder %s4579_s17, 3 }
   0x4   : > { %p346_p2 = pnand %p3446_p0, %p345_p1 }
   0x5   : > { %p388_p3 = scmp.lt.s32.totalorder (!%p346_p2), %s3442_s18, 1 }
   0x6   : > { %349 = sbr.rel (%p346_p2) target bundleno = 1085 (0x43d), region = 64 }
   0xb   : > { %v4413_v0 = vld [vmem:[%s5482_s2 + $0x18] sm:$0xff]   ;;  %v4581_v1 = vmov 0.0   ;;  %v4415_v3 = vld [vmem:[%s5482_s2 + $0x10] sm:$0xff]   ;;  %vm4582_vm0 = vmmov 0   ;;  %s5493_s18 = smov (!%p388_p3, %s3442_s18), 1  ;;  %v4417_v5 = vld [vmem:[%s5482_s2 + $0x8] sm:$0xff]  }
   0xc   : > { %4034 = vmatprep.subr.bf16.mxu0 %v4581_v1  ;;  %4046 = vmatprep.subr.bf16.mxu1 %v4581_v1  ;;  %v4414_v2 = vld [vmem:[%s5485_s5 + $0x38] sm:$0xff]   ;;  %v4416_v4 = vld [vmem:[%s5485_s5 + $0x30] sm:$0xff]   ;;  %s4402_s29 = smul.u32 36, %s5493_s18  ;;  %v4418_v6 = vld [vmem:[%s5485_s5 + $0x28] sm:$0xff]   ;;  %vm422_vm1 = vsmask.f32 6400  ;;  %s395_s23 = scalar_lea.vmem %s5481_s1, %s5493_s18 }
   0xd   : > { %4035 = vmatpush3.bf16.msra.mxu0 %v4413_v0  ;;  %4042 = vmatprep.mubr.msk.bf16.mxu0 %vm4582_vm0, %v4581_v1  ;;  %v4419_v7 = vld [vmem:[%s5482_s2] sm:$0xff]   ;;  %vm464_vm2 = vcmask 523264   ;;  %v4425_v29 = vld [vmem:[%s5485_s5 + $0x18] sm:$0xff]   ;;  %v4427_v40 = vld [vmem:[%s5485_s5 + $0x10] sm:$0xff]   ;;  %vm651_vm3 = vcmask 1046528   ;;  %vm736_vm4 = vcmask 1045504  }
   0xe   : > { %4047 = vmatpush3.bf16.msra.mxu1 %v4414_v2  ;;  %4036 = vmatprep.subr.bf16.mxu0 %v4581_v1  ;;  %s4688_s19 = scalar_lea.vmem %s5480_s0, %s4402_s29  ;;  %v4420_v10 = vld [vmem:[%s5485_s5 + $0x20] sm:$0xff]   ;;  %v4426_v39 = vld [vmem:[%s5485_s5 + $0x58] sm:$0xff]   ;;  %v4428_v42 = vld [vmem:[%s5485_s5 + $0x50] sm:$0xff]   ;;  %vm1375_vm5 = vcmask 261120   ;;  %vm1598_vm6 = vsmask.f32 7424 }
   0xf   : > { %4048 = vmatprep.subr.bf16.mxu1 %v4581_v1  ;;  %4054 = vmatprep.mubr.msk.bf16.mxu1 %vm4582_vm0, %v4581_v1  ;;  %v403_v8 = vld [vmem:[%s4688_s19 + $0xc] sm:$0xe]  ;;  %v4692_v9 = vld [vmem:[%s4688_s19 + $0x10] sm:$0xf]  ;;  %v534_v13 = vld [vmem:[%s4688_s19 + $0x8] sm:$0xe] }
  0x10   : > { %v4698_v11 = vcombine.low %v403_v8, %v4692_v9  ;;  %v4701_v12 = vld [vmem:[%s4688_s19 + $0x14] ss:$0 sps:$4 sm:$0x33]   ;;  %v535_v14 = vld [vmem:[%s4688_s19 + $0xc] sm:$0xf]  ;;  %v4431_v49 = vld [vmem:[%s5485_s5] sm:$0xff]  }
  0x11   : > { %4037 = vmatpush3.bf16.msra.mxu0 %v4415_v3  ;;  %v432_v17 = vshrl.u32 %v4701_v12, 16  ;;  %v435_v18 = vshll.u32 %v4701_v12, 16  ;;  %v3467_v19 = vcombine.low %v534_v13, %v535_v14  ;;  %v4712_v20 = vld [vmem:[%s4688_s19 + $0x10] ss:$0 sps:$4 sm:$0x33]   ;;  %v4429_v44 = vld [vmem:[%s5485_s5 + $0x8] sm:$0xff]  }
  0x12   : > { %4049 = vmatpush3.bf16.msra.mxu1 %v4416_v4  ;;  %4038 = vmatprep.subr.bf16.mxu0 %v4581_v1  ;;  %v424_v15 = vshrl.u32 %v4698_v11, 16  ;;  %v427_v16 = vshll.u32 %v4698_v11, 16  ;;  %v572_v27 = vshrl.u32 %v4712_v20, 16  ;;  %v575_v28 = vshll.u32 %v4712_v20, 16  ;;  %v723_v45 = vld [vmem:[%s4688_s19 + $0x8] sm:$0xc] }
  0x13   : > { %4050 = vmatprep.subr.bf16.mxu1 %v4581_v1  ;;  %v434_v23 = vrot.slane %v432_v17, 1  ;;  %v437_v24 = vrot.slane %v435_v18, 2  ;;  %v564_v25 = vshrl.u32 %v3467_v19, 16  ;;  %v567_v26 = vshll.u32 %v3467_v19, 16  ;;  %v4430_v46 = vld [vmem:[%s5485_s5 + $0x48] sm:$0xff]   ;;  %v4432_v52 = vld [vmem:[%s5485_s5 + $0x40] sm:$0xff]  }
  0x14   : > { %v426_v21 = vrot.slane %v424_v15, 1  ;;  %v429_v22 = vrot.slane %v427_v16, 2  ;;  %v574_v34 = vrot.slane %v572_v27, 1  ;;  %v577_v35 = vrot.slane %v575_v28, 2  ;;  %v4435_v55 = vld [vmem:[%s5485_s5 + $0x78] sm:$0xff]   ;;  %v4437_v58 = vld [vmem:[%s5485_s5 + $0x70] sm:$0xff]  }
  0x15   : > { %4039 = vmatpush3.bf16.msra.mxu0 %v4417_v5  ;;  %v438_v31 = vor.u32 %v437_v24, %v434_v23  ;;  %v566_v32 = vrot.slane %v564_v25, 1  ;;  %v569_v33 = vrot.slane %v567_v26, 2  ;;  %v4433_v43 = vld [vmem:[%s4688_s19 + $0x10] ss:$0 sps:$4 sm:$0x11]   ;;  %v652_v47 = vrot.slane %v3467_v19, 1 }
  0x16   : > { %4051 = vmatpush3.bf16.msra.mxu1 %v4418_v6  ;;  %4040 = vmatprep.subr.bf16.mxu0 %v4581_v1  ;;  %v430_v30 = vor.u32 %v429_v22, %v426_v21  ;;  %v578_v38 = vor.u32 %v577_v35, %v574_v34  ;;  %v3488_v48 = vcombine.low %v723_v45, %v535_v14  ;;  %v653_v50 = vrot.slane %v4433_v43, 1  ;;  %v4436_v57 = vld [vmem:[%s5485_s5 + $0x98] sm:$0xff]   ;;  %v4438_v59 = vld [vmem:[%s5485_s5 + $0x90] sm:$0xff]   ;;  %v4439_v60 = vld [vmem:[%s5485_s5 + $0x68] sm:$0xff]   ;;  %s3879_s27 = sshll.u32 %s5493_s18, 3 }
  0x17   : > { %4052 = vmatprep.subr.bf16.mxu1 %v4581_v1  ;;  %v570_v37 = vor.u32 %v569_v33, %v566_v32  ;;  %v738_v51 = vrot.slane %v4712_v20, 2  ;;  %v4789_v61 = vld [vmem:[%s4688_s19 + $0x14] ss:$0 sps:$4 sm:$0x11]   ;;  %v972_v62 = vld [vmem:[%s4688_s19 + $0xc] sm:$0xc]  ;;  %s400_s30 = scalar_lea.vmem %s5491_s11, %s3879_s27 }
  0x18   : > { %v4722_v36 = vsel %vm422_vm1, %v430_v30, %v438_v31  ;;  %v737_v53 = vrot.slane %v3488_v48, 2  ;;  %v654_v54 = vsel %vm651_vm3, %v652_v47, %v653_v50  ;;  %v1058_v63 = vld [vmem:[%s4688_s19 + $0x10] sm:$0xe]  ;;  %v1059_v0 = vld [vmem:[%s4688_s19 + $0x14] sm:$0xf]  ;;  %v4440_v3 = vld [vmem:[%s5485_s5 + $0x88] sm:$0xff]   ;;  %v4804_v5 = vcombine.low %v972_v62, %v4692_v9 }
  0x19   : > { %4041 = vmatpush3.bf16.msra.mxu0 %v4419_v7  ;;  %v579_v41 = vsel %vm422_vm1, %v570_v37, %v578_v38  ;;  %v4797_v2 = vld [vmem:[%s4688_s19 + $0x18] ss:$0 sps:$4 sm:$0x11]   ;;  %v823_v4 = vrot.slane %v4698_v11, 1  ;;  %v4806_v6 = vcombine.low %v1058_v63, %v1059_v0  ;;  %v4441_v7 = vld [vmem:[%s5485_s5 + $0x60] sm:$0xff]   ;;  %v824_v8 = vrot.slane %v4789_v61, 1 }
  0x1a   : > { %4053 = vmatpush3.bf16.msra.mxu1 %v4420_v10  ;;  %4058 = vmatprep.subr.bf16.mxu0 %v4581_v1  ;;  %v739_v56 = vsel %vm736_vm4, %v737_v53, %v738_v51  ;;  %v4442_v10 = vld [vmem:[%s5485_s5 + $0x80] sm:$0xff]   ;;  %v4444_v13 = vld [vmem:[%s5485_s5 + $0xb8] sm:$0xff]   ;;  %v986_v14 = vrot.slane %v4701_v12, 2  ;;  %v985_v15 = vrot.slane %v4804_v5, 2  ;;  %v1079_v19 = vrot.slane %v4797_v2, 1  ;;  %v4446_v23 = vld [vmem:[%s5485_s5 + $0xb0] sm:$0xff]  }
  0x1b   : > { %4070 = vmatprep.subr.bf16.mxu1 %v4581_v1  ;;  %v1165_v11 = vshrl.u32 %v4806_v6, 16  ;;  %v1168_v16 = vshll.u32 %v4806_v6, 16  ;;  %v825_v17 = vsel %vm651_vm3, %v823_v4, %v824_v8  ;;  %v1078_v18 = vrot.slane %v4806_v6, 1  ;;  %v4445_v12 = vld [vmem:[%s5485_s5 + $0xd8] sm:$0xff]   ;;  %v1251_v22 = vld [vmem:[%s4688_s19 + $0x10] sm:$0xc] }
  0x1c   : > { %4043 = vmatmul.mubr.msk.bf16.vlgmr.msra.gmra.mxu0 %vm464_vm2, %v4722_v36  ;;  %v4833_v20 = vld [vmem:[%s4688_s19 + $0x18] ss:$0 sps:$4 sm:$0x33]   ;;  %v3572_v27 = vcombine.low %v1251_v22, %v1059_v0  ;;  %v4447_v28 = vld [vmem:[%s5485_s5 + $0xd0] sm:$0xff]   ;;  %v4448_v33 = vld [vmem:[%s5485_s5 + $0xa8] sm:$0xff]   ;;  %vm2654_vm8 = vcmask 1044480  }
  0x1d   : > { %4059 = vmatpush3.bf16.msra.mxu0 %v4425_v29  ;;  %4066 = vmatprep.mubr.msk.bf16.mxu0 %vm4582_vm0, %v4581_v1  ;;  %v4835_v21 = vrot.slane %v1165_v11, 1  ;;  %v4842_v24 = vrot.slane %v1168_v16, 2  ;;  %v1173_v25 = vshrl.u32 %v4833_v20, 16  ;;  %v1176_v26 = vshll.u32 %v4833_v20, 16  ;;  %v4449_v34 = vld [vmem:[%s5485_s5 + $0xc8] sm:$0xff]   ;;  %v4450_v35 = vld [vmem:[%s5485_s5 + $0xa0] sm:$0xff]  }
  0x1e   : > { %4060 = vmatprep.subr.bf16.mxu0 %v4581_v1  ;;  %4055 = vmatmul.mubr.msk.bf16.vlgmr.msra.gmra.mxu1 %vm464_vm2, %v579_v41  ;;  %v1264_v31 = vrot.slane %v3572_v27, 2  ;;  %v1265_v32 = vrot.slane %v4833_v20, 2  ;;  %v4451_v37 = vld [vmem:[%s5485_s5 + $0xc0] sm:$0xff]   ;;  %v4455_v38 = vld [vmem:[%s5485_s5 + $0xf8] sm:$0xff]   ;;  %v4457_v41 = vld [vmem:[%s5485_s5 + $0xf0] sm:$0xff]   ;;  %vm3375_vm9 = vcmask 519168  }
  0x1f   : > { %4071 = vmatpush3.bf16.msra.mxu1 %v4426_v39  ;;  %4078 = vmatprep.mubr.msk.bf16.mxu1 %vm4582_vm0, %v4581_v1  ;;  %v1175_v29 = vrot.slane %v1173_v25, 1  ;;  %v1178_v30 = vrot.slane %v1176_v26, 2  ;;  %v987_v39 = vsel %vm736_vm4, %v985_v15, %v986_v14  ;;  %v4458_v43 = vld [vmem:[%s5485_s5 + $0x110] sm:$0xff]   ;;  %v4460_v45 = vld [vmem:[%s5485_s5 + $0x108] sm:$0xff]   ;;  %v1171_v47 = vor.u32 %v4842_v24, %v4835_v21  ;;  %v4466_v53 = vld [vmem:[%s5488_s8] sm:$0xff]  }
  0x20   : > { %4072 = vmatprep.subr.bf16.mxu1 %v4581_v1  ;;  %v1266_v51 = vsel %vm736_vm4, %v1264_v31, %v1265_v32  ;;  %v4954_v8 = vld [vmem:[%s4688_s19 + $0x8] sm:$0xf]  ;;  %v4470_v15 = vld [vmem:[%s5485_s5 + $0x138] sm:$0xff]   ;;  %vm1696_vm7 = vsmask.f32 5376 }
  0x21   : > { %4061 = vmatpush3.bf16.msra.mxu0 %v4427_v40  ;;  %v4456_v40 = vld [vmem:[%s5485_s5 + $0x118] sm:$0xff]   ;;  %v1179_v48 = vor.u32 %v1178_v30, %v1175_v29  ;;  %v4474_v22 = vld [vmem:[%s5485_s5 + $0x128] sm:$0xff]   ;;  %v4476_v30 = vld [vmem:[%s5485_s5 + $0x120] sm:$0xff]  }
  0x22   : > { %4062 = vmatprep.subr.bf16.mxu0 %v4581_v1 }
  0x23   : > { %4073 = vmatpush3.bf16.msra.mxu1 %v4428_v42  ;;  %v1080_v42 = vsel %vm651_vm3, %v1078_v18, %v1079_v19  ;;  %v1180_v50 = vsel %vm422_vm1, %v1171_v47, %v1179_v48  ;;  %v4472_v18 = vld [vmem:[%s5485_s5 + $0x130] sm:$0xff]   ;;  %v4480_v19 = vld [vmem:[%s4688_s19 + $0xc] ss:$0 sps:$4 sm:$0x11]  }
  0x24   : > { %4074 = vmatprep.subr.bf16.mxu1 %v4581_v1  ;;  %v1607_v25 = vshll.u32 %v4480_v19, 16 }
  0x25   : > { %4063 = vmatpush3.bf16.msra.mxu0 %v4429_v44  ;;  %v4459_v44 = vld [vmem:[%s5485_s5 + $0xe8] sm:$0xff]  }
  0x26   : > { %4064 = vmatprep.subr.bf16.mxu0 %v4581_v1  ;;  %v1609_v32 = vrot.slane %v1607_v25, 1 }
  0x27   : > { %4075 = vmatpush3.bf16.msra.mxu1 %v4430_v46  ;;  %v4461_v46 = vld [vmem:[%s5485_s5 + $0xe0] sm:$0xff]  }
  0x28   : > { %4076 = vmatprep.subr.bf16.mxu1 %v4581_v1 }
  0x29   : > { %4065 = vmatpush3.bf16.msra.mxu0 %v4431_v49  ;;  %v4462_v49 = vld [vmem:[%s5485_s5 + $0x100] sm:$0xff]  }
  0x2a   : > { %4082 = vmatprep.subr.bf16.mxu0 %v4581_v1 }
  0x2b   : > { %4077 = vmatpush3.bf16.msra.mxu1 %v4432_v52  ;;  %v4465_v52 = vld [vmem:[%s5488_s8 + $0x8] sm:$0xff]  }
  0x2c   : > { %4067 = vmatmul.mubr.msk.bf16.vlgmr.msra.gmra.mxu0 %vm464_vm2, %v654_v54  ;;  %4094 = vmatprep.subr.bf16.mxu1 %v4581_v1  ;;  %v4467_v54 = vld [vmem:[%s5488_s8 + $0x18] sm:$0xff]  }
  0x2d   : > { %4083 = vmatpush3.bf16.msra.mxu0 %v4435_v55  ;;  %4090 = vmatprep.mubr.msk.bf16.mxu0 %vm4582_vm0, %v4581_v1  ;;  %v4468_v55 = vld [vmem:[%s5488_s8 + $0x10] sm:$0xff]  }
  0x2e   : > { %4084 = vmatprep.subr.bf16.mxu0 %v4581_v1  ;;  %4079 = vmatmul.mubr.msk.bf16.vlgmr.msra.gmra.mxu1 %vm464_vm2, %v739_v56  ;;  %v3457_v56 = vld [vmem:[%s5483_s3] ss:$0 sm:$0xff] }
  0x2f   : > { %4095 = vmatpush3.bf16.msra.mxu1 %v4436_v57  ;;  %4102 = vmatprep.mubr.msk.bf16.mxu1 %vm4582_vm0, %v4581_v1 }
  0x30   : > { %4096 = vmatprep.subr.bf16.mxu1 %v4581_v1 }
  0x31   : > { %4085 = vmatpush3.bf16.msra.mxu0 %v4437_v58 }
  0x32   : > { %4086 = vmatprep.subr.bf16.mxu0 %v4581_v1 }
  0x33   : > { %4097 = vmatpush3.bf16.msra.mxu1 %v4438_v59  ;;  %v3458_v59 = vld [vmem:[%s5484_s4] ss:$0 sm:$0xff] }
  0x34   : > { %4098 = vmatprep.subr.bf16.mxu1 %v4581_v1 }
  0x35   : > { %4087 = vmatpush3.bf16.msra.mxu0 %v4439_v60 }
  0x36   : > { %4088 = vmatprep.subr.bf16.mxu0 %v4581_v1 }
  0x37   : > { %4099 = vmatpush3.bf16.msra.mxu1 %v4440_v3 }
  0x38   : > { %4100 = vmatprep.subr.bf16.mxu1 %v4581_v1 }
  0x39   : > { %4089 = vmatpush3.bf16.msra.mxu0 %v4441_v7 }
  0x3a   : > { %4106 = vmatprep.subr.bf16.mxu0 %v4581_v1 }
  0x3b   : > { %4101 = vmatpush3.bf16.msra.mxu1 %v4442_v10  ;;  %v1476_v10 = vld [vmem:[%s4688_s19 + $0x4] sm:$0xf] }
  0x3c   : > { %4091 = vmatmul.mubr.msk.bf16.vlgmr.msra.gmra.mxu0 %vm464_vm2, %v825_v17  ;;  %4118 = vmatprep.subr.bf16.mxu1 %v4581_v1  ;;  %v3613_v16 = vcombine.low %v1476_v10, %v4954_v8 }
  0x3d   : > { %4107 = vmatpush3.bf16.msra.mxu0 %v4444_v13  ;;  %4114 = vmatprep.mubr.msk.bf16.mxu0 %vm4582_vm0, %v4581_v1 }
  0x3e   : > { %4108 = vmatprep.subr.bf16.mxu0 %v4581_v1  ;;  %4103 = vmatmul.mubr.msk.bf16.vlgmr.msra.gmra.mxu1 %vm464_vm2, %v4722_v36 }
  0x3f   : > { %4119 = vmatpush3.bf16.msra.mxu1 %v4445_v12  ;;  %4126 = vmatprep.mubr.msk.bf16.mxu1 %vm4582_vm0, %v4581_v1  ;;  %v1602_v12 = vshll.u32 %v3613_v16, 16 }
  0x40   : > { %4120 = vmatprep.subr.bf16.mxu1 %v4581_v1 }
  0x41   : > { %4109 = vmatpush3.bf16.msra.mxu0 %v4446_v23  ;;  %v1600_v23 = vshrl.u32 %v3613_v16, 16  ;;  %v1604_v24 = vrot.slane %v1602_v12, 1  ;;  %v4499_v12 = vld [vmem:[%s5485_s5 + $0x1c0] sm:$0xff]  }
  0x42   : > { %4110 = vmatprep.subr.bf16.mxu0 %v4581_v1 }
  0x43   : > { %4121 = vmatpush3.bf16.msra.mxu1 %v4447_v28  ;;  %v1605_v31 = vor.u32 %v1604_v24, %v1600_v23 }
  0x44   : > { %4122 = vmatprep.subr.bf16.mxu1 %v4581_v1 }
  0x45   : > { %4111 = vmatpush3.bf16.msra.mxu0 %v4448_v33 }
  0x46   : > { %4112 = vmatprep.subr.bf16.mxu0 %v4581_v1 }
  0x47   : > { %4123 = vmatpush3.bf16.msra.mxu1 %v4449_v34  ;;  %v1784_v34 = vld [vmem:[%s4688_s19 + $0xc] sm:$0xf] }
  0x48   : > { %4124 = vmatprep.subr.bf16.mxu1 %v4581_v1 }
  0x49   : > { %4113 = vmatpush3.bf16.msra.mxu0 %v4450_v35 }
  0x4a   : > { %4130 = vmatprep.subr.bf16.mxu0 %v4581_v1 }
  0x4b   : > { %4125 = vmatpush3.bf16.msra.mxu1 %v4451_v37  ;;  %v1610_v37 = vsel %vm1598_vm6, %v1605_v31, %v1609_v32  ;;  %v4513_v31 = vld [vmem:[%s4688_s19 + $0x1c] ss:$0 sps:$4 sm:$0x33]  }
  0x4c   : > { %4115 = vmatmul.mubr.msk.bf16.vlgmr.msra.gmra.mxu0 %vm464_vm2, %v987_v39  ;;  %4142 = vmatprep.subr.bf16.mxu1 %v4581_v1  ;;  %v3643_v39 = vcombine.low %v1784_v34, %v4692_v9  ;;  %v4486_v9 = vld [vmem:[%s5485_s5 + $0x188] sm:$0xff]   ;;  %v4504_v34 = vld [vmem:[%s5485_s5 + $0x210] sm:$0xff]  }
  0x4d   : > { %4131 = vmatpush3.bf16.msra.mxu0 %v4455_v38  ;;  %4138 = vmatprep.mubr.msk.bf16.mxu0 %vm4582_vm0, %v4581_v1  ;;  %v4482_v38 = vld [vmem:[%s5485_s5 + $0x198] sm:$0xff]  }
  0x4e   : > { %4132 = vmatprep.subr.bf16.mxu0 %v4581_v1  ;;  %4127 = vmatmul.mubr.msk.bf16.vlgmr.msra.gmra.mxu1 %vm464_vm2, %v1080_v42 }
  0x4f   : > { %4143 = vmatpush3.bf16.msra.mxu1 %v4456_v40  ;;  %4150 = vmatprep.mubr.msk.bf16.mxu1 %vm4582_vm0, %v4581_v1  ;;  %v4484_v40 = vld [vmem:[%s5485_s5 + $0x190] sm:$0xff]  }
  0x50   : > { %4144 = vmatprep.subr.bf16.mxu1 %v4581_v1 }
  0x51   : > { %4133 = vmatpush3.bf16.msra.mxu0 %v4457_v41  ;;  %v1800_v41 = vshll.u32 %v3643_v39, 16 }
  0x52   : > { %4134 = vmatprep.subr.bf16.mxu0 %v4581_v1 }
  0x53   : > { %4145 = vmatpush3.bf16.msra.mxu1 %v4458_v43 }
  0x54   : > { %4146 = vmatprep.subr.bf16.mxu1 %v4581_v1 }
  0x55   : > { %4135 = vmatpush3.bf16.msra.mxu0 %v4459_v44  ;;  %v1798_v44 = vshrl.u32 %v3643_v39, 16  ;;  %v2186_v39 = vshll.u32 %v4513_v31, 16 }
  0x56   : > { %4136 = vmatprep.subr.bf16.mxu0 %v4581_v1 }
  0x57   : > { %4147 = vmatpush3.bf16.msra.mxu1 %v4460_v45  ;;  %v1802_v45 = vrot.slane %v1800_v41, 1 }
  0x58   : > { %4148 = vmatprep.subr.bf16.mxu1 %v4581_v1 }
  0x59   : > { %4137 = vmatpush3.bf16.msra.mxu0 %v4461_v46  ;;  %v1805_v46 = vshll.u32 %v4789_v61, 16 }
  0x5a   : > { %4154 = vmatprep.subr.bf16.mxu0 %v4581_v1 }
  0x5b   : > { %4149 = vmatpush3.bf16.msra.mxu1 %v4462_v49 }
  0x5c   : > { %4139 = vmatmul.mubr.msk.bf16.vlgmr.msra.gmra.mxu0 %vm464_vm2, %v1180_v50  ;;  %4162 = vmatprep.subr.bf16.mxu1 %v4581_v1 }
  0x5d   : > { %4158 = vmatprep.mubr.msk.bf16.mxu0 %vm4582_vm0, %v4581_v1  ;;  %4155 = vmatpush3.bf16.msra.mxu0 %v4467_v54 }
  0x5e   : > { %4151 = vmatmul.mubr.msk.bf16.vlgmr.msra.gmra.mxu1 %vm464_vm2, %v1266_v51  ;;  %4156 = vmatprep.subr.bf16.mxu0 %v4581_v1  ;;  %v4488_v51 = vld [vmem:[%s5485_s5 + $0x180] sm:$0xff]  }
  0x5f   : > { %4166 = vmatprep.mubr.msk.bf16.mxu1 %vm4582_vm0, %v4581_v1  ;;  %4163 = vmatpush3.bf16.msra.mxu1 %v4465_v52  ;;  %v1803_v52 = vor.u32 %v1802_v45, %v1798_v44  ;;  %v4506_v44 = vld [vmem:[%s5485_s5 + $0x208] sm:$0xff]  }
  0x60   : > { %4164 = vmatprep.subr.bf16.mxu1 %v4581_v1 }
  0x61   : > { %4157 = vmatpush3.bf16.msra.mxu0 %v4468_v55 }
  0x62   : > { %4170 = vmatprep.subr.bf16.mxu0 %v4581_v1 }
  0x63   : > { %4165 = vmatpush3.bf16.msra.mxu1 %v4466_v53  ;;  %v1807_v53 = vrot.slane %v1805_v46, 1 }
  0x64   : > { %4182 = vmatprep.subr.bf16.mxu1 %v4581_v1 }
  0x65   : > { %v1808_v61 = vsel %vm1598_vm6, %v1803_v52, %v1807_v53 }
  0xdc   : > { %v502_v57 = vpop.f32.mrf.mxu0 }
  0xdd   : > { %v516_v58 = vmul.f32 %v3457_v56, %v502_v57  ;;  %v5013_v57 = vld [vmem:[%s4688_s19 + $0x14] ss:$0 sps:$4 sm:$0x77]  }
  0xde   : > { %v4044_v60 = vpop.f32.mrf.mxu0  ;;  %v4949_v62 = vpop.f32.mrf.mxu1 }
  0xdf   : > { %v525_v0 = vadd.f32 %v3458_v59, %v516_v58  ;;  %v4495_v58 = vld [vmem:[%s5485_s5 + $0x1d0] sm:$0xff]   ;;  %v1972_v60 = vshll.u32 %v4804_v5, 16 }
  0xe0   : > { %v505_v63 = vpop.f32.mrf.mxu0  ;;  %v4056_v2 = vpop.f32.mrf.mxu1 }
  0xe1   : > { %v517_v3 = vmul.f32 %v3457_v56, %v505_v63  ;;  %v527_v11 = vmax.f32 %v525_v0, 0.0  ;;  %v4493_v56 = vld [vmem:[%s5485_s5 + $0x1d8] sm:$0xff]   ;;  %v1977_v63 = vshrl.u32 %v5013_v57, 16  ;;  %v1980_v0 = vshll.u32 %v5013_v57, 16 }
  0xe2   : > { %v4045_v4 = vpop.f32.mrf.mxu0  ;;  %v4951_v7 = vpop.f32.mrf.mxu1 }
  0xe3   : > { %v526_v6 = vadd.f32 %v3458_v59, %v517_v3  ;;  %v1969_v59 = vshrl.u32 %v4804_v5, 16  ;;  %v1982_v5 = vrot.slane %v1980_v0, 3 }
  0xe4   : > { %v4057_v14 = vpop.f32.mrf.mxu1 }
  0xe5   : > { %v528_v13 = vmax.f32 %v526_v6, 0.0  ;;  %v4497_v6 = vld [vmem:[%s5485_s5 + $0x1c8] sm:$0xff]   ;;  %v1971_v10 = vrot.slane %v1969_v59, 2 }
  0xe7   : > { %v529_v17 = vpack.c.bf16 %v528_v13, %v527_v11  ;;  %v1974_v11 = vrot.slane %v1972_v60, 3  ;;  %v1979_v13 = vrot.slane %v1977_v63, 2  ;;  %v3579_v63 = vld [vmem:[%s5487_s7] ss:$0 sm:$0xff] }
  0xe9   : > { %4167 = vmatmul.mubr.msk.bf16.vlgmr.msra.gmra.mxu1 %vm1375_vm5, %v529_v17 }
  0xea   : > { %4183 = vmatpush3.bf16.msra.mxu1 %v4470_v15  ;;  %4190 = vmatprep.mubr.msk.bf16.mxu1 %vm4582_vm0, %v4581_v1 }
  0xeb   : > { %4184 = vmatprep.subr.bf16.mxu1 %v4581_v1 }
  0xec   : > { %v4969_v20 = vpop.f32.mrf.mxu0 }
  0xed   : > { %v717_v2 = vadd.f32 %v4969_v20, %v4949_v62  ;;  %v1975_v20 = vor.u32 %v1974_v11, %v1971_v10 }
  0xee   : > { %v4068_v21 = vpop.f32.mrf.mxu0  ;;  %4185 = vmatpush3.bf16.msra.mxu1 %v4472_v18  ;;  %v4974_v26 = vpop.f32.mrf.mxu1 }
  0xef   : > { %4186 = vmatprep.subr.bf16.mxu1 %v4581_v1  ;;  %v808_v14 = vadd.f32 %v4974_v26, %v717_v2  ;;  %v1983_v21 = vor.u32 %v1982_v5, %v1979_v13  ;;  %v1488_v13 = vld [vmem:[%s4688_s19 + $0x4] sm:$0xe] }
  0xf0   : > { %v4977_v27 = vpop.f32.mrf.mxu0  ;;  %v4080_v28 = vpop.f32.mrf.mxu1 }
  0xf1   : > { %v720_v15 = vadd.f32 %v4977_v27, %v4951_v7  ;;  %v2157_v7 = vld [vmem:[%s4688_s19 + $0x14] sm:$0xe]  ;;  %v5043_v27 = vld [vmem:[%s4688_s19 + $0x18] sm:$0xf]  ;;  %v1984_v28 = vsel %vm1696_vm7, %v1975_v20, %v1983_v21 }
  0xf2   : > { %v4069_v29 = vpop.f32.mrf.mxu0  ;;  %4187 = vmatpush3.bf16.msra.mxu1 %v4474_v22  ;;  %v4982_v33 = vpop.f32.mrf.mxu1 }
  0xf3   : > { %4188 = vmatprep.subr.bf16.mxu1 %v4581_v1  ;;  %v809_v22 = vadd.f32 %v4982_v33, %v720_v15  ;;  %v4502_v29 = vld [vmem:[%s5485_s5 + $0x218] sm:$0xff]  }
  0xf4   : > { %v4081_v35 = vpop.f32.mrf.mxu1  ;;  %v4469_v15 = vld [vmem:[%s5485_s5 + $0x158] sm:$0xff]  }
  0xf6   : > { %4189 = vmatpush3.bf16.msra.mxu1 %v4476_v30  ;;  %v3699_v30 = vcombine.low %v2157_v7, %v5043_v27 }
  0xf7   : > { %4206 = vmatprep.subr.bf16.mxu1 %v4581_v1 }
  0xf8   : > { %v2175_v35 = vshrl.u32 %v3699_v30, 16 }
  0xf9   : > { %4191 = vmatmul.mubr.msk.bf16.vlgmr.msra.gmra.mxu1 %vm464_vm2, %v1610_v37  ;;  %v2178_v37 = vshll.u32 %v3699_v30, 16  ;;  %v1679_v30 = vld [vmem:[%s4688_s19 + $0x4] sm:$0xc] }
  0xfa   : > { %4207 = vmatpush3.bf16.msra.mxu1 %v4482_v38  ;;  %4214 = vmatprep.mubr.msk.bf16.mxu1 %vm4582_vm0, %v4581_v1  ;;  %v2183_v38 = vshrl.u32 %v4513_v31, 16  ;;  %v2177_v45 = vrot.slane %v2175_v35, 1  ;;  %v4483_v35 = vld [vmem:[%s5485_s5 + $0x170] sm:$0xff]  }
  0xfb   : > { %4208 = vmatprep.subr.bf16.mxu1 %v4581_v1  ;;  %v2180_v46 = vrot.slane %v2178_v37, 2 }
  0xfc   : > { %v887_v42 = vpop.f32.mrf.mxu0 }
  0xfd   : > { %v894_v17 = vadd.f32 %v887_v42, %v808_v14  ;;  %v2181_v59 = vor.u32 %v2180_v46, %v2177_v45 }
  0xfe   : > { %v4092_v43 = vpop.f32.mrf.mxu0  ;;  %4209 = vmatpush3.bf16.msra.mxu1 %v4484_v40  ;;  %v963_v47 = vpop.f32.mrf.mxu1 }
  0xff   : > { %4210 = vmatprep.subr.bf16.mxu1 %v4581_v1  ;;  %v970_v24 = vadd.f32 %v963_v47, %v894_v17  ;;  %v2185_v47 = vrot.slane %v2183_v38, 1 }
 0x100   : > { %v890_v48 = vpop.f32.mrf.mxu0  ;;  %v4104_v49 = vpop.f32.mrf.mxu1 }
 0x101   : > { %v895_v25 = vadd.f32 %v890_v48, %v809_v22  ;;  %v2188_v48 = vrot.slane %v2186_v39, 2  ;;  %v4473_v22 = vld [vmem:[%s5485_s5 + $0x148] sm:$0xff]  }
 0x102   : > { %v4093_v50 = vpop.f32.mrf.mxu0  ;;  %4211 = vmatpush3.bf16.msra.mxu1 %v4486_v9  ;;  %v966_v54 = vpop.f32.mrf.mxu1 }
 0x103   : > { %4212 = vmatprep.subr.bf16.mxu1 %v4581_v1  ;;  %v971_v33 = vadd.f32 %v966_v54, %v895_v25  ;;  %v2189_v60 = vor.u32 %v2188_v48, %v2185_v47  ;;  %v4491_v48 = vld [vmem:[%s5485_s5 + $0x1b8] sm:$0xff]  }
 0x104   : > { %v4105_v55 = vpop.f32.mrf.mxu1 }
 0x105   : > { %v2190_v10 = vsel %vm422_vm1, %v2181_v59, %v2189_v60 }
 0x106   : > { %4213 = vmatpush3.bf16.msra.mxu1 %v4488_v51  ;;  %v3578_v51 = vld [vmem:[%s5486_s6] ss:$0 sm:$0xff] }
 0x107   : > { %4230 = vmatprep.subr.bf16.mxu1 %v4581_v1 }
 0x109   : > { %4215 = vmatmul.mubr.msk.bf16.vlgmr.msra.gmra.mxu1 %vm464_vm2, %v1808_v61 }
 0x10a   : > { %4231 = vmatpush3.bf16.msra.mxu1 %v4493_v56  ;;  %4238 = vmatprep.mubr.msk.bf16.mxu1 %vm4582_vm0, %v4581_v1 }
 0x10b   : > { %4232 = vmatprep.subr.bf16.mxu1 %v4581_v1 }
 0x10c   : > { %v1049_v3 = vpop.f32.mrf.mxu0 }
 0x10d   : > { %v1056_v32 = vadd.f32 %v1049_v3, %v970_v24 }
 0x10e   : > { %v4116_v4 = vpop.f32.mrf.mxu0  ;;  %4233 = vmatpush3.bf16.msra.mxu1 %v4495_v58  ;;  %v1142_v62 = vpop.f32.mrf.mxu1  ;;  %v4508_v58 = vld [vmem:[%s5485_s5 + $0x200] sm:$0xff]  }
 0x10f   : > { %4234 = vmatprep.subr.bf16.mxu1 %v4581_v1  ;;  %v1149_v40 = vadd.f32 %v1142_v62, %v1056_v32  ;;  %v3606_v62 = vcombine.low %v1488_v13, %v4954_v8  ;;  %v4481_v32 = vld [vmem:[%s5485_s5 + $0x178] sm:$0xff]  }
 0x110   : > { %v1052_v16 = vpop.f32.mrf.mxu0  ;;  %v4128_v18 = vpop.f32.mrf.mxu1  ;;  %v4518_v13 = vld [vmem:[%s4688_s19 + $0x1c] ss:$0 sps:$4 sm:$0x77]  }
 0x111   : > { %v1057_v41 = vadd.f32 %v1052_v16, %v971_v33  ;;  %v4478_v16 = vld [vmem:[%s4688_s19 + $0xc] ss:$0 sps:$4 sm:$0x33]   ;;  %v4471_v18 = vld [vmem:[%s5485_s5 + $0x150] sm:$0xff]   ;;  %v3628_v33 = vcombine.low %v1679_v30, %v4954_v8 }
 0x112   : > { %v4117_v19 = vpop.f32.mrf.mxu0  ;;  %4235 = vmatpush3.bf16.msra.mxu1 %v4497_v6  ;;  %v1145_v23 = vpop.f32.mrf.mxu1  ;;  %v1516_v20 = vshrl.u32 %v4478_v16, 16  ;;  %v1519_v21 = vshll.u32 %v4478_v16, 16  ;;  %v4485_v8 = vld [vmem:[%s5485_s5 + $0x168] sm:$0xff]   ;;  %v2290_v16 = vshll.u32 %v4518_v13, 16 }
 0x113   : > { %4236 = vmatprep.subr.bf16.mxu1 %v4581_v1  ;;  %v1150_v49 = vadd.f32 %v1145_v23, %v1057_v41  ;;  %v1508_v19 = vshrl.u32 %v3606_v62, 16  ;;  %v1698_v37 = vshrl.u32 %v3628_v33, 16  ;;  %v1701_v38 = vshll.u32 %v3628_v33, 16  ;;  %v4519_v33 = vld [vmem:[%s5488_s8 + $0x28] sm:$0xff]  }
 0x114   : > { %v4129_v26 = vpop.f32.mrf.mxu1  ;;  %v1518_v24 = vrot.slane %v1516_v20, 1  ;;  %v1521_v25 = vrot.slane %v1519_v21, 2  ;;  %v2292_v20 = vrot.slane %v2290_v16, 3  ;;  %v4516_v21 = vld [vmem:[%s5485_s5 + $0x220] sm:$0xff]  }
 0x115   : > { %v1510_v23 = vrot.slane %v1508_v19, 1  ;;  %v4475_v26 = vld [vmem:[%s5485_s5 + $0x140] sm:$0xff]   ;;  %v1700_v41 = vrot.slane %v1698_v37, 2 }
 0x116   : > { %4237 = vmatpush3.bf16.msra.mxu1 %v4499_v12  ;;  %v1511_v12 = vshll.u32 %v3606_v62, 16  ;;  %v2287_v62 = vshrl.u32 %v4518_v13, 16  ;;  %v4550_v16 = vld [vmem:[%s5485_s5 + $0x2e0] sm:$0xff]  }
 0x117   : > { %4254 = vmatprep.subr.bf16.mxu1 %v4581_v1 }
 0x118   : > { %v1513_v7 = vrot.slane %v1511_v12, 2  ;;  %v2289_v12 = vrot.slane %v2287_v62, 2  ;;  %v2887_v62 = vld [vmem:[%s4688_s19 + $0xc] sm:$0x8] }
 0x119   : > { %4239 = vmatmul.mubr.msk.bf16.vlgmr.msra.gmra.mxu1 %vm464_vm2, %v1984_v28 }
 0x11a   : > { %4255 = vmatpush3.bf16.msra.mxu1 %v4502_v29  ;;  %4262 = vmatprep.mubr.msk.bf16.mxu1 %vm4582_vm0, %v4581_v1  ;;  %v1514_v28 = vor.u32 %v1513_v7, %v1510_v23  ;;  %v1522_v29 = vor.u32 %v1521_v25, %v1518_v24  ;;  %v2293_v23 = vor.u32 %v2292_v20, %v2289_v12  ;;  %v2901_v12 = vrot.slane %v5013_v57, 3 }
 0x11b   : > { %4256 = vmatprep.subr.bf16.mxu1 %v4581_v1 }
 0x11c   : > { %v1242_v42 = vpop.f32.mrf.mxu0  ;;  %v1523_v31 = vsel %vm422_vm1, %v1514_v28, %v1522_v29 }
 0x11d   : > { %v1249_v43 = vadd.f32 %v1242_v42, %v1149_v40  ;;  %v1703_v42 = vrot.slane %v1701_v38, 3  ;;  %v4522_v38 = vld [vmem:[%s5485_s5 + $0x258] sm:$0xff]  }
 0x11e   : > { %v4140_v9 = vpop.f32.mrf.mxu0  ;;  %4257 = vmatpush3.bf16.msra.mxu1 %v4504_v34  ;;  %v1328_v50 = vpop.f32.mrf.mxu1  ;;  %v4490_v34 = vld [vmem:[%s4688_s19 + $0xc] ss:$0 sps:$4 sm:$0x77]  }
 0x11f   : > { %4258 = vmatprep.subr.bf16.mxu1 %v4581_v1  ;;  %v1335_v52 = vadd.f32 %v1328_v50, %v1249_v43  ;;  %v1706_v39 = vshrl.u32 %v4490_v34, 16  ;;  %v1709_v40 = vshll.u32 %v4490_v34, 16  ;;  %v1704_v45 = vor.u32 %v1703_v42, %v1700_v41  ;;  %v4496_v50 = vld [vmem:[%s5485_s5 + $0x1a8] sm:$0xff]   ;;  %v4520_v34 = vld [vmem:[%s5488_s8 + $0x20] sm:$0xff]  }
 0x120   : > { %v1245_v53 = vpop.f32.mrf.mxu0  ;;  %v4152_v54 = vpop.f32.mrf.mxu1  ;;  %v4526_v41 = vld [vmem:[%s5485_s5 + $0x248] sm:$0xff]   ;;  %v4528_v42 = vld [vmem:[%s5485_s5 + $0x240] sm:$0xff]  }
 0x121   : > { %v1250_v55 = vadd.f32 %v1245_v53, %v1150_v49  ;;  %v1344_v61 = vmul.f32 %v3578_v51, %v1335_v52  ;;  %v1708_v43 = vrot.slane %v1706_v39, 2  ;;  %v1711_v9 = vrot.slane %v1709_v40, 3  ;;  %v4494_v49 = vld [vmem:[%s5485_s5 + $0x1b0] sm:$0xff]   ;;  %v4500_v53 = vld [vmem:[%s5485_s5 + $0x1f8] sm:$0xff]  }
 0x122   : > { %v4141_v56 = vpop.f32.mrf.mxu0  ;;  %4259 = vmatpush3.bf16.msra.mxu1 %v4506_v44  ;;  %v1331_v0 = vpop.f32.mrf.mxu1  ;;  %v4487_v44 = vld [vmem:[%s5485_s5 + $0x160] sm:$0xff]   ;;  %v2055_v52 = vld [vmem:[%s4688_s19 + $0x14] sm:$0xf] }
 0x123   : > { %4260 = vmatprep.subr.bf16.mxu1 %v4581_v1  ;;  %v1336_v2 = vadd.f32 %v1331_v0, %v1250_v55  ;;  %v1353_v4 = vadd.f32 %v3579_v63, %v1344_v61  ;;  %v1712_v46 = vor.u32 %v1711_v9, %v1708_v43  ;;  %v3684_v54 = vcombine.low %v2055_v52, %v5043_v27  ;;  %v4503_v55 = vld [vmem:[%s5485_s5 + $0x1f0] sm:$0xff]   ;;  %v4510_v61 = vld [vmem:[%s4688_s19 + $0x1c] ss:$0 sps:$4 sm:$0x11]   ;;  %v4507_v0 = vld [vmem:[%s5485_s5 + $0x1e0] sm:$0xff]  }
 0x124   : > { %v4153_v3 = vpop.f32.mrf.mxu1  ;;  %v5231_v9 = vld [vmem:[%s4688_s19 + $0x4] sm:$0xf]  ;;  %v2637_v52 = vld [vmem:[%s4688_s19] sm:$0x8] }
 0x125   : > { %v1345_v6 = vmul.f32 %v3578_v51, %v1336_v2  ;;  %v1355_v5 = vmax.f32 %v1353_v4, 0.0  ;;  %v1713_v47 = vsel %vm1696_vm7, %v1704_v45, %v1712_v46  ;;  %v4498_v51 = vld [vmem:[%s5485_s5 + $0x1a0] sm:$0xff]   ;;  %v2078_v56 = vshll.u32 %v3684_v54, 16  ;;  %v2261_v4 = vld [vmem:[%s4688_s19 + $0x14] sm:$0xc] }
 0x126   : > { %4261 = vmatpush3.bf16.msra.mxu1 %v4508_v58  ;;  %v4505_v58 = vld [vmem:[%s5485_s5 + $0x1e8] sm:$0xff]   ;;  %v2076_v59 = vshrl.u32 %v3684_v54, 16 }
 0x127   : > { %4278 = vmatprep.subr.bf16.mxu1 %v4581_v1  ;;  %v1354_v11 = vadd.f32 %v3579_v63, %v1345_v6  ;;  %v2080_v60 = vrot.slane %v2078_v56, 1  ;;  %v2083_v63 = vshll.u32 %v4510_v61, 16  ;;  %v4541_v54 = vld [vmem:[%s4688_s19 + $0x8] ss:$0 sps:$4 sm:$0x77]   ;;  %v4539_v61 = vld [vmem:[%s5485_s5 + $0x2a0] sm:$0xff]  }
 0x129   : > { %4263 = vmatmul.mubr.msk.bf16.vlgmr.msra.gmra.mxu1 %vm464_vm2, %v2190_v10  ;;  %v1356_v14 = vmax.f32 %v1354_v11, 0.0  ;;  %v2081_v2 = vor.u32 %v2080_v60, %v2076_v59  ;;  %v2085_v3 = vrot.slane %v2083_v63, 1  ;;  %v4511_v10 = vld [vmem:[%s5485_s5 + $0x238] sm:$0xff]   ;;  %v3714_v11 = vcombine.low %v2261_v4, %v5043_v27  ;;  %v2728_v63 = vld [vmem:[%s4688_s19 + $0x10] sm:$0xf] }
 0x12a   : > { %4282 = vmatprep.mubr.msk.bf16.mxu1 %vm4582_vm0, %v4581_v1  ;;  %4279 = vmatpush3.bf16.msra.mxu1 %v4519_v33 }
 0x12b   : > { %v1357_v17 = vpack.c.bf16 %v1356_v14, %v1355_v5  ;;  %v2086_v6 = vsel %vm1598_vm6, %v2081_v2, %v2085_v3  ;;  %v4514_v5 = vld [vmem:[%s5485_s5 + $0x230] sm:$0xff]   ;;  %v2279_v14 = vshrl.u32 %v3714_v11, 16  ;;  %4280 = vmatprep.subr.bf16.mxu1 %v4581_v1  ;;  %v4571_v2 = vld [vmem:[%s4688_s19 + $0xc] sm:$0xf] }
 0x12c   : > { %v3784_v3 = vcombine.low %v4571_v2, %v2728_v63 }
 0x12d   : > { %4159 = vmatmul.mubr.msk.bf16.vlgmr.msra.gmra.mxu0 %vm1375_vm5, %v1357_v17  ;;  %v4515_v17 = vld [vmem:[%s5485_s5 + $0x228] sm:$0xff]  }
 0x12e   : > { %4171 = vmatpush3.bf16.msra.mxu0 %v4469_v15  ;;  %4178 = vmatprep.mubr.msk.bf16.mxu0 %vm4582_vm0, %v4581_v1  ;;  %v2282_v15 = vshll.u32 %v3714_v11, 16 }
 0x12f   : > { %4172 = vmatprep.subr.bf16.mxu0 %v4581_v1  ;;  %4281 = vmatpush3.bf16.msra.mxu1 %v4520_v34  ;;  %v4563_v34 = vld [vmem:[%s4688_s19 + $0x20] ss:$0 sps:$4 sm:$0x33]  }
 0x130   : > { %v2284_v19 = vrot.slane %v2282_v15, 3  ;;  %4286 = vmatprep.subr.bf16.mxu1 %v4581_v1  ;;  %v4548_v15 = vld [vmem:[%s5485_s5 + $0x2e8] sm:$0xff]  }
 0x132   : > { %4173 = vmatpush3.bf16.msra.mxu0 %v4471_v18  ;;  %v2281_v18 = vrot.slane %v2279_v14, 2 }
 0x133   : > { %4174 = vmatprep.subr.bf16.mxu0 %v4581_v1 }
 0x136   : > { %4175 = vmatpush3.bf16.msra.mxu0 %v4473_v22  ;;  %v2285_v22 = vor.u32 %v2284_v19, %v2281_v18 }
 0x137   : > { %4176 = vmatprep.subr.bf16.mxu0 %v4581_v1 }
 0x138   : > { %v2294_v7 = vsel %vm1696_vm7, %v2285_v22, %v2293_v23  ;;  %v4553_v22 = vld [vmem:[%s5485_s5 + $0x338] sm:$0xff]  }
 0x13a   : > { %4177 = vmatpush3.bf16.msra.mxu0 %v4475_v26 }
 0x13b   : > { %4194 = vmatprep.subr.bf16.mxu0 %v4581_v1 }
 0x13d   : > { %4179 = vmatmul.mubr.msk.bf16.vlgmr.msra.gmra.mxu0 %vm464_vm2, %v1523_v31 }
 0x13e   : > { %4195 = vmatpush3.bf16.msra.mxu0 %v4481_v32  ;;  %4202 = vmatprep.mubr.msk.bf16.mxu0 %vm4582_vm0, %v4581_v1 }
 0x13f   : > { %4196 = vmatprep.subr.bf16.mxu0 %v4581_v1 }
 0x142   : > { %4197 = vmatpush3.bf16.msra.mxu0 %v4483_v35 }
 0x143   : > { %4198 = vmatprep.subr.bf16.mxu0 %v4581_v1 }
 0x146   : > { %4199 = vmatpush3.bf16.msra.mxu0 %v4485_v8  ;;  %v4524_v8 = vld [vmem:[%s5485_s5 + $0x250] sm:$0xff]  }
 0x147   : > { %4200 = vmatprep.subr.bf16.mxu0 %v4581_v1 }
 0x14a   : > { %4201 = vmatpush3.bf16.msra.mxu0 %v4487_v44  ;;  %v2451_v44 = vld [vmem:[%s4688_s19] sm:$0xf] }
 0x14b   : > { %4218 = vmatprep.subr.bf16.mxu0 %v4581_v1  ;;  %v3755_v46 = vcombine.low %v2451_v44, %v5231_v9 }
 0x14d   : > { %4203 = vmatmul.mubr.msk.bf16.vlgmr.msra.gmra.mxu0 %vm464_vm2, %v1713_v47 }
 0x14e   : > { %4219 = vmatpush3.bf16.msra.mxu0 %v4491_v48  ;;  %4226 = vmatprep.mubr.msk.bf16.mxu0 %vm4582_vm0, %v4581_v1  ;;  %v4533_v48 = vld [vmem:[%s5485_s5 + $0x2b8] sm:$0xff]  }
 0x14f   : > { %4220 = vmatprep.subr.bf16.mxu0 %v4581_v1 }
 0x152   : > { %4221 = vmatpush3.bf16.msra.mxu0 %v4494_v49 }
 0x153   : > { %4222 = vmatprep.subr.bf16.mxu0 %v4581_v1 }
 0x156   : > { %4223 = vmatpush3.bf16.msra.mxu0 %v4496_v50  ;;  %v4535_v50 = vld [vmem:[%s5485_s5 + $0x2b0] sm:$0xff]  }
 0x157   : > { %4224 = vmatprep.subr.bf16.mxu0 %v4581_v1 }
 0x15a   : > { %4225 = vmatpush3.bf16.msra.mxu0 %v4498_v51  ;;  %v4537_v51 = vld [vmem:[%s5485_s5 + $0x2a8] sm:$0xff]  }
 0x15b   : > { %4242 = vmatprep.subr.bf16.mxu0 %v4581_v1 }
 0x15d   : > { %4227 = vmatmul.mubr.msk.bf16.vlgmr.msra.gmra.mxu0 %vm464_vm2, %v4722_v36 }
 0x15e   : > { %4243 = vmatpush3.bf16.msra.mxu0 %v4500_v53  ;;  %4250 = vmatprep.mubr.msk.bf16.mxu0 %vm4582_vm0, %v4581_v1  ;;  %v3769_v53 = vcombine.low %v2637_v52, %v5231_v9 }
 0x15f   : > { %4244 = vmatprep.subr.bf16.mxu0 %v4581_v1 }
 0x160   : > { %v2655_v56 = vrot.slane %v3769_v53, 3 }
 0x162   : > { %4245 = vmatpush3.bf16.msra.mxu0 %v4503_v55 }
 0x163   : > { %4246 = vmatprep.subr.bf16.mxu0 %v4581_v1 }
 0x166   : > { %4247 = vmatpush3.bf16.msra.mxu0 %v4505_v58  ;;  %v2656_v58 = vrot.slane %v4541_v54, 3 }
 0x167   : > { %4248 = vmatprep.subr.bf16.mxu0 %v4581_v1 }
 0x168   : > { %v5262_v60 = vsel %vm2654_vm8, %v2655_v56, %v2656_v58  ;;  %v4568_v58 = vld [vmem:[%s4688_s19 + $0x20] ss:$0 sps:$4 sm:$0x77]  }
 0x169   : > { %v3181_v63 = vrot.slane %v4568_v58, 3 }
 0x16a   : > { %4249 = vmatpush3.bf16.msra.mxu0 %v4507_v0 }
 0x16b   : > { %4266 = vmatprep.subr.bf16.mxu0 %v4581_v1 }
 0x16d   : > { %4251 = vmatmul.mubr.msk.bf16.vlgmr.msra.gmra.mxu0 %vm464_vm2, %v2086_v6  ;;  %v4544_v6 = vld [vmem:[%s5485_s5 + $0x2f8] sm:$0xff]  }
 0x16e   : > { %4267 = vmatpush3.bf16.msra.mxu0 %v4511_v10  ;;  %4274 = vmatprep.mubr.msk.bf16.mxu0 %vm4582_vm0, %v4581_v1 }
 0x16f   : > { %4268 = vmatprep.subr.bf16.mxu0 %v4581_v1 }
 0x172   : > { %4269 = vmatpush3.bf16.msra.mxu0 %v4514_v5  ;;  %v4546_v5 = vld [vmem:[%s5485_s5 + $0x2f0] sm:$0xff]  }
 0x173   : > { %4270 = vmatprep.subr.bf16.mxu0 %v4581_v1 }
 0x176   : > { %4271 = vmatpush3.bf16.msra.mxu0 %v4515_v17  ;;  %v4572_v17 = vld [vmem:[%s4688_s19 + $0x10] sm:$0xf] }
 0x177   : > { %4272 = vmatprep.subr.bf16.mxu0 %v4581_v1  ;;  %v3811_v18 = vcombine.low %v2887_v62, %v4572_v17 }
 0x179   : > { %v2900_v19 = vrot.slane %v3811_v18, 3 }
 0x17a   : > { %4273 = vmatpush3.bf16.msra.mxu0 %v4516_v21 }
 0x17b   : > { %4298 = vmatprep.subr.bf16.mxu0 %v4581_v1  ;;  %v2902_v21 = vsel %vm2654_vm8, %v2900_v19, %v2901_v12 }
 0x17d   : > { %4275 = vmatmul.mubr.msk.bf16.vlgmr.msra.gmra.mxu0 %vm464_vm2, %v2294_v7  ;;  %v4555_v7 = vld [vmem:[%s5485_s5 + $0x330] sm:$0xff]  }
 0x17e   : > { %4306 = vmatprep.mubr.msk.bf16.mxu0 %vm4582_vm0, %v4581_v1  ;;  %4299 = vmatpush3.bf16.msra.mxu0 %v4522_v38 }
 0x17f   : > { %4300 = vmatprep.subr.bf16.mxu0 %v4581_v1 }
 0x182   : > { %4301 = vmatpush3.bf16.msra.mxu0 %v4524_v8  ;;  %v3088_v8 = vshll.u32 %v4563_v34, 16 }
 0x183   : > { %4302 = vmatprep.subr.bf16.mxu0 %v4581_v1 }
 0x186   : > { %4303 = vmatpush3.bf16.msra.mxu0 %v4526_v41  ;;  %v4559_v41 = vld [vmem:[%s5485_s5 + $0x320] sm:$0xff]  }
 0x187   : > { %4304 = vmatprep.subr.bf16.mxu0 %v4581_v1 }
 0x18a   : > { %4305 = vmatpush3.bf16.msra.mxu0 %v4528_v42 }
 0x18b   : > { %4322 = vmatprep.subr.bf16.mxu0 %v4581_v1 }
 0x18d   : > { %4307 = vmatmul.mubr.msk.bf16.vlgmr.msra.gmra.mxu0 %vm464_vm2, %v3755_v46  ;;  %v3090_v46 = vrot.slane %v3088_v8, 2 }
 0x18e   : > { %4330 = vmatprep.mubr.msk.bf16.mxu0 %vm4582_vm0, %v4581_v1  ;;  %4323 = vmatpush3.bf16.msra.mxu0 %v4533_v48 }
 0x18f   : > { %4324 = vmatprep.subr.bf16.mxu0 %v4581_v1 }
 0x192   : > { %4325 = vmatpush3.bf16.msra.mxu0 %v4535_v50 }
 0x193   : > { %4326 = vmatprep.subr.bf16.mxu0 %v4581_v1 }
 0x196   : > { %4327 = vmatpush3.bf16.msra.mxu0 %v4537_v51 }
 0x197   : > { %4328 = vmatprep.subr.bf16.mxu0 %v4581_v1 }
 0x19a   : > { %4329 = vmatpush3.bf16.msra.mxu0 %v4539_v61  ;;  %v3163_v61 = vld [vmem:[%s4688_s19 + $0x18] sm:$0x8] }
 0x19b   : > { %4346 = vmatprep.subr.bf16.mxu0 %v4581_v1 }
 0x19d   : > { %4331 = vmatmul.mubr.msk.bf16.vlgmr.msra.gmra.mxu0 %vm464_vm2, %v3784_v3 }
 0x19e   : > { %4347 = vmatpush3.bf16.msra.mxu0 %v4544_v6  ;;  %4354 = vmatprep.mubr.msk.bf16.mxu0 %vm4582_vm0, %v4581_v1 }
 0x19f   : > { %4348 = vmatprep.subr.bf16.mxu0 %v4581_v1 }
 0x1a2   : > { %4349 = vmatpush3.bf16.msra.mxu0 %v4546_v5 }
 0x1a3   : > { %4350 = vmatprep.subr.bf16.mxu0 %v4581_v1 }
 0x1a6   : > { %4351 = vmatpush3.bf16.msra.mxu0 %v4548_v15 }
 0x1a7   : > { %4352 = vmatprep.subr.bf16.mxu0 %v4581_v1 }
 0x1a9   : > { %v5193_v24 = vpop.f32.mrf.mxu1 }
 0x1aa   : > { %4353 = vmatpush3.bf16.msra.mxu0 %v4550_v16 }
 0x1ab   : > { %v4168_v25 = vpop.f32.mrf.mxu1  ;;  %4370 = vmatprep.subr.bf16.mxu0 %v4581_v1 }
 0x1ad   : > { %v5195_v26 = vpop.f32.mrf.mxu1  ;;  %4355 = vmatmul.mubr.msk.bf16.vlgmr.msra.gmra.mxu0 %vm464_vm2, %v2902_v21 }
 0x1ae   : > { %4371 = vmatpush3.bf16.msra.mxu0 %v4553_v22  ;;  %4378 = vmatprep.mubr.msk.bf16.mxu0 %vm4582_vm0, %v4581_v1 }
 0x1af   : > { %v4169_v28 = vpop.f32.mrf.mxu1  ;;  %4372 = vmatprep.subr.bf16.mxu0 %v4581_v1 }
 0x1b0   : > { %v3056_v28 = vld [vmem:[%s4688_s19 + $0x18] sm:$0xe] }
 0x1b2   : > { %4373 = vmatpush3.bf16.msra.mxu0 %v4555_v7 }
 0x1b3   : > { %4374 = vmatprep.subr.bf16.mxu0 %v4581_v1 }
 0x1b9   : > { %v5197_v29 = vpop.f32.mrf.mxu1 }
 0x1bb   : > { %v4192_v30 = vpop.f32.mrf.mxu1 }
 0x1bc   : > { %v3057_v30 = vld [vmem:[%s4688_s19 + $0x1c] sm:$0xf] }
 0x1bd   : > { %v5199_v31 = vpop.f32.mrf.mxu1  ;;  %v3839_v33 = vcombine.low %v3056_v28, %v3057_v30  ;;  %v3854_v56 = vcombine.low %v3163_v61, %v3057_v30 }
 0x1bf   : > { %v4193_v32 = vpop.f32.mrf.mxu1  ;;  %v3080_v38 = vshll.u32 %v3839_v33, 16 }
 0x1c0   : > { %v4557_v32 = vld [vmem:[%s5485_s5 + $0x328] sm:$0xff]  }
 0x1c1   : > { %4375 = vmatpush3.bf16.msra.mxu0 %v4557_v32  ;;  %v3082_v44 = vrot.slane %v3080_v38, 2 }
 0x1c2   : > { %4376 = vmatprep.subr.bf16.mxu0 %v4581_v1 }
 0x1c5   : > { %4377 = vmatpush3.bf16.msra.mxu0 %v4559_v41 }
 0x1c6   : > { %4394 = vmatprep.subr.bf16.mxu0 %v4581_v1 }
 0x1c9   : > { %v5208_v35 = vpop.f32.mrf.mxu1 }
 0x1cb   : > { %v4216_v37 = vpop.f32.mrf.mxu1 }
 0x1cc   : > { %v3077_v37 = vshrl.u32 %v3839_v33, 16 }
 0x1cd   : > { %v5214_v39 = vpop.f32.mrf.mxu1 }
 0x1ce   : > { %v3079_v42 = vrot.slane %v3077_v37, 1 }
 0x1cf   : > { %v4217_v40 = vpop.f32.mrf.mxu1 }
 0x1d0   : > { %v3085_v40 = vshrl.u32 %v4563_v34, 16  ;;  %v3083_v48 = vor.u32 %v3082_v44, %v3079_v42  ;;  %v4521_v42 = vld [vmem:[%s5485_s5 + $0x278] sm:$0xff]   ;;  %v4530_v44 = vld [vmem:[%s4688_s19 + $0x8] ss:$0 sps:$4 sm:$0x33]  }
 0x1d9   : > { %v5228_v43 = vpop.f32.mrf.mxu1 }
 0x1db   : > { %v4240_v45 = vpop.f32.mrf.mxu1 }
 0x1dc   : > { %v3087_v45 = vrot.slane %v3085_v40, 1  ;;  %v2462_v40 = vld [vmem:[%s4688_s19] sm:$0xe] }
 0x1dd   : > { %v5236_v47 = vpop.f32.mrf.mxu1 }
 0x1df   : > { %v4241_v49 = vpop.f32.mrf.mxu1 }
 0x1e0   : > { %v3091_v49 = vor.u32 %v3090_v46, %v3087_v45  ;;  %v4523_v46 = vld [vmem:[%s5485_s5 + $0x270] sm:$0xff]  }
 0x1e2   : > { %v3092_v51 = vsel %vm422_vm1, %v3083_v48, %v3091_v49 }
 0x1e3   : > { %4379 = vmatmul.mubr.msk.bf16.vlgmr.msra.gmra.mxu0 %vm464_vm2, %v3092_v51  ;;  %v2493_v51 = vshll.u32 %v4530_v44, 16 }
 0x1e4   : > { %4398 = vmatprep.mubr.msk.bf16.mxu0 %vm4582_vm0, %v4581_v1 }
 0x1e5   : > { %v2495_v61 = vrot.slane %v2493_v51, 2 }
 0x1e9   : > { %v5255_v55 = vpop.f32.mrf.mxu1 }
 0x1eb   : > { %v4264_v59 = vpop.f32.mrf.mxu1 }
 0x1ec   : > { %v3180_v59 = vrot.slane %v3854_v56, 3  ;;  %v4527_v56 = vld [vmem:[%s5485_s5 + $0x260] sm:$0xff]  }
 0x1ed   : > { %v5265_v0 = vpop.f32.mrf.mxu1  ;;  %v5269_v4 = vpop.f32.mrf.mxu0 }
 0x1ee   : > { %v5325_v2 = vsel %vm2654_vm8, %v3180_v59, %v3181_v63 }
 0x1ef   : > { %v4265_v10 = vpop.f32.mrf.mxu1  ;;  %v4160_v11 = vpop.f32.mrf.mxu0 }
 0x1f1   : > { %v5278_v13 = vpop.f32.mrf.mxu0 }
 0x1f3   : > { %v4161_v14 = vpop.f32.mrf.mxu0 }
 0x1fd   : > { %v1585_v20 = vpop.f32.mrf.mxu0 }
 0x1fe   : > { %v1673_v5 = vadd.f32 %v5197_v29, %v1585_v20 }
 0x1ff   : > { %v4180_v23 = vpop.f32.mrf.mxu0 }
 0x201   : > { %v1588_v57 = vpop.f32.mrf.mxu0 }
 0x202   : > { %v1676_v62 = vadd.f32 %v5199_v31, %v1588_v57 }
 0x203   : > { %v4181_v25 = vpop.f32.mrf.mxu0 }
 0x20d   : > { %v1775_v50 = vpop.f32.mrf.mxu0 }
 0x20e   : > { %v1782_v14 = vadd.f32 %v1775_v50, %v1673_v5  ;;  %v2490_v50 = vshrl.u32 %v4530_v44, 16  ;;  %v4542_v5 = vld [vmem:[%s5485_s5 + $0x2d8] sm:$0xff]  }
 0x20f   : > { %v4204_v52 = vpop.f32.mrf.mxu0 }
 0x210   : > { %v1877_v17 = vadd.f32 %v5208_v35, %v1782_v14  ;;  %v3722_v35 = vld [vmem:[%s5486_s6 + $0x1] ss:$0 sm:$0xff]  ;;  %v4545_v14 = vld [vmem:[%s5485_s5 + $0x2d0] sm:$0xff]  }
 0x211   : > { %v1778_v53 = vpop.f32.mrf.mxu0 }
 0x212   : > { %v1783_v18 = vadd.f32 %v1778_v53, %v1676_v62  ;;  %v4551_v62 = vld [vmem:[%s5485_s5 + $0x318] sm:$0xff]  }
 0x213   : > { %v4205_v54 = vpop.f32.mrf.mxu0 }
 0x214   : > { %v1878_v22 = vadd.f32 %v5214_v39, %v1783_v18  ;;  %v2492_v54 = vrot.slane %v2490_v50, 1  ;;  %v2973_v18 = vld [vmem:[%s4688_s19 + $0x1c] sm:$0xf] }
 0x216   : > { %v2496_v59 = vor.u32 %v2495_v61, %v2492_v54 }
 0x21d   : > { %v1946_v3 = vpop.f32.mrf.mxu0 }
 0x21e   : > { %v1953_v12 = vadd.f32 %v1946_v3, %v1877_v17  ;;  %v4532_v3 = vld [vmem:[%s5485_s5 + $0x298] sm:$0xff]   ;;  %v4556_v17 = vld [vmem:[%s5485_s5 + $0x308] sm:$0xff]  }
 0x21f   : > { %v4228_v6 = vpop.f32.mrf.mxu0 }
 0x220   : > { %v2053_v23 = vadd.f32 %v5228_v43, %v1953_v12  ;;  %v3724_v43 = vld [vmem:[%s5487_s7 + $0x1] ss:$0 sm:$0xff]  ;;  %v4534_v6 = vld [vmem:[%s5485_s5 + $0x290] sm:$0xff]   ;;  %v4561_v12 = vld [vmem:[%s5485_s5 + $0x358] sm:$0xff]  }
 0x221   : > { %v1949_v10 = vpop.f32.mrf.mxu0 }
 0x222   : > { %v1954_v7 = vadd.f32 %v1949_v10, %v1878_v22  ;;  %v4536_v10 = vld [vmem:[%s5485_s5 + $0x288] sm:$0xff]   ;;  %v4566_v22 = vld [vmem:[%s5485_s5 + $0x340] sm:$0xff]  }
 0x223   : > { %v4229_v11 = vpop.f32.mrf.mxu0 }
 0x224   : > { %v2054_v28 = vadd.f32 %v5236_v47, %v1954_v7  ;;  %v4538_v11 = vld [vmem:[%s5485_s5 + $0x280] sm:$0xff]  }
 0x22d   : > { %v2148_v15 = vpop.f32.mrf.mxu0 }
 0x22e   : > { %v2155_v25 = vadd.f32 %v2148_v15, %v2053_v23  ;;  %v4547_v15 = vld [vmem:[%s5485_s5 + $0x2c8] sm:$0xff]  }
 0x22f   : > { %v4252_v16 = vpop.f32.mrf.mxu0 }
 0x230   : > { %v2259_v29 = vadd.f32 %v5255_v55, %v2155_v25  ;;  %v4554_v16 = vld [vmem:[%s5485_s5 + $0x310] sm:$0xff]  }
 0x231   : > { %v2151_v19 = vpop.f32.mrf.mxu0 }
 0x232   : > { %v2156_v20 = vadd.f32 %v2151_v19, %v2054_v28  ;;  %v3825_v19 = vcombine.low %v5043_v27, %v2973_v18  ;;  %v4565_v27 = vld [vmem:[%s5485_s5 + $0x348] sm:$0xff]  }
 0x233   : > { %v4253_v21 = vpop.f32.mrf.mxu0 }
 0x234   : > { %v2260_v39 = vadd.f32 %v5265_v0, %v2156_v20  ;;  %v3748_v0 = vcombine.low %v2462_v40, %v5231_v9  ;;  %v4525_v9 = vld [vmem:[%s5485_s5 + $0x268] sm:$0xff]   ;;  %v4564_v21 = vld [vmem:[%s5485_s5 + $0x350] sm:$0xff]  }
 0x236   : > { %v2482_v48 = vshrl.u32 %v3748_v0, 16  ;;  %v2485_v49 = vshll.u32 %v3748_v0, 16 }
 0x238   : > { %v2484_v52 = vrot.slane %v2482_v48, 1  ;;  %v2487_v53 = vrot.slane %v2485_v49, 2 }
 0x23a   : > { %v2488_v58 = vor.u32 %v2487_v53, %v2484_v52 }
 0x23c   : > { %v2497_v63 = vsel %vm422_vm1, %v2488_v58, %v2496_v59 }
 0x23d   : > { %v2356_v31 = vpop.f32.mrf.mxu0 }
 0x23e   : > { %v2363_v57 = vadd.f32 %v2356_v31, %v2259_v29 }
 0x23f   : > { %v4276_v30 = vpop.f32.mrf.mxu0 }
 0x240   : > { %v2373_v32 = vmul.f32 %v3722_v35, %v2363_v57 }
 0x241   : > { %v2359_v47 = vpop.f32.mrf.mxu0 }
 0x242   : > { %v2364_v33 = vadd.f32 %v2359_v47, %v2260_v39  ;;  %v2383_v55 = vadd.f32 %v3724_v43, %v2373_v32 }
 0x243   : > { %v4277_v34 = vpop.f32.mrf.mxu0 }
 0x244   : > { %v2374_v37 = vmul.f32 %v3722_v35, %v2364_v33  ;;  %v2385_v8 = vmax.f32 %v2383_v55, 0.0  ;;  %v4570_v55 = vld [vmem:[%s5488_s8 + $0x30] sm:$0xff]  }
 0x246   : > { %v2384_v38 = vadd.f32 %v3724_v43, %v2374_v37  ;;  %v1470_v37 = vadd.f32 %v5193_v24, %v5269_v4 }
 0x248   : > { %v2386_v41 = vmax.f32 %v2384_v38, 0.0 }
 0x24a   : > { %v2387_v45 = vpack.c.bf16 %v2386_v41, %v2385_v8  ;;  %v1473_v41 = vadd.f32 %v5195_v26, %v5278_v13 }
 0x24c   : > { %4283 = vmatmul.mubr.msk.bf16.vlgmr.msra.gmra.mxu1 %vm1375_vm5, %v2387_v45 }
 0x24d   : > { %4287 = vmatpush3.bf16.msra.mxu1 %v4521_v42  ;;  %4294 = vmatprep.mubr.msk.bf16.mxu1 %vm4582_vm0, %v4581_v1  ;;  %v2630_v23 = vpop.f32.mrf.mxu0 }
 0x24e   : > { %4288 = vmatprep.subr.bf16.mxu1 %v4581_v1 }
 0x24f   : > { %v4308_v7 = vpop.f32.mrf.mxu0 }
 0x251   : > { %4289 = vmatpush3.bf16.msra.mxu1 %v4523_v46  ;;  %v2633_v25 = vpop.f32.mrf.mxu0 }
 0x252   : > { %4290 = vmatprep.subr.bf16.mxu1 %v4581_v1 }
 0x253   : > { %v4309_v28 = vpop.f32.mrf.mxu0 }
 0x255   : > { %4291 = vmatpush3.bf16.msra.mxu1 %v4525_v9 }
 0x256   : > { %4292 = vmatprep.subr.bf16.mxu1 %v4581_v1 }
 0x259   : > { %4293 = vmatpush3.bf16.msra.mxu1 %v4527_v56 }
 0x25a   : > { %4310 = vmatprep.subr.bf16.mxu1 %v4581_v1 }
 0x25c   : > { %4295 = vmatmul.mubr.msk.bf16.vlgmr.msra.gmra.mxu1 %vm464_vm2, %v2497_v63 }
 0x25d   : > { %4311 = vmatpush3.bf16.msra.mxu1 %v4532_v3  ;;  %4318 = vmatprep.mubr.msk.bf16.mxu1 %vm4582_vm0, %v4581_v1  ;;  %v2802_v29 = vpop.f32.mrf.mxu0 }
 0x25e   : > { %4312 = vmatprep.subr.bf16.mxu1 %v4581_v1 }
 0x25f   : > { %v4332_v20 = vpop.f32.mrf.mxu0 }
 0x261   : > { %4313 = vmatpush3.bf16.msra.mxu1 %v4534_v6  ;;  %v2805_v31 = vpop.f32.mrf.mxu0 }
 0x262   : > { %4314 = vmatprep.subr.bf16.mxu1 %v4581_v1 }
 0x263   : > { %v4333_v35 = vpop.f32.mrf.mxu0 }
 0x264   : > { %v3872_v35 = vld [vmem:[%s395_s23] ss:$0 sm:$0xff] }
 0x265   : > { %4315 = vmatpush3.bf16.msra.mxu1 %v4536_v10 }
 0x266   : > { %4316 = vmatprep.subr.bf16.mxu1 %v4581_v1 }
 0x269   : > { %4317 = vmatpush3.bf16.msra.mxu1 %v4538_v11 }
 0x26a   : > { %4334 = vmatprep.subr.bf16.mxu1 %v4581_v1 }
 0x26c   : > { %4319 = vmatmul.mubr.msk.bf16.vlgmr.msra.gmra.mxu1 %vm464_vm2, %v5262_v60  ;;  %v4549_v60 = vld [vmem:[%s5485_s5 + $0x2c0] sm:$0xff]  }
 0x26d   : > { %4335 = vmatpush3.bf16.msra.mxu1 %v4542_v5  ;;  %4342 = vmatprep.mubr.msk.bf16.mxu1 %vm4582_vm0, %v4581_v1  ;;  %v2964_v57 = vpop.f32.mrf.mxu0 }
 0x26e   : > { %4336 = vmatprep.subr.bf16.mxu1 %v4581_v1 }
 0x26f   : > { %v4356_v30 = vpop.f32.mrf.mxu0 }
 0x271   : > { %4337 = vmatpush3.bf16.msra.mxu1 %v4545_v14  ;;  %v2967_v39 = vpop.f32.mrf.mxu0 }
 0x272   : > { %4338 = vmatprep.subr.bf16.mxu1 %v4581_v1 }
 0x273   : > { %v4357_v32 = vpop.f32.mrf.mxu0 }
 0x275   : > { %4339 = vmatpush3.bf16.msra.mxu1 %v4547_v15 }
 0x276   : > { %4340 = vmatprep.subr.bf16.mxu1 %v4581_v1 }
 0x279   : > { %4341 = vmatpush3.bf16.msra.mxu1 %v4549_v60 }
 0x27a   : > { %4358 = vmatprep.subr.bf16.mxu1 %v4581_v1 }
 0x27c   : > { %4343 = vmatmul.mubr.msk.bf16.vlgmr.msra.gmra.mxu1 %vm464_vm2, %v4722_v36  ;;  %v4558_v36 = vld [vmem:[%s5485_s5 + $0x300] sm:$0xff]  }
 0x27d   : > { %4359 = vmatpush3.bf16.msra.mxu1 %v4551_v62  ;;  %4366 = vmatprep.mubr.msk.bf16.mxu1 %vm4582_vm0, %v4581_v1 }
 0x27e   : > { %4360 = vmatprep.subr.bf16.mxu1 %v4581_v1 }
 0x281   : > { %4361 = vmatpush3.bf16.msra.mxu1 %v4554_v16 }
 0x282   : > { %4362 = vmatprep.subr.bf16.mxu1 %v4581_v1 }
 0x285   : > { %4363 = vmatpush3.bf16.msra.mxu1 %v4556_v17  ;;  %v3862_v17 = vld [vmem:[%s5486_s6 + $0x2] ss:$0 sm:$0xff] }
 0x286   : > { %4364 = vmatprep.subr.bf16.mxu1 %v4581_v1 }
 0x289   : > { %4365 = vmatpush3.bf16.msra.mxu1 %v4558_v36 }
 0x28a   : > { %4382 = vmatprep.subr.bf16.mxu1 %v4581_v1 }
 0x28c   : > { %4367 = vmatmul.mubr.msk.bf16.vlgmr.msra.gmra.mxu1 %vm464_vm2, %v3825_v19 }
 0x28d   : > { %4383 = vmatpush3.bf16.msra.mxu1 %v4561_v12  ;;  %4390 = vmatprep.mubr.msk.bf16.mxu1 %vm4582_vm0, %v4581_v1 }
 0x28e   : > { %4384 = vmatprep.subr.bf16.mxu1 %v4581_v1 }
 0x291   : > { %4385 = vmatpush3.bf16.msra.mxu1 %v4564_v21  ;;  %v3864_v21 = vld [vmem:[%s5487_s7 + $0x2] ss:$0 sm:$0xff] }
 0x292   : > { %4386 = vmatprep.subr.bf16.mxu1 %v4581_v1 }
 0x295   : > { %4387 = vmatpush3.bf16.msra.mxu1 %v4565_v27 }
 0x296   : > { %4388 = vmatprep.subr.bf16.mxu1 %v4581_v1 }
 0x299   : > { %4389 = vmatpush3.bf16.msra.mxu1 %v4566_v22 }
 0x29c   : > { %4391 = vmatmul.mubr.msk.bf16.vlgmr.msra.gmra.mxu1 %vm464_vm2, %v5325_v2  ;;  %v4569_v2 = vld [vmem:[%s5488_s8 + $0x38] sm:$0xff]  }
 0x29d   : > { %4395 = vmatpush3.bf16.msra.mxu0 %v4569_v2 }
 0x29e   : > { %4396 = vmatprep.subr.bf16.mxu0 %v4581_v1 }
 0x2a1   : > { %4397 = vmatpush3.bf16.msra.mxu0 %v4570_v55 }
 0x2a3   : > { %v3154_v43 = vpop.f32.mrf.mxu0 }
 0x2a5   : > { %v4380_v47 = vpop.f32.mrf.mxu0 }
 0x2a6   : > { %v3874_v47 = vld [vmem:[%s5490_s10] ss:$0 sm:$0xff] }
 0x2a7   : > { %v3157_v33 = vpop.f32.mrf.mxu0 }
 0x2a9   : > { %v4381_v34 = vpop.f32.mrf.mxu0 }
 0x30c   : > { %v2442_v38 = vpop.f32.mrf.mxu1 }
 0x30d   : > { %v2449_v40 = vadd.f32 %v2442_v38, %v1470_v37 }
 0x30e   : > { %v4284_v8 = vpop.f32.mrf.mxu1 }
 0x310   : > { %v2445_v42 = vpop.f32.mrf.mxu1 }
 0x311   : > { %v2450_v0 = vadd.f32 %v2445_v42, %v1473_v41 }
 0x312   : > { %v4285_v44 = vpop.f32.mrf.mxu1 }
 0x31c   : > { %v2559_v45 = vpop.f32.mrf.mxu1 }
 0x31d   : > { %v2631_v54 = vadd.f32 %v2630_v23, %v2559_v45 }
 0x31e   : > { %v4296_v46 = vpop.f32.mrf.mxu1 }
 0x320   : > { %v2562_v1 = vpop.f32.mrf.mxu1 }
 0x321   : > { %v2634_v58 = vadd.f32 %v2633_v25, %v2562_v1 }
 0x322   : > { %v4297_v48 = vpop.f32.mrf.mxu1 }
 0x32c   : > { %v2719_v49 = vpop.f32.mrf.mxu1 }
 0x32d   : > { %v2726_v61 = vadd.f32 %v2719_v49, %v2631_v54 }
 0x32e   : > { %v4320_v50 = vpop.f32.mrf.mxu1 }
 0x32f   : > { %v2809_v13 = vadd.f32 %v2802_v29, %v2726_v61 }
 0x330   : > { %v2722_v51 = vpop.f32.mrf.mxu1 }
 0x331   : > { %v2727_v59 = vadd.f32 %v2722_v51, %v2634_v58 }
 0x332   : > { %v4321_v9 = vpop.f32.mrf.mxu1 }
 0x333   : > { %v2810_v10 = vadd.f32 %v2805_v31, %v2727_v59 }
 0x33c   : > { %v2878_v52 = vpop.f32.mrf.mxu1 }
 0x33d   : > { %v2885_v3 = vadd.f32 %v2878_v52, %v2809_v13 }
 0x33e   : > { %v4344_v53 = vpop.f32.mrf.mxu1 }
 0x33f   : > { %v2971_v11 = vadd.f32 %v2964_v57, %v2885_v3 }
 0x340   : > { %v2881_v24 = vpop.f32.mrf.mxu1 }
 0x341   : > { %v2886_v5 = vadd.f32 %v2881_v24, %v2810_v10 }
 0x342   : > { %v4345_v4 = vpop.f32.mrf.mxu1 }
 0x343   : > { %v2972_v15 = vadd.f32 %v2967_v39, %v2886_v5  ;;  %v3873_v39 = vld [vmem:[%s5489_s9] ss:$0 sm:$0xff] }
 0x34c   : > { %v3047_v56 = vpop.f32.mrf.mxu1 }
 0x34d   : > { %v3054_v14 = vadd.f32 %v3047_v56, %v2971_v11 }
 0x34e   : > { %v4368_v26 = vpop.f32.mrf.mxu1 }
 0x34f   : > { %v3161_v60 = vadd.f32 %v3154_v43, %v3054_v14 }
 0x350   : > { %v3050_v63 = vpop.f32.mrf.mxu1 }
 0x351   : > { %v3055_v62 = vadd.f32 %v3050_v63, %v2972_v15 }
 0x352   : > { %v4369_v6 = vpop.f32.mrf.mxu1 }
 0x353   : > { %v3162_v19 = vadd.f32 %v3157_v33, %v3055_v62 }
 0x35c   : > { %v3244_v16 = vpop.f32.mrf.mxu1 }
 0x35d   : > { %v3251_v36 = vadd.f32 %v3244_v16, %v3161_v60 }
 0x35e   : > { %v4392_v18 = vpop.f32.mrf.mxu1 }
 0x35f   : > { %v3261_v12 = vmul.f32 %v3862_v17, %v3251_v36 }
 0x360   : > { %v3247_v27 = vpop.f32.mrf.mxu1 }
 0x361   : > { %v3252_v22 = vadd.f32 %v3247_v27, %v3162_v19  ;;  %v3271_v7 = vadd.f32 %v3864_v21, %v3261_v12 }
 0x362   : > { %v4393_v23 = vpop.f32.mrf.mxu1 }
 0x363   : > { %v3262_v25 = vmul.f32 %v3862_v17, %v3252_v22  ;;  %v3273_v29 = vmax.f32 %v3271_v7, 0.0 }
 0x365   : > { %v3272_v28 = vadd.f32 %v3864_v21, %v3262_v25 }
 0x367   : > { %v3274_v20 = vmax.f32 %v3272_v28, 0.0 }
 0x369   : > { %v3275_v31 = vpack.c.bf16 %v3274_v20, %v3273_v29 }
 0x36b   : > { %4399 = vmatmul.mubr.msk.bf16.vlgmr.msra.gmra.mxu0 %vm1375_vm5, %v3275_v31 }
 0x42b   : > { %v3330_v57 = vpop.f32.mrf.mxu0 }
 0x42c   : > { %v3337_v30 = vadd.f32 %v3330_v57, %v2449_v40 }
 0x42d   : > { %v4400_v32 = vpop.f32.mrf.mxu0 }
 0x42e   : > { %v3345_v43 = vadd.f32 %v3872_v35, %v3337_v30 }
 0x42f   : > { %v3333_v33 = vpop.f32.mrf.mxu0 }
 0x430   : > { %v3354_v34 = vmul.f32 %v3873_v39, %v3345_v43  ;;  %v3338_v2 = vadd.f32 %v3333_v33, %v2450_v0 }
 0x431   : > { %v4401_v55 = vpop.f32.mrf.mxu0 }
 0x432   : > { %v3363_v37 = vadd.f32 %v3874_v47, %v3354_v34  ;;  %v3346_v38 = vadd.f32 %v3872_v35, %v3338_v2 }
 0x434   : > { %v3365_v8 = vmax.f32 %v3363_v37, 0.0  ;;  %v3355_v41 = vmul.f32 %v3873_v39, %v3346_v38 }
 0x436   : > { %v3880_v40 = vpack.c.bf16 %v3365_v8, %v3365_v8  ;;  %v3364_v42 = vadd.f32 %v3874_v47, %v3355_v41 }
 0x438   : > { %3376 = vst.msk [vmem:[%s400_s30] sm:$0xf] %vm3375_vm9, %v3880_v40  ;;  %v3366_v44 = vmax.f32 %v3364_v42, 0.0 }
 0x43a   : > { %v3881_v45 = vpack.c.bf16 %v3366_v44, %v3366_v44 }
 0x43c   : > { %3377 = vst.msk [vmem:[%s400_s30 + $0x4] sm:$0xf] %vm3375_vm9, %v3881_v45 }
 0x43d PF: > { %s21_s17 = sadd.s32 1, %s4579_s17  }
 0x43e   : > { %p18_p4 = scmp.ge.s32.totalorder %s21_s17, 4  }
 0x440   :  { %20 = sbr.rel (!%p18_p4) target bundleno = 1 (0x1), region = 130 }

// kernel: garment_seg_forward.14
= control target key start
LH: loop header
LB: loop body
LE: loop exit
PB: predicated region body
PF: predicated region fallthrough
CT: control target
= control target key end

     0   :  { %s2651_s15 = smov 0   ;;  %s3297_s0 = inlined_call_operand.vmem [shape: bf16[2,110,76], index: 0, kind: input, shape index: {}]   ;;  %s3298_s1 = inlined_call_operand.vmem [shape: bf16[9,76,64], index: 1, kind: input, shape index: {}]   ;;  %s3299_s2 = inlined_call_operand.vmem [shape: f32[1,64], index: 2, kind: input, shape index: {}]   ;;  %s3300_s3 = inlined_call_operand.vmem [shape: f32[1,64], index: 3, kind: input, shape index: {}]   ;;  %s3301_s4 = inlined_call_operand.vmem [shape: bf16[2,80,64], index: 4, kind: output, shape index: {}]  }
   0x1 LB: > { %s1942_s16 = sadd.s32 4294967295, %s2622_s15   ;;  %p1946_p0 = scmp.ge.s32.totalorder %s2622_s15, 1  ;;  %s2622_s15 = sphi %s2651_s15, %s14_s15  }
   0x2   : > { %p162_p1 = scmp.lt.s32.totalorder %s2622_s15, 3 }
   0x4   : > { %p163_p2 = pnand %p1946_p0, %p162_p1 }
   0x5   : > { %p188_p3 = scmp.lt.s32.totalorder (!%p163_p2), %s1942_s16, 1 }
   0x6   : > { %166 = sbr.rel (%p163_p2) target bundleno = 417 (0x1a1), region = 36 }
   0xb   : > { %vm349_vm0 = vcmask 1045504   ;;  %v2624_v0 = vmov 0.0   ;;  %v2548_v1 = vld [vmem:[%s3298_s1 + $0x48] sm:$0x3f]   ;;  %vm2625_vm1 = vmmov 0   ;;  %v2549_v3 = vld [vmem:[%s3298_s1 + $0x40] sm:$0xff]  }
   0xc   : > { %2256 = vmatprep.subr.bf16.mxu0 %v2624_v0  ;;  %2526 = vmatprep.subr.bf16.mxu1 %v2624_v0  ;;  %v351_v2 = vsel %vm349_vm0, %v2548_v1, 0  ;;  %s3303_s16 = smov (!%p188_p3, %s1942_s16), 1  ;;  %v2550_v4 = vld [vmem:[%s3298_s1 + $0x38] sm:$0xff]   ;;  %v2551_v5 = vld [vmem:[%s3298_s1 + $0x30] sm:$0xff]   ;;  %vm259_vm2 = vsmask.f32 7424 }
   0xd   : > { %2266 = vmatprep.mubr.msk.bf16.mxu0 %vm2625_vm1, %v2624_v0  ;;  %2278 = vmatprep.mubr.msk.bf16.mxu1 %vm2625_vm1, %v2624_v0  ;;  %s2536_s23 = smul.u32 56, %s3303_s16  ;;  %v2552_v10 = vld [vmem:[%s3298_s1 + $0x28] sm:$0xff]   ;;  %vm333_vm3 = vcmask 621568   ;;  %v2557_v16 = vld [vmem:[%s3298_s1 + $0x20] sm:$0x3f]   ;;  %v2559_v37 = vld [vmem:[%s3298_s1 + $0x18] sm:$0xff]  }
   0xe   : > { %2257 = vmatpush3.bf16.msra.mxu0 %v351_v2  ;;  %2531 = vmatpush3.bf16.msra.mxu1 %v351_v2  ;;  %v2558_v23 = vld [vmem:[%s3298_s1 + $0x70] sm:$0x3f]   ;;  %v466_v34 = vsel %vm349_vm0, %v2557_v16, 0  ;;  %v2560_v38 = vld [vmem:[%s3298_s1 + $0x68] sm:$0xff]   ;;  %v2564_v46 = vld [vmem:[%s3298_s1 + $0x60] sm:$0xff]   ;;  %vm556_vm4 = vcmask 1046528  }
   0xf   : > { %2258 = vmatprep.subr.bf16.mxu0 %v2624_v0  ;;  %2527 = vmatprep.subr.bf16.mxu1 %v2624_v0  ;;  %s2688_s28 = scalar_lea.vmem %s3297_s0, %s2536_s23  ;;  %v613_v35 = vsel %vm349_vm0, %v2558_v23, 0  ;;  %v2563_v43 = vld [vmem:[%s3298_s1 + $0x10] sm:$0xff]   ;;  %v2565_v48 = vld [vmem:[%s3298_s1 + $0x8] sm:$0xff]   ;;  %v2566_v50 = vld [vmem:[%s3298_s1 + $0x58] sm:$0xff]   ;;  %vm904_vm5 = vsmask.f32 6400 }
  0x10   : > { %v199_v6 = vld [vmem:[%s2688_s28] sm:$0xf]  ;;  %v2692_v7 = vld [vmem:[%s2688_s28 + $0x4] sm:$0xf]  ;;  %v2698_v9 = vld [vmem:[%s2688_s28 + $0x8] sm:$0xff]   ;;  %vm1650_vm7 = vcmask 1044480  }
  0x11   : > { %v2695_v8 = vcombine.low %v199_v6, %v2692_v7  ;;  %v268_v13 = vshll.u32 %v2698_v9, 16  ;;  %v2709_v14 = vld [vmem:[%s2688_s28 + $0x18] sm:$0xff]   ;;  %v2712_v15 = vld [vmem:[%s2688_s28 + $0x20] sm:$0xff]   ;;  %v2718_v17 = vld [vmem:[%s2688_s28 + $0x10] sm:$0xff]   ;;  %v272_v27 = vshrl.u32 %v2698_v9, 16  ;;  %v558_v58 = vrot.slane %v2698_v9, 1 }
  0x12   : > { %2259 = vmatpush3.bf16.msra.mxu0 %v2549_v3  ;;  %2532 = vmatpush3.bf16.msra.mxu1 %v2549_v3  ;;  %v284_v20 = vshll.u32 %v2709_v14, 16  ;;  %v288_v21 = vshrl.u32 %v2709_v14, 16  ;;  %v292_v22 = vshll.u32 %v2712_v15, 16  ;;  %v2729_v24 = vld [vmem:[%s2688_s28 + $0x28] ss:$0 sps:$4 sm:$0x11]  }
  0x13   : > { %2260 = vmatprep.subr.bf16.mxu0 %v2624_v0  ;;  %2528 = vmatprep.subr.bf16.mxu1 %v2624_v0  ;;  %v261_v11 = vshrl.u32 %v2695_v8, 16  ;;  %v263_v12 = vshll.u32 %v2695_v8, 16  ;;  %v270_v19 = vrot.slane %v268_v13, 1  ;;  %v276_v29 = vshll.u32 %v2718_v17, 16  ;;  %v541_v51 = vld [vmem:[%s2688_s28] sm:$0xe] }
  0x14   : > { %v286_v26 = vrot.slane %v284_v20, 1  ;;  %v294_v28 = vrot.slane %v292_v22, 1  ;;  %v296_v30 = vshrl.u32 %v2712_v15, 16  ;;  %v300_v31 = vshll.u32 %v2729_v24, 16  ;;  %v2567_v53 = vld [vmem:[%s3298_s1] sm:$0xff]   ;;  %v2568_v54 = vld [vmem:[%s3298_s1 + $0x50] sm:$0xff]  }
  0x15   : > { %v265_v18 = vrot.slane %v263_v12, 1  ;;  %v274_v39 = vor.u32 %v272_v27, %v270_v19  ;;  %v278_v40 = vrot.slane %v276_v29, 1  ;;  %v280_v47 = vshrl.u32 %v2718_v17, 16  ;;  %v2569_v56 = vld [vmem:[%s3298_s1 + $0x98] sm:$0x3f]   ;;  %v2572_v63 = vld [vmem:[%s3298_s1 + $0x90] sm:$0xff]  }
  0x16   : > { %2261 = vmatpush3.bf16.msra.mxu0 %v2550_v4  ;;  %2533 = vmatpush3.bf16.msra.mxu1 %v2550_v4  ;;  %v290_v33 = vor.u32 %v288_v21, %v286_v26  ;;  %v298_v41 = vor.u32 %v296_v30, %v294_v28  ;;  %v302_v42 = vrot.slane %v300_v31, 1  ;;  %v1995_v55 = vcombine.low %v541_v51, %v2692_v7  ;;  %v2571_v60 = vld [vmem:[%s3298_s1 + $0xc0] sm:$0x3f]   ;;  %v2573_v2 = vld [vmem:[%s3298_s1 + $0xb8] sm:$0xff]   ;;  %v2574_v4 = vld [vmem:[%s3298_s1 + $0x88] sm:$0xff]   ;;  %s2537_s21 = smul.u32 40, %s3303_s16 }
  0x17   : > { %2262 = vmatprep.subr.bf16.mxu0 %v2624_v0  ;;  %2529 = vmatprep.subr.bf16.mxu1 %v2624_v0  ;;  %v266_v25 = vor.u32 %v265_v18, %v261_v11  ;;  %v279_v44 = vsel %vm259_vm2, %v274_v39, %v278_v40  ;;  %v282_v49 = vor.u32 %v280_v47, %v278_v40  ;;  %v804_v59 = vsel %vm349_vm0, %v2569_v56, 0  ;;  %v2822_v3 = vld [vmem:[%s2688_s28 + $0x24] sm:$0xff]   ;;  %v2575_v7 = vld [vmem:[%s3298_s1 + $0xb0] sm:$0xff]   ;;  %v2578_v16 = vld [vmem:[%s3298_s1 + $0x78] sm:$0xff]  }
  0x18   : > { %v295_v36 = vsel %vm259_vm2, %v290_v33, %v294_v28  ;;  %v303_v45 = vsel %vm259_vm2, %v298_v41, %v302_v42  ;;  %v557_v57 = vrot.slane %v1995_v55, 1  ;;  %v1003_v62 = vsel %vm349_vm0, %v2571_v60, 0  ;;  %v2577_v13 = vld [vmem:[%s3298_s1 + $0xa8] sm:$0xff]   ;;  %v698_v20 = vld [vmem:[%s2688_s28 + $0x4] sm:$0xe]  ;;  %v2588_v56 = vld [vmem:[%s3298_s1 + $0xd8] sm:$0xff]   ;;  %s3237_s24 = scalar_lea.vmem %s3301_s4, %s2537_s21 }
  0x19   : > { %v271_v32 = vsel %vm259_vm2, %v266_v25, %v270_v19  ;;  %v287_v52 = vsel %vm259_vm2, %v282_v49, %v286_v26  ;;  %v560_v1 = vrot.slane %v2718_v17, 1  ;;  %v562_v12 = vrot.slane %v2709_v14, 1  ;;  %v2579_v19 = vld [vmem:[%s3298_s1 + $0xa0] sm:$0xff]   ;;  %v2877_v21 = vld [vmem:[%s2688_s28 + $0x8] sm:$0xf]  ;;  %v2887_v25 = vld [vmem:[%s2688_s28 + $0xc] sm:$0xff]  }
  0x1a   : > { %2263 = vmatpush3.bf16.msra.mxu0 %v2551_v5  ;;  %2534 = vmatpush3.bf16.msra.mxu1 %v2551_v5  ;;  %v559_v61 = vsel %vm556_vm4, %v557_v57, %v558_v58  ;;  %v2593_v5 = vld [vmem:[%s2688_s28 + $0x2c] ss:$0 sps:$4 sm:$0x11]   ;;  %v2016_v23 = vcombine.low %v698_v20, %v2877_v21  ;;  %v566_v26 = vrot.slane %v2729_v24, 1  ;;  %v917_v29 = vshll.u32 %v2887_v25, 16 }
  0x1b   : > { %2264 = vmatprep.subr.bf16.mxu0 %v2624_v0  ;;  %2530 = vmatprep.subr.bf16.mxu1 %v2624_v0  ;;  %v561_v6 = vsel %vm556_vm4, %v558_v58, %v560_v1  ;;  %v563_v18 = vsel %vm556_vm4, %v560_v1, %v562_v12  ;;  %vm1451_vm6 = vsmask.f32 5376  ;;  %vm1876_vm8 = vcmask 519168  }
  0x1c   : > { %v906_v27 = vshrl.u32 %v2016_v23, 16  ;;  %v909_v28 = vshll.u32 %v2016_v23, 16  ;;  %v748_v31 = vrot.slane %v2016_v23, 1  ;;  %v1088_v23 = vld [vmem:[%s2688_s28 + $0x4] sm:$0xc] }
  0x1e   : > { %2265 = vmatpush3.bf16.msra.mxu0 %v2552_v10  ;;  %2535 = vmatpush3.bf16.msra.mxu1 %v2552_v10  ;;  %v757_v10 = vrot.slane %v2593_v5, 1  ;;  %v908_v24 = vrot.slane %v906_v27, 1  ;;  %v911_v33 = vrot.slane %v909_v28, 2  ;;  %v2592_v5 = vld [vmem:[%s3298_s1 + $0xf8] sm:$0xff]   ;;  %v2063_v27 = vcombine.low %v1088_v23, %v2877_v21  ;;  %v1245_v28 = vld [vmem:[%s2688_s28 + $0x8] sm:$0xc] }
  0x1f   : > { %2286 = vmatprep.subr.bf16.mxu1 %v2624_v0  ;;  %2316 = vmatprep.subr.bf16.mxu0 %v2624_v0  ;;  %v2598_v21 = vld [vmem:[%s3298_s1 + $0x138] sm:$0x3f]  }
  0x21   : > { %2267 = vmatmul.mubr.msk.bf16.vlgmr.msra.gmra.mxu0 %vm333_vm3, %v271_v32  ;;  %2279 = vmatmul.mubr.msk.bf16.vlgmr.msra.gmra.mxu1 %vm333_vm3, %v295_v36  ;;  %v749_v32 = vrot.slane %v2887_v25, 1  ;;  %v2902_v36 = vld [vmem:[%s2688_s28 + $0x14] sm:$0xff]  }
  0x22   : > { %2287 = vmatpush3.bf16.msra.mxu1 %v466_v34  ;;  %2317 = vmatpush3.bf16.msra.mxu0 %v613_v35  ;;  %v919_v35 = vrot.slane %v917_v29, 2  ;;  %v923_v40 = vshrl.u32 %v2902_v36, 16  ;;  %v926_v41 = vshll.u32 %v2902_v36, 16 }
  0x23   : > { %2288 = vmatprep.subr.bf16.mxu1 %v2624_v0  ;;  %2318 = vmatprep.subr.bf16.mxu0 %v2624_v0 }
  0x24   : > { %2270 = vmatprep.mubr.msk.bf16.mxu0 %vm2625_vm1, %v2624_v0  ;;  %2282 = vmatprep.mubr.msk.bf16.mxu1 %vm2625_vm1, %v2624_v0  ;;  %v928_v47 = vrot.slane %v926_v41, 2 }
  0x26   : > { %2289 = vmatpush3.bf16.msra.mxu1 %v2559_v37  ;;  %2319 = vmatpush3.bf16.msra.mxu0 %v2560_v38  ;;  %v2582_v37 = vld [vmem:[%s3298_s1 + $0xe8] sm:$0x3f]   ;;  %v912_v38 = vor.u32 %v911_v33, %v908_v24  ;;  %v3015_v24 = vld [vmem:[%s2688_s28 + $0x10] sm:$0xff]  }
  0x27   : > { %2290 = vmatprep.subr.bf16.mxu1 %v2624_v0  ;;  %2320 = vmatprep.subr.bf16.mxu0 %v2624_v0  ;;  %v1160_v42 = vsel %vm349_vm0, %v2582_v37, 0 }
  0x29   : > { %2271 = vmatmul.mubr.msk.bf16.gmra.mxu0 %vm333_vm3, %v279_v44  ;;  %2283 = vmatmul.mubr.msk.bf16.gmra.mxu1 %vm333_vm3, %v303_v45  ;;  %v751_v45 = vrot.slane %v2902_v36, 1 }
  0x2a   : > { %2291 = vmatpush3.bf16.msra.mxu1 %v2563_v43  ;;  %2321 = vmatpush3.bf16.msra.mxu0 %v2564_v46  ;;  %v2583_v43 = vld [vmem:[%s3298_s1 + $0x110] sm:$0x3f]   ;;  %v925_v46 = vrot.slane %v923_v40, 1 }
  0x2b   : > { %2292 = vmatprep.subr.bf16.mxu1 %v2624_v0  ;;  %2274 = vmatprep.mubr.msk.bf16.mxu0 %vm2625_vm1, %v2624_v0  ;;  %v1351_v49 = vsel %vm349_vm0, %v2583_v43, 0  ;;  %v752_v51 = vsel %vm556_vm4, %v749_v32, %v751_v45  ;;  %v2602_v40 = vld [vmem:[%s3298_s1 + $0x130] sm:$0xff]   ;;  %v2605_v43 = vld [vmem:[%s3298_s1 + $0x128] sm:$0xff]  }
  0x2c   : > { %2322 = vmatprep.subr.bf16.mxu0 %v2624_v0  ;;  %2296 = vmatprep.mubr.msk.bf16.mxu1 %vm2625_vm1, %v2624_v0 }
  0x2e   : > { %2293 = vmatpush3.bf16.msra.mxu1 %v2565_v48  ;;  %2323 = vmatpush3.bf16.msra.mxu0 %v2566_v50  ;;  %v2923_v48 = vld [vmem:[%s2688_s28 + $0x1c] sm:$0xff]  }
  0x2f   : > { %2294 = vmatprep.subr.bf16.mxu1 %v2624_v0  ;;  %2324 = vmatprep.subr.bf16.mxu0 %v2624_v0  ;;  %v2585_v50 = vld [vmem:[%s3298_s1 + $0xe0] sm:$0xff]   ;;  %v935_v55 = vshll.u32 %v2923_v48, 16  ;;  %v753_v58 = vrot.slane %v2923_v48, 1 }
  0x31   : > { %2275 = vmatmul.mubr.msk.bf16.gmra.mxu0 %vm333_vm3, %v287_v52  ;;  %v929_v52 = vor.u32 %v928_v47, %v925_v46  ;;  %v937_v60 = vrot.slane %v935_v55, 2  ;;  %v3062_v46 = vld [vmem:[%s2688_s28 + $0x20] sm:$0xff]   ;;  %v2607_v47 = vld [vmem:[%s3298_s1 + $0x150] sm:$0xff]   ;;  %v3091_v55 = vld [vmem:[%s2688_s28 + $0x28] sm:$0xff]  }
  0x32   : > { %2295 = vmatpush3.bf16.msra.mxu1 %v2567_v53  ;;  %2325 = vmatpush3.bf16.msra.mxu0 %v2568_v54  ;;  %v2586_v53 = vld [vmem:[%s3298_s1 + $0x108] sm:$0xff]   ;;  %v932_v54 = vshrl.u32 %v2923_v48, 16 }
  0x33   : > { %2346 = vmatprep.subr.bf16.mxu1 %v2624_v0  ;;  %2326 = vmatprep.mubr.msk.bf16.mxu0 %vm2625_vm1, %v2624_v0 }
  0x34   : > { %2376 = vmatprep.subr.bf16.mxu0 %v2624_v0 }
  0x35   : > { %2297 = vmatmul.mubr.msk.bf16.vlgmr.msra.gmra.mxu1 %vm333_vm3, %v2695_v8  ;;  %v755_v8 = vrot.slane %v2822_v3, 1 }
  0x36   : > { %2347 = vmatpush3.bf16.msra.mxu1 %v804_v59  ;;  %2300 = vmatprep.mubr.msk.bf16.mxu1 %vm2625_vm1, %v2624_v0  ;;  %v934_v59 = vrot.slane %v932_v54, 1  ;;  %v1111_v54 = vrot.slane %v2822_v3, 2 }
  0x37   : > { %2348 = vmatprep.subr.bf16.mxu1 %v2624_v0  ;;  %v2847_v11 = vsel %vm556_vm4, %v755_v8, %v757_v10 }
  0x38   : > { %v938_v1 = vor.u32 %v937_v60, %v934_v59 }
  0x39   : > { %2327 = vmatmul.mubr.msk.bf16.vlgmr.msra.gmra.mxu0 %vm333_vm3, %v559_v61  ;;  %v2589_v61 = vld [vmem:[%s3298_s1 + $0x100] sm:$0xff]  }
  0x3a   : > { %2377 = vmatpush3.bf16.msra.mxu0 %v1003_v62  ;;  %2330 = vmatprep.mubr.msk.bf16.mxu0 %vm2625_vm1, %v2624_v0  ;;  %v2591_v62 = vld [vmem:[%s3298_s1 + $0xd0] sm:$0xff]  }
  0x3b   : > { %2349 = vmatpush3.bf16.msra.mxu1 %v2572_v63  ;;  %2378 = vmatprep.subr.bf16.mxu0 %v2624_v0  ;;  %v754_v63 = vsel %vm556_vm4, %v751_v45, %v753_v58  ;;  %v1109_v45 = vrot.slane %v2923_v48, 2 }
  0x3c   : > { %2350 = vmatprep.subr.bf16.mxu1 %v2624_v0 }
  0x3d   : > { %2301 = vmatmul.mubr.msk.bf16.gmra.mxu1 %vm333_vm3, %v2698_v9  ;;  %v2576_v9 = vld [vmem:[%s3298_s1 + $0x80] sm:$0xff]  }
  0x3e   : > { %2379 = vmatpush3.bf16.msra.mxu0 %v2573_v2  ;;  %2304 = vmatprep.mubr.msk.bf16.mxu1 %vm2625_vm1, %v2624_v0  ;;  %v941_v2 = vshrl.u32 %v2822_v3, 16 }
  0x3f   : > { %2351 = vmatpush3.bf16.msra.mxu1 %v2574_v4  ;;  %2380 = vmatprep.subr.bf16.mxu0 %v2624_v0  ;;  %v944_v4 = vshll.u32 %v2822_v3, 16  ;;  %v1302_v3 = vrot.slane %v3091_v55, 2 }
  0x40   : > { %2352 = vmatprep.subr.bf16.mxu1 %v2624_v0  ;;  %v943_v10 = vrot.slane %v941_v2, 1 }
  0x41   : > { %2331 = vmatmul.mubr.msk.bf16.gmra.mxu0 %vm333_vm3, %v561_v6  ;;  %v2594_v6 = vld [vmem:[%s3298_s1 + $0xc8] sm:$0xff]  }
  0x42   : > { %2334 = vmatprep.mubr.msk.bf16.mxu0 %vm2625_vm1, %v2624_v0  ;;  %2381 = vmatpush3.bf16.msra.mxu0 %v2575_v7  ;;  %v939_v7 = vsel %vm904_vm5, %v929_v52, %v938_v1 }
  0x43   : > { %2353 = vmatpush3.bf16.msra.mxu1 %v2576_v9  ;;  %2382 = vmatprep.subr.bf16.mxu0 %v2624_v0  ;;  %v946_v9 = vrot.slane %v944_v4, 2 }
  0x44   : > { %2354 = vmatprep.subr.bf16.mxu1 %v2624_v0 }
  0x45   : > { %2305 = vmatmul.mubr.msk.bf16.gmra.mxu1 %vm333_vm3, %v2718_v17  ;;  %v564_v17 = vrot.slane %v2712_v15, 1 }
  0x46   : > { %2308 = vmatprep.mubr.msk.bf16.mxu1 %vm2625_vm1, %v2624_v0  ;;  %2383 = vmatpush3.bf16.msra.mxu0 %v2577_v13  ;;  %v2596_v13 = vld [vmem:[%s3298_s1 + $0xf0] sm:$0xff]  }
  0x47   : > { %2355 = vmatpush3.bf16.msra.mxu1 %v2578_v16  ;;  %2384 = vmatprep.subr.bf16.mxu0 %v2624_v0  ;;  %v565_v22 = vsel %vm556_vm4, %v562_v12, %v564_v17  ;;  %v567_v30 = vsel %vm556_vm4, %v564_v17, %v566_v26  ;;  %v2976_v12 = vld [vmem:[%s2688_s28 + $0x2c] ss:$0 sps:$4 sm:$0x33]   ;;  %v756_v16 = vsel %vm556_vm4, %v753_v58, %v755_v8 }
  0x48   : > { %2406 = vmatprep.subr.bf16.mxu1 %v2624_v0  ;;  %v953_v17 = vshll.u32 %v2976_v12, 16 }
  0x49   : > { %2335 = vmatmul.mubr.msk.bf16.gmra.mxu0 %vm333_vm3, %v563_v18  ;;  %v947_v18 = vor.u32 %v946_v9, %v943_v10  ;;  %v1635_v9 = vld [vmem:[%s2688_s28 + $0x8] sm:$0x8] }
  0x4a   : > { %2338 = vmatprep.mubr.msk.bf16.mxu0 %vm2625_vm1, %v2624_v0  ;;  %2385 = vmatpush3.bf16.msra.mxu0 %v2579_v19  ;;  %v950_v19 = vshrl.u32 %v2976_v12, 16 }
  0x4b   : > { %2436 = vmatprep.subr.bf16.mxu0 %v2624_v0  ;;  %v948_v20 = vsel %vm904_vm5, %v938_v1, %v947_v18  ;;  %v1464_v1 = vshll.u32 %v3015_v24, 16 }
  0x4c   : > { %v952_v8 = vrot.slane %v950_v19, 1 }
  0x4d   : > { %2309 = vmatmul.mubr.msk.bf16.gmra.mxu1 %vm333_vm3, %v2709_v14  ;;  %v914_v14 = vshrl.u32 %v2887_v25, 16  ;;  %v1466_v10 = vrot.slane %v1464_v1, 3 }
  0x4e   : > { %2312 = vmatprep.mubr.msk.bf16.mxu1 %vm2625_vm1, %v2624_v0 }
  0x4f   : > { %v916_v34 = vrot.slane %v914_v14, 1  ;;  %v3003_v14 = vld [vmem:[%s2688_s28 + $0xc] sm:$0xf] }
  0x50   : > { %v2131_v19 = vcombine.low %v1635_v9, %v3003_v14 }
  0x51   : > { %2339 = vmatmul.mubr.msk.bf16.gmra.mxu0 %vm333_vm3, %v565_v22  ;;  %v920_v39 = vor.u32 %v919_v35, %v916_v34  ;;  %v955_v22 = vrot.slane %v953_v17, 2  ;;  %v1550_v34 = vsel %vm349_vm0, %v2598_v21, 0  ;;  %v2601_v35 = vld [vmem:[%s3298_s1 + $0x160] sm:$0x3f]  }
  0x52   : > { %2342 = vmatprep.mubr.msk.bf16.mxu0 %vm2625_vm1, %v2624_v0 }
  0x53   : > { %v921_v44 = vsel %vm904_vm5, %v912_v38, %v920_v39  ;;  %v930_v57 = vsel %vm904_vm5, %v920_v39, %v929_v52  ;;  %v956_v26 = vor.u32 %v955_v22, %v952_v8  ;;  %v3036_v38 = vld [vmem:[%s2688_s28 + $0x18] sm:$0xff]   ;;  %v1707_v39 = vsel %vm349_vm0, %v2601_v35, 0 }
  0x54   : > { %v2611_v52 = vld [vmem:[%s3298_s1 + $0x118] sm:$0xff]   ;;  %v1473_v17 = vshll.u32 %v3036_v38, 16  ;;  %v1651_v22 = vrot.slane %v2131_v19, 3  ;;  %v1656_v35 = vrot.slane %v3062_v46, 3 }
  0x55   : > { %2313 = vmatmul.mubr.msk.bf16.gmra.mxu1 %vm333_vm3, %v2712_v15  ;;  %v750_v15 = vsel %vm556_vm4, %v748_v31, %v749_v32  ;;  %v957_v29 = vsel %vm904_vm5, %v947_v18, %v956_v26  ;;  %v1105_v31 = vrot.slane %v2887_v25, 2  ;;  %v3012_v32 = vcombine.low %v1245_v28, %v3003_v14 }
  0x56   : > { %2356 = vmatprep.mubr.msk.bf16.mxu1 %vm2625_vm1, %v2624_v0  ;;  %v1296_v25 = vrot.slane %v3015_v24, 2  ;;  %v1475_v26 = vrot.slane %v1473_v17, 3  ;;  %v1479_v14 = vshrl.u32 %v3062_v46, 16 }
  0x57   : > { %v1295_v33 = vrot.slane %v3012_v32, 2  ;;  %v1453_v58 = vshrl.u32 %v3012_v32, 16  ;;  %v1456_v59 = vshll.u32 %v3012_v32, 16 }
  0x58   : > { %v1481_v32 = vrot.slane %v1479_v14, 2 }
  0x59   : > { %2343 = vmatmul.mubr.msk.bf16.gmra.mxu0 %vm333_vm3, %v567_v30  ;;  %v1104_v30 = vrot.slane %v2063_v27, 2  ;;  %v1297_v37 = vsel %vm349_vm0, %v1295_v33, %v1296_v25  ;;  %v1455_v2 = vrot.slane %v1453_v58, 2  ;;  %v1458_v4 = vrot.slane %v1456_v59, 3 }
  0x5a   : > { %2386 = vmatprep.mubr.msk.bf16.mxu0 %vm2625_vm1, %v2624_v0  ;;  %v1488_v33 = vshrl.u32 %v3091_v55, 16 }
  0x5d   : > { %2357 = vmatmul.mubr.msk.bf16.vlgmr.msra.gmra.mxu1 %vm333_vm3, %v750_v15  ;;  %v1107_v15 = vrot.slane %v2902_v36, 2  ;;  %v1298_v36 = vrot.slane %v3036_v38, 2 }
  0x5e   : > { %2407 = vmatpush3.bf16.msra.mxu1 %v1160_v42  ;;  %2360 = vmatprep.mubr.msk.bf16.mxu1 %vm2625_vm1, %v2624_v0  ;;  %v2604_v42 = vld [vmem:[%s3298_s1 + $0x158] sm:$0xff]  }
  0x5f   : > { %2408 = vmatprep.subr.bf16.mxu1 %v2624_v0  ;;  %v1108_v41 = vsel %vm349_vm0, %v1105_v31, %v1107_v15  ;;  %v1110_v48 = vsel %vm349_vm0, %v1107_v15, %v1109_v45 }
  0x61   : > { %2387 = vmatmul.mubr.msk.bf16.vlgmr.msra.gmra.mxu0 %vm333_vm3, %v921_v44  ;;  %v1299_v44 = vsel %vm349_vm0, %v1296_v25, %v1298_v36  ;;  %v1491_v25 = vshll.u32 %v3091_v55, 16 }
  0x62   : > { %2437 = vmatpush3.bf16.msra.mxu0 %v1351_v49  ;;  %2390 = vmatprep.mubr.msk.bf16.mxu0 %vm2625_vm1, %v2624_v0  ;;  %v2608_v49 = vld [vmem:[%s3298_s1 + $0x120] sm:$0xff]  }
  0x63   : > { %2409 = vmatpush3.bf16.msra.mxu1 %v2585_v50  ;;  %2438 = vmatprep.subr.bf16.mxu0 %v2624_v0  ;;  %v1300_v50 = vrot.slane %v3062_v46, 2  ;;  %v1493_v15 = vrot.slane %v1491_v25, 3 }
  0x64   : > { %2410 = vmatprep.subr.bf16.mxu1 %v2624_v0 }
  0x65   : > { %2361 = vmatmul.mubr.msk.bf16.gmra.mxu1 %vm333_vm3, %v752_v51  ;;  %v2610_v51 = vld [vmem:[%s3298_s1 + $0x148] sm:$0xff]   ;;  %v1303_v60 = vsel %vm349_vm0, %v1300_v50, %v1302_v3 }
  0x66   : > { %2439 = vmatpush3.bf16.msra.mxu0 %v2586_v53  ;;  %2364 = vmatprep.mubr.msk.bf16.mxu1 %vm2625_vm1, %v2624_v0  ;;  %v1301_v53 = vsel %vm349_vm0, %v1298_v36, %v1300_v50 }
  0x67   : > { %2411 = vmatpush3.bf16.msra.mxu1 %v2588_v56  ;;  %2440 = vmatprep.subr.bf16.mxu0 %v2624_v0  ;;  %v2613_v56 = vld [vmem:[%s3298_s1 + $0x140] sm:$0xff]  }
  0x68   : > { %2412 = vmatprep.subr.bf16.mxu1 %v2624_v0 }
  0x69   : > { %2391 = vmatmul.mubr.msk.bf16.gmra.mxu0 %vm333_vm3, %v930_v57  ;;  %v1112_v57 = vsel %vm349_vm0, %v1109_v45, %v1111_v54 }
  0x6a   : > { %2394 = vmatprep.mubr.msk.bf16.mxu0 %vm2625_vm1, %v2624_v0  ;;  %2441 = vmatpush3.bf16.msra.mxu0 %v2589_v61  ;;  %v1113_v61 = vrot.slane %v2976_v12, 2  ;;  %v1459_v12 = vor.u32 %v1458_v4, %v1455_v2 }
  0x6b   : > { %2413 = vmatpush3.bf16.msra.mxu1 %v2591_v62  ;;  %2442 = vmatprep.subr.bf16.mxu0 %v2624_v0  ;;  %v2612_v62 = vld [vmem:[%s2688_s28 + $0x30] ss:$0 sps:$4 sm:$0x33]  }
  0x6c   : > { %2414 = vmatprep.subr.bf16.mxu1 %v2624_v0 }
  0x6d   : > { %2365 = vmatmul.mubr.msk.bf16.gmra.mxu1 %vm333_vm3, %v754_v63  ;;  %v1461_v63 = vshrl.u32 %v3015_v24, 16 }
  0x6e   : > { %2368 = vmatprep.mubr.msk.bf16.mxu1 %vm2625_vm1, %v2624_v0  ;;  %2443 = vmatpush3.bf16.msra.mxu0 %v2592_v5  ;;  %v1114_v5 = vsel %vm349_vm0, %v1111_v54, %v1113_v61 }
  0x6f   : > { %2415 = vmatpush3.bf16.msra.mxu1 %v2594_v6  ;;  %2444 = vmatprep.subr.bf16.mxu0 %v2624_v0  ;;  %v1304_v6 = vrot.slane %v2612_v62, 2 }
  0x70   : > { %2466 = vmatprep.subr.bf16.mxu1 %v2624_v0 }
  0x71   : > { %2395 = vmatmul.mubr.msk.bf16.gmra.mxu0 %vm333_vm3, %v939_v7  ;;  %v1463_v7 = vrot.slane %v1461_v63, 2 }
  0x72   : > { %2398 = vmatprep.mubr.msk.bf16.mxu0 %vm2625_vm1, %v2624_v0  ;;  %2445 = vmatpush3.bf16.msra.mxu0 %v2596_v13  ;;  %v1470_v13 = vshrl.u32 %v3036_v38, 16 }
  0x73   : > { %2496 = vmatprep.subr.bf16.mxu0 %v2624_v0  ;;  %v1467_v18 = vor.u32 %v1466_v10, %v1463_v7 }
  0x74   : > { %v1472_v23 = vrot.slane %v1470_v13, 2 }
  0x75   : > { %2369 = vmatmul.mubr.msk.bf16.gmra.mxu1 %vm333_vm3, %v756_v16  ;;  %v1305_v16 = vsel %vm349_vm0, %v1302_v3, %v1304_v6  ;;  %v1468_v8 = vsel %vm1451_vm6, %v1459_v12, %v1467_v18 }
  0x76   : > { %2372 = vmatprep.mubr.msk.bf16.mxu1 %vm2625_vm1, %v2624_v0  ;;  %v1476_v28 = vor.u32 %v1475_v26, %v1472_v23 }
  0x79   : > { %2399 = vmatmul.mubr.msk.bf16.gmra.mxu0 %vm333_vm3, %v948_v20  ;;  %v1652_v20 = vrot.slane %v3015_v24, 3 }
  0x7a   : > { %2402 = vmatprep.mubr.msk.bf16.mxu0 %vm2625_vm1, %v2624_v0 }
  0x7b   : > { %v1653_v27 = vsel %vm1650_vm7, %v1651_v22, %v1652_v20 }
  0x7d   : > { %2373 = vmatmul.mubr.msk.bf16.gmra.mxu1 %vm333_vm3, %v2847_v11  ;;  %v1106_v11 = vsel %vm349_vm0, %v1104_v30, %v1105_v31  ;;  %v1477_v30 = vsel %vm1451_vm6, %v1467_v18, %v1476_v28  ;;  %v1654_v31 = vrot.slane %v3036_v38, 3  ;;  %v2615_v38 = vld [vmem:[%s2688_s28 + $0x30] ss:$0 sps:$4 sm:$0x77]  }
  0x7e   : > { %2416 = vmatprep.mubr.msk.bf16.mxu1 %vm2625_vm1, %v2624_v0  ;;  %v1500_v36 = vshll.u32 %v2615_v38, 16 }
  0x7f   : > { %v1655_v21 = vsel %vm1650_vm7, %v1652_v20, %v1654_v31 }
  0x80   : > { %v1502_v45 = vrot.slane %v1500_v36, 3 }
  0x81   : > { %2403 = vmatmul.mubr.msk.bf16.gmra.mxu0 %vm333_vm3, %v957_v29  ;;  %v1482_v29 = vshll.u32 %v3062_v46, 16 }
  0x82   : > { %2446 = vmatprep.mubr.msk.bf16.mxu0 %vm2625_vm1, %v2624_v0 }
  0x83   : > { %v1484_v24 = vrot.slane %v1482_v29, 3 }
  0x85   : > { %2417 = vmatmul.mubr.msk.bf16.vlgmr.msra.gmra.mxu1 %vm333_vm3, %v1106_v11  ;;  %v1485_v11 = vor.u32 %v1484_v24, %v1481_v32 }
  0x86   : > { %2467 = vmatpush3.bf16.msra.mxu1 %v1550_v34  ;;  %2420 = vmatprep.mubr.msk.bf16.mxu1 %vm2625_vm1, %v2624_v0 }
  0x87   : > { %2468 = vmatprep.subr.bf16.mxu1 %v2624_v0  ;;  %v1486_v34 = vsel %vm1451_vm6, %v1476_v28, %v1485_v11 }
  0x89   : > { %2447 = vmatmul.mubr.msk.bf16.vlgmr.msra.gmra.mxu0 %vm333_vm3, %v1297_v37  ;;  %v1490_v37 = vrot.slane %v1488_v33, 2 }
  0x8a   : > { %2497 = vmatpush3.bf16.msra.mxu0 %v1707_v39  ;;  %2450 = vmatprep.mubr.msk.bf16.mxu0 %vm2625_vm1, %v2624_v0  ;;  %v1657_v39 = vsel %vm1650_vm7, %v1654_v31, %v1656_v35 }
  0x8b   : > { %2469 = vmatpush3.bf16.msra.mxu1 %v2602_v40  ;;  %2498 = vmatprep.subr.bf16.mxu0 %v2624_v0  ;;  %v1494_v40 = vor.u32 %v1493_v15, %v1490_v37 }
  0x8c   : > { %2470 = vmatprep.subr.bf16.mxu1 %v2624_v0 }
  0x8d   : > { %2421 = vmatmul.mubr.msk.bf16.gmra.mxu1 %vm333_vm3, %v1108_v41  ;;  %v1497_v41 = vshrl.u32 %v2615_v38, 16 }
  0x8e   : > { %2499 = vmatpush3.bf16.msra.mxu0 %v2604_v42  ;;  %2424 = vmatprep.mubr.msk.bf16.mxu1 %vm2625_vm1, %v2624_v0  ;;  %v1495_v42 = vsel %vm1451_vm6, %v1485_v11, %v1494_v40 }
  0x8f   : > { %2471 = vmatpush3.bf16.msra.mxu1 %v2605_v43  ;;  %2500 = vmatprep.subr.bf16.mxu0 %v2624_v0  ;;  %v1658_v43 = vrot.slane %v3091_v55, 3 }
  0x90   : > { %2472 = vmatprep.subr.bf16.mxu1 %v2624_v0 }
  0x91   : > { %2451 = vmatmul.mubr.msk.bf16.gmra.mxu0 %vm333_vm3, %v1299_v44  ;;  %v1499_v44 = vrot.slane %v1497_v41, 2  ;;  %v1659_v46 = vsel %vm1650_vm7, %v1656_v35, %v1658_v43 }
  0x92   : > { %2454 = vmatprep.mubr.msk.bf16.mxu0 %vm2625_vm1, %v2624_v0  ;;  %2501 = vmatpush3.bf16.msra.mxu0 %v2607_v47 }
  0x93   : > { %2473 = vmatpush3.bf16.msra.mxu1 %v2608_v49  ;;  %2502 = vmatprep.subr.bf16.mxu0 %v2624_v0  ;;  %v1503_v47 = vor.u32 %v1502_v45, %v1499_v44 }
  0x94   : > { %2474 = vmatprep.subr.bf16.mxu1 %v2624_v0 }
  0x95   : > { %2425 = vmatmul.mubr.msk.bf16.gmra.mxu1 %vm333_vm3, %v1110_v48  ;;  %v1504_v49 = vsel %vm1451_vm6, %v1494_v40, %v1503_v47  ;;  %v1660_v48 = vrot.slane %v2615_v38, 3 }
  0x96   : > { %2428 = vmatprep.mubr.msk.bf16.mxu1 %vm2625_vm1, %v2624_v0  ;;  %2503 = vmatpush3.bf16.msra.mxu0 %v2610_v51 }
  0x97   : > { %2475 = vmatpush3.bf16.msra.mxu1 %v2611_v52  ;;  %2504 = vmatprep.subr.bf16.mxu0 %v2624_v0  ;;  %v1661_v50 = vsel %vm1650_vm7, %v1658_v43, %v1660_v48 }
  0x99   : > { %2455 = vmatmul.mubr.msk.bf16.gmra.mxu0 %vm333_vm3, %v1301_v53 }
  0x9a   : > { %2458 = vmatprep.mubr.msk.bf16.mxu0 %vm2625_vm1, %v2624_v0  ;;  %2505 = vmatpush3.bf16.msra.mxu0 %v2613_v56 }
  0x9d   : > { %2429 = vmatmul.mubr.msk.bf16.gmra.mxu1 %vm333_vm3, %v1112_v57 }
  0x9e   : > { %2432 = vmatprep.mubr.msk.bf16.mxu1 %vm2625_vm1, %v2624_v0 }
  0xa1   : > { %2459 = vmatmul.mubr.msk.bf16.gmra.mxu0 %vm333_vm3, %v1303_v60 }
  0xa2   : > { %2462 = vmatprep.mubr.msk.bf16.mxu0 %vm2625_vm1, %v2624_v0 }
  0xa5   : > { %2433 = vmatmul.mubr.msk.bf16.gmra.mxu1 %vm333_vm3, %v1114_v5 }
  0xa6   : > { %2476 = vmatprep.mubr.msk.bf16.mxu1 %vm2625_vm1, %v2624_v0 }
  0xa9   : > { %2463 = vmatmul.mubr.msk.bf16.gmra.mxu0 %vm333_vm3, %v1305_v16 }
  0xaa   : > { %2506 = vmatprep.mubr.msk.bf16.mxu0 %vm2625_vm1, %v2624_v0 }
  0xad   : > { %2477 = vmatmul.mubr.msk.bf16.vlgmr.msra.gmra.mxu1 %vm333_vm3, %v1468_v8 }
  0xae   : > { %2480 = vmatprep.mubr.msk.bf16.mxu1 %vm2625_vm1, %v2624_v0 }
  0xb1   : > { %2507 = vmatmul.mubr.msk.bf16.vlgmr.msra.gmra.mxu0 %vm333_vm3, %v1653_v27 }
  0xb2   : > { %2510 = vmatprep.mubr.msk.bf16.mxu0 %vm2625_vm1, %v2624_v0 }
  0xb5   : > { %2481 = vmatmul.mubr.msk.bf16.gmra.mxu1 %vm333_vm3, %v1477_v30 }
  0xb6   : > { %2484 = vmatprep.mubr.msk.bf16.mxu1 %vm2625_vm1, %v2624_v0 }
  0xb9   : > { %2511 = vmatmul.mubr.msk.bf16.gmra.mxu0 %vm333_vm3, %v1655_v21 }
  0xba   : > { %2514 = vmatprep.mubr.msk.bf16.mxu0 %vm2625_vm1, %v2624_v0 }
  0xbd   : > { %2485 = vmatmul.mubr.msk.bf16.gmra.mxu1 %vm333_vm3, %v1486_v34 }
  0xbe   : > { %2488 = vmatprep.mubr.msk.bf16.mxu1 %vm2625_vm1, %v2624_v0 }
  0xc1   : > { %2515 = vmatmul.mubr.msk.bf16.gmra.mxu0 %vm333_vm3, %v1657_v39 }
  0xc2   : > { %2518 = vmatprep.mubr.msk.bf16.mxu0 %vm2625_vm1, %v2624_v0 }
  0xc5   : > { %2489 = vmatmul.mubr.msk.bf16.gmra.mxu1 %vm333_vm3, %v1495_v42 }
  0xc6   : > { %2492 = vmatprep.mubr.msk.bf16.mxu1 %vm2625_vm1, %v2624_v0 }
  0xc9   : > { %2519 = vmatmul.mubr.msk.bf16.gmra.mxu0 %vm333_vm3, %v1659_v46 }
  0xca   : > { %2522 = vmatprep.mubr.msk.bf16.mxu0 %vm2625_vm1, %v2624_v0 }
  0xcd   : > { %2493 = vmatmul.mubr.msk.bf16.gmra.mxu1 %vm333_vm3, %v1504_v49 }
  0xd1   : > { %2523 = vmatmul.mubr.msk.bf16.gmra.mxu0 %vm333_vm3, %v1661_v50 }
  0xe1   : > { %v387_v51 = vpop.f32.mrf.mxu0  ;;  %v411_v52 = vpop.f32.mrf.mxu1 }
  0xe3   : > { %v2268_v53 = vpop.f32.mrf.mxu0  ;;  %v2280_v54 = vpop.f32.mrf.mxu1 }
  0xe5   : > { %v390_v55 = vpop.f32.mrf.mxu0  ;;  %v414_v56 = vpop.f32.mrf.mxu1 }
  0xe7   : > { %v2269_v57 = vpop.f32.mrf.mxu0  ;;  %v2281_v3 = vpop.f32.mrf.mxu1 }
  0xe9   : > { %v395_v58 = vpop.f32.mrf.mxu0  ;;  %v419_v59 = vpop.f32.mrf.mxu1 }
  0xeb   : > { %v2272_v60 = vpop.f32.mrf.mxu0  ;;  %v2284_v61 = vpop.f32.mrf.mxu1 }
  0xed   : > { %v398_v0 = vpop.f32.mrf.mxu0  ;;  %v422_v62 = vpop.f32.mrf.mxu1 }
  0xef   : > { %v2273_v63 = vpop.f32.mrf.mxu0  ;;  %v2285_v1 = vpop.f32.mrf.mxu1 }
  0xf1   : > { %v403_v2 = vpop.f32.mrf.mxu0 }
  0xf3   : > { %v2276_v4 = vpop.f32.mrf.mxu0 }
  0xf5   : > { %v406_v5 = vpop.f32.mrf.mxu0  ;;  %v502_v6 = vpop.f32.mrf.mxu1 }
  0xf6   : > { %v503_v7 = vadd.f32 %v502_v6, %v387_v51 }
  0xf7   : > { %v2277_v10 = vpop.f32.mrf.mxu0  ;;  %v2298_v9 = vpop.f32.mrf.mxu1 }
  0xf9   : > { %v505_v12 = vpop.f32.mrf.mxu1  ;;  %v649_v13 = vpop.f32.mrf.mxu0 }
  0xfa   : > { %v506_v16 = vadd.f32 %v505_v12, %v390_v55  ;;  %v688_v18 = vadd.f32 %v649_v13, %v503_v7 }
  0xfb   : > { %v2299_v19 = vpop.f32.mrf.mxu1  ;;  %v2328_v17 = vpop.f32.mrf.mxu0 }
  0xfd   : > { %v510_v20 = vpop.f32.mrf.mxu1  ;;  %v652_v8 = vpop.f32.mrf.mxu0 }
  0xfe   : > { %v511_v22 = vadd.f32 %v510_v20, %v395_v58  ;;  %v689_v23 = vadd.f32 %v652_v8, %v506_v16 }
  0xff   : > { %v2302_v26 = vpop.f32.mrf.mxu1  ;;  %v2329_v27 = vpop.f32.mrf.mxu0 }
 0x101   : > { %v513_v28 = vpop.f32.mrf.mxu1  ;;  %v657_v14 = vpop.f32.mrf.mxu0 }
 0x102   : > { %v514_v29 = vadd.f32 %v513_v28, %v398_v0  ;;  %v690_v30 = vadd.f32 %v657_v14, %v511_v22 }
 0x103   : > { %v2303_v31 = vpop.f32.mrf.mxu1  ;;  %v2332_v32 = vpop.f32.mrf.mxu0 }
 0x105   : > { %v518_v24 = vpop.f32.mrf.mxu1  ;;  %v660_v21 = vpop.f32.mrf.mxu0 }
 0x106   : > { %v519_v11 = vadd.f32 %v518_v24, %v403_v2  ;;  %v691_v33 = vadd.f32 %v660_v21, %v514_v29 }
 0x107   : > { %v2306_v25 = vpop.f32.mrf.mxu1  ;;  %v2333_v34 = vpop.f32.mrf.mxu0 }
 0x109   : > { %v521_v35 = vpop.f32.mrf.mxu1  ;;  %v665_v37 = vpop.f32.mrf.mxu0 }
 0x10a   : > { %v522_v15 = vadd.f32 %v521_v35, %v406_v5  ;;  %v692_v38 = vadd.f32 %v665_v37, %v519_v11 }
 0x10b   : > { %v2307_v39 = vpop.f32.mrf.mxu1  ;;  %v2336_v40 = vpop.f32.mrf.mxu0 }
 0x10d   : > { %v526_v41 = vpop.f32.mrf.mxu1  ;;  %v668_v36 = vpop.f32.mrf.mxu0 }
 0x10e   : > { %v527_v42 = vadd.f32 %v526_v41, %v411_v52  ;;  %v693_v43 = vadd.f32 %v668_v36, %v522_v15 }
 0x10f   : > { %v2310_v44 = vpop.f32.mrf.mxu1  ;;  %v2337_v45 = vpop.f32.mrf.mxu0 }
 0x111   : > { %v529_v46 = vpop.f32.mrf.mxu1  ;;  %v673_v47 = vpop.f32.mrf.mxu0 }
 0x112   : > { %v530_v49 = vadd.f32 %v529_v46, %v414_v56  ;;  %v694_v48 = vadd.f32 %v673_v47, %v527_v42 }
 0x113   : > { %v2311_v50 = vpop.f32.mrf.mxu1  ;;  %v2340_v51 = vpop.f32.mrf.mxu0 }
 0x115   : > { %v534_v53 = vpop.f32.mrf.mxu1  ;;  %v676_v54 = vpop.f32.mrf.mxu0 }
 0x116   : > { %v535_v55 = vadd.f32 %v534_v53, %v419_v59  ;;  %v695_v57 = vadd.f32 %v676_v54, %v530_v49 }
 0x117   : > { %v2314_v3 = vpop.f32.mrf.mxu1  ;;  %v2341_v58 = vpop.f32.mrf.mxu0 }
 0x119   : > { %v537_v60 = vpop.f32.mrf.mxu1  ;;  %v681_v61 = vpop.f32.mrf.mxu0 }
 0x11a   : > { %v538_v0 = vadd.f32 %v537_v60, %v422_v62  ;;  %v696_v63 = vadd.f32 %v681_v61, %v535_v55 }
 0x11b   : > { %v2315_v52 = vpop.f32.mrf.mxu1  ;;  %v2344_v1 = vpop.f32.mrf.mxu0 }
 0x11d   : > { %v684_v2 = vpop.f32.mrf.mxu0  ;;  %v840_v4 = vpop.f32.mrf.mxu1 }
 0x11e   : > { %v697_v5 = vadd.f32 %v684_v2, %v538_v0  ;;  %v879_v6 = vadd.f32 %v840_v4, %v688_v18 }
 0x11f   : > { %v2345_v56 = vpop.f32.mrf.mxu0  ;;  %v2358_v7 = vpop.f32.mrf.mxu1 }
 0x121   : > { %v843_v10 = vpop.f32.mrf.mxu1  ;;  %v1039_v9 = vpop.f32.mrf.mxu0 }
 0x122   : > { %v880_v12 = vadd.f32 %v843_v10, %v689_v23  ;;  %v3172_v13 = vadd.f32 %v1039_v9, %v879_v6 }
 0x123   : > { %v2359_v59 = vpop.f32.mrf.mxu1  ;;  %v2388_v16 = vpop.f32.mrf.mxu0 }
 0x125   : > { %v848_v19 = vpop.f32.mrf.mxu1  ;;  %v1042_v17 = vpop.f32.mrf.mxu0 }
 0x126   : > { %v881_v20 = vadd.f32 %v848_v19, %v690_v30  ;;  %v3174_v62 = vadd.f32 %v1042_v17, %v880_v12 }
 0x127   : > { %v2362_v8 = vpop.f32.mrf.mxu1  ;;  %v2389_v22 = vpop.f32.mrf.mxu0 }
 0x129   : > { %v851_v26 = vpop.f32.mrf.mxu1  ;;  %v1047_v27 = vpop.f32.mrf.mxu0 }
 0x12a   : > { %v882_v28 = vadd.f32 %v851_v26, %v691_v33  ;;  %v3176_v18 = vadd.f32 %v1047_v27, %v881_v20 }
 0x12b   : > { %v2363_v14 = vpop.f32.mrf.mxu1  ;;  %v2392_v29 = vpop.f32.mrf.mxu0 }
 0x12d   : > { %v856_v31 = vpop.f32.mrf.mxu1  ;;  %v1050_v23 = vpop.f32.mrf.mxu0 }
 0x12e   : > { %v883_v32 = vadd.f32 %v856_v31, %v692_v38  ;;  %v3178_v24 = vadd.f32 %v1050_v23, %v882_v28 }
 0x12f   : > { %v2366_v21 = vpop.f32.mrf.mxu1  ;;  %v2393_v11 = vpop.f32.mrf.mxu0 }
 0x131   : > { %v859_v25 = vpop.f32.mrf.mxu1  ;;  %v1055_v30 = vpop.f32.mrf.mxu0 }
 0x132   : > { %v884_v34 = vadd.f32 %v859_v25, %v693_v43  ;;  %v3180_v35 = vadd.f32 %v1055_v30, %v883_v32 }
 0x133   : > { %v2367_v37 = vpop.f32.mrf.mxu1  ;;  %v2396_v15 = vpop.f32.mrf.mxu0 }
 0x135   : > { %v864_v39 = vpop.f32.mrf.mxu1  ;;  %v1058_v33 = vpop.f32.mrf.mxu0 }
 0x136   : > { %v885_v40 = vadd.f32 %v864_v39, %v694_v48  ;;  %v3182_v41 = vadd.f32 %v1058_v33, %v884_v34 }
 0x137   : > { %v2370_v36 = vpop.f32.mrf.mxu1  ;;  %v2397_v42 = vpop.f32.mrf.mxu0 }
 0x139   : > { %v867_v44 = vpop.f32.mrf.mxu1  ;;  %v1063_v38 = vpop.f32.mrf.mxu0 }
 0x13a   : > { %v886_v45 = vadd.f32 %v867_v44, %v695_v57  ;;  %v3184_v46 = vadd.f32 %v1063_v38, %v885_v40 }
 0x13b   : > { %v2371_v47 = vpop.f32.mrf.mxu1  ;;  %v2400_v49 = vpop.f32.mrf.mxu0 }
 0x13d   : > { %v872_v50 = vpop.f32.mrf.mxu1  ;;  %v1066_v43 = vpop.f32.mrf.mxu0 }
 0x13e   : > { %v887_v51 = vadd.f32 %v872_v50, %v696_v63  ;;  %v3186_v53 = vadd.f32 %v1066_v43, %v886_v45 }
 0x13f   : > { %v2374_v54 = vpop.f32.mrf.mxu1  ;;  %v2401_v55 = vpop.f32.mrf.mxu0 }
 0x141   : > { %v875_v3 = vpop.f32.mrf.mxu1  ;;  %v1071_v48 = vpop.f32.mrf.mxu0 }
 0x142   : > { %v888_v58 = vadd.f32 %v875_v3, %v697_v5  ;;  %v3188_v60 = vadd.f32 %v1071_v48, %v887_v51  ;;  %v3221_v48 = vld [vmem:[%s3299_s2] ss:$0 sm:$0xff] }
 0x143   : > { %v2375_v61 = vpop.f32.mrf.mxu1  ;;  %v2404_v0 = vpop.f32.mrf.mxu0 }
 0x145   : > { %v1074_v52 = vpop.f32.mrf.mxu0  ;;  %v1196_v57 = vpop.f32.mrf.mxu1 }
 0x146   : > { %v3190_v1 = vadd.f32 %v1074_v52, %v888_v58  ;;  %v1235_v38 = vadd.f32 %v1196_v57, %v3172_v13  ;;  %v3226_v13 = vld [vmem:[%s3300_s3] ss:$0 sm:$0xff] }
 0x147   : > { %v2405_v2 = vpop.f32.mrf.mxu0  ;;  %v2418_v4 = vpop.f32.mrf.mxu1 }
 0x149   : > { %v1199_v6 = vpop.f32.mrf.mxu1  ;;  %v1387_v56 = vpop.f32.mrf.mxu0 }
 0x14a   : > { %v1426_v49 = vadd.f32 %v1387_v56, %v1235_v38  ;;  %v1236_v51 = vadd.f32 %v1199_v6, %v3174_v62 }
 0x14b   : > { %v2419_v63 = vpop.f32.mrf.mxu1  ;;  %v2448_v7 = vpop.f32.mrf.mxu0 }
 0x14d   : > { %v1204_v10 = vpop.f32.mrf.mxu1  ;;  %v1390_v9 = vpop.f32.mrf.mxu0 }
 0x14e   : > { %v1427_v58 = vadd.f32 %v1390_v9, %v1236_v51  ;;  %v1237_v57 = vadd.f32 %v1204_v10, %v3176_v18 }
 0x14f   : > { %v2422_v12 = vpop.f32.mrf.mxu1  ;;  %v2449_v59 = vpop.f32.mrf.mxu0 }
 0x151   : > { %v1207_v16 = vpop.f32.mrf.mxu1  ;;  %v1395_v5 = vpop.f32.mrf.mxu0 }
 0x152   : > { %v1428_v56 = vadd.f32 %v1395_v5, %v1237_v57  ;;  %v1238_v59 = vadd.f32 %v1207_v16, %v3178_v24 }
 0x153   : > { %v2423_v19 = vpop.f32.mrf.mxu1  ;;  %v2452_v17 = vpop.f32.mrf.mxu0 }
 0x155   : > { %v3192_v20 = vpop.f32.mrf.mxu1  ;;  %v1398_v8 = vpop.f32.mrf.mxu0 }
 0x156   : > { %v1429_v5 = vadd.f32 %v1398_v8, %v1238_v59  ;;  %v1239_v16 = vadd.f32 %v3192_v20, %v3180_v35 }
 0x157   : > { %v2426_v22 = vpop.f32.mrf.mxu1  ;;  %v2453_v26 = vpop.f32.mrf.mxu0 }
 0x159   : > { %v3194_v27 = vpop.f32.mrf.mxu1  ;;  %v3196_v28 = vpop.f32.mrf.mxu0 }
 0x15a   : > { %v1430_v8 = vadd.f32 %v3196_v28, %v1239_v16  ;;  %v1240_v35 = vadd.f32 %v3194_v27, %v3182_v41 }
 0x15b   : > { %v2427_v14 = vpop.f32.mrf.mxu1  ;;  %v2456_v29 = vpop.f32.mrf.mxu0 }
 0x15d   : > { %v3198_v31 = vpop.f32.mrf.mxu1  ;;  %v3200_v23 = vpop.f32.mrf.mxu0 }
 0x15e   : > { %v1431_v28 = vadd.f32 %v3200_v23, %v1240_v35  ;;  %v1241_v41 = vadd.f32 %v3198_v31, %v3184_v46 }
 0x15f   : > { %v2430_v32 = vpop.f32.mrf.mxu1  ;;  %v2457_v21 = vpop.f32.mrf.mxu0 }
 0x161   : > { %v3202_v11 = vpop.f32.mrf.mxu1  ;;  %v3204_v25 = vpop.f32.mrf.mxu0 }
 0x162   : > { %v1432_v23 = vadd.f32 %v3204_v25, %v1241_v41  ;;  %v1242_v46 = vadd.f32 %v3202_v11, %v3186_v53 }
 0x163   : > { %v2431_v30 = vpop.f32.mrf.mxu1  ;;  %v2460_v34 = vpop.f32.mrf.mxu0 }
 0x165   : > { %v3206_v37 = vpop.f32.mrf.mxu1  ;;  %v3208_v15 = vpop.f32.mrf.mxu0 }
 0x166   : > { %v1433_v25 = vadd.f32 %v3208_v15, %v1242_v46  ;;  %v1243_v53 = vadd.f32 %v3206_v37, %v3188_v60 }
 0x167   : > { %v2434_v39 = vpop.f32.mrf.mxu1  ;;  %v2461_v33 = vpop.f32.mrf.mxu0 }
 0x169   : > { %v3210_v40 = vpop.f32.mrf.mxu1  ;;  %v3212_v36 = vpop.f32.mrf.mxu0 }
 0x16a   : > { %v1434_v15 = vadd.f32 %v3212_v36, %v1243_v53  ;;  %v1244_v60 = vadd.f32 %v3210_v40, %v3190_v1 }
 0x16b   : > { %v2435_v42 = vpop.f32.mrf.mxu1  ;;  %v2464_v44 = vpop.f32.mrf.mxu0 }
 0x16d   : > { %v3215_v45 = vpop.f32.mrf.mxu0  ;;  %v1586_v47 = vpop.f32.mrf.mxu1 }
 0x16e   : > { %v1625_v54 = vadd.f32 %v1586_v47, %v1426_v49  ;;  %v1435_v36 = vadd.f32 %v3215_v45, %v1244_v60 }
 0x16f   : > { %v2465_v50 = vpop.f32.mrf.mxu0  ;;  %v2478_v43 = vpop.f32.mrf.mxu1 }
 0x171   : > { %v1589_v55 = vpop.f32.mrf.mxu1  ;;  %v1743_v3 = vpop.f32.mrf.mxu0 }
 0x172   : > { %v1782_v61 = vadd.f32 %v1743_v3, %v1625_v54  ;;  %v1626_v62 = vadd.f32 %v1589_v55, %v1427_v58 }
 0x173   : > { %v2479_v0 = vpop.f32.mrf.mxu1  ;;  %v2508_v52 = vpop.f32.mrf.mxu0 }
 0x174   : > { %v1799_v2 = vmul.f32 %v3221_v48, %v1782_v61 }
 0x175   : > { %v1594_v4 = vpop.f32.mrf.mxu1  ;;  %v1746_v6 = vpop.f32.mrf.mxu0 }
 0x176   : > { %v1816_v63 = vadd.f32 %v3226_v13, %v1799_v2  ;;  %v1783_v7 = vadd.f32 %v1746_v6, %v1626_v62  ;;  %v1627_v17 = vadd.f32 %v1594_v4, %v1428_v56 }
 0x177   : > { %v2482_v9 = vpop.f32.mrf.mxu1  ;;  %v2509_v12 = vpop.f32.mrf.mxu0 }
 0x178   : > { %v1826_v19 = vmax.f32 %v1816_v63, 0.0  ;;  %v1800_v22 = vmul.f32 %v3221_v48, %v1783_v7 }
 0x179   : > { %v1597_v18 = vpop.f32.mrf.mxu1  ;;  %v1751_v10 = vpop.f32.mrf.mxu0 }
 0x17a   : > { %v2156_v26 = vpack.c.bf16 %v1826_v19, %v1826_v19  ;;  %v1817_v14 = vadd.f32 %v3226_v13, %v1800_v22  ;;  %v1784_v29 = vadd.f32 %v1751_v10, %v1627_v17  ;;  %v1628_v30 = vadd.f32 %v1597_v18, %v1429_v5 }
 0x17b   : > { %v2483_v32 = vpop.f32.mrf.mxu1  ;;  %v2512_v24 = vpop.f32.mrf.mxu0 }
 0x17c   : > { %1877 = vst.msk [vmem:[%s3237_s24] sm:$0xf] %vm1876_vm8, %v2156_v26  ;;  %v1827_v21 = vmax.f32 %v1817_v14, 0.0  ;;  %v1801_v34 = vmul.f32 %v3221_v48, %v1784_v29 }
 0x17d   : > { %v1602_v39 = vpop.f32.mrf.mxu1  ;;  %v1754_v33 = vpop.f32.mrf.mxu0 }
 0x17e   : > { %v2157_v42 = vpack.c.bf16 %v1827_v21, %v1827_v21  ;;  %v1818_v44 = vadd.f32 %v3226_v13, %v1801_v34  ;;  %v1785_v38 = vadd.f32 %v1754_v33, %v1628_v30  ;;  %v1629_v50 = vadd.f32 %v1602_v39, %v1430_v8 }
 0x17f   : > { %v2486_v47 = vpop.f32.mrf.mxu1  ;;  %v2513_v49 = vpop.f32.mrf.mxu0 }
 0x180   : > { %1878 = vst.msk [vmem:[%s3237_s24 + $0x4] sm:$0xf] %vm1876_vm8, %v2157_v42  ;;  %v1828_v20 = vmax.f32 %v1818_v44, 0.0  ;;  %v1802_v43 = vmul.f32 %v3221_v48, %v1785_v38 }
 0x181   : > { %v1605_v51 = vpop.f32.mrf.mxu1  ;;  %v1759_v54 = vpop.f32.mrf.mxu0 }
 0x182   : > { %v2158_v55 = vpack.c.bf16 %v1828_v20, %v1828_v20  ;;  %v1819_v3 = vadd.f32 %v3226_v13, %v1802_v43  ;;  %v1786_v58 = vadd.f32 %v1759_v54, %v1629_v50  ;;  %v1630_v52 = vadd.f32 %v1605_v51, %v1431_v28 }
 0x183   : > { %v2487_v61 = vpop.f32.mrf.mxu1  ;;  %v2516_v0 = vpop.f32.mrf.mxu0 }
 0x184   : > { %1879 = vst.msk [vmem:[%s3237_s24 + $0x8] sm:$0xf] %vm1876_vm8, %v2158_v55  ;;  %v1829_v27 = vmax.f32 %v1819_v3, 0.0  ;;  %v1803_v57 = vmul.f32 %v3221_v48, %v1786_v58 }
 0x185   : > { %v1610_v62 = vpop.f32.mrf.mxu1  ;;  %v1762_v2 = vpop.f32.mrf.mxu0 }
 0x186   : > { %v2159_v4 = vpack.c.bf16 %v1829_v27, %v1829_v27  ;;  %v1820_v6 = vadd.f32 %v3226_v13, %v1803_v57  ;;  %v1787_v56 = vadd.f32 %v1762_v2, %v1630_v52  ;;  %v1631_v9 = vadd.f32 %v1610_v62, %v1432_v23 }
 0x187   : > { %v2490_v63 = vpop.f32.mrf.mxu1  ;;  %v2517_v7 = vpop.f32.mrf.mxu0 }
 0x188   : > { %1880 = vst.msk [vmem:[%s3237_s24 + $0xc] sm:$0xf] %vm1876_vm8, %v2159_v4  ;;  %v1830_v31 = vmax.f32 %v1820_v6, 0.0  ;;  %v1804_v12 = vmul.f32 %v3221_v48, %v1787_v56 }
 0x189   : > { %v1613_v59 = vpop.f32.mrf.mxu1  ;;  %v1767_v19 = vpop.f32.mrf.mxu0 }
 0x18a   : > { %v2160_v17 = vpack.c.bf16 %v1830_v31, %v1830_v31  ;;  %v1821_v22 = vadd.f32 %v3226_v13, %v1804_v12  ;;  %v1788_v18 = vadd.f32 %v1767_v19, %v1631_v9  ;;  %v1632_v26 = vadd.f32 %v1613_v59, %v1433_v25 }
 0x18b   : > { %v2491_v10 = vpop.f32.mrf.mxu1  ;;  %v2520_v5 = vpop.f32.mrf.mxu0 }
 0x18c   : > { %1881 = vst.msk [vmem:[%s3237_s24 + $0x10] sm:$0xf] %vm1876_vm8, %v2160_v17  ;;  %v1831_v11 = vmax.f32 %v1821_v22, 0.0  ;;  %v1805_v14 = vmul.f32 %v3221_v48, %v1788_v18 }
 0x18d   : > { %v1618_v29 = vpop.f32.mrf.mxu1  ;;  %v1770_v32 = vpop.f32.mrf.mxu0 }
 0x18e   : > { %v2161_v24 = vpack.c.bf16 %v1831_v11, %v1831_v11  ;;  %v1822_v16 = vadd.f32 %v3226_v13, %v1805_v14  ;;  %v1789_v21 = vadd.f32 %v1770_v32, %v1632_v26  ;;  %v1633_v39 = vadd.f32 %v1618_v29, %v1434_v15 }
 0x18f   : > { %v2494_v30 = vpop.f32.mrf.mxu1  ;;  %v2521_v34 = vpop.f32.mrf.mxu0 }
 0x190   : > { %1882 = vst.msk [vmem:[%s3237_s24 + $0x14] sm:$0xf] %vm1876_vm8, %v2161_v24  ;;  %v1832_v37 = vmax.f32 %v1822_v16, 0.0  ;;  %v1806_v33 = vmul.f32 %v3221_v48, %v1789_v21 }
 0x191   : > { %v1621_v8 = vpop.f32.mrf.mxu1  ;;  %v1775_v42 = vpop.f32.mrf.mxu0 }
 0x192   : > { %v2162_v44 = vpack.c.bf16 %v1832_v37, %v1832_v37  ;;  %v1823_v38 = vadd.f32 %v3226_v13, %v1806_v33  ;;  %v1790_v47 = vadd.f32 %v1775_v42, %v1633_v39  ;;  %v1634_v40 = vadd.f32 %v1621_v8, %v1435_v36 }
 0x193   : > { %v2495_v49 = vpop.f32.mrf.mxu1  ;;  %v2524_v35 = vpop.f32.mrf.mxu0 }
 0x194   : > { %1883 = vst.msk [vmem:[%s3237_s24 + $0x18] sm:$0xf] %vm1876_vm8, %v2162_v44  ;;  %v1833_v1 = vmax.f32 %v1823_v38, 0.0  ;;  %v1807_v20 = vmul.f32 %v3221_v48, %v1790_v47 }
 0x195   : > { %v1778_v50 = vpop.f32.mrf.mxu0 }
 0x196   : > { %v2163_v43 = vpack.c.bf16 %v1833_v1, %v1833_v1  ;;  %v1824_v51 = vadd.f32 %v3226_v13, %v1807_v20  ;;  %v1791_v54 = vadd.f32 %v1778_v50, %v1634_v40 }
 0x197   : > { %v2525_v45 = vpop.f32.mrf.mxu0 }
 0x198   : > { %1884 = vst.msk [vmem:[%s3237_s24 + $0x1c] sm:$0xf] %vm1876_vm8, %v2163_v43  ;;  %v1834_v28 = vmax.f32 %v1824_v51, 0.0  ;;  %v1808_v55 = vmul.f32 %v3221_v48, %v1791_v54 }
 0x19a   : > { %v2164_v3 = vpack.c.bf16 %v1834_v28, %v1834_v28  ;;  %v1825_v58 = vadd.f32 %v3226_v13, %v1808_v55 }
 0x19c   : > { %1885 = vst.msk [vmem:[%s3237_s24 + $0x20] sm:$0xf] %vm1876_vm8, %v2164_v3  ;;  %v1835_v61 = vmax.f32 %v1825_v58, 0.0 }
 0x19e   : > { %v2165_v0 = vpack.c.bf16 %v1835_v61, %v1835_v61 }
 0x1a0   : > { %1886 = vst.msk [vmem:[%s3237_s24 + $0x24] sm:$0xf] %vm1876_vm8, %v2165_v0 }
 0x1a1 PF: > { %s14_s15 = sadd.s32 1, %s2622_s15  }
 0x1a2   : > { %p11_p4 = scmp.ge.s32.totalorder %s14_s15, 4  }
 0x1a4   :  { %13 = sbr.rel (!%p11_p4) target bundleno = 1 (0x1), region = 74 }

// kernel: garment_seg_forward.15
= control target key start
LH: loop header
LB: loop body
LE: loop exit
PB: predicated region body
PF: predicated region fallthrough
CT: control target
= control target key end

     0   :  { %s2427_s15 = smov 0   ;;  %s3030_s0 = inlined_call_operand.vmem [shape: bf16[2,110,64], index: 0, kind: input, shape index: {}]   ;;  %s3031_s1 = inlined_call_operand.vmem [shape: bf16[9,64,7], index: 1, kind: input, shape index: {}]   ;;  %s3032_s2 = inlined_call_operand.vmem [shape: f32[1,7], index: 2, kind: input, shape index: {}]   ;;  %s3033_s3 = inlined_call_operand.vmem [shape: f32[1,7], index: 3, kind: input, shape index: {}]   ;;  %s3034_s4 = inlined_call_operand.vmem [shape: f32[2,80,7], index: 4, kind: output, shape index: {}]  }
   0x1 LB: > { %s1801_s16 = sadd.s32 4294967295, %s2398_s15   ;;  %p1805_p0 = scmp.ge.s32.totalorder %s2398_s15, 1  ;;  %s2398_s15 = sphi %s2427_s15, %s14_s15  }
   0x2   : > { %p162_p1 = scmp.lt.s32.totalorder %s2398_s15, 3 }
   0x4   : > { %p163_p2 = pnand %p1805_p0, %p162_p1 }
   0x5   : > { %p188_p3 = scmp.lt.s32.totalorder (!%p163_p2), %s1801_s16, 1 }
   0x6   : > { %166 = sbr.rel (%p163_p2) target bundleno = 410 (0x19a), region = 36 }
   0xb   : > { %v2333_v0 = vld [vmem:[%s3031_s1 + $0x38] sm:$0xff]   ;;  %v2400_v1 = vmov 0.0   ;;  %v2334_v2 = vld [vmem:[%s3031_s1 + $0x30] sm:$0xff]   ;;  %vm2401_vm0 = vmmov 0   ;;  %s3036_s16 = smov (!%p188_p3, %s1801_s16), 1  ;;  %v2335_v3 = vld [vmem:[%s3031_s1 + $0x28] sm:$0xff]  }
   0xc   : > { %2313 = vmatprep.subr.bf16.mxu1 %v2400_v1  ;;  %2061 = vmatprep.subr.bf16.mxu0 %v2400_v1  ;;  %s2321_s23 = smul.u32 56, %s3036_s16  ;;  %v2336_v4 = vld [vmem:[%s3031_s1 + $0x20] sm:$0xff]   ;;  %vm255_vm1 = vsmask.f32 7424  ;;  %vm324_vm2 = vcmask 523264   ;;  %v2339_v19 = vld [vmem:[%s3031_s1 + $0x18] sm:$0xff]  }
   0xd   : > { %2317 = vmatpush3.bf16.msra.mxu1 %v2333_v0  ;;  %2062 = vmatpush3.bf16.msra.mxu0 %v2333_v0  ;;  %v2342_v26 = vld [vmem:[%s3031_s1 + $0x58] sm:$0xff]   ;;  %v2343_v32 = vld [vmem:[%s3031_s1 + $0x10] sm:$0xff]   ;;  %v2346_v37 = vld [vmem:[%s3031_s1 + $0x8] sm:$0xff]   ;;  %vm533_vm3 = vcmask 1046528   ;;  %vm861_vm4 = vsmask.f32 6400 }
   0xe   : > { %2314 = vmatprep.subr.bf16.mxu1 %v2400_v1  ;;  %2063 = vmatprep.subr.bf16.mxu0 %v2400_v1  ;;  %s2463_s28 = scalar_lea.vmem %s3030_s0, %s2321_s23  ;;  %v2345_v35 = vld [vmem:[%s3031_s1 + $0x50] sm:$0xff]   ;;  %v2347_v43 = vld [vmem:[%s3031_s1 + $0x48] sm:$0xff]   ;;  %v2350_v47 = vld [vmem:[%s3031_s1] sm:$0xff]   ;;  %vm1050_vm5 = vcmask 1045504   ;;  %vm1567_vm6 = vcmask 1044480   ;;  %vm1735_vm8 = vcmask 56320  }
   0xf   : > { %2077 = vmatprep.mubr.msk.bf16.mxu1 %vm2401_vm0, %v2400_v1  ;;  %2069 = vmatprep.mubr.msk.bf16.mxu0 %vm2401_vm0, %v2400_v1  ;;  %v2466_v5 = vld [vmem:[%s2463_s28 + $0x10] sm:$0xff]   ;;  %v2469_v6 = vld [vmem:[%s2463_s28 + $0x18] sm:$0xff]   ;;  %v199_v7 = vld [vmem:[%s2463_s28] sm:$0xf]  ;;  %vm1378_vm7 = vsmask.f32 5376 }
  0x10   : > { %v2475_v8 = vld [vmem:[%s2463_s28 + $0x4] sm:$0xf]  ;;  %v272_v9 = vshll.u32 %v2466_v5, 16  ;;  %v276_v10 = vshrl.u32 %v2466_v5, 16  ;;  %v280_v11 = vshll.u32 %v2469_v6, 16  ;;  %v2484_v13 = vld [vmem:[%s2463_s28 + $0x8] sm:$0xff]  }
  0x11   : > { %2318 = vmatpush3.bf16.msra.mxu1 %v2334_v2  ;;  %2064 = vmatpush3.bf16.msra.mxu0 %v2334_v2  ;;  %v2481_v12 = vcombine.low %v199_v7, %v2475_v8  ;;  %v2487_v14 = vld [vmem:[%s2463_s28 + $0x20] sm:$0xff]   ;;  %v264_v20 = vshll.u32 %v2484_v13, 16  ;;  %v284_v21 = vshrl.u32 %v2469_v6, 16  ;;  %v268_v27 = vshrl.u32 %v2484_v13, 16  ;;  %v2353_v53 = vld [vmem:[%s3031_s1 + $0x98] sm:$0xff]   ;;  %v2355_v55 = vld [vmem:[%s3031_s1 + $0x90] sm:$0xff]  }
  0x12   : > { %2315 = vmatprep.subr.bf16.mxu1 %v2400_v1  ;;  %2065 = vmatprep.subr.bf16.mxu0 %v2400_v1  ;;  %v274_v15 = vrot.slane %v272_v9, 1  ;;  %v282_v16 = vrot.slane %v280_v11, 1  ;;  %v288_v24 = vshll.u32 %v2487_v14, 16  ;;  %v2506_v30 = vld [vmem:[%s2463_s28 + $0x28] ss:$0 sps:$4 sm:$0x11]  }
  0x13   : > { %v257_v17 = vshrl.u32 %v2481_v12, 16  ;;  %v259_v18 = vshll.u32 %v2481_v12, 16  ;;  %v266_v25 = vrot.slane %v264_v20, 1  ;;  %v520_v38 = vld [vmem:[%s2463_s28] sm:$0xe]  ;;  %v292_v40 = vshrl.u32 %v2487_v14, 16 }
  0x14   : > { %v278_v22 = vor.u32 %v276_v10, %v274_v15  ;;  %v286_v33 = vor.u32 %v284_v21, %v282_v16  ;;  %v290_v34 = vrot.slane %v288_v24, 1  ;;  %v296_v41 = vshll.u32 %v2506_v30, 16  ;;  %v2349_v48 = vld [vmem:[%s3031_s1 + $0x40] sm:$0xff]   ;;  %v2352_v58 = vld [vmem:[%s3031_s1 + $0x78] sm:$0xff]   ;;  %v2357_v62 = vld [vmem:[%s3031_s1 + $0x88] sm:$0xff]  }
  0x15   : > { %2319 = vmatpush3.bf16.msra.mxu1 %v2335_v3  ;;  %2066 = vmatpush3.bf16.msra.mxu0 %v2335_v3  ;;  %v261_v23 = vrot.slane %v259_v18, 1  ;;  %v270_v36 = vor.u32 %v268_v27, %v266_v25  ;;  %v1848_v44 = vcombine.low %v520_v38, %v2475_v8  ;;  %v535_v50 = vrot.slane %v2484_v13, 1  ;;  %v2569_v56 = vld [vmem:[%s2463_s28 + $0x1c] sm:$0xff]   ;;  %v2573_v57 = vld [vmem:[%s2463_s28 + $0x24] sm:$0xff]   ;;  %v2354_v0 = vld [vmem:[%s3031_s1 + $0x70] sm:$0xff]  }
  0x16   : > { %2316 = vmatprep.subr.bf16.mxu1 %v2400_v1  ;;  %2067 = vmatprep.subr.bf16.mxu0 %v2400_v1  ;;  %v283_v28 = vsel %vm255_vm1, %v278_v22, %v282_v16  ;;  %v291_v39 = vsel %vm255_vm1, %v286_v33, %v290_v34  ;;  %v294_v45 = vor.u32 %v292_v40, %v290_v34  ;;  %v298_v46 = vrot.slane %v296_v41, 1  ;;  %v2373_v2 = vld [vmem:[%s2463_s28 + $0x2c] ss:$0 sps:$4 sm:$0x11]   ;;  %v2358_v11 = vld [vmem:[%s3031_s1 + $0x60] sm:$0xff]  }
  0x17   : > { %v262_v29 = vor.u32 %v261_v23, %v257_v17  ;;  %v275_v42 = vsel %vm255_vm1, %v270_v36, %v274_v15  ;;  %v534_v49 = vrot.slane %v1848_v44, 1  ;;  %v537_v54 = vrot.slane %v2466_v5, 1  ;;  %v2356_v8 = vld [vmem:[%s3031_s1 + $0x68] sm:$0xff]  }
  0x18   : > { %v299_v51 = vsel %vm255_vm1, %v294_v45, %v298_v46  ;;  %v720_v59 = vrot.slane %v2569_v56, 1  ;;  %v722_v60 = vrot.slane %v2573_v57, 1  ;;  %v539_v3 = vrot.slane %v2469_v6, 1  ;;  %v2630_v15 = vld [vmem:[%s2463_s28 + $0x8] sm:$0xf]  ;;  %v2636_v18 = vld [vmem:[%s2463_s28 + $0xc] sm:$0xff]  }
  0x19   : > { %2320 = vmatpush3.bf16.msra.mxu1 %v2336_v4  ;;  %2068 = vmatpush3.bf16.msra.mxu0 %v2336_v4  ;;  %v267_v31 = vsel %vm255_vm1, %v262_v29, %v266_v25  ;;  %v536_v52 = vsel %vm533_vm3, %v534_v49, %v535_v50  ;;  %v538_v61 = vsel %vm533_vm3, %v535_v50, %v537_v54  ;;  %v2359_v4 = vld [vmem:[%s3031_s1 + $0x80] sm:$0xff]   ;;  %v724_v7 = vrot.slane %v2373_v2, 1  ;;  %v2370_v46 = vld [vmem:[%s3031_s1 + $0xc8] sm:$0xff]  }
  0x1a   : > { %2089 = vmatprep.subr.bf16.mxu1 %v2400_v1  ;;  %2117 = vmatprep.subr.bf16.mxu0 %v2400_v1  ;;  %v2590_v63 = vsel %vm533_vm3, %v720_v59, %v722_v60  ;;  %v540_v10 = vsel %vm533_vm3, %v537_v54, %v539_v3  ;;  %v871_v22 = vshrl.u32 %v2636_v18, 16  ;;  %v874_v23 = vshll.u32 %v2636_v18, 16  ;;  %v2369_v54 = vld [vmem:[%s3031_s1 + $0xa8] sm:$0xff]  }
  0x1b   : > { %v2611_v9 = vsel %vm533_vm3, %v722_v60, %v724_v7  ;;  %v892_v40 = vshll.u32 %v2569_v56, 16  ;;  %v898_v50 = vshrl.u32 %v2573_v57, 16 }
  0x1c   : > { %2078 = vmatmul.mubr.msk.bf16.vlgmr.msra.gmra.mxu1 %vm324_vm2, %v283_v28  ;;  %2070 = vmatmul.mubr.msk.bf16.vlgmr.msra.gmra.mxu0 %vm324_vm2, %v267_v31  ;;  %v876_v27 = vrot.slane %v874_v23, 2  ;;  %v2650_v28 = vld [vmem:[%s2463_s28 + $0x14] sm:$0xff]  }
  0x1d   : > { %2090 = vmatpush3.bf16.msra.mxu1 %v2339_v19  ;;  %2081 = vmatprep.mubr.msk.bf16.mxu1 %vm2401_vm0, %v2400_v1  ;;  %v543_v19 = vrot.slane %v2506_v30, 1  ;;  %v880_v31 = vshrl.u32 %v2650_v28, 16  ;;  %v894_v45 = vrot.slane %v892_v40, 2 }
  0x1e   : > { %2091 = vmatprep.subr.bf16.mxu1 %v2400_v1  ;;  %2118 = vmatpush3.bf16.msra.mxu0 %v2342_v26  ;;  %v873_v26 = vrot.slane %v871_v22, 1 }
  0x1f   : > { %2073 = vmatprep.mubr.msk.bf16.mxu0 %vm2401_vm0, %v2400_v1  ;;  %2119 = vmatprep.subr.bf16.mxu0 %v2400_v1  ;;  %v882_v34 = vrot.slane %v880_v31, 1  ;;  %v1054_v31 = vrot.slane %v2650_v28, 2 }
  0x20   : > { %v877_v30 = vor.u32 %v876_v27, %v873_v26  ;;  %v2383_v26 = vld [vmem:[%s3031_s1 + $0x110] sm:$0xff]  }
  0x21   : > { %2092 = vmatpush3.bf16.msra.mxu1 %v2343_v32  ;;  %v883_v32 = vshll.u32 %v2650_v28, 16 }
  0x22   : > { %2093 = vmatprep.subr.bf16.mxu1 %v2400_v1  ;;  %2120 = vmatpush3.bf16.msra.mxu0 %v2345_v35 }
  0x23   : > { %2121 = vmatprep.subr.bf16.mxu0 %v2400_v1  ;;  %v885_v35 = vrot.slane %v883_v32, 2  ;;  %v2381_v32 = vld [vmem:[%s3031_s1 + $0xf0] sm:$0xff]  }
  0x24   : > { %2082 = vmatmul.mubr.msk.bf16.gmra.mxu1 %vm324_vm2, %v291_v39  ;;  %2074 = vmatmul.mubr.msk.bf16.gmra.mxu0 %vm324_vm2, %v275_v42  ;;  %v889_v39 = vshrl.u32 %v2569_v56, 16  ;;  %v2362_v42 = vld [vmem:[%s3031_s1 + $0xb8] sm:$0xff]  }
  0x25   : > { %2094 = vmatpush3.bf16.msra.mxu1 %v2346_v37  ;;  %2085 = vmatprep.mubr.msk.bf16.mxu1 %vm2401_vm0, %v2400_v1  ;;  %v716_v37 = vrot.slane %v2636_v18, 1  ;;  %v886_v38 = vor.u32 %v885_v35, %v882_v34  ;;  %v2385_v34 = vld [vmem:[%s3031_s1 + $0xe8] sm:$0xff]  }
  0x26   : > { %2095 = vmatprep.subr.bf16.mxu1 %v2400_v1  ;;  %2122 = vmatpush3.bf16.msra.mxu0 %v2347_v43  ;;  %v891_v44 = vrot.slane %v889_v39, 1 }
  0x27   : > { %2125 = vmatprep.mubr.msk.bf16.mxu0 %vm2401_vm0, %v2400_v1  ;;  %2123 = vmatprep.subr.bf16.mxu0 %v2400_v1  ;;  %v887_v43 = vsel %vm861_vm4, %v877_v30, %v886_v38 }
  0x28   : > { %v895_v49 = vor.u32 %v894_v45, %v891_v44 }
  0x29   : > { %2096 = vmatpush3.bf16.msra.mxu1 %v2350_v47  ;;  %v718_v47 = vrot.slane %v2650_v28, 1 }
  0x2a   : > { %2145 = vmatprep.subr.bf16.mxu1 %v2400_v1  ;;  %2124 = vmatpush3.bf16.msra.mxu0 %v2349_v48  ;;  %v2365_v48 = vld [vmem:[%s3031_s1 + $0xb0] sm:$0xff]  }
  0x2b   : > { %2173 = vmatprep.subr.bf16.mxu0 %v2400_v1 }
  0x2c   : > { %2086 = vmatmul.mubr.msk.bf16.gmra.mxu1 %vm324_vm2, %v299_v51  ;;  %v901_v51 = vshll.u32 %v2573_v57, 16 }
  0x2d   : > { %2097 = vmatprep.mubr.msk.bf16.mxu1 %vm2401_vm0, %v2400_v1  ;;  %2126 = vmatmul.mubr.msk.bf16.vlgmr.msra.gmra.mxu0 %vm324_vm2, %v536_v52  ;;  %v2374_v52 = vld [vmem:[%s3031_s1 + $0xc0] sm:$0xff]  }
  0x2e   : > { %2174 = vmatpush3.bf16.msra.mxu0 %v2353_v53  ;;  %2129 = vmatprep.mubr.msk.bf16.mxu0 %vm2401_vm0, %v2400_v1  ;;  %v719_v53 = vsel %vm533_vm3, %v716_v37, %v718_v47  ;;  %v903_v60 = vrot.slane %v901_v51, 2 }
  0x2f   : > { %2175 = vmatprep.subr.bf16.mxu0 %v2400_v1 }
  0x32   : > { %2176 = vmatpush3.bf16.msra.mxu0 %v2355_v55  ;;  %v896_v55 = vsel %vm861_vm4, %v886_v38, %v895_v49  ;;  %v2388_v38 = vld [vmem:[%s3031_s1 + $0xe0] sm:$0xff]  }
  0x33   : > { %2177 = vmatprep.subr.bf16.mxu0 %v2400_v1 }
  0x34   : > { %2098 = vmatmul.mubr.msk.bf16.vlgmr.msra.gmra.mxu1 %vm324_vm2, %v2481_v12  ;;  %v541_v12 = vrot.slane %v2487_v14, 1 }
  0x35   : > { %2146 = vmatpush3.bf16.msra.mxu1 %v2352_v58  ;;  %2101 = vmatprep.mubr.msk.bf16.mxu1 %vm2401_vm0, %v2400_v1  ;;  %v900_v58 = vrot.slane %v898_v50, 1 }
  0x36   : > { %2130 = vmatmul.mubr.msk.bf16.gmra.mxu0 %vm324_vm2, %v538_v61  ;;  %2147 = vmatprep.subr.bf16.mxu1 %v2400_v1  ;;  %v542_v16 = vsel %vm533_vm3, %v539_v3, %v541_v12  ;;  %v544_v24 = vsel %vm533_vm3, %v541_v12, %v543_v19  ;;  %v2712_v61 = vld [vmem:[%s2463_s28 + $0x2c] ss:$0 sps:$4 sm:$0x33]   ;;  %v1037_v19 = vld [vmem:[%s2463_s28 + $0x4] sm:$0xc] }
  0x37   : > { %2133 = vmatprep.mubr.msk.bf16.mxu0 %vm2401_vm0, %v2400_v1  ;;  %2178 = vmatpush3.bf16.msra.mxu0 %v2357_v62  ;;  %v2372_v62 = vld [vmem:[%s3031_s1 + $0xa0] sm:$0xff]   ;;  %v907_v2 = vshrl.u32 %v2712_v61, 16  ;;  %v910_v3 = vshll.u32 %v2712_v61, 16  ;;  %v2740_v12 = vld [vmem:[%s2463_s28 + $0xc] sm:$0xf]  ;;  %v1907_v22 = vcombine.low %v1037_v19, %v2630_v15 }
  0x38   : > { %2179 = vmatprep.subr.bf16.mxu0 %v2400_v1 }
  0x39   : > { %2148 = vmatpush3.bf16.msra.mxu1 %v2354_v0  ;;  %v904_v0 = vor.u32 %v903_v60, %v900_v58 }
  0x3a   : > { %2149 = vmatprep.subr.bf16.mxu1 %v2400_v1 }
  0x3b   : > { %2180 = vmatpush3.bf16.msra.mxu0 %v2359_v4  ;;  %v721_v4 = vsel %vm533_vm3, %v718_v47, %v720_v59  ;;  %v905_v7 = vsel %vm861_vm4, %v895_v49, %v904_v0  ;;  %v1184_v59 = vld [vmem:[%s2463_s28 + $0x8] sm:$0xc]  ;;  %v1060_v47 = vrot.slane %v2712_v61, 2 }
  0x3c   : > { %2102 = vmatmul.mubr.msk.bf16.gmra.mxu1 %vm324_vm2, %v2484_v13  ;;  %2229 = vmatprep.subr.bf16.mxu0 %v2400_v1  ;;  %v667_v13 = vld [vmem:[%s2463_s28 + $0x4] sm:$0xe] }
  0x3d   : > { %2105 = vmatprep.mubr.msk.bf16.mxu1 %vm2401_vm0, %v2400_v1  ;;  %2150 = vmatpush3.bf16.msra.mxu1 %v2356_v8  ;;  %v1866_v17 = vcombine.low %v667_v13, %v2630_v15  ;;  %v909_v8 = vrot.slane %v907_v2, 1 }
  0x3e   : > { %2134 = vmatmul.mubr.msk.bf16.gmra.mxu0 %vm324_vm2, %v540_v10  ;;  %2151 = vmatprep.subr.bf16.mxu1 %v2400_v1  ;;  %v912_v10 = vrot.slane %v910_v3, 2 }
  0x3f   : > { %2137 = vmatprep.mubr.msk.bf16.mxu0 %vm2401_vm0, %v2400_v1  ;;  %v863_v20 = vshrl.u32 %v1866_v17, 16  ;;  %v866_v21 = vshll.u32 %v1866_v17, 16  ;;  %v715_v36 = vrot.slane %v1866_v17, 1  ;;  %v2747_v17 = vld [vmem:[%s2463_s28 + $0x10] sm:$0xff]  }
  0x40   : > { %v1388_v49 = vshrl.u32 %v2747_v17, 16  ;;  %v1391_v50 = vshll.u32 %v2747_v17, 16 }
  0x41   : > { %2152 = vmatpush3.bf16.msra.mxu1 %v2358_v11  ;;  %v865_v25 = vrot.slane %v863_v20, 1  ;;  %v717_v41 = vsel %vm533_vm3, %v715_v36, %v716_v37  ;;  %v913_v11 = vor.u32 %v912_v10, %v909_v8  ;;  %v2815_v36 = vld [vmem:[%s2463_s28 + $0x28] sm:$0xff]   ;;  %v1056_v37 = vrot.slane %v2569_v56, 2 }
  0x42   : > { %2201 = vmatprep.subr.bf16.mxu1 %v2400_v1  ;;  %v1239_v39 = vrot.slane %v2815_v36, 2  ;;  %v1390_v58 = vrot.slane %v1388_v49, 2  ;;  %v1393_v60 = vrot.slane %v1391_v50, 3 }
  0x43   : > { %v914_v13 = vsel %vm861_vm4, %v904_v0, %v913_v11  ;;  %v1057_v40 = vsel %vm1050_vm5, %v1054_v31, %v1056_v37 }
  0x44   : > { %2106 = vmatmul.mubr.msk.bf16.gmra.mxu1 %vm324_vm2, %v2466_v5  ;;  %v868_v5 = vrot.slane %v866_v21, 2  ;;  %v1233_v21 = vrot.slane %v2747_v17, 2  ;;  %v1394_v0 = vor.u32 %v1393_v60, %v1390_v58 }
  0x45   : > { %2109 = vmatprep.mubr.msk.bf16.mxu1 %vm2401_vm0, %v2400_v1 }
  0x46   : > { %2138 = vmatmul.mubr.msk.bf16.gmra.mxu0 %vm324_vm2, %v542_v16  ;;  %v869_v29 = vor.u32 %v868_v5, %v865_v25  ;;  %v2744_v16 = vcombine.low %v1184_v59, %v2740_v12  ;;  %v1051_v25 = vrot.slane %v1907_v22, 2  ;;  %v1052_v5 = vrot.slane %v2636_v18, 2  ;;  %v2378_v18 = vld [vmem:[%s3031_s1 + $0xf8] sm:$0xff]  }
  0x47   : > { %2141 = vmatprep.mubr.msk.bf16.mxu0 %vm2401_vm0, %v2400_v1 }
  0x48   : > { %v878_v33 = vsel %vm861_vm4, %v869_v29, %v877_v30  ;;  %v1232_v20 = vrot.slane %v2744_v16, 2  ;;  %v2786_v29 = vld [vmem:[%s2463_s28 + $0x20] sm:$0xff]   ;;  %v2386_v30 = vld [vmem:[%s3031_s1 + $0x108] sm:$0xff]   ;;  %v1055_v28 = vsel %vm1050_vm5, %v1052_v5, %v1054_v31 }
  0x4a   : > { %v1234_v23 = vsel %vm1050_vm5, %v1232_v20, %v1233_v21 }
  0x4c   : > { %2110 = vmatmul.mubr.msk.bf16.gmra.mxu1 %vm324_vm2, %v2469_v6  ;;  %v2363_v6 = vld [vmem:[%s3031_s1 + $0xd8] sm:$0xff]  }
  0x4d   : > { %2113 = vmatprep.mubr.msk.bf16.mxu1 %vm2401_vm0, %v2400_v1 }
  0x4e   : > { %2142 = vmatmul.mubr.msk.bf16.gmra.mxu0 %vm324_vm2, %v544_v24  ;;  %v2765_v24 = vld [vmem:[%s2463_s28 + $0x18] sm:$0xff]  }
  0x4f   : > { %2181 = vmatprep.mubr.msk.bf16.mxu0 %vm2401_vm0, %v2400_v1  ;;  %v1235_v15 = vrot.slane %v2765_v24, 2  ;;  %v1397_v2 = vshrl.u32 %v2765_v24, 16  ;;  %v1400_v3 = vshll.u32 %v2765_v24, 16 }
  0x51   : > { %v1236_v27 = vsel %vm1050_vm5, %v1233_v21, %v1235_v15  ;;  %v1399_v8 = vrot.slane %v1397_v2, 2  ;;  %v1402_v10 = vrot.slane %v1400_v3, 3 }
  0x53   : > { %v1403_v59 = vor.u32 %v1402_v10, %v1399_v8 }
  0x54   : > { %2114 = vmatmul.mubr.msk.bf16.gmra.mxu1 %vm324_vm2, %v2487_v14  ;;  %v2367_v14 = vld [vmem:[%s3031_s1 + $0xd0] sm:$0xff]  }
  0x55   : > { %2153 = vmatprep.mubr.msk.bf16.mxu1 %vm2401_vm0, %v2400_v1 }
  0x56   : > { %2182 = vmatmul.mubr.msk.bf16.vlgmr.msra.gmra.mxu0 %vm324_vm2, %v878_v33  ;;  %v1237_v33 = vrot.slane %v2786_v29, 2 }
  0x57   : > { %2230 = vmatpush3.bf16.msra.mxu0 %v2363_v6  ;;  %2185 = vmatprep.mubr.msk.bf16.mxu0 %vm2401_vm0, %v2400_v1  ;;  %v2389_v6 = vld [vmem:[%s3031_s1 + $0x100] sm:$0xff]  }
  0x58   : > { %2231 = vmatprep.subr.bf16.mxu0 %v2400_v1  ;;  %v1238_v35 = vsel %vm1050_vm5, %v1235_v15, %v1237_v33  ;;  %v1240_v56 = vsel %vm1050_vm5, %v1237_v33, %v1239_v39 }
  0x5b   : > { %2232 = vmatpush3.bf16.msra.mxu0 %v2367_v14  ;;  %v2387_v14 = vld [vmem:[%s2463_s28 + $0x30] ss:$0 sps:$4 sm:$0x33]  }
  0x5c   : > { %2154 = vmatmul.mubr.msk.bf16.vlgmr.msra.gmra.mxu1 %vm324_vm2, %v717_v41  ;;  %2233 = vmatprep.subr.bf16.mxu0 %v2400_v1  ;;  %v1058_v41 = vrot.slane %v2573_v57, 2  ;;  %v1380_v57 = vshrl.u32 %v2744_v16, 16 }
  0x5d   : > { %2202 = vmatpush3.bf16.msra.mxu1 %v2362_v42  ;;  %2157 = vmatprep.mubr.msk.bf16.mxu1 %vm2401_vm0, %v2400_v1  ;;  %v1241_v42 = vrot.slane %v2387_v14, 2 }
  0x5e   : > { %2186 = vmatmul.mubr.msk.bf16.gmra.mxu0 %vm324_vm2, %v887_v43  ;;  %2203 = vmatprep.subr.bf16.mxu1 %v2400_v1  ;;  %v1554_v43 = vld [vmem:[%s2463_s28 + $0x8] sm:$0x8]  ;;  %v1059_v44 = vsel %vm1050_vm5, %v1056_v37, %v1058_v41 }
  0x5f   : > { %2189 = vmatprep.mubr.msk.bf16.mxu0 %vm2401_vm0, %v2400_v1  ;;  %2234 = vmatpush3.bf16.msra.mxu0 %v2370_v46  ;;  %v1242_v45 = vsel %vm1050_vm5, %v1239_v39, %v1241_v42  ;;  %v1966_v46 = vcombine.low %v1554_v43, %v2740_v12  ;;  %v1406_v12 = vshrl.u32 %v2786_v29, 16 }
  0x60   : > { %2235 = vmatprep.subr.bf16.mxu0 %v2400_v1 }
  0x61   : > { %2204 = vmatpush3.bf16.msra.mxu1 %v2365_v48  ;;  %v1383_v48 = vshll.u32 %v2744_v16, 16  ;;  %v1568_v51 = vrot.slane %v1966_v46, 3  ;;  %v1573_v16 = vrot.slane %v2786_v29, 3  ;;  %v1408_v19 = vrot.slane %v1406_v12, 2 }
  0x62   : > { %2205 = vmatprep.subr.bf16.mxu1 %v2400_v1 }
  0x63   : > { %2236 = vmatpush3.bf16.msra.mxu0 %v2374_v52  ;;  %v1569_v52 = vrot.slane %v2747_v17, 3  ;;  %v1404_v17 = vsel %vm1378_vm7, %v1394_v0, %v1403_v59 }
  0x64   : > { %2158 = vmatmul.mubr.msk.bf16.gmra.mxu1 %vm324_vm2, %v719_v53  ;;  %2285 = vmatprep.subr.bf16.mxu0 %v2400_v1  ;;  %v1061_v53 = vsel %vm1050_vm5, %v1058_v41, %v1060_v47 }
  0x65   : > { %2161 = vmatprep.mubr.msk.bf16.mxu1 %vm2401_vm0, %v2400_v1  ;;  %2206 = vmatpush3.bf16.msra.mxu1 %v2369_v54  ;;  %v1382_v54 = vrot.slane %v1380_v57, 2  ;;  %v1570_v61 = vsel %vm1567_vm6, %v1568_v51, %v1569_v52 }
  0x66   : > { %2190 = vmatmul.mubr.msk.bf16.gmra.mxu0 %vm324_vm2, %v896_v55  ;;  %2207 = vmatprep.subr.bf16.mxu1 %v2400_v1  ;;  %v1385_v55 = vrot.slane %v1383_v48, 3 }
  0x67   : > { %2193 = vmatprep.mubr.msk.bf16.mxu0 %vm2401_vm0, %v2400_v1 }
  0x69   : > { %2208 = vmatpush3.bf16.msra.mxu1 %v2372_v62  ;;  %v1386_v62 = vor.u32 %v1385_v55, %v1382_v54 }
  0x6a   : > { %2257 = vmatprep.subr.bf16.mxu1 %v2400_v1 }
  0x6c   : > { %2162 = vmatmul.mubr.msk.bf16.gmra.mxu1 %vm324_vm2, %v721_v4  ;;  %v1571_v4 = vrot.slane %v2765_v24, 3  ;;  %v1575_v24 = vrot.slane %v2815_v36, 3 }
  0x6d   : > { %2165 = vmatprep.mubr.msk.bf16.mxu1 %vm2401_vm0, %v2400_v1 }
  0x6e   : > { %2194 = vmatmul.mubr.msk.bf16.gmra.mxu0 %vm324_vm2, %v905_v7  ;;  %v1395_v7 = vsel %vm1378_vm7, %v1386_v62, %v1394_v0  ;;  %v1572_v11 = vsel %vm1567_vm6, %v1569_v52, %v1571_v4  ;;  %v1574_v21 = vsel %vm1567_vm6, %v1571_v4, %v1573_v16 }
  0x6f   : > { %2197 = vmatprep.mubr.msk.bf16.mxu0 %vm2401_vm0, %v2400_v1 }
  0x74   : > { %2166 = vmatmul.mubr.msk.bf16.gmra.mxu1 %vm324_vm2, %v2590_v63  ;;  %v2379_v63 = vld [vmem:[%s3031_s1 + $0x118] sm:$0xff]  }
  0x75   : > { %2169 = vmatprep.mubr.msk.bf16.mxu1 %vm2401_vm0, %v2400_v1 }
  0x76   : > { %2198 = vmatmul.mubr.msk.bf16.gmra.mxu0 %vm324_vm2, %v914_v13  ;;  %v1409_v13 = vshll.u32 %v2786_v29, 16 }
  0x77   : > { %2237 = vmatprep.mubr.msk.bf16.mxu0 %vm2401_vm0, %v2400_v1 }
  0x78   : > { %v1411_v20 = vrot.slane %v1409_v13, 3 }
  0x7a   : > { %v1412_v22 = vor.u32 %v1411_v20, %v1408_v19 }
  0x7c   : > { %2170 = vmatmul.mubr.msk.bf16.gmra.mxu1 %vm324_vm2, %v2611_v9  ;;  %v1053_v9 = vsel %vm1050_vm5, %v1051_v25, %v1052_v5  ;;  %v1413_v25 = vsel %vm1378_vm7, %v1403_v59, %v1412_v22 }
  0x7d   : > { %2209 = vmatprep.mubr.msk.bf16.mxu1 %vm2401_vm0, %v2400_v1 }
  0x7e   : > { %2238 = vmatmul.mubr.msk.bf16.vlgmr.msra.gmra.mxu0 %vm324_vm2, %v1234_v23  ;;  %v1415_v23 = vshrl.u32 %v2815_v36, 16 }
  0x7f   : > { %2286 = vmatpush3.bf16.msra.mxu0 %v2379_v63  ;;  %2241 = vmatprep.mubr.msk.bf16.mxu0 %vm2401_vm0, %v2400_v1  ;;  %v1418_v63 = vshll.u32 %v2815_v36, 16 }
  0x80   : > { %2287 = vmatprep.subr.bf16.mxu0 %v2400_v1  ;;  %v1417_v5 = vrot.slane %v1415_v23, 2 }
  0x81   : > { %v1420_v15 = vrot.slane %v1418_v63, 3 }
  0x83   : > { %2288 = vmatpush3.bf16.msra.mxu0 %v2383_v26  ;;  %v2391_v26 = vld [vmem:[%s2463_s28 + $0x30] ss:$0 sps:$4 sm:$0x77]   ;;  %s2322_s28 = smul.u32 80, %s3036_s16 }
  0x84   : > { %2210 = vmatmul.mubr.msk.bf16.vlgmr.msra.gmra.mxu1 %vm324_vm2, %v1053_v9  ;;  %2289 = vmatprep.subr.bf16.mxu0 %v2400_v1  ;;  %v1576_v9 = vsel %vm1567_vm6, %v1573_v16, %v1575_v24  ;;  %v1427_v29 = vshll.u32 %v2391_v26, 16 }
  0x85   : > { %2258 = vmatpush3.bf16.msra.mxu1 %v2378_v18  ;;  %2213 = vmatprep.mubr.msk.bf16.mxu1 %vm2401_vm0, %v2400_v1  ;;  %v1421_v18 = vor.u32 %v1420_v15, %v1417_v5  ;;  %s2967_s29 = scalar_lea.vmem %s3034_s4, %s2322_s28 }
  0x86   : > { %2242 = vmatmul.mubr.msk.bf16.gmra.mxu0 %vm324_vm2, %v1236_v27  ;;  %2259 = vmatprep.subr.bf16.mxu1 %v2400_v1  ;;  %v1424_v27 = vshrl.u32 %v2391_v26, 16  ;;  %v1429_v33 = vrot.slane %v1427_v29, 3 }
  0x87   : > { %2245 = vmatprep.mubr.msk.bf16.mxu0 %vm2401_vm0, %v2400_v1  ;;  %2290 = vmatpush3.bf16.msra.mxu0 %v2386_v30  ;;  %v1577_v30 = vrot.slane %v2391_v26, 3  ;;  %v1422_v31 = vsel %vm1378_vm7, %v1412_v22, %v1421_v18 }
  0x88   : > { %2291 = vmatprep.subr.bf16.mxu0 %v2400_v1 }
  0x89   : > { %2260 = vmatpush3.bf16.msra.mxu1 %v2381_v32  ;;  %v1426_v32 = vrot.slane %v1424_v27, 2 }
  0x8a   : > { %2261 = vmatprep.subr.bf16.mxu1 %v2400_v1 }
  0x8b   : > { %2292 = vmatpush3.bf16.msra.mxu0 %v2389_v6  ;;  %v1578_v6 = vsel %vm1567_vm6, %v1575_v24, %v1577_v30 }
  0x8c   : > { %2214 = vmatmul.mubr.msk.bf16.gmra.mxu1 %vm324_vm2, %v1055_v28  ;;  %v1430_v28 = vor.u32 %v1429_v33, %v1426_v32 }
  0x8d   : > { %2217 = vmatprep.mubr.msk.bf16.mxu1 %vm2401_vm0, %v2400_v1  ;;  %2262 = vmatpush3.bf16.msra.mxu1 %v2385_v34 }
  0x8e   : > { %2246 = vmatmul.mubr.msk.bf16.gmra.mxu0 %vm324_vm2, %v1238_v35  ;;  %2263 = vmatprep.subr.bf16.mxu1 %v2400_v1  ;;  %v1431_v34 = vsel %vm1378_vm7, %v1421_v18, %v1430_v28 }
  0x8f   : > { %2249 = vmatprep.mubr.msk.bf16.mxu0 %vm2401_vm0, %v2400_v1 }
  0x91   : > { %2264 = vmatpush3.bf16.msra.mxu1 %v2388_v38 }
  0x94   : > { %2218 = vmatmul.mubr.msk.bf16.gmra.mxu1 %vm324_vm2, %v1057_v40 }
  0x95   : > { %2221 = vmatprep.mubr.msk.bf16.mxu1 %vm2401_vm0, %v2400_v1 }
  0x96   : > { %2250 = vmatmul.mubr.msk.bf16.gmra.mxu0 %vm324_vm2, %v1240_v56 }
  0x97   : > { %2253 = vmatprep.mubr.msk.bf16.mxu0 %vm2401_vm0, %v2400_v1 }
  0x9c   : > { %2222 = vmatmul.mubr.msk.bf16.gmra.mxu1 %vm324_vm2, %v1059_v44 }
  0x9d   : > { %2225 = vmatprep.mubr.msk.bf16.mxu1 %vm2401_vm0, %v2400_v1 }
  0x9e   : > { %2254 = vmatmul.mubr.msk.bf16.gmra.mxu0 %vm324_vm2, %v1242_v45 }
  0x9f   : > { %2293 = vmatprep.mubr.msk.bf16.mxu0 %vm2401_vm0, %v2400_v1 }
  0xa4   : > { %2226 = vmatmul.mubr.msk.bf16.gmra.mxu1 %vm324_vm2, %v1061_v53 }
  0xa5   : > { %2265 = vmatprep.mubr.msk.bf16.mxu1 %vm2401_vm0, %v2400_v1 }
  0xa6   : > { %2294 = vmatmul.mubr.msk.bf16.vlgmr.msra.gmra.mxu0 %vm324_vm2, %v1570_v61 }
  0xa7   : > { %2297 = vmatprep.mubr.msk.bf16.mxu0 %vm2401_vm0, %v2400_v1 }
  0xac   : > { %2266 = vmatmul.mubr.msk.bf16.vlgmr.msra.gmra.mxu1 %vm324_vm2, %v1395_v7 }
  0xad   : > { %2269 = vmatprep.mubr.msk.bf16.mxu1 %vm2401_vm0, %v2400_v1 }
  0xae   : > { %2298 = vmatmul.mubr.msk.bf16.gmra.mxu0 %vm324_vm2, %v1572_v11 }
  0xaf   : > { %2301 = vmatprep.mubr.msk.bf16.mxu0 %vm2401_vm0, %v2400_v1 }
  0xb4   : > { %2270 = vmatmul.mubr.msk.bf16.gmra.mxu1 %vm324_vm2, %v1404_v17 }
  0xb5   : > { %2273 = vmatprep.mubr.msk.bf16.mxu1 %vm2401_vm0, %v2400_v1 }
  0xb6   : > { %2302 = vmatmul.mubr.msk.bf16.gmra.mxu0 %vm324_vm2, %v1574_v21 }
  0xb7   : > { %2305 = vmatprep.mubr.msk.bf16.mxu0 %vm2401_vm0, %v2400_v1 }
  0xbc   : > { %2274 = vmatmul.mubr.msk.bf16.gmra.mxu1 %vm324_vm2, %v1413_v25 }
  0xbd   : > { %2277 = vmatprep.mubr.msk.bf16.mxu1 %vm2401_vm0, %v2400_v1 }
  0xbe   : > { %2306 = vmatmul.mubr.msk.bf16.gmra.mxu0 %vm324_vm2, %v1576_v9 }
  0xbf   : > { %2309 = vmatprep.mubr.msk.bf16.mxu0 %vm2401_vm0, %v2400_v1 }
  0xc4   : > { %2278 = vmatmul.mubr.msk.bf16.gmra.mxu1 %vm324_vm2, %v1422_v31 }
  0xc5   : > { %2281 = vmatprep.mubr.msk.bf16.mxu1 %vm2401_vm0, %v2400_v1 }
  0xc6   : > { %2310 = vmatmul.mubr.msk.bf16.gmra.mxu0 %vm324_vm2, %v1578_v6 }
  0xcc   : > { %2282 = vmatmul.mubr.msk.bf16.gmra.mxu1 %vm324_vm2, %v1431_v34 }
  0xdc   : > { %v390_v35 = vpop.f32.mrf.mxu1  ;;  %v374_v37 = vpop.f32.mrf.mxu0 }
  0xde   : > { %v2079_v36 = vpop.f32.mrf.mxu1  ;;  %v2071_v39 = vpop.f32.mrf.mxu0 }
  0xe0   : > { %v393_v38 = vpop.f32.mrf.mxu1  ;;  %v377_v56 = vpop.f32.mrf.mxu0 }
  0xe2   : > { %v2080_v40 = vpop.f32.mrf.mxu1  ;;  %v2072_v41 = vpop.f32.mrf.mxu0 }
  0xe4   : > { %v398_v14 = vpop.f32.mrf.mxu1  ;;  %v382_v43 = vpop.f32.mrf.mxu0 }
  0xe6   : > { %v2083_v42 = vpop.f32.mrf.mxu1  ;;  %v2075_v1 = vpop.f32.mrf.mxu0 }
  0xe8   : > { %v401_v44 = vpop.f32.mrf.mxu1  ;;  %v385_v46 = vpop.f32.mrf.mxu0 }
  0xea   : > { %v2084_v45 = vpop.f32.mrf.mxu1  ;;  %v2076_v57 = vpop.f32.mrf.mxu0 }
  0xec   : > { %v406_v47 = vpop.f32.mrf.mxu1 }
  0xed   : > { %v618_v49 = vpop.f32.mrf.mxu0 }
  0xee   : > { %v2087_v48 = vpop.f32.mrf.mxu1 }
  0xef   : > { %v2127_v51 = vpop.f32.mrf.mxu0 }
  0xf0   : > { %v409_v50 = vpop.f32.mrf.mxu1 }
  0xf1   : > { %v621_v53 = vpop.f32.mrf.mxu0 }
  0xf2   : > { %v2088_v52 = vpop.f32.mrf.mxu1 }
  0xf3   : > { %v2128_v55 = vpop.f32.mrf.mxu0 }
  0xf4   : > { %v481_v54 = vpop.f32.mrf.mxu1 }
  0xf5   : > { %v482_v58 = vadd.f32 %v481_v54, %v374_v37 }
  0xf6   : > { %v2099_v60 = vpop.f32.mrf.mxu1  ;;  %v626_v61 = vpop.f32.mrf.mxu0 }
  0xf7   : > { %v657_v62 = vadd.f32 %v618_v49, %v482_v58 }
  0xf8   : > { %v484_v0 = vpop.f32.mrf.mxu1  ;;  %v2131_v2 = vpop.f32.mrf.mxu0 }
  0xf9   : > { %v485_v3 = vadd.f32 %v484_v0, %v377_v56 }
  0xfa   : > { %v2100_v4 = vpop.f32.mrf.mxu1  ;;  %v629_v7 = vpop.f32.mrf.mxu0 }
  0xfb   : > { %v658_v8 = vadd.f32 %v621_v53, %v485_v3 }
  0xfc   : > { %v489_v10 = vpop.f32.mrf.mxu1  ;;  %v2132_v11 = vpop.f32.mrf.mxu0 }
  0xfd   : > { %v490_v59 = vadd.f32 %v489_v10, %v382_v43 }
  0xfe   : > { %v2103_v12 = vpop.f32.mrf.mxu1  ;;  %v634_v13 = vpop.f32.mrf.mxu0 }
  0xff   : > { %v659_v16 = vadd.f32 %v626_v61, %v490_v59 }
 0x100   : > { %v492_v17 = vpop.f32.mrf.mxu1  ;;  %v2135_v19 = vpop.f32.mrf.mxu0 }
 0x101   : > { %v493_v20 = vadd.f32 %v492_v17, %v385_v46 }
 0x102   : > { %v2104_v21 = vpop.f32.mrf.mxu1  ;;  %v637_v22 = vpop.f32.mrf.mxu0 }
 0x103   : > { %v660_v23 = vadd.f32 %v629_v7, %v493_v20 }
 0x104   : > { %v497_v63 = vpop.f32.mrf.mxu1  ;;  %v2136_v24 = vpop.f32.mrf.mxu0 }
 0x105   : > { %v498_v25 = vadd.f32 %v497_v63, %v390_v35 }
 0x106   : > { %v2107_v5 = vpop.f32.mrf.mxu1  ;;  %v642_v15 = vpop.f32.mrf.mxu0 }
 0x107   : > { %v661_v26 = vadd.f32 %v634_v13, %v498_v25 }
 0x108   : > { %v500_v9 = vpop.f32.mrf.mxu1  ;;  %v2139_v18 = vpop.f32.mrf.mxu0 }
 0x109   : > { %v501_v27 = vadd.f32 %v500_v9, %v393_v38 }
 0x10a   : > { %v2108_v29 = vpop.f32.mrf.mxu1  ;;  %v645_v30 = vpop.f32.mrf.mxu0 }
 0x10b   : > { %v662_v31 = vadd.f32 %v637_v22, %v501_v27 }
 0x10c   : > { %v505_v32 = vpop.f32.mrf.mxu1  ;;  %v2140_v33 = vpop.f32.mrf.mxu0 }
 0x10d   : > { %v506_v6 = vadd.f32 %v505_v32, %v398_v14 }
 0x10e   : > { %v2111_v28 = vpop.f32.mrf.mxu1  ;;  %v650_v34 = vpop.f32.mrf.mxu0 }
 0x10f   : > { %v663_v36 = vadd.f32 %v642_v15, %v506_v6 }
 0x110   : > { %v508_v37 = vpop.f32.mrf.mxu1  ;;  %v2143_v39 = vpop.f32.mrf.mxu0 }
 0x111   : > { %v509_v40 = vadd.f32 %v508_v37, %v401_v44 }
 0x112   : > { %v2112_v56 = vpop.f32.mrf.mxu1  ;;  %v653_v35 = vpop.f32.mrf.mxu0 }
 0x113   : > { %v664_v41 = vadd.f32 %v645_v30, %v509_v40 }
 0x114   : > { %v513_v42 = vpop.f32.mrf.mxu1  ;;  %v2144_v43 = vpop.f32.mrf.mxu0 }
 0x115   : > { %v514_v1 = vadd.f32 %v513_v42, %v406_v47 }
 0x116   : > { %v2115_v45 = vpop.f32.mrf.mxu1  ;;  %v988_v38 = vpop.f32.mrf.mxu0 }
 0x117   : > { %v665_v46 = vadd.f32 %v650_v34, %v514_v1 }
 0x118   : > { %v516_v57 = vpop.f32.mrf.mxu1  ;;  %v2183_v48 = vpop.f32.mrf.mxu0 }
 0x119   : > { %v517_v49 = vadd.f32 %v516_v57, %v409_v50 }
 0x11a   : > { %v2116_v51 = vpop.f32.mrf.mxu1  ;;  %v991_v14 = vpop.f32.mrf.mxu0 }
 0x11b   : > { %v666_v52 = vadd.f32 %v653_v35, %v517_v49 }
 0x11c   : > { %v799_v53 = vpop.f32.mrf.mxu1  ;;  %v2184_v54 = vpop.f32.mrf.mxu0 }
 0x11d   : > { %v838_v55 = vadd.f32 %v799_v53, %v657_v62 }
 0x11e   : > { %v2155_v58 = vpop.f32.mrf.mxu1  ;;  %v996_v44 = vpop.f32.mrf.mxu0 }
 0x11f   : > { %v2905_v60 = vadd.f32 %v988_v38, %v838_v55 }
 0x120   : > { %v802_v61 = vpop.f32.mrf.mxu1  ;;  %v2187_v0 = vpop.f32.mrf.mxu0 }
 0x121   : > { %v839_v2 = vadd.f32 %v802_v61, %v658_v8 }
 0x122   : > { %v2156_v47 = vpop.f32.mrf.mxu1  ;;  %v999_v3 = vpop.f32.mrf.mxu0 }
 0x123   : > { %v2907_v4 = vadd.f32 %v991_v14, %v839_v2 }
 0x124   : > { %v807_v7 = vpop.f32.mrf.mxu1  ;;  %v2188_v10 = vpop.f32.mrf.mxu0 }
 0x125   : > { %v840_v50 = vadd.f32 %v807_v7, %v659_v16 }
 0x126   : > { %v2159_v11 = vpop.f32.mrf.mxu1  ;;  %v1004_v59 = vpop.f32.mrf.mxu0 }
 0x127   : > { %v2909_v12 = vadd.f32 %v996_v44, %v840_v50 }
 0x128   : > { %v810_v13 = vpop.f32.mrf.mxu1  ;;  %v2191_v62 = vpop.f32.mrf.mxu0 }
 0x129   : > { %v841_v17 = vadd.f32 %v810_v13, %v660_v23 }
 0x12a   : > { %v2160_v19 = vpop.f32.mrf.mxu1  ;;  %v1007_v20 = vpop.f32.mrf.mxu0 }
 0x12b   : > { %v2911_v21 = vadd.f32 %v999_v3, %v841_v17 }
 0x12c   : > { %v815_v22 = vpop.f32.mrf.mxu1  ;;  %v2192_v8 = vpop.f32.mrf.mxu0 }
 0x12d   : > { %v842_v63 = vadd.f32 %v815_v22, %v661_v26 }
 0x12e   : > { %v2163_v24 = vpop.f32.mrf.mxu1  ;;  %v1012_v25 = vpop.f32.mrf.mxu0 }
 0x12f   : > { %v2913_v5 = vadd.f32 %v1004_v59, %v842_v63 }
 0x130   : > { %v818_v15 = vpop.f32.mrf.mxu1  ;;  %v2195_v16 = vpop.f32.mrf.mxu0 }
 0x131   : > { %v843_v9 = vadd.f32 %v818_v15, %v662_v31 }
 0x132   : > { %v2164_v18 = vpop.f32.mrf.mxu1  ;;  %v1015_v27 = vpop.f32.mrf.mxu0 }
 0x133   : > { %v2915_v29 = vadd.f32 %v1007_v20, %v843_v9 }
 0x134   : > { %v823_v30 = vpop.f32.mrf.mxu1  ;;  %v2196_v23 = vpop.f32.mrf.mxu0 }
 0x135   : > { %v844_v32 = vadd.f32 %v823_v30, %v663_v36 }
 0x136   : > { %v2167_v33 = vpop.f32.mrf.mxu1  ;;  %v1020_v6 = vpop.f32.mrf.mxu0 }
 0x137   : > { %v2917_v28 = vadd.f32 %v1012_v25, %v844_v32 }
 0x138   : > { %v826_v34 = vpop.f32.mrf.mxu1  ;;  %v2199_v26 = vpop.f32.mrf.mxu0 }
 0x139   : > { %v845_v37 = vadd.f32 %v826_v34, %v664_v41 }
 0x13a   : > { %v2168_v39 = vpop.f32.mrf.mxu1  ;;  %v1023_v40 = vpop.f32.mrf.mxu0 }
 0x13b   : > { %v2919_v56 = vadd.f32 %v1015_v27, %v845_v37 }
 0x13c   : > { %v831_v35 = vpop.f32.mrf.mxu1  ;;  %v2200_v31 = vpop.f32.mrf.mxu0 }
 0x13d   : > { %v846_v42 = vadd.f32 %v831_v35, %v665_v46 }
 0x13e   : > { %v2171_v43 = vpop.f32.mrf.mxu1  ;;  %v1316_v1 = vpop.f32.mrf.mxu0 }
 0x13f   : > { %v2921_v45 = vadd.f32 %v1020_v6, %v846_v42  ;;  %v2955_v42 = vld [vmem:[%s3032_s2] ss:$0 sm:$0xff] }
 0x140   : > { %v834_v38 = vpop.f32.mrf.mxu1  ;;  %v2239_v36 = vpop.f32.mrf.mxu0 }
 0x141   : > { %v847_v57 = vadd.f32 %v834_v38, %v666_v52 }
 0x142   : > { %v2172_v48 = vpop.f32.mrf.mxu1  ;;  %v1319_v49 = vpop.f32.mrf.mxu0 }
 0x143   : > { %v2923_v51 = vadd.f32 %v1023_v40, %v847_v57 }
 0x144   : > { %v1135_v14 = vpop.f32.mrf.mxu1  ;;  %v2240_v41 = vpop.f32.mrf.mxu0 }
 0x145   : > { %v1174_v32 = vadd.f32 %v1135_v14, %v2905_v60 }
 0x146   : > { %v2211_v53 = vpop.f32.mrf.mxu1  ;;  %v1324_v54 = vpop.f32.mrf.mxu0 }
 0x147   : > { %v1355_v39 = vadd.f32 %v1316_v1, %v1174_v32 }
 0x148   : > { %v1138_v55 = vpop.f32.mrf.mxu1  ;;  %v2243_v58 = vpop.f32.mrf.mxu0 }
 0x149   : > { %v1175_v37 = vadd.f32 %v1138_v55, %v2907_v4  ;;  %v2961_v4 = vld [vmem:[%s3033_s3] ss:$0 sm:$0xff] }
 0x14a   : > { %v2212_v44 = vpop.f32.mrf.mxu1  ;;  %v2925_v61 = vpop.f32.mrf.mxu0 }
 0x14b   : > { %v1356_v57 = vadd.f32 %v1319_v49, %v1175_v37 }
 0x14c   : > { %v1143_v46 = vpop.f32.mrf.mxu1  ;;  %v2244_v0 = vpop.f32.mrf.mxu0 }
 0x14d   : > { %v1176_v60 = vadd.f32 %v1143_v46, %v2909_v12 }
 0x14e   : > { %v2215_v2 = vpop.f32.mrf.mxu1  ;;  %v2927_v47 = vpop.f32.mrf.mxu0 }
 0x14f   : > { %v1357_v44 = vadd.f32 %v1324_v54, %v1176_v60 }
 0x150   : > { %v1146_v3 = vpop.f32.mrf.mxu1  ;;  %v2247_v52 = vpop.f32.mrf.mxu0 }
 0x151   : > { %v1177_v49 = vadd.f32 %v1146_v3, %v2911_v21 }
 0x152   : > { %v2216_v7 = vpop.f32.mrf.mxu1  ;;  %v2929_v10 = vpop.f32.mrf.mxu0 }
 0x153   : > { %v1358_v3 = vadd.f32 %v2925_v61, %v1177_v49 }
 0x154   : > { %v1151_v50 = vpop.f32.mrf.mxu1  ;;  %v2248_v11 = vpop.f32.mrf.mxu0 }
 0x156   : > { %v2219_v59 = vpop.f32.mrf.mxu1  ;;  %v2931_v13 = vpop.f32.mrf.mxu0 }
 0x157   : > { %v1178_v59 = vadd.f32 %v1151_v50, %v2913_v5 }
 0x158   : > { %v2933_v62 = vpop.f32.mrf.mxu1  ;;  %v2251_v17 = vpop.f32.mrf.mxu0 }
 0x15a   : > { %v2220_v19 = vpop.f32.mrf.mxu1  ;;  %v2935_v20 = vpop.f32.mrf.mxu0 }
 0x15c   : > { %v2937_v22 = vpop.f32.mrf.mxu1  ;;  %v2252_v8 = vpop.f32.mrf.mxu0 }
 0x15d   : > { %v1180_v37 = vadd.f32 %v2937_v22, %v2917_v28 }
 0x15e   : > { %v2223_v63 = vpop.f32.mrf.mxu1  ;;  %v2939_v24 = vpop.f32.mrf.mxu0 }
 0x160   : > { %v2941_v25 = vpop.f32.mrf.mxu1  ;;  %v2255_v15 = vpop.f32.mrf.mxu0 }
 0x161   : > { %v1181_v60 = vadd.f32 %v2941_v25, %v2919_v56 }
 0x162   : > { %v2224_v16 = vpop.f32.mrf.mxu1  ;;  %v2943_v9 = vpop.f32.mrf.mxu0 }
 0x164   : > { %v2945_v18 = vpop.f32.mrf.mxu1  ;;  %v2256_v27 = vpop.f32.mrf.mxu0 }
 0x165   : > { %v1179_v27 = vadd.f32 %v2933_v62, %v2915_v29 }
 0x166   : > { %v2227_v30 = vpop.f32.mrf.mxu1  ;;  %v1652_v23 = vpop.f32.mrf.mxu0 }
 0x167   : > { %v1359_v30 = vadd.f32 %v2927_v47, %v1178_v59 }
 0x168   : > { %v2948_v33 = vpop.f32.mrf.mxu1  ;;  %v2295_v6 = vpop.f32.mrf.mxu0 }
 0x16a   : > { %v2228_v34 = vpop.f32.mrf.mxu1  ;;  %v1655_v26 = vpop.f32.mrf.mxu0 }
 0x16c   : > { %v1505_v40 = vpop.f32.mrf.mxu1  ;;  %v2296_v35 = vpop.f32.mrf.mxu0 }
 0x16d   : > { %v1544_v31 = vadd.f32 %v1505_v40, %v1355_v39  ;;  %v1360_v39 = vadd.f32 %v2929_v10, %v1179_v27 }
 0x16e   : > { %v2267_v43 = vpop.f32.mrf.mxu1  ;;  %v1660_v38 = vpop.f32.mrf.mxu0 }
 0x16f   : > { %v1691_v36 = vadd.f32 %v1652_v23, %v1544_v31 }
 0x170   : > { %v1508_v1 = vpop.f32.mrf.mxu1  ;;  %v2299_v48 = vpop.f32.mrf.mxu0 }
 0x171   : > { %v1708_v14 = vmul.f32 %v2955_v42, %v1691_v36  ;;  %v1545_v41 = vadd.f32 %v1508_v1, %v1356_v57  ;;  %v1361_v36 = vadd.f32 %v2931_v13, %v1180_v37 }
 0x172   : > { %v2268_v12 = vpop.f32.mrf.mxu1  ;;  %v1663_v53 = vpop.f32.mrf.mxu0 }
 0x173   : > { %v1725_v55 = vadd.f32 %v2961_v4, %v1708_v14  ;;  %v1692_v58 = vadd.f32 %v1655_v26, %v1545_v41  ;;  %v1182_v12 = vadd.f32 %v2945_v18, %v2921_v45 }
 0x174   : > { %v1513_v46 = vpop.f32.mrf.mxu1  ;;  %v2300_v0 = vpop.f32.mrf.mxu0 }
 0x175   : > { %1736 = vst.msk [vmem:[%s2967_s29] sm:$0xff] %vm1735_vm8, %v1725_v55  ;;  %v1709_v2 = vmul.f32 %v2955_v42, %v1692_v58  ;;  %v1546_v52 = vadd.f32 %v1513_v46, %v1357_v44  ;;  %v1183_v0 = vadd.f32 %v2948_v33, %v2923_v51 }
 0x176   : > { %v2271_v7 = vpop.f32.mrf.mxu1  ;;  %v1668_v11 = vpop.f32.mrf.mxu0 }
 0x177   : > { %v1726_v17 = vadd.f32 %v2961_v4, %v1709_v2  ;;  %v1693_v21 = vadd.f32 %v1660_v38, %v1546_v52  ;;  %v1363_v2 = vadd.f32 %v2939_v24, %v1182_v12  ;;  %v1364_v51 = vadd.f32 %v2943_v9, %v1183_v0 }
 0x178   : > { %v1516_v19 = vpop.f32.mrf.mxu1  ;;  %v2303_v8 = vpop.f32.mrf.mxu0 }
 0x179   : > { %1737 = vst.msk [vmem:[%s2967_s29 + $0x8] sm:$0xff] %vm1735_vm8, %v1726_v17  ;;  %v1710_v54 = vmul.f32 %v2955_v42, %v1693_v21  ;;  %v1547_v63 = vadd.f32 %v1516_v19, %v1358_v3 }
 0x17a   : > { %v2272_v15 = vpop.f32.mrf.mxu1  ;;  %v1671_v16 = vpop.f32.mrf.mxu0 }
 0x17b   : > { %v1727_v5 = vadd.f32 %v2961_v4, %v1710_v54  ;;  %v1694_v50 = vadd.f32 %v1663_v53, %v1547_v63  ;;  %v1362_v53 = vadd.f32 %v2935_v20, %v1181_v60 }
 0x17c   : > { %v1521_v23 = vpop.f32.mrf.mxu1  ;;  %v2304_v61 = vpop.f32.mrf.mxu0 }
 0x17d   : > { %1738 = vst.msk [vmem:[%s2967_s29 + $0x10] sm:$0xff] %vm1735_vm8, %v1727_v5  ;;  %v1711_v32 = vmul.f32 %v2955_v42, %v1694_v50  ;;  %v1548_v6 = vadd.f32 %v1521_v23, %v1359_v30 }
 0x17e   : > { %v2275_v34 = vpop.f32.mrf.mxu1  ;;  %v1676_v26 = vpop.f32.mrf.mxu0 }
 0x17f   : > { %v1728_v29 = vadd.f32 %v2961_v4, %v1711_v32  ;;  %v1695_v62 = vadd.f32 %v1668_v11, %v1548_v6 }
 0x180   : > { %v1524_v40 = vpop.f32.mrf.mxu1  ;;  %v2307_v47 = vpop.f32.mrf.mxu0 }
 0x181   : > { %1739 = vst.msk [vmem:[%s2967_s29 + $0x18] sm:$0xff] %vm1735_vm8, %v1728_v29  ;;  %v1712_v35 = vmul.f32 %v2955_v42, %v1695_v62  ;;  %v1549_v31 = vadd.f32 %v1524_v40, %v1360_v39 }
 0x182   : > { %v2276_v43 = vpop.f32.mrf.mxu1  ;;  %v1679_v38 = vpop.f32.mrf.mxu0 }
 0x183   : > { %v1729_v28 = vadd.f32 %v2961_v4, %v1712_v35  ;;  %v1696_v22 = vadd.f32 %v1671_v16, %v1549_v31 }
 0x184   : > { %v1529_v57 = vpop.f32.mrf.mxu1  ;;  %v2308_v10 = vpop.f32.mrf.mxu0 }
 0x185   : > { %1740 = vst.msk [vmem:[%s2967_s29 + $0x20] sm:$0xff] %vm1735_vm8, %v1729_v28  ;;  %v1713_v1 = vmul.f32 %v2955_v42, %v1696_v22  ;;  %v1550_v48 = vadd.f32 %v1529_v57, %v1361_v36 }
 0x186   : > { %v2279_v14 = vpop.f32.mrf.mxu1  ;;  %v1684_v41 = vpop.f32.mrf.mxu0 }
 0x187   : > { %v1730_v56 = vadd.f32 %v2961_v4, %v1713_v1  ;;  %v1697_v25 = vadd.f32 %v1676_v26, %v1550_v48 }
 0x188   : > { %v1532_v49 = vpop.f32.mrf.mxu1  ;;  %v2311_v13 = vpop.f32.mrf.mxu0 }
 0x189   : > { %1741 = vst.msk [vmem:[%s2967_s29 + $0x28] sm:$0xff] %vm1735_vm8, %v1730_v56  ;;  %v1714_v55 = vmul.f32 %v2955_v42, %v1697_v25  ;;  %v1551_v58 = vadd.f32 %v1532_v49, %v1362_v53 }
 0x18a   : > { %v2280_v44 = vpop.f32.mrf.mxu1  ;;  %v1687_v46 = vpop.f32.mrf.mxu0 }
 0x18b   : > { %v1731_v45 = vadd.f32 %v2961_v4, %v1714_v55  ;;  %v1698_v18 = vadd.f32 %v1679_v38, %v1551_v58 }
 0x18c   : > { %v1537_v52 = vpop.f32.mrf.mxu1  ;;  %v2312_v20 = vpop.f32.mrf.mxu0 }
 0x18d   : > { %1742 = vst.msk [vmem:[%s2967_s29 + $0x30] sm:$0xff] %vm1735_vm8, %v1731_v45  ;;  %v1715_v7 = vmul.f32 %v2955_v42, %v1698_v18  ;;  %v1552_v11 = vadd.f32 %v1537_v52, %v1363_v2 }
 0x18e   : > { %v2283_v59 = vpop.f32.mrf.mxu1 }
 0x18f   : > { %v1732_v17 = vadd.f32 %v2961_v4, %v1715_v7  ;;  %v1699_v21 = vadd.f32 %v1684_v41, %v1552_v11 }
 0x190   : > { %v1540_v33 = vpop.f32.mrf.mxu1 }
 0x191   : > { %1743 = vst.msk [vmem:[%s2967_s29 + $0x38] sm:$0xff] %vm1735_vm8, %v1732_v17  ;;  %v1716_v24 = vmul.f32 %v2955_v42, %v1699_v21  ;;  %v1553_v3 = vadd.f32 %v1540_v33, %v1364_v51 }
 0x192   : > { %v2284_v19 = vpop.f32.mrf.mxu1 }
 0x193   : > { %v1733_v8 = vadd.f32 %v2961_v4, %v1716_v24  ;;  %v1700_v54 = vadd.f32 %v1687_v46, %v1553_v3 }
 0x195   : > { %1744 = vst.msk [vmem:[%s2967_s29 + $0x40] sm:$0xff] %vm1735_vm8, %v1733_v8  ;;  %v1717_v63 = vmul.f32 %v2955_v42, %v1700_v54 }
 0x197   : > { %v1734_v15 = vadd.f32 %v2961_v4, %v1717_v63 }
 0x199   : > { %1745 = vst.msk [vmem:[%s2967_s29 + $0x48] sm:$0xff] %vm1735_vm8, %v1734_v15 }
 0x19a PF: > { %s14_s15 = sadd.s32 1, %s2398_s15  }
 0x19b   : > { %p11_p4 = scmp.ge.s32.totalorder %s14_s15, 4  }
 0x19d   :  { %13 = sbr.rel (!%p11_p4) target bundleno = 1 (0x1), region = 74 }

</bundles_post_ra>
